<compile_context>
chip_gen: v7x
topology: tpu7x:2x2x1
jax: 0.10.0
libtpu: 0.0.40
codegen_flags: <defaults>
</compile_context>

<pallas_src>
import functools
import math

import jax
import jax.numpy as jnp
from jax.experimental import pallas as pl
from jax.experimental.pallas import tpu as pltpu

LN_EPS = 1e-5
LANE = 128
NEG_INF = -1e9


def _erf(x):
    # Abramowitz-Stegun 7.1.26 polynomial erf, |err| < 1.5e-7 (exp/mul/add only,
    # avoids relying on a native erf lowering in Mosaic).
    p = 0.3275911
    a1, a2, a3, a4, a5 = (0.254829592, -0.284496736, 1.421413741,
                          -1.453152027, 1.061405429)
    ax = jnp.abs(x)
    t = 1.0 / (1.0 + p * ax)
    poly = ((((a5 * t + a4) * t + a3) * t + a2) * t + a1) * t
    y = 1.0 - poly * jnp.exp(-(ax * ax))
    return jnp.where(x >= 0, y, -y)


def _gelu_exact(x):
    # PyTorch activation='gelu' default = exact erf GELU.
    return 0.5 * x * (1.0 + _erf(x * (1.0 / math.sqrt(2.0))))


# ----------------------------------------------------------------------------
# Fused kernel: one grid step per (row_tile, transformer layer).
# ----------------------------------------------------------------------------
def _fused_forward_kernel(
    x_ref, pe_t_ref, pe_pos_ref, mask_ref,     # activations / embeddings / mask
    tw1_ref, tw2_ref, tb_ref,                  # TimestepEmbedder MLP (bf16)
    inw_ref, inb_ref, outw_ref, outb_ref,      # Input / Output projections
    wqkv_ref, wo_ref, w1_ref, w2_ref, vec_ref,  # per-layer streamed weights
    out_ref,                                   # (ROWS, 128) lane-dense output
    act_ref, ctx_ref,                          # VMEM scratch: activation, head ctx
    *, num_heads, bs, ff_size):
    l = pl.program_id(1)
    L = pl.num_programs(1)
    ROWS, D = act_ref.shape
    FF = ff_size
    H = num_heads
    hd = D // H
    t_rows = ROWS // bs
    scale = 1.0 / math.sqrt(hd)
    bf16 = jnp.bfloat16

    def mm(a, w, b=None):
        # bf16 MXU inputs, f32 accumulation (prologue/epilogue weights are bf16).
        r = jnp.dot(a.astype(bf16), w.astype(bf16),
                    preferred_element_type=jnp.float32)
        return r if b is None else r + b

    def mmq(a_bf16, w_ref, s_row, b_row):
        # int8 streamed weight block -> bf16 dequant, f32 MXU accumulation,
        # per-output-channel rescale (scale factors out of the column sums).
        w = w_ref[0].astype(jnp.float32).astype(bf16)
        r = jnp.dot(a_bf16, w, preferred_element_type=jnp.float32)
        return r * s_row + b_row

    def layernorm(x, g, beta):
        mu = jnp.mean(x, axis=-1, keepdims=True)
        var = jnp.mean(jnp.square(x - mu), axis=-1, keepdims=True)
        return (x - mu) * jax.lax.rsqrt(var + LN_EPS) * g + beta

    # ---- prologue (layer 0 of each row tile): time MLP + input embed + PE ---
    @pl.when(l == 0)
    def _():
        h = mm(pe_t_ref[...], tw1_ref[...], tb_ref[0:1, :])
        h = h * jax.nn.sigmoid(h)                          # SiLU (f32)
        temb = mm(h, tw2_ref[...], tb_ref[1:2, :])         # (bs, D)
        x = mm(x_ref[...], inw_ref[...], inb_ref[...])     # (ROWS, D)
        xr = (x.reshape(t_rows, bs, D)
              + pe_pos_ref[...][:, None, :]                # pos enc over T
              + temb[None, :, :])                          # time emb over bs
        act_ref[...] = xr.reshape(ROWS, D)

    # ---- per-layer packed vectors: biases, LN params, dequant scales --------
    vec = vec_ref[0]                                       # (16, VW) f32
    bqkv, bo = vec[0:1, :3 * D], vec[1:2, :D]
    b1, b2 = vec[2:3, :FF], vec[3:4, :D]
    g1, be1 = vec[4:5, :D], vec[5:6, :D]
    g2, be2 = vec[6:7, :D], vec[7:8, :D]
    sqkv, so = vec[8:9, :3 * D], vec[9:10, :D]
    s1, s2 = vec[10:11, :FF], vec[11:12, :D]

    # ---- self-attention (batch = T groups, sequence = bs; see header note) --
    x2 = act_ref[...]                                      # (ROWS, D) f32
    qkv = mmq(x2.astype(bf16), wqkv_ref, sqkv, bqkv).astype(bf16)  # (ROWS, 3D)

    for h_i in range(H):
        q = qkv[:, h_i * hd:(h_i + 1) * hd]
        k = qkv[:, D + h_i * hd:D + (h_i + 1) * hd]
        v = qkv[:, 2 * D + h_i * hd:2 * D + (h_i + 1) * hd]
        # full (ROWS, ROWS) scores; block-diag mask keeps T-groups independent
        s = jax.lax.dot_general(q, k, (((1,), (1,)), ((), ())),
                                preferred_element_type=jnp.float32)
        s = s * scale + mask_ref[...]
        s = s - jnp.max(s, axis=-1, keepdims=True)
        p = jnp.exp(s)
        p = p / jnp.sum(p, axis=-1, keepdims=True)         # exact divide
        ctx = jnp.dot(p.astype(bf16), v, preferred_element_type=jnp.float32)
        ctx_ref[:, h_i * hd:(h_i + 1) * hd] = ctx.astype(bf16)

    attn = mmq(ctx_ref[...], wo_ref, so, bo)               # (ROWS, D) f32
    y1 = layernorm(x2 + attn, g1, be1)

    # ---- feed-forward (post-norm encoder layer) ------------------------------
    h1 = mmq(y1.astype(bf16), w1_ref, s1, b1)              # (ROWS, FF) f32
    g = _gelu_exact(h1)
    h2 = mmq(g.astype(bf16), w2_ref, s2, b2)
    y2 = layernorm(y1 + h2, g2, be2)
    act_ref[...] = y2

    # ---- epilogue (last layer): lane-dense output projection ----------------
    @pl.when(l == L - 1)
    def _():
        out_ref[...] = mm(y2, outw_ref[...], outb_ref[...])


# ----------------------------------------------------------------------------
# Parameters (deterministic, synthetic).  Per-layer matmul weights quantized
# to int8 with per-output-channel scales; small vectors packed per layer.
# ----------------------------------------------------------------------------
def _quantize_int8(w):
    # symmetric per-output-channel quantization: w ~= q * scale
    amax = jnp.max(jnp.abs(w), axis=0, keepdims=True)
    s = jnp.maximum(amax, 1e-8) / 127.0
    q = jnp.clip(jnp.round(w / s), -127.0, 127.0).astype(jnp.int8)
    return q, s[0]


def init_params(key, *, njoints, nfeats, latent_dim, ff_size, num_layers,
                num_heads, max_len=1024):
    Fin = njoints * nfeats
    D, FF, L = latent_dim, ff_size, num_layers
    assert D % num_heads == 0
    assert Fin <= LANE
    VW = max(3 * D, FF)

    ks = iter(jax.random.split(key, 8 + 8 * L))
    w = lambda shape: 0.02 * jax.random.normal(next(ks), shape, jnp.float32)

    in_w, in_b = w((Fin, D)), w((D,))
    time_w1, time_b1 = w((D, D)), w((D,))
    time_w2, time_b2 = w((D, D)), w((D,))
    out_w, out_b = w((D, Fin)), w((Fin,))

    params = {
        'in_w_pad': jnp.zeros((LANE, D), jnp.float32).at[:Fin].set(in_w)
                      .astype(jnp.bfloat16),
        'in_b': in_b.reshape(1, D),
        'time_w1': time_w1.astype(jnp.bfloat16),
        'time_w2': time_w2.astype(jnp.bfloat16),
        'time_b': jnp.stack([time_b1, time_b2], axis=0),           # (2, D)
        'out_w_pad': jnp.zeros((D, LANE), jnp.float32).at[:, :Fin].set(out_w)
                       .astype(jnp.bfloat16),
        'out_b_pad': jnp.zeros((1, LANE), jnp.float32).at[0, :Fin].set(out_b),
    }

    wqkv_l, wo_l, w1_l, w2_l, vec_l = [], [], [], [], []
    for _ in range(L):
        wqkv, bqkv = w((D, 3 * D)), w((3 * D,))
        wo, bo = w((D, D)), w((D,))
        w1, b1 = w((D, FF)), w((FF,))
        w2, b2 = w((FF, D)), w((D,))
        qkv_q, qkv_s = _quantize_int8(wqkv)
        wo_q, wo_s = _quantize_int8(wo)
        w1_q, w1_s = _quantize_int8(w1)
        w2_q, w2_s = _quantize_int8(w2)
        vec = jnp.zeros((16, VW), jnp.float32)
        vec = vec.at[0, :3 * D].set(bqkv)
        vec = vec.at[1, :D].set(bo)
        vec = vec.at[2, :FF].set(b1)
        vec = vec.at[3, :D].set(b2)
        vec = vec.at[4, :D].set(1.0)          # ln1 gamma (beta row 5 = 0)
        vec = vec.at[6, :D].set(1.0)          # ln2 gamma (beta row 7 = 0)
        vec = vec.at[8, :3 * D].set(qkv_s)    # dequant scales
        vec = vec.at[9, :D].set(wo_s)
        vec = vec.at[10, :FF].set(w1_s)
        vec = vec.at[11, :D].set(w2_s)
        wqkv_l.append(qkv_q)
        wo_l.append(wo_q)
        w1_l.append(w1_q)
        w2_l.append(w2_q)
        vec_l.append(vec)

    params['wqkv_stack'] = jnp.stack(wqkv_l)    # (L, D, 3D) int8
    params['wo_stack'] = jnp.stack(wo_l)        # (L, D, D)  int8
    params['w1_stack'] = jnp.stack(w1_l)        # (L, D, FF) int8
    params['w2_stack'] = jnp.stack(w2_l)        # (L, FF, D) int8
    params['vec_stack'] = jnp.stack(vec_l)      # (L, 16, VW) f32

    # PositionalEncoding buffer (max_len, D)
    pos = jnp.arange(max_len, dtype=jnp.float32)[:, None]
    div = jnp.exp(jnp.arange(0, D, 2, dtype=jnp.float32)
                  * (-math.log(10000.0) / D))
    pe = jnp.zeros((max_len, D), jnp.float32)
    pe = pe.at[:, 0::2].set(jnp.sin(pos * div))
    pe = pe.at[:, 1::2].set(jnp.cos(pos * div))
    params['pe'] = pe
    return params


# ----------------------------------------------------------------------------
# Forward pass (matches DiffusionModel.forward; eval-mode dropout)
# ----------------------------------------------------------------------------
def diffusion_forward(params, x_t, t, partial_seq=None, *, num_heads,
                      t_tiles=1):
    bs, T, nj, nf = x_t.shape
    Fin = nj * nf
    D = params['in_w_pad'].shape[1]
    FF = params['w1_stack'].shape[2]
    L = params['wqkv_stack'].shape[0]
    VW = params['vec_stack'].shape[2]
    N = T * bs
    PAD = LANE

    assert T % t_tiles == 0
    Tt = T // t_tiles                 # attention groups (t values) per row tile
    ROWS = Tt * bs                    # rows per tile (multiple of bs)
    assert ROWS % 8 == 0 and (t_tiles == 1 or Tt % 8 == 0)

    x_flat = x_t.reshape(bs, T, Fin).astype(jnp.float32)
    in_b = params['in_b']
    if partial_seq is not None:
        # embedding(x) + embedding(p) == embedding(x + p) with the bias twice
        x_flat = x_flat + partial_seq.reshape(bs, T, Fin).astype(jnp.float32)
        in_b = in_b * 2.0

    # seq-first row layout (T-major, bs-minor) so attention groups are
    # contiguous bs-row blocks.
    x_tb = jnp.transpose(x_flat, (1, 0, 2)).reshape(N, Fin)
    x_pad = jnp.pad(x_tb, ((0, 0), (0, PAD - Fin)))        # lane-dense input

    pe_t = params['pe'][jnp.clip(t, 0, 999)]               # (bs, D) gather (glue)
    pe_pos = params['pe'][:T]                              # (T, D)

    # additive block-diagonal attention mask (same for every row tile)
    grp = jnp.arange(ROWS, dtype=jnp.int32) // bs
    attn_mask = jnp.where(grp[:, None] == grp[None, :], 0.0,
                          NEG_INF).astype(jnp.float32)

    def cspec(shape):
        nd = len(shape)
        return pl.BlockSpec(shape, lambda r, l, nd=nd: (0,) * nd)

    kernel = functools.partial(_fused_forward_kernel, num_heads=num_heads,
                               bs=bs, ff_size=FF)

    grid_spec = pltpu.PrefetchScalarGridSpec(
        num_scalar_prefetch=0,
        grid=(t_tiles, L),
        in_specs=[
            pl.BlockSpec((ROWS, PAD), lambda r, l: (r, 0)),      # x_pad
            cspec((bs, D)),                                      # pe_t
            pl.BlockSpec((Tt, D), lambda r, l: (r, 0)),          # pe_pos
            cspec((ROWS, ROWS)),                                 # attn_mask
            cspec((D, D)),                                       # time_w1
            cspec((D, D)),                                       # time_w2
            cspec((2, D)),                                       # time_b
            cspec((PAD, D)),                                     # in_w_pad
            cspec((1, D)),                                       # in_b
            cspec((D, PAD)),                                     # out_w_pad
            cspec((1, PAD)),                                     # out_b_pad
            pl.BlockSpec((1, D, 3 * D), lambda r, l: (l, 0, 0)),  # wqkv int8
            pl.BlockSpec((1, D, D), lambda r, l: (l, 0, 0)),      # wo   int8
            pl.BlockSpec((1, D, FF), lambda r, l: (l, 0, 0)),     # w1   int8
            pl.BlockSpec((1, FF, D), lambda r, l: (l, 0, 0)),     # w2   int8
            pl.BlockSpec((1, 16, VW), lambda r, l: (l, 0, 0)),    # vec  f32
        ],
        out_specs=pl.BlockSpec((ROWS, PAD), lambda r, l: (r, 0)),
        scratch_shapes=[pltpu.VMEM((ROWS, D), jnp.float32),     # resident act
                        pltpu.VMEM((ROWS, D), jnp.bfloat16)],   # head ctx slab
    )

    out_pad = pl.pallas_call(
        kernel,
        grid_spec=grid_spec,
        out_shape=jax.ShapeDtypeStruct((N, PAD), jnp.float32),
        compiler_params=pltpu.CompilerParams(
            dimension_semantics=("parallel", "arbitrary"),
            vmem_limit_bytes=32 * 1024 * 1024),
    )(x_pad, pe_t, pe_pos, attn_mask,
      params['time_w1'], params['time_w2'], params['time_b'],
      params['in_w_pad'], in_b,
      params['out_w_pad'], params['out_b_pad'],
      params['wqkv_stack'], params['wo_stack'],
      params['w1_stack'], params['w2_stack'], params['vec_stack'])

    out = jnp.transpose(out_pad.reshape(T, bs, PAD), (1, 0, 2))[:, :, :Fin]
    return out.reshape(bs, T, nj, nf)


# ----------------------------------------------------------------------------
if __name__ == "__main__":
    # small, module-consistent configuration (head_dim = 128, lane aligned)
    NJOINTS, NFEATS = 4, 3          # input_feats = 12
    LATENT, FF = 256, 512           # d_model, dim_feedforward
    LAYERS, HEADS = 2, 2
    BS, T = 8, 8

    key = jax.random.PRNGKey(0)
    kp, kx, kt = jax.random.split(key, 3)
    params = init_params(kp, njoints=NJOINTS, nfeats=NFEATS,
                         latent_dim=LATENT, ff_size=FF,
                         num_layers=LAYERS, num_heads=HEADS)

    x_t = jax.random.normal(kx, (BS, T, NJOINTS, NFEATS), jnp.float32)
    t = jax.random.randint(kt, (BS,), 0, 1000, jnp.int32)

    fwd = jax.jit(functools.partial(diffusion_forward, num_heads=HEADS))
    out = fwd(params, x_t, t)
    jax.block_until_ready(out)

    assert out.shape == (BS, T, NJOINTS, NFEATS)
    assert bool(jnp.all(jnp.isfinite(out)))
    print("KERNEL_OK")
</pallas_src>

<mosaic_0001>
module attributes {stable_mosaic.version = 11 : i64} {
  func.func @_fused_forward_kernel(%arg0: i32, %arg1: i32, %arg2: memref<64x128xf32, #tpu.memory_space<vmem>>, %arg3: memref<8x256xf32, #tpu.memory_space<vmem>>, %arg4: memref<8x256xf32, #tpu.memory_space<vmem>>, %arg5: memref<64x64xf32, #tpu.memory_space<vmem>>, %arg6: memref<256x256xbf16, #tpu.memory_space<vmem>>, %arg7: memref<256x256xbf16, #tpu.memory_space<vmem>>, %arg8: memref<2x256xf32, #tpu.memory_space<vmem>>, %arg9: memref<128x256xbf16, #tpu.memory_space<vmem>>, %arg10: memref<1x256xf32, #tpu.memory_space<vmem>>, %arg11: memref<256x128xbf16, #tpu.memory_space<vmem>>, %arg12: memref<1x128xf32, #tpu.memory_space<vmem>>, %arg13: memref<1x256x768xi8, #tpu.memory_space<vmem>>, %arg14: memref<1x256x256xi8, #tpu.memory_space<vmem>>, %arg15: memref<1x256x512xi8, #tpu.memory_space<vmem>>, %arg16: memref<1x512x256xi8, #tpu.memory_space<vmem>>, %arg17: memref<1x16x768xf32, #tpu.memory_space<vmem>>, %arg18: memref<64x128xf32, #tpu.memory_space<vmem>>, %arg19: memref<64x256xf32, #tpu.memory_space<vmem>>, %arg20: memref<64x256xbf16, #tpu.memory_space<vmem>>) attributes {dimension_semantics = [#tpu.dimension_semantics<parallel>, #tpu.dimension_semantics<arbitrary>], iteration_bounds = array<i64: 1, 2>, scalar_prefetch = 0 : i64, scratch_operands = 2 : i64, tpu.core_type = #tpu.core_type<tc>, window_params = [{transform_indices = @transform_0, window_bounds = array<i64: 64, 128>}, {pipeline_mode = #tpu.pipeline_mode<synchronous>, transform_indices = @transform_1, window_bounds = array<i64: 8, 256>}, {transform_indices = @transform_2, window_bounds = array<i64: 8, 256>}, {pipeline_mode = #tpu.pipeline_mode<synchronous>, transform_indices = @transform_3, window_bounds = array<i64: 64, 64>}, {pipeline_mode = #tpu.pipeline_mode<synchronous>, transform_indices = @transform_4, window_bounds = array<i64: 256, 256>}, {pipeline_mode = #tpu.pipeline_mode<synchronous>, transform_indices = @transform_5, window_bounds = array<i64: 256, 256>}, {pipeline_mode = #tpu.pipeline_mode<synchronous>, transform_indices = @transform_6, window_bounds = array<i64: 2, 256>}, {pipeline_mode = #tpu.pipeline_mode<synchronous>, transform_indices = @transform_7, window_bounds = array<i64: 128, 256>}, {pipeline_mode = #tpu.pipeline_mode<synchronous>, transform_indices = @transform_8, window_bounds = array<i64: 1, 256>}, {pipeline_mode = #tpu.pipeline_mode<synchronous>, transform_indices = @transform_9, window_bounds = array<i64: 256, 128>}, {pipeline_mode = #tpu.pipeline_mode<synchronous>, transform_indices = @transform_10, window_bounds = array<i64: 1, 128>}, {transform_indices = @transform_11, window_bounds = array<i64: 1, 256, 768>}, {transform_indices = @transform_12, window_bounds = array<i64: 1, 256, 256>}, {transform_indices = @transform_13, window_bounds = array<i64: 1, 256, 512>}, {transform_indices = @transform_14, window_bounds = array<i64: 1, 512, 256>}, {transform_indices = @transform_15, window_bounds = array<i64: 1, 16, 768>}, {transform_indices = @transform_16, window_bounds = array<i64: 64, 128>}]} {
    %c0_i32 = arith.constant 0 : i32
    %0 = arith.cmpi eq, %arg1, %c0_i32 : i32
    %1 = arith.extui %0 : i1 to i32
    %c0_i32_0 = arith.constant 0 : i32
    %2 = arith.cmpi ne, %1, %c0_i32_0 : i32
    scf.if %2 {
      %c0_67 = arith.constant 0 : index
      %c0_68 = arith.constant 0 : index
      %191 = vector.load %arg3[%c0_67, %c0_68] : memref<8x256xf32, #tpu.memory_space<vmem>>, vector<8x256xf32>
      %c0_69 = arith.constant 0 : index
      %c0_70 = arith.constant 0 : index
      %192 = vector.load %arg6[%c0_69, %c0_70] : memref<256x256xbf16, #tpu.memory_space<vmem>>, vector<256x256xbf16>
      %c0_71 = arith.constant 0 : index
      %c0_72 = arith.constant 0 : index
      %193 = vector.load %arg8[%c0_71, %c0_72] : memref<2x256xf32, #tpu.memory_space<vmem>>, vector<1x256xf32>
      %194 = arith.truncf %191 : vector<8x256xf32> to vector<8x256xbf16>
      %cst_73 = arith.constant dense<0.000000e+00> : vector<8x256xf32>
      %195 = tpu.matmul %194, %192, %cst_73 {dimension_numbers = #tpu.dot_dimension_numbers<[1], [0], [0], [1], [0, 0, 1, 1], [], []>} : vector<8x256xbf16>, vector<256x256xbf16>, vector<8x256xf32> -> vector<8x256xf32>
      %196 = vector.broadcast %193 : vector<1x256xf32> to vector<8x256xf32>
      %197 = arith.addf %195, %196 : vector<8x256xf32>
      %198 = arith.negf %197 : vector<8x256xf32>
      %199 = math.exp %198 : vector<8x256xf32>
      %cst_74 = arith.constant 1.000000e+00 : f32
      %200 = vector.broadcast %cst_74 : f32 to vector<8x256xf32>
      %201 = arith.addf %200, %199 : vector<8x256xf32>
      %202 = arith.divf %200, %201 : vector<8x256xf32>
      %203 = arith.mulf %197, %202 : vector<8x256xf32>
      %c0_75 = arith.constant 0 : index
      %c0_76 = arith.constant 0 : index
      %204 = vector.load %arg7[%c0_75, %c0_76] : memref<256x256xbf16, #tpu.memory_space<vmem>>, vector<256x256xbf16>
      %c1 = arith.constant 1 : index
      %c0_77 = arith.constant 0 : index
      %205 = vector.load %arg8[%c1, %c0_77] : memref<2x256xf32, #tpu.memory_space<vmem>>, vector<1x256xf32>
      %206 = arith.truncf %203 : vector<8x256xf32> to vector<8x256xbf16>
      %cst_78 = arith.constant dense<0.000000e+00> : vector<8x256xf32>
      %207 = tpu.matmul %206, %204, %cst_78 {dimension_numbers = #tpu.dot_dimension_numbers<[1], [0], [0], [1], [0, 0, 1, 1], [], []>} : vector<8x256xbf16>, vector<256x256xbf16>, vector<8x256xf32> -> vector<8x256xf32>
      %208 = vector.broadcast %205 : vector<1x256xf32> to vector<8x256xf32>
      %209 = arith.addf %207, %208 : vector<8x256xf32>
      %c0_79 = arith.constant 0 : index
      %c0_80 = arith.constant 0 : index
      %210 = vector.load %arg2[%c0_79, %c0_80] : memref<64x128xf32, #tpu.memory_space<vmem>>, vector<64x128xf32>
      %c0_81 = arith.constant 0 : index
      %c0_82 = arith.constant 0 : index
      %211 = vector.load %arg9[%c0_81, %c0_82] : memref<128x256xbf16, #tpu.memory_space<vmem>>, vector<128x256xbf16>
      %c0_83 = arith.constant 0 : index
      %c0_84 = arith.constant 0 : index
      %212 = vector.load %arg10[%c0_83, %c0_84] : memref<1x256xf32, #tpu.memory_space<vmem>>, vector<1x256xf32>
      %213 = arith.truncf %210 : vector<64x128xf32> to vector<64x128xbf16>
      %cst_85 = arith.constant dense<0.000000e+00> : vector<64x256xf32>
      %214 = tpu.matmul %213, %211, %cst_85 {dimension_numbers = #tpu.dot_dimension_numbers<[1], [0], [0], [1], [0, 0, 1, 1], [], []>} : vector<64x128xbf16>, vector<128x256xbf16>, vector<64x256xf32> -> vector<64x256xf32>
      %215 = vector.broadcast %212 : vector<1x256xf32> to vector<64x256xf32>
      %216 = arith.addf %214, %215 : vector<64x256xf32>
      %217 = vector.shape_cast %216 : vector<64x256xf32> to vector<8x8x256xf32>
      %c0_86 = arith.constant 0 : index
      %c0_87 = arith.constant 0 : index
      %218 = vector.load %arg4[%c0_86, %c0_87] : memref<8x256xf32, #tpu.memory_space<vmem>>, vector<8x256xf32>
      %219 = vector.shape_cast %218 : vector<8x256xf32> to vector<8x1x256xf32>
      %220 = vector.broadcast %219 : vector<8x1x256xf32> to vector<8x8x256xf32>
      %221 = arith.addf %217, %220 : vector<8x8x256xf32>
      %222 = vector.shape_cast %209 : vector<8x256xf32> to vector<1x8x256xf32>
      %223 = vector.broadcast %222 : vector<1x8x256xf32> to vector<8x8x256xf32>
      %224 = arith.addf %221, %223 : vector<8x8x256xf32>
      %225 = vector.shape_cast %224 : vector<8x8x256xf32> to vector<64x256xf32>
      %c0_88 = arith.constant 0 : index
      %c0_89 = arith.constant 0 : index
      %226 = vector.load %arg19[%c0_88, %c0_89] : memref<64x256xf32, #tpu.memory_space<vmem>>, vector<64x256xf32>
      tpu.vector_store %arg19[%c0_88, %c0_89], %225 {strides = array<i32>} : memref<64x256xf32, #tpu.memory_space<vmem>>, vector<64x256xf32>,
    } else {
    }
    %c0 = arith.constant 0 : index
    %c0_1 = arith.constant 0 : index
    %c0_2 = arith.constant 0 : index
    %3 = vector.load %arg17[%c0, %c0_1, %c0_2] : memref<1x16x768xf32, #tpu.memory_space<vmem>>, vector<1x16x768xf32>
    %4 = vector.shape_cast %3 : vector<1x16x768xf32> to vector<16x768xf32>
    %5 = vector.extract_strided_slice %4 {offsets = [0, 0], sizes = [1, 768], strides = [1, 1]} : vector<16x768xf32> to vector<1x768xf32>
    %6 = vector.extract_strided_slice %4 {offsets = [1, 0], sizes = [1, 256], strides = [1, 1]} : vector<16x768xf32> to vector<1x256xf32>
    %7 = vector.extract_strided_slice %4 {offsets = [2, 0], sizes = [1, 512], strides = [1, 1]} : vector<16x768xf32> to vector<1x512xf32>
    %8 = vector.extract_strided_slice %4 {offsets = [3, 0], sizes = [1, 256], strides = [1, 1]} : vector<16x768xf32> to vector<1x256xf32>
    %9 = vector.extract_strided_slice %4 {offsets = [4, 0], sizes = [1, 256], strides = [1, 1]} : vector<16x768xf32> to vector<1x256xf32>
    %10 = vector.extract_strided_slice %4 {offsets = [5, 0], sizes = [1, 256], strides = [1, 1]} : vector<16x768xf32> to vector<1x256xf32>
    %11 = vector.extract_strided_slice %4 {offsets = [6, 0], sizes = [1, 256], strides = [1, 1]} : vector<16x768xf32> to vector<1x256xf32>
    %12 = vector.extract_strided_slice %4 {offsets = [7, 0], sizes = [1, 256], strides = [1, 1]} : vector<16x768xf32> to vector<1x256xf32>
    %13 = vector.extract_strided_slice %4 {offsets = [8, 0], sizes = [1, 768], strides = [1, 1]} : vector<16x768xf32> to vector<1x768xf32>
    %14 = vector.extract_strided_slice %4 {offsets = [9, 0], sizes = [1, 256], strides = [1, 1]} : vector<16x768xf32> to vector<1x256xf32>
    %15 = vector.extract_strided_slice %4 {offsets = [10, 0], sizes = [1, 512], strides = [1, 1]} : vector<16x768xf32> to vector<1x512xf32>
    %16 = vector.extract_strided_slice %4 {offsets = [11, 0], sizes = [1, 256], strides = [1, 1]} : vector<16x768xf32> to vector<1x256xf32>
    %c0_3 = arith.constant 0 : index
    %c0_4 = arith.constant 0 : index
    %17 = vector.load %arg19[%c0_3, %c0_4] : memref<64x256xf32, #tpu.memory_space<vmem>>, vector<64x256xf32>
    %18 = arith.truncf %17 : vector<64x256xf32> to vector<64x256xbf16>
    %c0_5 = arith.constant 0 : index
    %c0_6 = arith.constant 0 : index
    %c0_7 = arith.constant 0 : index
    %19 = vector.load %arg13[%c0_5, %c0_6, %c0_7] : memref<1x256x768xi8, #tpu.memory_space<vmem>>, vector<1x256x768xi8>
    %20 = vector.shape_cast %19 : vector<1x256x768xi8> to vector<256x768xi8>
    %21 = arith.sitofp %20 : vector<256x768xi8> to vector<256x768xf32>
    %22 = arith.truncf %21 : vector<256x768xf32> to vector<256x768xbf16>
    %cst = arith.constant dense<0.000000e+00> : vector<64x768xf32>
    %23 = tpu.matmul %18, %22, %cst {dimension_numbers = #tpu.dot_dimension_numbers<[1], [0], [0], [1], [0, 0, 1, 1], [], []>} : vector<64x256xbf16>, vector<256x768xbf16>, vector<64x768xf32> -> vector<64x768xf32>
    %24 = vector.broadcast %13 : vector<1x768xf32> to vector<64x768xf32>
    %25 = arith.mulf %23, %24 : vector<64x768xf32>
    %26 = vector.broadcast %5 : vector<1x768xf32> to vector<64x768xf32>
    %27 = arith.addf %25, %26 : vector<64x768xf32>
    %28 = arith.truncf %27 : vector<64x768xf32> to vector<64x768xbf16>
    %29 = vector.extract_strided_slice %28 {offsets = [0, 0], sizes = [64, 128], strides = [1, 1]} : vector<64x768xbf16> to vector<64x128xbf16>
    %30 = vector.extract_strided_slice %28 {offsets = [0, 256], sizes = [64, 128], strides = [1, 1]} : vector<64x768xbf16> to vector<64x128xbf16>
    %31 = vector.extract_strided_slice %28 {offsets = [0, 512], sizes = [64, 128], strides = [1, 1]} : vector<64x768xbf16> to vector<64x128xbf16>
    %cst_8 = arith.constant dense<0.000000e+00> : vector<64x64xf32>
    %32 = tpu.matmul %29, %30, %cst_8 {dimension_numbers = #tpu.dot_dimension_numbers<[1], [1], [0], [0], [0, 0, 1, 0], [], []>} : vector<64x128xbf16>, vector<64x128xbf16>, vector<64x64xf32> -> vector<64x64xf32>
    %cst_9 = arith.constant 0.0883883461 : f32
    %33 = vector.broadcast %cst_9 : f32 to vector<64x64xf32>
    %34 = arith.mulf %32, %33 : vector<64x64xf32>
    %c0_10 = arith.constant 0 : index
    %c0_11 = arith.constant 0 : index
    %35 = vector.load %arg5[%c0_10, %c0_11] : memref<64x64xf32, #tpu.memory_space<vmem>>, vector<64x64xf32>
    %36 = arith.addf %34, %35 : vector<64x64xf32>
    %cst_12 = arith.constant dense<0xFF800000> : vector<64xf32>
    %37 = vector.multi_reduction <maximumf>, %36, %cst_12 [1] : vector<64x64xf32> to vector<64xf32>
    %38 = vector.shape_cast %37 : vector<64xf32> to vector<64x1xf32>
    %39 = vector.broadcast %38 : vector<64x1xf32> to vector<64x64xf32>
    %40 = arith.subf %36, %39 : vector<64x64xf32>
    %41 = math.exp %40 : vector<64x64xf32>
    %cst_13 = arith.constant dense<0.000000e+00> : vector<64xf32>
    %42 = vector.multi_reduction <add>, %41, %cst_13 [1] : vector<64x64xf32> to vector<64xf32>
    %43 = vector.shape_cast %42 : vector<64xf32> to vector<64x1xf32>
    %44 = vector.broadcast %43 : vector<64x1xf32> to vector<64x64xf32>
    %45 = arith.divf %41, %44 : vector<64x64xf32>
    %46 = arith.truncf %45 : vector<64x64xf32> to vector<64x64xbf16>
    %cst_14 = arith.constant dense<0.000000e+00> : vector<64x128xf32>
    %47 = tpu.matmul %46, %31, %cst_14 {dimension_numbers = #tpu.dot_dimension_numbers<[1], [0], [0], [1], [0, 0, 1, 1], [], []>} : vector<64x64xbf16>, vector<64x128xbf16>, vector<64x128xf32> -> vector<64x128xf32>
    %48 = arith.truncf %47 : vector<64x128xf32> to vector<64x128xbf16>
    %c0_15 = arith.constant 0 : index
    %c0_16 = arith.constant 0 : index
    %49 = vector.load %arg20[%c0_15, %c0_16] : memref<64x256xbf16, #tpu.memory_space<vmem>>, vector<64x128xbf16>
    tpu.vector_store %arg20[%c0_15, %c0_16], %48 {strides = array<i32>} : memref<64x256xbf16, #tpu.memory_space<vmem>>, vector<64x128xbf16>,
    %50 = vector.extract_strided_slice %28 {offsets = [0, 128], sizes = [64, 128], strides = [1, 1]} : vector<64x768xbf16> to vector<64x128xbf16>
    %51 = vector.extract_strided_slice %28 {offsets = [0, 384], sizes = [64, 128], strides = [1, 1]} : vector<64x768xbf16> to vector<64x128xbf16>
    %52 = vector.extract_strided_slice %28 {offsets = [0, 640], sizes = [64, 128], strides = [1, 1]} : vector<64x768xbf16> to vector<64x128xbf16>
    %cst_17 = arith.constant dense<0.000000e+00> : vector<64x64xf32>
    %53 = tpu.matmul %50, %51, %cst_17 {dimension_numbers = #tpu.dot_dimension_numbers<[1], [1], [0], [0], [0, 0, 1, 0], [], []>} : vector<64x128xbf16>, vector<64x128xbf16>, vector<64x64xf32> -> vector<64x64xf32>
    %cst_18 = arith.constant 0.0883883461 : f32
    %54 = vector.broadcast %cst_18 : f32 to vector<64x64xf32>
    %55 = arith.mulf %53, %54 : vector<64x64xf32>
    %c0_19 = arith.constant 0 : index
    %c0_20 = arith.constant 0 : index
    %56 = vector.load %arg5[%c0_19, %c0_20] : memref<64x64xf32, #tpu.memory_space<vmem>>, vector<64x64xf32>
    %57 = arith.addf %55, %56 : vector<64x64xf32>
    %cst_21 = arith.constant dense<0xFF800000> : vector<64xf32>
    %58 = vector.multi_reduction <maximumf>, %57, %cst_21 [1] : vector<64x64xf32> to vector<64xf32>
    %59 = vector.shape_cast %58 : vector<64xf32> to vector<64x1xf32>
    %60 = vector.broadcast %59 : vector<64x1xf32> to vector<64x64xf32>
    %61 = arith.subf %57, %60 : vector<64x64xf32>
    %62 = math.exp %61 : vector<64x64xf32>
    %cst_22 = arith.constant dense<0.000000e+00> : vector<64xf32>
    %63 = vector.multi_reduction <add>, %62, %cst_22 [1] : vector<64x64xf32> to vector<64xf32>
    %64 = vector.shape_cast %63 : vector<64xf32> to vector<64x1xf32>
    %65 = vector.broadcast %64 : vector<64x1xf32> to vector<64x64xf32>
    %66 = arith.divf %62, %65 : vector<64x64xf32>
    %67 = arith.truncf %66 : vector<64x64xf32> to vector<64x64xbf16>
    %cst_23 = arith.constant dense<0.000000e+00> : vector<64x128xf32>
    %68 = tpu.matmul %67, %52, %cst_23 {dimension_numbers = #tpu.dot_dimension_numbers<[1], [0], [0], [1], [0, 0, 1, 1], [], []>} : vector<64x64xbf16>, vector<64x128xbf16>, vector<64x128xf32> -> vector<64x128xf32>
    %69 = arith.truncf %68 : vector<64x128xf32> to vector<64x128xbf16>
    %c0_24 = arith.constant 0 : index
    %c128 = arith.constant 128 : index
    %70 = vector.load %arg20[%c0_24, %c128] : memref<64x256xbf16, #tpu.memory_space<vmem>>, vector<64x128xbf16>
    tpu.vector_store %arg20[%c0_24, %c128], %69 {strides = array<i32>} : memref<64x256xbf16, #tpu.memory_space<vmem>>, vector<64x128xbf16>,
    %c0_25 = arith.constant 0 : index
    %c0_26 = arith.constant 0 : index
    %71 = vector.load %arg20[%c0_25, %c0_26] : memref<64x256xbf16, #tpu.memory_space<vmem>>, vector<64x256xbf16>
    %c0_27 = arith.constant 0 : index
    %c0_28 = arith.constant 0 : index
    %c0_29 = arith.constant 0 : index
    %72 = vector.load %arg14[%c0_27, %c0_28, %c0_29] : memref<1x256x256xi8, #tpu.memory_space<vmem>>, vector<1x256x256xi8>
    %73 = vector.shape_cast %72 : vector<1x256x256xi8> to vector<256x256xi8>
    %74 = arith.sitofp %73 : vector<256x256xi8> to vector<256x256xf32>
    %75 = arith.truncf %74 : vector<256x256xf32> to vector<256x256xbf16>
    %cst_30 = arith.constant dense<0.000000e+00> : vector<64x256xf32>
    %76 = tpu.matmul %71, %75, %cst_30 {dimension_numbers = #tpu.dot_dimension_numbers<[1], [0], [0], [1], [0, 0, 1, 1], [], []>} : vector<64x256xbf16>, vector<256x256xbf16>, vector<64x256xf32> -> vector<64x256xf32>
    %77 = vector.broadcast %14 : vector<1x256xf32> to vector<64x256xf32>
    %78 = arith.mulf %76, %77 : vector<64x256xf32>
    %79 = vector.broadcast %6 : vector<1x256xf32> to vector<64x256xf32>
    %80 = arith.addf %78, %79 : vector<64x256xf32>
    %81 = arith.addf %17, %80 : vector<64x256xf32>
    %cst_31 = arith.constant dense<0.000000e+00> : vector<64xf32>
    %82 = vector.multi_reduction <add>, %81, %cst_31 [1] : vector<64x256xf32> to vector<64xf32>
    %83 = vector.shape_cast %82 : vector<64xf32> to vector<64x1xf32>
    %cst_32 = arith.constant 2.560000e+02 : f32
    %84 = vector.broadcast %cst_32 : f32 to vector<64x1xf32>
    %85 = arith.divf %83, %84 : vector<64x1xf32>
    %86 = vector.broadcast %85 : vector<64x1xf32> to vector<64x256xf32>
    %87 = arith.subf %81, %86 : vector<64x256xf32>
    %88 = arith.mulf %87, %87 : vector<64x256xf32>
    %cst_33 = arith.constant dense<0.000000e+00> : vector<64xf32>
    %89 = vector.multi_reduction <add>, %88, %cst_33 [1] : vector<64x256xf32> to vector<64xf32>
    %90 = vector.shape_cast %89 : vector<64xf32> to vector<64x1xf32>
    %cst_34 = arith.constant 2.560000e+02 : f32
    %91 = vector.broadcast %cst_34 : f32 to vector<64x1xf32>
    %92 = arith.divf %90, %91 : vector<64x1xf32>
    %93 = vector.broadcast %85 : vector<64x1xf32> to vector<64x256xf32>
    %94 = arith.subf %81, %93 : vector<64x256xf32>
    %cst_35 = arith.constant 9.99999974E-6 : f32
    %95 = vector.broadcast %cst_35 : f32 to vector<64x1xf32>
    %96 = arith.addf %92, %95 : vector<64x1xf32>
    %97 = math.rsqrt %96 : vector<64x1xf32>
    %98 = vector.broadcast %97 : vector<64x1xf32> to vector<64x256xf32>
    %99 = arith.mulf %94, %98 : vector<64x256xf32>
    %100 = vector.broadcast %9 : vector<1x256xf32> to vector<64x256xf32>
    %101 = arith.mulf %99, %100 : vector<64x256xf32>
    %102 = vector.broadcast %10 : vector<1x256xf32> to vector<64x256xf32>
    %103 = arith.addf %101, %102 : vector<64x256xf32>
    %104 = arith.truncf %103 : vector<64x256xf32> to vector<64x256xbf16>
    %c0_36 = arith.constant 0 : index
    %c0_37 = arith.constant 0 : index
    %c0_38 = arith.constant 0 : index
    %105 = vector.load %arg15[%c0_36, %c0_37, %c0_38] : memref<1x256x512xi8, #tpu.memory_space<vmem>>, vector<1x256x512xi8>
    %106 = vector.shape_cast %105 : vector<1x256x512xi8> to vector<256x512xi8>
    %107 = arith.sitofp %106 : vector<256x512xi8> to vector<256x512xf32>
    %108 = arith.truncf %107 : vector<256x512xf32> to vector<256x512xbf16>
    %cst_39 = arith.constant dense<0.000000e+00> : vector<64x512xf32>
    %109 = tpu.matmul %104, %108, %cst_39 {dimension_numbers = #tpu.dot_dimension_numbers<[1], [0], [0], [1], [0, 0, 1, 1], [], []>} : vector<64x256xbf16>, vector<256x512xbf16>, vector<64x512xf32> -> vector<64x512xf32>
    %110 = vector.broadcast %15 : vector<1x512xf32> to vector<64x512xf32>
    %111 = arith.mulf %109, %110 : vector<64x512xf32>
    %112 = vector.broadcast %7 : vector<1x512xf32> to vector<64x512xf32>
    %113 = arith.addf %111, %112 : vector<64x512xf32>
    %cst_40 = arith.constant 5.000000e-01 : f32
    %114 = vector.broadcast %cst_40 : f32 to vector<64x512xf32>
    %115 = arith.mulf %114, %113 : vector<64x512xf32>
    %cst_41 = arith.constant 0.707106769 : f32
    %116 = vector.broadcast %cst_41 : f32 to vector<64x512xf32>
    %117 = arith.mulf %113, %116 : vector<64x512xf32>
    %118 = math.absf %117 : vector<64x512xf32>
    %cst_42 = arith.constant 0.327591091 : f32
    %119 = vector.broadcast %cst_42 : f32 to vector<64x512xf32>
    %120 = arith.mulf %119, %118 : vector<64x512xf32>
    %cst_43 = arith.constant 1.000000e+00 : f32
    %121 = vector.broadcast %cst_43 : f32 to vector<64x512xf32>
    %122 = arith.addf %121, %120 : vector<64x512xf32>
    %cst_44 = arith.constant 1.000000e+00 : f32
    %123 = vector.broadcast %cst_44 : f32 to vector<64x512xf32>
    %124 = arith.divf %123, %122 : vector<64x512xf32>
    %cst_45 = arith.constant 1.06140542 : f32
    %125 = vector.broadcast %cst_45 : f32 to vector<64x512xf32>
    %126 = arith.mulf %125, %124 : vector<64x512xf32>
    %cst_46 = arith.constant -1.45315206 : f32
    %127 = vector.broadcast %cst_46 : f32 to vector<64x512xf32>
    %128 = arith.addf %126, %127 : vector<64x512xf32>
    %129 = arith.mulf %128, %124 : vector<64x512xf32>
    %cst_47 = arith.constant 1.42141378 : f32
    %130 = vector.broadcast %cst_47 : f32 to vector<64x512xf32>
    %131 = arith.addf %129, %130 : vector<64x512xf32>
    %132 = arith.mulf %131, %124 : vector<64x512xf32>
    %cst_48 = arith.constant -0.284496725 : f32
    %133 = vector.broadcast %cst_48 : f32 to vector<64x512xf32>
    %134 = arith.addf %132, %133 : vector<64x512xf32>
    %135 = arith.mulf %134, %124 : vector<64x512xf32>
    %cst_49 = arith.constant 0.254829586 : f32
    %136 = vector.broadcast %cst_49 : f32 to vector<64x512xf32>
    %137 = arith.addf %135, %136 : vector<64x512xf32>
    %138 = arith.mulf %137, %124 : vector<64x512xf32>
    %139 = arith.mulf %118, %118 : vector<64x512xf32>
    %cst_50 = arith.constant 0.000000e+00 : f32
    %140 = vector.broadcast %cst_50 : f32 to vector<64x512xf32>
    %141 = arith.subf %140, %139 : vector<64x512xf32>
    %142 = math.exp %141 : vector<64x512xf32>
    %143 = arith.mulf %138, %142 : vector<64x512xf32>
    %cst_51 = arith.constant 1.000000e+00 : f32
    %144 = vector.broadcast %cst_51 : f32 to vector<64x512xf32>
    %145 = arith.subf %144, %143 : vector<64x512xf32>
    %cst_52 = arith.constant 0.000000e+00 : f32
    %146 = vector.broadcast %cst_52 : f32 to vector<64x512xf32>
    %147 = arith.cmpf oge, %117, %146 : vector<64x512xf32>
    %cst_53 = arith.constant 0.000000e+00 : f32
    %148 = vector.broadcast %cst_53 : f32 to vector<64x512xf32>
    %149 = arith.subf %148, %145 : vector<64x512xf32>
    %150 = arith.select %147, %145, %149 : vector<64x512xi1>, vector<64x512xf32>
    %cst_54 = arith.constant 1.000000e+00 : f32
    %151 = vector.broadcast %cst_54 : f32 to vector<64x512xf32>
    %152 = arith.addf %151, %150 : vector<64x512xf32>
    %153 = arith.mulf %115, %152 : vector<64x512xf32>
    %154 = arith.truncf %153 : vector<64x512xf32> to vector<64x512xbf16>
    %c0_55 = arith.constant 0 : index
    %c0_56 = arith.constant 0 : index
    %c0_57 = arith.constant 0 : index
    %155 = vector.load %arg16[%c0_55, %c0_56, %c0_57] : memref<1x512x256xi8, #tpu.memory_space<vmem>>, vector<1x512x256xi8>
    %156 = vector.shape_cast %155 : vector<1x512x256xi8> to vector<512x256xi8>
    %157 = arith.sitofp %156 : vector<512x256xi8> to vector<512x256xf32>
    %158 = arith.truncf %157 : vector<512x256xf32> to vector<512x256xbf16>
    %cst_58 = arith.constant dense<0.000000e+00> : vector<64x256xf32>
    %159 = tpu.matmul %154, %158, %cst_58 {dimension_numbers = #tpu.dot_dimension_numbers<[1], [0], [0], [1], [0, 0, 1, 1], [], []>} : vector<64x512xbf16>, vector<512x256xbf16>, vector<64x256xf32> -> vector<64x256xf32>
    %160 = vector.broadcast %16 : vector<1x256xf32> to vector<64x256xf32>
    %161 = arith.mulf %159, %160 : vector<64x256xf32>
    %162 = vector.broadcast %8 : vector<1x256xf32> to vector<64x256xf32>
    %163 = arith.addf %161, %162 : vector<64x256xf32>
    %164 = arith.addf %103, %163 : vector<64x256xf32>
    %cst_59 = arith.constant dense<0.000000e+00> : vector<64xf32>
    %165 = vector.multi_reduction <add>, %164, %cst_59 [1] : vector<64x256xf32> to vector<64xf32>
    %166 = vector.shape_cast %165 : vector<64xf32> to vector<64x1xf32>
    %cst_60 = arith.constant 2.560000e+02 : f32
    %167 = vector.broadcast %cst_60 : f32 to vector<64x1xf32>
    %168 = arith.divf %166, %167 : vector<64x1xf32>
    %169 = vector.broadcast %168 : vector<64x1xf32> to vector<64x256xf32>
    %170 = arith.subf %164, %169 : vector<64x256xf32>
    %171 = arith.mulf %170, %170 : vector<64x256xf32>
    %cst_61 = arith.constant dense<0.000000e+00> : vector<64xf32>
    %172 = vector.multi_reduction <add>, %171, %cst_61 [1] : vector<64x256xf32> to vector<64xf32>
    %173 = vector.shape_cast %172 : vector<64xf32> to vector<64x1xf32>
    %cst_62 = arith.constant 2.560000e+02 : f32
    %174 = vector.broadcast %cst_62 : f32 to vector<64x1xf32>
    %175 = arith.divf %173, %174 : vector<64x1xf32>
    %176 = vector.broadcast %168 : vector<64x1xf32> to vector<64x256xf32>
    %177 = arith.subf %164, %176 : vector<64x256xf32>
    %cst_63 = arith.constant 9.99999974E-6 : f32
    %178 = vector.broadcast %cst_63 : f32 to vector<64x1xf32>
    %179 = arith.addf %175, %178 : vector<64x1xf32>
    %180 = math.rsqrt %179 : vector<64x1xf32>
    %181 = vector.broadcast %180 : vector<64x1xf32> to vector<64x256xf32>
    %182 = arith.mulf %177, %181 : vector<64x256xf32>
    %183 = vector.broadcast %11 : vector<1x256xf32> to vector<64x256xf32>
    %184 = arith.mulf %182, %183 : vector<64x256xf32>
    %185 = vector.broadcast %12 : vector<1x256xf32> to vector<64x256xf32>
    %186 = arith.addf %184, %185 : vector<64x256xf32>
    %c0_64 = arith.constant 0 : index
    %c0_65 = arith.constant 0 : index
    %187 = vector.load %arg19[%c0_64, %c0_65] : memref<64x256xf32, #tpu.memory_space<vmem>>, vector<64x256xf32>
    tpu.vector_store %arg19[%c0_64, %c0_65], %186 {strides = array<i32>} : memref<64x256xf32, #tpu.memory_space<vmem>>, vector<64x256xf32>,
    %c1_i32 = arith.constant 1 : i32
    %188 = arith.cmpi eq, %arg1, %c1_i32 : i32
    %189 = arith.extui %188 : i1 to i32
    %c0_i32_66 = arith.constant 0 : i32
    %190 = arith.cmpi ne, %189, %c0_i32_66 : i32
    scf.if %190 {
      %c0_67 = arith.constant 0 : index
      %c0_68 = arith.constant 0 : index
      %191 = vector.load %arg11[%c0_67, %c0_68] : memref<256x128xbf16, #tpu.memory_space<vmem>>, vector<256x128xbf16>
      %c0_69 = arith.constant 0 : index
      %c0_70 = arith.constant 0 : index
      %192 = vector.load %arg12[%c0_69, %c0_70] : memref<1x128xf32, #tpu.memory_space<vmem>>, vector<1x128xf32>
      %193 = arith.truncf %186 : vector<64x256xf32> to vector<64x256xbf16>
      %cst_71 = arith.constant dense<0.000000e+00> : vector<64x128xf32>
      %194 = tpu.matmul %193, %191, %cst_71 {dimension_numbers = #tpu.dot_dimension_numbers<[1], [0], [0], [1], [0, 0, 1, 1], [], []>} : vector<64x256xbf16>, vector<256x128xbf16>, vector<64x128xf32> -> vector<64x128xf32>
      %195 = vector.broadcast %192 : vector<1x128xf32> to vector<64x128xf32>
      %196 = arith.addf %194, %195 : vector<64x128xf32>
      %c0_72 = arith.constant 0 : index
      %c0_73 = arith.constant 0 : index
      %197 = vector.load %arg18[%c0_72, %c0_73] : memref<64x128xf32, #tpu.memory_space<vmem>>, vector<64x128xf32>
      tpu.vector_store %arg18[%c0_72, %c0_73], %196 {strides = array<i32>} : memref<64x128xf32, #tpu.memory_space<vmem>>, vector<64x128xf32>,
    } else {
    }
    return
  }
  func.func @transform_0(%arg0: i32, %arg1: i32) -> (i32, i32) {
    %c0_i32 = arith.constant 0 : i32
    %c0_i32_0 = arith.constant 0 : i32
    return %arg0, %c0_i32 : i32, i32
  }
  func.func @transform_1(%arg0: i32, %arg1: i32) -> (i32, i32) {
    %c0_i32 = arith.constant 0 : i32
    %c0_i32_0 = arith.constant 0 : i32
    %c0_i32_1 = arith.constant 0 : i32
    return %c0_i32, %c0_i32_0 : i32, i32
  }
  func.func @transform_2(%arg0: i32, %arg1: i32) -> (i32, i32) {
    %c0_i32 = arith.constant 0 : i32
    %c0_i32_0 = arith.constant 0 : i32
    return %arg0, %c0_i32 : i32, i32
  }
  func.func @transform_3(%arg0: i32, %arg1: i32) -> (i32, i32) {
    %c0_i32 = arith.constant 0 : i32
    %c0_i32_0 = arith.constant 0 : i32
    %c0_i32_1 = arith.constant 0 : i32
    return %c0_i32, %c0_i32_0 : i32, i32
  }
  func.func @transform_4(%arg0: i32, %arg1: i32) -> (i32, i32) {
    %c0_i32 = arith.constant 0 : i32
    %c0_i32_0 = arith.constant 0 : i32
    %c0_i32_1 = arith.constant 0 : i32
    return %c0_i32, %c0_i32_0 : i32, i32
  }
  func.func @transform_5(%arg0: i32, %arg1: i32) -> (i32, i32) {
    %c0_i32 = arith.constant 0 : i32
    %c0_i32_0 = arith.constant 0 : i32
    %c0_i32_1 = arith.constant 0 : i32
    return %c0_i32, %c0_i32_0 : i32, i32
  }
  func.func @transform_6(%arg0: i32, %arg1: i32) -> (i32, i32) {
    %c0_i32 = arith.constant 0 : i32
    %c0_i32_0 = arith.constant 0 : i32
    %c0_i32_1 = arith.constant 0 : i32
    return %c0_i32, %c0_i32_0 : i32, i32
  }
  func.func @transform_7(%arg0: i32, %arg1: i32) -> (i32, i32) {
    %c0_i32 = arith.constant 0 : i32
    %c0_i32_0 = arith.constant 0 : i32
    %c0_i32_1 = arith.constant 0 : i32
    return %c0_i32, %c0_i32_0 : i32, i32
  }
  func.func @transform_8(%arg0: i32, %arg1: i32) -> (i32, i32) {
    %c0_i32 = arith.constant 0 : i32
    %c0_i32_0 = arith.constant 0 : i32
    %c0_i32_1 = arith.constant 0 : i32
    return %c0_i32, %c0_i32_0 : i32, i32
  }
  func.func @transform_9(%arg0: i32, %arg1: i32) -> (i32, i32) {
    %c0_i32 = arith.constant 0 : i32
    %c0_i32_0 = arith.constant 0 : i32
    %c0_i32_1 = arith.constant 0 : i32
    return %c0_i32, %c0_i32_0 : i32, i32
  }
  func.func @transform_10(%arg0: i32, %arg1: i32) -> (i32, i32) {
    %c0_i32 = arith.constant 0 : i32
    %c0_i32_0 = arith.constant 0 : i32
    %c0_i32_1 = arith.constant 0 : i32
    return %c0_i32, %c0_i32_0 : i32, i32
  }
  func.func @transform_11(%arg0: i32, %arg1: i32) -> (i32, i32, i32) {
    %c0_i32 = arith.constant 0 : i32
    %c0_i32_0 = arith.constant 0 : i32
    %c0_i32_1 = arith.constant 0 : i32
    return %arg1, %c0_i32, %c0_i32_0 : i32, i32, i32
  }
  func.func @transform_12(%arg0: i32, %arg1: i32) -> (i32, i32, i32) {
    %c0_i32 = arith.constant 0 : i32
    %c0_i32_0 = arith.constant 0 : i32
    %c0_i32_1 = arith.constant 0 : i32
    return %arg1, %c0_i32, %c0_i32_0 : i32, i32, i32
  }
  func.func @transform_13(%arg0: i32, %arg1: i32) -> (i32, i32, i32) {
    %c0_i32 = arith.constant 0 : i32
    %c0_i32_0 = arith.constant 0 : i32
    %c0_i32_1 = arith.constant 0 : i32
    return %arg1, %c0_i32, %c0_i32_0 : i32, i32, i32
  }
  func.func @transform_14(%arg0: i32, %arg1: i32) -> (i32, i32, i32) {
    %c0_i32 = arith.constant 0 : i32
    %c0_i32_0 = arith.constant 0 : i32
    %c0_i32_1 = arith.constant 0 : i32
    return %arg1, %c0_i32, %c0_i32_0 : i32, i32, i32
  }
  func.func @transform_15(%arg0: i32, %arg1: i32) -> (i32, i32, i32) {
    %c0_i32 = arith.constant 0 : i32
    %c0_i32_0 = arith.constant 0 : i32
    %c0_i32_1 = arith.constant 0 : i32
    return %arg1, %c0_i32, %c0_i32_0 : i32, i32, i32
  }
  func.func @transform_16(%arg0: i32, %arg1: i32) -> (i32, i32) {
    %c0_i32 = arith.constant 0 : i32
    %c0_i32_0 = arith.constant 0 : i32
    return %arg0, %c0_i32 : i32, i32
  }
}

</mosaic_0001>

<bundles_post_ra>
// kernel: diffusion_forward.1
= control target key start
LH: loop header
LB: loop body
LE: loop exit
PB: predicated region body
PF: predicated region fallthrough
CT: control target
= control target key end

     0   :  { %s9340_s0 = inlined_call_operand.vmem [shape: f32[64,128], index: 0, kind: input, shape index: {}]   ;;  %s9341_s1 = inlined_call_operand.vmem [shape: f32[8,256], index: 1, kind: input, shape index: {}]   ;;  %s9342_s2 = inlined_call_operand.vmem [shape: f32[8,256], index: 2, kind: input, shape index: {}]   ;;  %s9343_s3 = inlined_call_operand.vmem [shape: f32[64,64], index: 3, kind: input, shape index: {}]   ;;  %s9344_s4 = inlined_call_operand.hbm [shape: bf16[256,256], index: 4, kind: input, shape index: {}]   ;;  %s9345_s5 = inlined_call_operand.hbm [shape: bf16[256,256], index: 5, kind: input, shape index: {}]   ;;  %s9346_s6 = inlined_call_operand.vmem [shape: f32[2,256], index: 6, kind: input, shape index: {}]   ;;  %s9347_s7 = inlined_call_operand.hbm [shape: bf16[128,256], index: 7, kind: input, shape index: {}]   ;;  %s9348_s8 = inlined_call_operand.hbm [shape: f32[1,256], index: 8, kind: input, shape index: {}]   ;;  %s9349_s9 = inlined_call_operand.hbm [shape: bf16[256,128], index: 9, kind: input, shape index: {}]   ;;  %s9350_s10 = inlined_call_operand.vmem [shape: f32[1,128], index: 10, kind: input, shape index: {}]   ;;  %s9351_s11 = inlined_call_operand.vmem [shape: s8[2,256,768], index: 11, kind: input, shape index: {}]   ;;  %s9352_s12 = inlined_call_operand.hbm [shape: s8[2,256,256], index: 12, kind: input, shape index: {}]   ;;  %s9353_s13 = inlined_call_operand.hbm [shape: s8[2,256,512], index: 13, kind: input, shape index: {}]   ;;  %s9354_s14 = inlined_call_operand.hbm [shape: s8[2,512,256], index: 14, kind: input, shape index: {}]   ;;  %s9355_s15 = inlined_call_operand.hbm [shape: f32[2,16,768], index: 15, kind: input, shape index: {}]   ;;  %s9356_s16 = inlined_call_operand.vmem [shape: f32[64,128], index: 16, kind: output, shape index: {}]  }
   0x1   :  { %9470 = sst [smem:[#allocation125_spill]] %s9340_s0 }
   0x2   :  { %9471 = sst [smem:[#allocation126_spill]] %s9341_s1 }
   0x3   :  { %9472 = sst [smem:[#allocation127_spill]] %s9342_s2 }
   0x4   :  { %9473 = sst [smem:[#allocation128_spill]] %s9343_s3 }
   0x5   :  { %9474 = sst [smem:[#allocation129_spill]] %s9345_s5 }
   0x6   :  { %9475 = sst [smem:[#allocation130_spill]] %s9346_s6 }
   0x7   :  { %9476 = sst [smem:[#allocation131_spill]] %s9348_s8 }
   0x8   :  { %9477 = sst [smem:[#allocation132_spill]] %s9350_s10 }
   0x9   :  { %9478 = sst [smem:[#allocation133_spill]] %s9351_s11 }
   0xa   :  { %9479 = sst [smem:[#allocation134_spill]] %s9352_s12 }
   0xb   :  { %9480 = sst [smem:[#allocation135_spill]] %s9354_s14 }
   0xc   :  { %9481 = sst [smem:[#allocation136_spill]] %s9356_s16 }
   0xd   :  { %21 = vsyncpa [#allocation5], 0 }
   0xe   :  { %22 = vsyncpa [#allocation7], 0 }
   0xf   :  { %23 = vsyncpa [#allocation10], 0 }
  0x10   :  { %24 = vsyncpa [#allocation13], 0 }
  0x11   :  { %26 = vsyncpa [#allocation13 + $0x1], 0 }
  0x12   :  { %27 = vsyncpa [#allocation16], 0 }
  0x13   :  { %29 = vsyncpa [#allocation16 + $0x1], 0  ;;  %s6637_s21 = smov 0   ;;  %s6639_s22 = smov 0  }
  0x14   :  { %s6641_s23 = smov 0   ;;  %s6643_s24 = smov 0  }
  0x15   :  { %s6645_s25 = smov 0   ;;  %s6647_s26 = smov 0  }
  0x16 LB: > { %9482 = sst [smem:[#allocation23_spill]] %s6513_s22  ;;  %s9358_s27 = sadd.s32 4294967295, %s6529_s26   ;;  %s6529_s26 = sphi %s6647_s26, %s35_s26   ;;  %s6525_s25 = sphi %s6645_s25, %s9755_s25   ;;  %s6521_s24 = sphi %s6643_s24, %s9754_s24   ;;  %s6517_s23 = sphi %s6641_s23, %s9752_s23   ;;  %s6513_s22 = sphi %s6639_s22, %s9751_s22   ;;  %s6509_s21 = sphi %s6637_s21, %s9750_s21  }
  0x17   : > { %9483 = sst [smem:[#allocation24_spill]] %s6517_s23  ;;  %p5336_p0 = scmp.ge.s32.totalorder %s6529_s26, 1 }
  0x18   : > { %9484 = sst [smem:[#allocation25_spill]] %s6521_s24  ;;  %p6671_p1 = scmp.eq.s32.totalorder %s9358_s27, 0 }
  0x19   : > { %9485 = sst [smem:[#allocation26_spill]] %s6529_s26  ;;  %p449_p2 = scmp.lt.s32.totalorder %s6529_s26, 3 }
  0x1a   : > { %s9486_s28 = scalar_select %p6671_p1, 1, 0 }
  0x1b   : > { %p6676_p3 = pnand %p5336_p0, %p449_p2  ;;  %s6531_s30 = smov [#allocation6]  }
  0x1c   : > { %9487 = sst [smem:[#allocation27_spill]] %s9486_s28  ;;  %s497_s0 = sshll.u32 %s6531_s30, 4  ;;  %s498_s0 = int_to_ptr.vmem [resolvable:$true] %s497_s0 }
  0x1d   : > { %s9488_s29 = scalar_select %p6676_p3, 1, 0 }
  0x1e   : > { %p5698_p4 = pneg %p6676_p3  ;;  %s6532_s17 = smov [#allocation9]  }
  0x1f   : > { %s527_s18 = sshll.u32 %s6532_s17, 4  ;;  %s9490_s5 = sld [smem:[#allocation129_spill]]  ;;  %s6688_s18 = int_to_ptr.vmem [resolvable:$true] %s527_s18 }
  0x20   : > { %p6684_p5 = pnand %p5698_p4, %p6671_p1 }
  0x22   : > { %s9489_s19 = scalar_select %p6684_p5, 1, 0 }
  0x23   : > { %p6698_p7 = pneg %p6684_p5 }
  0x25   : > { %s6203_s16 = scalar_lea.hbm %s9490_s5, 4096 }
  0x26   : > { %p6204_p6 = scmp.ne.s32.totalorder %s9490_s5, %s6203_s16  ;;  %p6210_p10 = scmp.lt.u32.totalorder %s6203_s16, %s9490_s5 }
  0x27   : > { %s9491_s30 = scalar_select %p6698_p7, 1, 0 }
  0x28   : > { %p6206_p8 = pnand %p6698_p7, %p6204_p6 }
  0x2a   : > { %p6207_p9 = pneg %p6206_p8 }
  0x2c   : > { %p6212_p11 = pnand %p6210_p10, %p6207_p9 }
  0x2e   : > { %6215 = shalt.err (!%p6212_p11)
}
  0x2f   : > { %s6216_s27 = scalar_lea.vmem %s498_s0, 4096  ;;  %p6224_p2 = scmp.lt.s32.totalorder %s498_s0, %s498_s0 }
  0x30   : > { %p6217_p12 = scmp.ne.s32.totalorder %s498_s0, %s6216_s27  ;;  %p6225_p4 = scmp.lt.s32.totalorder %s6216_s27, %s6216_s27 }
  0x32   : > { %p6219_p13 = pnand %p6217_p12, %p6698_p7  ;;  %p6226_p3 = por %p6225_p4, %p6224_p2 }
  0x34   : > { %p6220_p0 = pneg %p6219_p13 }
  0x36   : > { %p6227_p1 = pnand %p6226_p3, %p6220_p0 }
  0x38   : > { %6230 = shalt.err (!%p6227_p1)
}
  0x39   : > { %s9368_s3 = smov 128   ;;  %s9370_s10 = smov 8  }
  0x3a   : > { %5704 = dma.hbm_to_vmem [thread:$0]  (!%p6684_p5), %s9490_s5, 4096, %s498_s0, [#allocation7], %s9368_s3, %s9368_s3, %s9370_s10  }
  0x3b   : > { %s9492_s8 = sld [smem:[#allocation131_spill]] }
  0x41   : > { %s6231_s6 = scalar_lea.hbm %s9492_s8, 32 }
  0x42   : > { %p6232_p1 = scmp.ne.s32.totalorder %s9492_s8, %s6231_s6  ;;  %p6238_p8 = scmp.lt.u32.totalorder %s6231_s6, %s9492_s8 }
  0x44   : > { %p6234_p3 = pnand %p6232_p1, %p6698_p7 }
  0x46   : > { %p6235_p6 = pneg %p6234_p3 }
  0x48   : > { %p6240_p9 = pnand %p6238_p8, %p6235_p6 }
  0x4a   : > { %6243 = shalt.err (!%p6240_p9)
}
  0x4b   : > { %s6244_s0 = scalar_lea.vmem %s6688_s18, 32  ;;  %p6252_p13 = scmp.lt.s32.totalorder %s6688_s18, %s6688_s18 }
  0x4c   : > { %p6245_p10 = scmp.ne.s32.totalorder %s6688_s18, %s6244_s0  ;;  %p6253_p0 = scmp.lt.s32.totalorder %s6244_s0, %s6244_s0 }
  0x4e   : > { %p6247_p11 = pnand %p6245_p10, %p6698_p7  ;;  %p6254_p2 = por %p6253_p0, %p6252_p13 }
  0x50   : > { %p6248_p12 = pneg %p6247_p11 }
  0x52   : > { %p6255_p4 = pnand %p6254_p2, %p6248_p12 }
  0x54   : > { %6258 = shalt.err (!%p6255_p4)
}
  0x55   : > { %5710 = dma.hbm_to_vmem [thread:$0]  (!%p6684_p5), %s9492_s8, 32, %s6688_s18, [#allocation10]  }
  0x56   : > { %s44_s11 = sadd.s32 1, %s6525_s25  ;;  %s321_s24 = sadd.s32 1, %s6517_s23 }
  0x57   : > { %p45_p1 = scmp.ge.s32.totalorder %s44_s11, 2  ;;  %p328_p3 = scmp.ne.s32.totalorder %s6517_s23, %s6513_s22 }
  0x58   : > { %p329_p6 = scmp.eq.s32.totalorder %s6529_s26, 0  ;;  %p334_p8 = scmp.ne.s32.totalorder %s6513_s22, %s6509_s21 }
  0x59   : > { %s9757_s11 = smov (%p45_p1, %s44_s11), 0  ;;  %p9495_p10 = scmp.ne.s32.totalorder %s9486_s28, 0 }
  0x5a   : > { %9493 = sst [smem:[#allocation28_spill]] %s9757_s11  ;;  %p6749_p9 = por %p329_p6, %p328_p3 }
  0x5b   : > { %p6755_p11 = por %p9495_p10, %p334_p8  ;;  %s318_s18 = ssub.s32 %s6525_s25, %s9757_s11 }
  0x5c   : > { %p5732_p12 = scmp.lt.s32.totalorder %s6529_s26, 2  ;;  %p319_p13 = scmp.eq.s32.totalorder %s318_s18, 0 }
  0x5d   : > { %s9496_s16 = scalar_select %p6755_p11, 1, 0 }
  0x5e   : > { %s9372_s20 = sand.u32 1, %s6529_s26   ;;  %s6764_s17 = sand.u32 1, %s6517_s23  }
  0x5f   : > { %9497 = sst [smem:[#allocation29_spill]] %s9496_s16  ;;  %s5345_s27 = sshll.u32 %s6764_s17, 7 }
  0x60   : > { %s6767_s21 = scalar_select %p319_p13, %s6517_s23, %s321_s24  }
  0x61   : > { %s5479_s0 = sshll.u32 %s6525_s25, 11  ;;  %s9499_s12 = sld [smem:[#allocation134_spill]] }
  0x62   : > { %9498 = sst [smem:[#allocation30_spill]] %s6767_s21  ;;  %s566_s10 = scalar_lea.vmem [#allocation12], %s5345_s27 }
  0x63   : > { %s573_s5 = sshll.u32 %s566_s10, 4  ;;  %p6778_p0 = pnand %p5732_p12, %p6749_p9  ;;  %s6782_s5 = int_to_ptr.vmem [resolvable:$true] %s573_s5 }
  0x64   : > { %s6786_s24 = scalar_lea.sflag [#allocation13], %s9372_s20 }
  0x65   : > { %s9500_s18 = scalar_select %p6778_p0, 1, 0 }
  0x66   : > { %p6792_p4 = pneg %p6778_p0 }
  0x67   : > { %s6774_s3 = scalar_lea.hbm %s9499_s12, %s5479_s0  ;;  %s6264_s27 = scalar_lea.hbm %s9499_s12, 4096 }
  0x68   : > { %s6259_s1 = scalar_lea.hbm %s6774_s3, 2048  ;;  %p6265_p6 = scmp.lt.u32.totalorder %s6774_s3, %s9499_s12 }
  0x69   : > { %p6260_p2 = scmp.ne.s32.totalorder %s6774_s3, %s6259_s1  ;;  %p6266_p8 = scmp.lt.u32.totalorder %s6264_s27, %s6259_s1 }
  0x6a   : > { %s9501_s0 = scalar_select %p6792_p4, 1, 0 }
  0x6b   : > { %p6262_p1 = pnand %p6792_p4, %p6260_p2  ;;  %p6267_p9 = por %p6266_p8, %p6265_p6 }
  0x6c   : > { %p6268_p10 = scmp.lt.u32.totalorder %s6259_s1, %s6774_s3 }
  0x6d   : > { %p6263_p3 = pneg %p6262_p1 }
  0x6e   : > { %p6269_p12 = por %p6268_p10, %p6267_p9 }
  0x70   : > { %p6270_p13 = pnand %p6269_p12, %p6263_p3 }
  0x72   : > { %6273 = shalt.err (!%p6270_p13)
}
  0x73   : > { %s6274_s20 = scalar_lea.vmem %s6782_s5, 2048  ;;  %s6535_s10 = smov [#allocation12]  }
  0x74   : > { %p6275_p2 = scmp.ne.s32.totalorder %s6782_s5, %s6274_s20  ;;  %s6279_s2 = sshll.u32 %s6535_s10, 4  ;;  %s6280_s2 = int_to_ptr.vmem [resolvable:$false] %s6279_s2 }
  0x75   : > { %s6281_s8 = scalar_lea.vmem %s6280_s2, 4096  ;;  %p6282_p5 = scmp.lt.s32.totalorder %s6782_s5, %s6280_s2 }
  0x76   : > { %p6277_p1 = pnand %p6275_p2, %p6792_p4  ;;  %p6283_p7 = scmp.lt.s32.totalorder %s6281_s8, %s6274_s20 }
  0x78   : > { %p6278_p11 = pneg %p6277_p1  ;;  %p6284_p6 = por %p6283_p7, %p6282_p5 }
  0x7a   : > { %p6285_p8 = pnand %p6284_p6, %p6278_p11 }
  0x7c   : > { %6288 = shalt.err (!%p6285_p8)
}
  0x7d   : > { %s9382_s1 = smov 256   ;;  %s9383_s27 = smov 16  }
  0x7e   : > { %5717 = dma.hbm_to_vmem [thread:$0]  (!%p6778_p0), %s6774_s3, 2048, %s6782_s5, %s6786_s24, %s9382_s1, %s9382_s1, %s9383_s27  }
  0x7f   : > { %s5348_s6 = sshll.u32 %s6764_s17, 8  ;;  %s5480_s20 = sshll.u32 %s6525_s25, 12 }
  0x80   : > { %s6824_s8 = scalar_lea.hbm %s9353_s13, %s5480_s20  ;;  %s587_s12 = scalar_lea.vmem [#allocation14], %s5348_s6 }
  0x81   : > { %s594_s11 = sshll.u32 %s587_s12, 4  ;;  %s9502_s14 = sld [smem:[#allocation135_spill]]  ;;  %s6826_s11 = int_to_ptr.vmem [resolvable:$true] %s594_s11 }
  0x82   : > { %s608_s5 = scalar_lea.vmem [#allocation15], %s5348_s6  ;;  %s9503_s10 = sand.u32 1, %s6529_s26  }
  0x83   : > { %s615_s3 = sshll.u32 %s608_s5, 4  ;;  %s6837_s2 = scalar_lea.sflag [#allocation16], %s9503_s10  ;;  %s6833_s3 = int_to_ptr.vmem [resolvable:$true] %s615_s3 }
  0x87   : > { %s6831_s16 = scalar_lea.hbm %s9502_s14, %s5480_s20  ;;  %s6294_s21 = scalar_lea.hbm %s9502_s14, 8192 }
  0x88   : > { %s6289_s1 = scalar_lea.hbm %s6831_s16, 4096  ;;  %p6295_p3 = scmp.lt.u32.totalorder %s6831_s16, %s9502_s14 }
  0x89   : > { %p6290_p5 = scmp.ne.s32.totalorder %s6831_s16, %s6289_s1  ;;  %p6296_p9 = scmp.lt.u32.totalorder %s6294_s21, %s6289_s1 }
  0x8a   : > { %p6298_p12 = scmp.lt.u32.totalorder %s6289_s1, %s6831_s16 }
  0x8b   : > { %p6292_p7 = pnand %p6290_p5, %p6792_p4  ;;  %p6297_p10 = por %p6296_p9, %p6295_p3 }
  0x8d   : > { %p6293_p11 = pneg %p6292_p7  ;;  %p6299_p13 = por %p6298_p12, %p6297_p10 }
  0x8f   : > { %p6300_p2 = pnand %p6299_p13, %p6293_p11 }
  0x91   : > { %6303 = shalt.err (!%p6300_p2)
}
  0x92   : > { %s6304_s6 = scalar_lea.vmem %s6833_s3, 4096  ;;  %s6538_s5 = smov [#allocation15]  }
  0x93   : > { %p6305_p1 = scmp.ne.s32.totalorder %s6833_s3, %s6304_s6  ;;  %s6309_s10 = sshll.u32 %s6538_s5, 4  ;;  %s6310_s10 = int_to_ptr.vmem [resolvable:$false] %s6309_s10 }
  0x94   : > { %s6311_s27 = scalar_lea.vmem %s6310_s10, 8192  ;;  %p6312_p5 = scmp.lt.s32.totalorder %s6833_s3, %s6310_s10 }
  0x95   : > { %p6307_p6 = pnand %p6305_p1, %p6792_p4  ;;  %p6313_p7 = scmp.lt.s32.totalorder %s6311_s27, %s6304_s6 }
  0x97   : > { %p6308_p8 = pneg %p6307_p6  ;;  %p6314_p3 = por %p6313_p7, %p6312_p5 }
  0x99   : > { %p6315_p9 = pnand %p6314_p3, %p6308_p8 }
  0x9b   : > { %6318 = shalt.err (!%p6315_p9)
}
  0x9c   : > { %s9504_s1 = smov 16   ;;  %s9505_s12 = smov 256  }
  0x9d   : > { %5723 = dma.hbm_to_vmem [thread:$0]  (!%p6778_p0), %s6831_s16, 4096, %s6833_s3, %s6837_s2, %s9505_s12, %s9505_s12, %s9504_s1  }
  0x9e   : > { %s6539_s23 = smov [#allocation4]   ;;  %s6540_s20 = smov [#allocation8]  }
  0x9f   : > { %s484_s21 = sshll.u32 %s6539_s23, 4  ;;  %s513_s5 = sshll.u32 %s6540_s20, 4  ;;  %s485_s21 = int_to_ptr.vmem [resolvable:$true] %s484_s21  ;;  %s514_s5 = int_to_ptr.vmem [resolvable:$true] %s513_s5 }
  0xa0   : > { %s6319_s27 = scalar_lea.hbm %s9344_s4, 4096  ;;  %p9506_p10 = scmp.ne.s32.totalorder %s9491_s30, 0 }
  0xa1   : > { %p6320_p11 = scmp.ne.s32.totalorder %s9344_s4, %s6319_s27  ;;  %p6326_p2 = scmp.lt.u32.totalorder %s6319_s27, %s9344_s4 }
  0xa3   : > { %p6322_p12 = pnand %p6320_p11, %p9506_p10 }
  0xa5   : > { %p6323_p13 = pneg %p6322_p12 }
  0xa7   : > { %p6328_p1 = pnand %p6326_p2, %p6323_p13 }
  0xa9   : > { %6331 = shalt.err (!%p6328_p1)
}
  0xaa   : > { %s6332_s16 = scalar_lea.vmem %s485_s21, 4096  ;;  %p6340_p7 = scmp.lt.s32.totalorder %s485_s21, %s485_s21 }
  0xab   : > { %p6333_p6 = scmp.ne.s32.totalorder %s485_s21, %s6332_s16  ;;  %p6341_p3 = scmp.lt.s32.totalorder %s6332_s16, %s6332_s16 }
  0xad   : > { %p6335_p8 = pnand %p6333_p6, %p9506_p10  ;;  %p6342_p9 = por %p6341_p3, %p6340_p7 }
  0xaf   : > { %p6336_p5 = pneg %p6335_p8 }
  0xb1   : > { %p6343_p0 = pnand %p6342_p9, %p6336_p5 }
  0xb3   : > { %6346 = shalt.err (!%p6343_p0)
}
  0xb4   : > { %p9507_p11 = scmp.ne.s32.totalorder %s9489_s19, 0  ;;  %s9508_s14 = smov 8  }
  0xb5   : > { %s9509_s22 = smov 128   ;;  %s6347_s12 = scalar_lea.hbm %s9347_s7, 2048 }
  0xb6   : > { %5701 = dma.hbm_to_vmem [thread:$0]  (!%p9507_p11), %s9344_s4, 4096, %s485_s21, [#allocation5], %s9509_s22, %s9509_s22, %s9508_s14  }
  0xb7   : > { %p6348_p12 = scmp.ne.s32.totalorder %s9347_s7, %s6347_s12  ;;  %p6354_p2 = scmp.lt.u32.totalorder %s6347_s12, %s9347_s7 }
  0xb9   : > { %p6350_p0 = pnand %p6348_p12, %p9506_p10 }
  0xbb   : > { %p6351_p13 = pneg %p6350_p0 }
  0xbd   : > { %p6356_p1 = pnand %p6354_p2, %p6351_p13 }
  0xbf   : > { %6359 = shalt.err (!%p6356_p1)
}
  0xc0   : > { %s6360_s27 = scalar_lea.vmem %s514_s5, 2048  ;;  %p6368_p7 = scmp.lt.s32.totalorder %s514_s5, %s514_s5 }
  0xc1   : > { %p6361_p6 = scmp.ne.s32.totalorder %s514_s5, %s6360_s27  ;;  %p6369_p3 = scmp.lt.s32.totalorder %s6360_s27, %s6360_s27 }
  0xc3   : > { %p6363_p8 = pnand %p6361_p6, %p9506_p10  ;;  %p6370_p9 = por %p6369_p3, %p6368_p7 }
  0xc5   : > { %p6364_p5 = pneg %p6363_p8 }
  0xc7   : > { %p6371_p4 = pnand %p6370_p9, %p6364_p5 }
  0xc9   : > { %6374 = shalt.err (!%p6371_p4)
}
  0xca   : > { %5707 = dma.hbm_to_vmem [thread:$0]  (!%p9507_p11), %s9347_s7, 2048, %s514_s5, [#allocation7], %s9509_s22, %s9509_s22, %s9508_s14  }
  0xcb   : > { %s6541_s26 = smov [#allocation11]   ;;  %s6375_s12 = scalar_lea.hbm %s9349_s9, 2048 }
  0xcc   : > { %s537_s28 = sshll.u32 %s6541_s26, 4  ;;  %p6376_p4 = scmp.ne.s32.totalorder %s9349_s9, %s6375_s12  ;;  %s538_s28 = int_to_ptr.vmem [resolvable:$true] %s537_s28 }
  0xcd   : > { %p6382_p13 = scmp.lt.u32.totalorder %s6375_s12, %s9349_s9 }
  0xce   : > { %p6378_p12 = pnand %p6376_p4, %p9506_p10 }
  0xd0   : > { %p6379_p0 = pneg %p6378_p12 }
  0xd2   : > { %p6384_p2 = pnand %p6382_p13, %p6379_p0 }
  0xd4   : > { %6387 = shalt.err (!%p6384_p2)
}
  0xd5   : > { %s6388_s5 = scalar_lea.vmem %s538_s28, 2048  ;;  %p6396_p5 = scmp.lt.s32.totalorder %s538_s28, %s538_s28 }
  0xd6   : > { %p6389_p1 = scmp.ne.s32.totalorder %s538_s28, %s6388_s5  ;;  %p6397_p7 = scmp.lt.s32.totalorder %s6388_s5, %s6388_s5 }
  0xd8   : > { %p6391_p6 = pnand %p6389_p1, %p9506_p10  ;;  %p6398_p3 = por %p6397_p7, %p6396_p5 }
  0xda   : > { %p6392_p8 = pneg %p6391_p6 }
  0xdc   : > { %p6399_p9 = pnand %p6398_p3, %p6392_p8 }
  0xde   : > { %6402 = shalt.err (!%p6399_p9)
}
  0xdf   : > { %s6542_s14 = smov 64   ;;  %s6543_s22 = smov 4  }
  0xe0   : > { %5713 = dma.hbm_to_vmem [thread:$0]  (!%p9507_p11), %s9349_s9, 2048, %s538_s28, [#allocation10], %s6542_s14, %s6542_s14, %s6543_s22  }
  0xe1   : > { %s6403_s30 = scalar_lea.hbm %s6824_s8, 4096  ;;  %p9510_p4 = scmp.ne.s32.totalorder %s9501_s0, 0 }
  0xe2   : > { %p6404_p10 = scmp.ne.s32.totalorder %s6824_s8, %s6403_s30  ;;  %s6408_s3 = scalar_lea.hbm %s9353_s13, 8192 }
  0xe3   : > { %p6409_p13 = scmp.lt.u32.totalorder %s6824_s8, %s9353_s13  ;;  %p6410_p2 = scmp.lt.u32.totalorder %s6408_s3, %s6403_s30 }
  0xe4   : > { %p6406_p12 = pnand %p6404_p10, %p9510_p4  ;;  %p6412_p6 = scmp.lt.u32.totalorder %s6403_s30, %s6824_s8 }
  0xe5   : > { %p6411_p1 = por %p6410_p2, %p6409_p13 }
  0xe6   : > { %p6407_p0 = pneg %p6406_p12 }
  0xe7   : > { %p6413_p8 = por %p6412_p6, %p6411_p1 }
  0xe9   : > { %p6414_p5 = pnand %p6413_p8, %p6407_p0 }
  0xeb   : > { %6417 = shalt.err (!%p6414_p5)
}
  0xec   : > { %s6418_s19 = scalar_lea.vmem %s6826_s11, 4096  ;;  %s6544_s28 = smov [#allocation14]  }
  0xed   : > { %p6419_p11 = scmp.ne.s32.totalorder %s6826_s11, %s6418_s19  ;;  %s6423_s23 = sshll.u32 %s6544_s28, 4  ;;  %s6424_s23 = int_to_ptr.vmem [resolvable:$false] %s6423_s23 }
  0xee   : > { %s6425_s20 = scalar_lea.vmem %s6424_s23, 8192  ;;  %p6426_p9 = scmp.lt.s32.totalorder %s6826_s11, %s6424_s23 }
  0xef   : > { %p6421_p7 = pnand %p6419_p11, %p9510_p4  ;;  %p6427_p10 = scmp.lt.s32.totalorder %s6425_s20, %s6418_s19 }
  0xf1   : > { %p6422_p3 = pneg %p6421_p7  ;;  %p6428_p12 = por %p6427_p10, %p6426_p9 }
  0xf3   : > { %p6429_p13 = pnand %p6428_p12, %p6422_p3 }
  0xf5   : > { %6432 = shalt.err (!%p6429_p13)
}
  0xf6   : > { %s6545_s10 = smov 512   ;;  %s6546_s6 = smov 32  }
  0xf7   : > { %p9511_p0 = scmp.ne.s32.totalorder %s9500_s18, 0  ;;  %s5666_s5 = smul.u32 96, %s6764_s17 }
  0xf8   : > { %s5667_s14 = smul.u32 1536, %s6525_s25 }
  0xf9   : > { %5720 = dma.hbm_to_vmem [thread:$0]  (!%p9511_p0), %s6824_s8, 4096, %s6826_s11, %s6786_s24, %s6545_s10, %s6545_s10, %s6546_s6  }
  0xfa   : > { %s6951_s21 = scalar_lea.hbm %s9355_s15, %s5667_s14  ;;  %s629_s30 = scalar_lea.vmem [#allocation17], %s5666_s5 }
  0xfb   : > { %s636_s16 = sshll.u32 %s629_s30, 4  ;;  %s6433_s26 = scalar_lea.hbm %s6951_s21, 1536  ;;  %s6953_s16 = int_to_ptr.vmem [resolvable:$true] %s636_s16 }
  0xfc   : > { %p6434_p2 = scmp.ne.s32.totalorder %s6951_s21, %s6433_s26  ;;  %s6438_s24 = scalar_lea.hbm %s9355_s15, 3072 }
  0xfd   : > { %p6439_p8 = scmp.lt.u32.totalorder %s6951_s21, %s9355_s15  ;;  %p6440_p5 = scmp.lt.u32.totalorder %s6438_s24, %s6433_s26 }
  0xfe   : > { %p6436_p1 = pnand %p6434_p2, %p9510_p4  ;;  %p6442_p7 = scmp.lt.u32.totalorder %s6433_s26, %s6951_s21 }
  0xff   : > { %p6441_p11 = por %p6440_p5, %p6439_p8 }
 0x100   : > { %p6437_p6 = pneg %p6436_p1 }
 0x101   : > { %p6443_p3 = por %p6442_p7, %p6441_p11 }
 0x103   : > { %p6444_p9 = pnand %p6443_p3, %p6437_p6 }
 0x105   : > { %6447 = shalt.err (!%p6444_p9)
}
 0x106   : > { %s6448_s1 = scalar_lea.vmem %s6953_s16, 1536  ;;  %s6547_s12 = smov [#allocation17]  }
 0x107   : > { %p6449_p10 = scmp.ne.s32.totalorder %s6953_s16, %s6448_s1  ;;  %s6453_s19 = sshll.u32 %s6547_s12, 4  ;;  %s6454_s19 = int_to_ptr.vmem [resolvable:$false] %s6453_s19 }
 0x108   : > { %s6455_s28 = scalar_lea.vmem %s6454_s19, 3072  ;;  %p6456_p2 = scmp.lt.s32.totalorder %s6953_s16, %s6454_s19 }
 0x109   : > { %p6451_p12 = pnand %p6449_p10, %p9510_p4  ;;  %p6457_p1 = scmp.lt.s32.totalorder %s6455_s28, %s6448_s1 }
 0x10b   : > { %p6452_p13 = pneg %p6451_p12  ;;  %p6458_p8 = por %p6457_p1, %p6456_p2 }
 0x10d   : > { %p6459_p5 = pnand %p6458_p8, %p6452_p13 }
 0x10f   : > { %6462 = shalt.err (!%p6459_p5)
}
 0x110   : > { %s6548_s23 = smov 768   ;;  %s6549_s20 = smov 48  }
 0x111   : > { %5726 = dma.hbm_to_vmem [thread:$0]  (!%p9511_p0), %s6951_s21, 1536, %s6953_s16, %s6837_s2, %s6548_s23, %s6548_s23, %s6549_s20  }
 0x112   : > { %p9512_p4 = scmp.ne.s32.totalorder %s9488_s29, 0 }
 0x114   : > { %648 = sbr.rel (%p9512_p4) target bundleno = 4342 (0x10f6), region = 84 }
 0x11b   : > { %s9513_s0 = sld [smem:[#allocation27_spill]] }
 0x121   : > { %p9514_p6 = scmp.ne.s32.totalorder %s9513_s0, 0 }
 0x123   : > { %6488 = dma.done.wait (%p9514_p6), [#allocation5], 4096  }
 0x124   : > { %6490 = vsyncadd (%p9514_p6), [#allocation5], 4294963200 }
 0x125   : > { %6492 = dma.done.wait (%p9514_p6), [#allocation7], 6144  }
 0x126   : > { %6494 = vsyncadd (%p9514_p6), [#allocation7], 4294961152 }
 0x127   : > { %6496 = dma.done.wait (%p9514_p6), [#allocation10], 2080  }
 0x128   : > { %6498 = vsyncadd (%p9514_p6), [#allocation10], 4294965216  ;;  %s9515_s29 = sld [smem:[#allocation26_spill]]  ;;  %s9517_s2 = sld [smem:[#allocation23_spill]] }
 0x129   : > { %s9518_s10 = sld [smem:[#allocation29_spill]] }
 0x12e   : > { %s9516_s18 = sadd.s32 4294967295, %s9515_s29   ;;  %s672_s5 = sand.u32 1, %s9517_s2  }
 0x12f   : > { %s670_s6 = sand.u32 1, %s9516_s18   ;;  %s5361_s14 = sshll.u32 %s672_s5, 7 }
 0x130   : > { %s671_s22 = scalar_lea.sflag [#allocation13], %s670_s6  ;;  %s6994_s27 = scalar_lea.vmem [#allocation12], %s5361_s14 }
 0x131   : > { %p9519_p0 = scmp.ne.s32.totalorder %s9518_s10, 0 }
 0x133   : > { %6500 = dma.done.wait (%p9519_p0), %s671_s22, 6144  }
 0x134   : > { %6502 = vsyncadd (%p9519_p0), %s671_s22, 4294961152  ;;  %s5362_s21 = sshll.u32 %s672_s5, 8  ;;  %s689_s16 = scalar_lea.sflag [#allocation16], %s670_s6 }
 0x135   : > { %s7000_s30 = scalar_lea.vmem [#allocation14], %s5362_s21  ;;  %s7002_s26 = scalar_lea.vmem [#allocation15], %s5362_s21 }
 0x136   : > { %6504 = dma.done.wait (%p9519_p0), %s689_s16, 5632  }
 0x137   : > { %6506 = vsyncadd (%p9519_p0), %s689_s16, 4294961664  ;;  %s9520_s11 = sld [smem:[#allocation25_spill]]  ;;  %s5668_s17 = smul.u32 96, %s672_s5 }
 0x138   : > { %s9521_s12 = sld [smem:[#allocation133_spill]] }
 0x139   : > { %s7015_s28 = scalar_lea.vmem [#allocation17], %s5668_s17 }
 0x13d   : > { %p791_p11 = scmp.lt.s32.totalorder %s9520_s11, 1  ;;  %p5365_p7 = scmp.ne.s32.totalorder %s9520_s11, 0 }
 0x13e   : > { %v5803_v0 = vld [vmem:[#allocation4 + $0x4] ss:$8 sps:$4 sm:$0xff] (!%p5365_p7)   ;;  %v5805_v1 = vld [vmem:[#allocation4] ss:$8 sps:$4 sm:$0xff] (!%p5365_p7)   ;;  %v5806_v2 = vld [vmem:[#allocation4 + $0x14] ss:$8 sps:$4 sm:$0xff] (!%p5365_p7)  }
 0x13f   : > { %s792_s24 = scalar_select %p791_p11, %s9520_s11, 1 }
 0x140   : > { %806 = sbr.rel (%p5365_p7) target bundleno = 892 (0x37c), region = 124  ;;  %1015 = vmatprep.subr.bf16.mxu0 (!%p5365_p7), %v5803_v0  ;;  %v5808_v3 = vld [vmem:[#allocation4 + $0x10] ss:$8 sps:$4 sm:$0xff] (!%p5365_p7)   ;;  %v5809_v4 = vld [vmem:[#allocation4 + $0x24] ss:$8 sps:$4 sm:$0xff] (!%p5365_p7)   ;;  %s9522_s0 = sld [smem:[#allocation126_spill]] (!%p5365_p7) }
 0x141   : > { %s5669_s8 = smul.u32 384, %s792_s24  ;;  %1016 = vmatpush1.bf16.msra.mxu0 (!%p5365_p7), %v5805_v1  ;;  %v5811_v5 = vld [vmem:[#allocation4 + $0x20] ss:$8 sps:$4 sm:$0xff] (!%p5365_p7)   ;;  %v5812_v6 = vld [vmem:[#allocation4 + $0x34] ss:$8 sps:$4 sm:$0xff] (!%p5365_p7)   ;;  %s9523_s6 = sld [smem:[#allocation125_spill]] (!%p5365_p7) }
 0x142   : > { %1017 = vmatprep.subr.bf16.mxu0 (!%p5365_p7), %v5806_v2  ;;  %v5814_v7 = vld [vmem:[#allocation4 + $0x30] ss:$8 sps:$4 sm:$0xff] (!%p5365_p7)   ;;  %v5815_v8 = vld [vmem:[#allocation4 + $0x44] ss:$8 sps:$4 sm:$0xff] (!%p5365_p7)   ;;  %v5817_v9 = vld [vmem:[#allocation4 + $0x40] ss:$8 sps:$4 sm:$0xff] (!%p5365_p7)  }
 0x143   : > { %s7013_s19 = scalar_lea.vmem %s9521_s12, %s5669_s8  ;;  %v5818_v10 = vld [vmem:[#allocation4 + $0x54] ss:$8 sps:$4 sm:$0xff] (!%p5365_p7)   ;;  %v5820_v11 = vld [vmem:[#allocation4 + $0x50] ss:$8 sps:$4 sm:$0xff] (!%p5365_p7)   ;;  %v5821_v12 = vld [vmem:[#allocation4 + $0x64] ss:$8 sps:$4 sm:$0xff] (!%p5365_p7)  }
 0x144   : > { %v5823_v13 = vld [vmem:[#allocation4 + $0x60] ss:$8 sps:$4 sm:$0xff] (!%p5365_p7)   ;;  %v5851_v16 = vld [vmem:[#allocation6 + $0x4] ss:$8 sps:$4 sm:$0xff] (!%p5365_p7)   ;;  %v5824_v18 = vld [vmem:[#allocation4 + $0x74] ss:$8 sps:$4 sm:$0xff] (!%p5365_p7)  }
 0x145   : > { %1018 = vmatpush1.bf16.msra.mxu0 (!%p5365_p7), %v5808_v3  ;;  %v5853_v17 = vld [vmem:[#allocation6] ss:$8 sps:$4 sm:$0xff] (!%p5365_p7)   ;;  %v5854_v19 = vld [vmem:[#allocation6 + $0x14] ss:$8 sps:$4 sm:$0xff] (!%p5365_p7)   ;;  %v5826_v20 = vld [vmem:[#allocation4 + $0x70] ss:$8 sps:$4 sm:$0xff] (!%p5365_p7)   ;;  %1277 = vmatprep.subr.bf16.mxu1 (!%p5365_p7), %v5851_v16 }
 0x146   : > { %1019 = vmatprep.subr.bf16.mxu0 (!%p5365_p7), %v5809_v4  ;;  %v808_v14 = vld [vmem:[%s9522_s0 + $0x8] sm:$0xff] (!%p5365_p7)  ;;  %1278 = vmatpush1.bf16.msra.mxu1 (!%p5365_p7), %v5853_v17  ;;  %v5856_v21 = vld [vmem:[#allocation6 + $0x10] ss:$8 sps:$4 sm:$0xff] (!%p5365_p7)   ;;  %v5860_v26 = vld [vmem:[#allocation6 + $0x34] ss:$8 sps:$4 sm:$0xff] (!%p5365_p7)   ;;  %s9524_s8 = sld [smem:[#allocation130_spill]] (!%p5365_p7) }
 0x147   : > { %v843_v15 = vpack.c.bf16 %v808_v14, %v808_v14  ;;  %1279 = vmatprep.subr.bf16.mxu1 %v5854_v19  ;;  %v5857_v22 = vld [vmem:[#allocation6 + $0x24] ss:$8 sps:$4 sm:$0xff]   ;;  %v5829_v24 = vld [vmem:[#allocation4 + $0x80] ss:$8 sps:$4 sm:$0xff]   ;;  %v5830_v27 = vld [vmem:[#allocation4 + $0x94] ss:$8 sps:$4 sm:$0xff]  }
 0x148   : > { %v5827_v23 = vld [vmem:[#allocation4 + $0x84] ss:$8 sps:$4 sm:$0xff]   ;;  %v5859_v25 = vld [vmem:[#allocation6 + $0x20] ss:$8 sps:$4 sm:$0xff]   ;;  %v5832_v28 = vld [vmem:[#allocation4 + $0x90] ss:$8 sps:$4 sm:$0xff]  }
 0x149   : > { %1020 = vmatpush1.bf16.msra.mxu0 %v5811_v5  ;;  %1047 = vmatprep.mubr.bf16.mxu0 %v843_v15  ;;  %v5862_v29 = vld [vmem:[#allocation6 + $0x30] ss:$8 sps:$4 sm:$0xff]   ;;  %v5863_v30 = vld [vmem:[#allocation6 + $0x44] ss:$8 sps:$4 sm:$0xff]   ;;  %v5865_v32 = vld [vmem:[#allocation6 + $0x40] ss:$8 sps:$4 sm:$0xff]  }
 0x14a   : > { %1021 = vmatprep.subr.bf16.mxu0 %v5812_v6  ;;  %1280 = vmatpush1.bf16.msra.mxu1 %v5856_v21  ;;  %v5833_v31 = vld [vmem:[#allocation4 + $0xa4] ss:$8 sps:$4 sm:$0xff]   ;;  %v5835_v33 = vld [vmem:[#allocation4 + $0xa0] ss:$8 sps:$4 sm:$0xff]   ;;  %v5866_v34 = vld [vmem:[#allocation6 + $0x54] ss:$8 sps:$4 sm:$0xff]  }
 0x14b   : > { %1281 = vmatprep.subr.bf16.mxu1 %v5857_v22  ;;  %v5836_v35 = vld [vmem:[#allocation4 + $0xb4] ss:$8 sps:$4 sm:$0xff]   ;;  %v5868_v36 = vld [vmem:[#allocation6 + $0x50] ss:$8 sps:$4 sm:$0xff]   ;;  %v5872_v38 = vld [vmem:[#allocation6 + $0x64] ss:$8 sps:$4 sm:$0xff]  }
 0x14c   : > { %v5838_v37 = vld [vmem:[#allocation4 + $0xb0] ss:$8 sps:$4 sm:$0xff]   ;;  %v5839_v39 = vld [vmem:[#allocation4 + $0xc4] ss:$8 sps:$4 sm:$0xff]   ;;  %v5874_v40 = vld [vmem:[#allocation6 + $0x60] ss:$8 sps:$4 sm:$0xff]  }
 0x14d   : > { %1022 = vmatpush1.bf16.msra.mxu0 %v5814_v7  ;;  %v5841_v41 = vld [vmem:[#allocation4 + $0xc0] ss:$8 sps:$4 sm:$0xff]   ;;  %v5878_v42 = vld [vmem:[#allocation6 + $0x74] ss:$8 sps:$4 sm:$0xff]   ;;  %v5880_v44 = vld [vmem:[#allocation6 + $0x70] ss:$8 sps:$4 sm:$0xff]  }
 0x14e   : > { %1023 = vmatprep.subr.bf16.mxu0 %v5815_v8  ;;  %1282 = vmatpush1.bf16.msra.mxu1 %v5859_v25  ;;  %v5842_v43 = vld [vmem:[#allocation4 + $0xd4] ss:$8 sps:$4 sm:$0xff]   ;;  %v5844_v45 = vld [vmem:[#allocation4 + $0xd0] ss:$8 sps:$4 sm:$0xff]   ;;  %v5845_v46 = vld [vmem:[#allocation4 + $0xe4] ss:$8 sps:$4 sm:$0xff]  }
 0x14f   : > { %1283 = vmatprep.subr.bf16.mxu1 %v5860_v26  ;;  %v5847_v47 = vld [vmem:[#allocation4 + $0xe0] ss:$8 sps:$4 sm:$0xff]   ;;  %v5848_v48 = vld [vmem:[#allocation4 + $0xf4] ss:$8 sps:$4 sm:$0xff]   ;;  %v5850_v49 = vld [vmem:[#allocation4 + $0xf0] ss:$8 sps:$4 sm:$0xff]  }
 0x150   : > { %v807_v50 = vld [vmem:[%s9522_s0] sm:$0xff]  ;;  %v7029_v54 = vld [vmem:[#allocation8 + $0x14] ss:$8 sps:$4 sm:$0xff]   ;;  %v7032_v55 = vld [vmem:[#allocation8 + $0x10] ss:$8 sps:$4 sm:$0xff]   ;;  %v6550_v19 = vmov 0  }
 0x151   : > { %1024 = vmatpush1.bf16.msra.mxu0 %v5817_v9  ;;  %v7024_v51 = vld [vmem:[#allocation8 + $0x4] ss:$8 sps:$4 sm:$0xff]   ;;  %v842_v52 = vpack.c.bf16 %v807_v50, %v807_v50  ;;  %v7026_v53 = vld [vmem:[#allocation8] ss:$8 sps:$4 sm:$0xff]   ;;  %v7042_v60 = vld [vmem:[#allocation8 + $0x34] ss:$8 sps:$4 sm:$0xff]  }
 0x152   : > { %1025 = vmatprep.subr.bf16.mxu0 %v5818_v10  ;;  %1284 = vmatpush1.bf16.msra.mxu1 %v5862_v29  ;;  %v7035_v56 = vld [vmem:[#allocation8 + $0x24] ss:$8 sps:$4 sm:$0xff]   ;;  %v7038_v57 = vld [vmem:[#allocation8 + $0x20] ss:$8 sps:$4 sm:$0xff]   ;;  %v7044_v61 = vld [vmem:[#allocation8 + $0x30] ss:$8 sps:$4 sm:$0xff]  }
 0x153   : > { %1285 = vmatprep.subr.bf16.mxu1 %v5863_v30  ;;  %v5884_v58 = vld [vmem:[#allocation6 + $0x84] ss:$8 sps:$4 sm:$0xff]   ;;  %v5886_v59 = vld [vmem:[#allocation6 + $0x80] ss:$8 sps:$4 sm:$0xff]   ;;  %v5890_v62 = vld [vmem:[#allocation6 + $0x94] ss:$8 sps:$4 sm:$0xff]  }
 0x154   : > { %v5892_v63 = vld [vmem:[#allocation6 + $0x90] ss:$8 sps:$4 sm:$0xff]   ;;  %v7048_v0 = vld [vmem:[#allocation8 + $0x44] ss:$8 sps:$4 sm:$0xff]   ;;  %v7050_v1 = vld [vmem:[#allocation8 + $0x40] ss:$8 sps:$4 sm:$0xff]  }
 0x155   : > { %1026 = vmatpush1.bf16.msra.mxu0 %v5820_v11  ;;  %v5896_v2 = vld [vmem:[#allocation6 + $0xa4] ss:$8 sps:$4 sm:$0xff]   ;;  %v5898_v3 = vld [vmem:[#allocation6 + $0xa0] ss:$8 sps:$4 sm:$0xff]   ;;  %v7054_v4 = vld [vmem:[#allocation8 + $0x54] ss:$8 sps:$4 sm:$0xff]  }
 0x156   : > { %1027 = vmatprep.subr.bf16.mxu0 %v5821_v12  ;;  %1286 = vmatpush1.bf16.msra.mxu1 %v5865_v32  ;;  %v7056_v5 = vld [vmem:[#allocation8 + $0x50] ss:$8 sps:$4 sm:$0xff]   ;;  %v5902_v6 = vld [vmem:[#allocation6 + $0xb4] ss:$8 sps:$4 sm:$0xff]   ;;  %v7060_v8 = vld [vmem:[#allocation8 + $0x64] ss:$8 sps:$4 sm:$0xff]  }
 0x157   : > { %1287 = vmatprep.subr.bf16.mxu1 %v5866_v34  ;;  %v5904_v7 = vld [vmem:[#allocation6 + $0xb0] ss:$8 sps:$4 sm:$0xff]   ;;  %v7062_v9 = vld [vmem:[#allocation8 + $0x60] ss:$8 sps:$4 sm:$0xff]   ;;  %v5908_v10 = vld [vmem:[#allocation6 + $0xc4] ss:$8 sps:$4 sm:$0xff]  }
 0x158   : > { %v5910_v11 = vld [vmem:[#allocation6 + $0xc0] ss:$8 sps:$4 sm:$0xff]   ;;  %v7066_v12 = vld [vmem:[#allocation8 + $0x74] ss:$8 sps:$4 sm:$0xff]   ;;  %v5916_v17 = vld [vmem:[#allocation6 + $0xd0] ss:$8 sps:$4 sm:$0xff]  }
 0x159   : > { %1028 = vmatpush1.bf16.msra.mxu0 %v5823_v13  ;;  %v7068_v13 = vld [vmem:[#allocation8 + $0x70] ss:$8 sps:$4 sm:$0xff]   ;;  %v5914_v14 = vld [vmem:[#allocation6 + $0xd4] ss:$8 sps:$4 sm:$0xff]   ;;  %v1318_v15 = vld [vmem:[%s9523_s6] sm:$0xff]  ;;  %s9525_s14 = sld [smem:[#allocation127_spill]] }
 0x15a   : > { %1029 = vmatprep.subr.bf16.mxu0 %v5824_v18  ;;  %1288 = vmatpush1.bf16.msra.mxu1 %v5868_v36  ;;  %v1319_v16 = vld [vmem:[%s9523_s6 + $0x8] sm:$0xff]  ;;  %v5920_v22 = vld [vmem:[#allocation6 + $0xf4] ss:$8 sps:$4 sm:$0xff]   ;;  %v5922_v25 = vld [vmem:[#allocation6 + $0xf0] ss:$8 sps:$4 sm:$0xff]  }
 0x15b   : > { %1289 = vmatprep.subr.bf16.mxu1 %v5872_v38  ;;  %v1343_v18 = vpack.c.bf16 %v1319_v16, %v1318_v15  ;;  %v5919_v21 = vld [vmem:[#allocation6 + $0xe0] ss:$8 sps:$4 sm:$0xff]  }
 0x15c   : > { %v841_v30 = vld [vmem:[%s9524_s8] ss:$2 sm:$0x3] }
 0x15d   : > { %1030 = vmatpush1.bf16.msra.mxu0 %v5826_v20  ;;  %v5917_v20 = vld [vmem:[#allocation6 + $0xe4] ss:$8 sps:$4 sm:$0xff]  }
 0x15e   : > { %1031 = vmatprep.subr.bf16.mxu0 %v5827_v23  ;;  %1290 = vmatpush1.bf16.msra.mxu1 %v5874_v40  ;;  %v1320_v23 = vld [vmem:[%s9523_s6 + $0x10] sm:$0xff] }
 0x15f   : > { %1291 = vmatprep.subr.bf16.mxu1 %v5878_v42 }
 0x161   : > { %1032 = vmatpush1.bf16.msra.mxu0 %v5829_v24  ;;  %v1321_v24 = vld [vmem:[%s9523_s6 + $0x18] sm:$0xff] }
 0x162   : > { %1033 = vmatprep.subr.bf16.mxu0 %v5830_v27  ;;  %1292 = vmatpush1.bf16.msra.mxu1 %v5880_v44  ;;  %v1344_v26 = vpack.c.bf16 %v1321_v24, %v1320_v23  ;;  %v845_v27 = vlaneseq  ;;  %v5400_v24 = vld [vmem:[%s9524_s8 + $0x1] ss:$2 sm:$0x3] }
 0x163   : > { %1293 = vmatprep.subr.bf16.mxu1 %v5884_v58 }
 0x165   : > { %1034 = vmatpush1.bf16.msra.mxu0 %v5832_v28  ;;  %v7087_v28 = vshrl.u32 %v845_v27, 7 }
 0x166   : > { %1035 = vmatprep.subr.bf16.mxu0 %v5833_v31  ;;  %1294 = vmatpush1.bf16.msra.mxu1 %v5886_v59 }
 0x167   : > { %1295 = vmatprep.subr.bf16.mxu1 %v5890_v62  ;;  %v7090_v29 = vsub.s32 0, %v7087_v28  ;;  %v7096_v31 = vsub.s32 1, %v7087_v28 }
 0x169   : > { %1036 = vmatpush1.bf16.msra.mxu0 %v5835_v33  ;;  %v848_v32 = vrot.slane %v841_v30, %v7090_v29  ;;  %v852_v33 = vrot.slane %v841_v30, %v7096_v31 }
 0x16a   : > { %1037 = vmatprep.subr.bf16.mxu0 %v5836_v35  ;;  %1296 = vmatpush1.bf16.msra.mxu1 %v5892_v63 }
 0x16b   : > { %1297 = vmatprep.subr.bf16.mxu1 %v5896_v2  ;;  %v6551_v2 = vmov 1966171168  }
 0x16d   : > { %1038 = vmatpush1.bf16.msra.mxu0 %v5838_v37 }
 0x16e   : > { %1039 = vmatprep.subr.bf16.mxu0 %v5839_v39  ;;  %1298 = vmatpush1.bf16.msra.mxu1 %v5898_v3  ;;  %v1518_v3 = vunpack.c.l.s4 %v6551_v2 }
 0x16f   : > { %1299 = vmatprep.subr.bf16.mxu1 %v5902_v6 }
 0x171   : > { %1040 = vmatpush1.bf16.msra.mxu0 %v5841_v41 }
 0x172   : > { %1041 = vmatprep.subr.bf16.mxu0 %v5842_v43  ;;  %1300 = vmatpush1.bf16.msra.mxu1 %v5904_v7 }
 0x173   : > { %1301 = vmatprep.subr.bf16.mxu1 %v5908_v10 }
 0x175   : > { %1042 = vmatpush1.bf16.msra.mxu0 %v5844_v45 }
 0x176   : > { %1043 = vmatprep.subr.bf16.mxu0 %v5845_v46  ;;  %1302 = vmatpush1.bf16.msra.mxu1 %v5910_v11  ;;  %v1342_v11 = vld [vmem:[#allocation9] sm:$0x3] }
 0x177   : > { %1303 = vmatprep.subr.bf16.mxu1 %v5914_v14  ;;  %v7139_v14 = vrot.slane %v1342_v11, %v7090_v29  ;;  %v7142_v15 = vrot.slane %v1342_v11, %v7096_v31 }
 0x179   : > { %1044 = vmatpush1.bf16.msra.mxu0 %v5847_v47 }
 0x17a   : > { %1045 = vmatprep.subr.bf16.mxu0 %v5848_v48  ;;  %1304 = vmatpush1.bf16.msra.mxu1 %v5916_v17 }
 0x17b   : > { %1305 = vmatprep.subr.bf16.mxu1 %v5917_v20 }
 0x17d   : > { %1046 = vmatpush1.bf16.msra.mxu0 %v5850_v49 }
 0x17e   : > { %1438 = vmatprep.subr.bf16.mxu0 %v7024_v51  ;;  %1306 = vmatpush1.bf16.msra.mxu1 %v5919_v21 }
 0x17f   : > { %1307 = vmatprep.subr.bf16.mxu1 %v5920_v22 }
 0x180   : > { %1048 = vmatmul.mubr.bf16.vlgmr.msra.gmra.mrb[0].mxu0 %v842_v52  ;;  %v1322_v52 = vld [vmem:[%s9523_s6 + $0x20] sm:$0xff] }
 0x181   : > { %1439 = vmatpush1.bf16.msra.mxu0 %v7026_v53  ;;  %1470 = vmatprep.mubr.bf16.mxu0 %v6550_v19 }
 0x182   : > { %1440 = vmatprep.subr.bf16.mxu0 %v7029_v54  ;;  %1308 = vmatpush1.bf16.msra.mxu1 %v5922_v25 }
 0x183   : > { %5618 = vmatprep.subr.bf16.mxu1 %v7024_v51 }
 0x185   : > { %1441 = vmatpush1.bf16.msra.mxu0 %v7032_v55 }
 0x186   : > { %1442 = vmatprep.subr.bf16.mxu0 %v7035_v56 }
 0x189   : > { %1443 = vmatpush1.bf16.msra.mxu0 %v7038_v57 }
 0x18a   : > { %1444 = vmatprep.subr.bf16.mxu0 %v7042_v60 }
 0x18d   : > { %1445 = vmatpush1.bf16.msra.mxu0 %v7044_v61 }
 0x18e   : > { %1446 = vmatprep.subr.bf16.mxu0 %v7048_v0 }
 0x191   : > { %1447 = vmatpush1.bf16.msra.mxu0 %v7050_v1 }
 0x192   : > { %1448 = vmatprep.subr.bf16.mxu0 %v7054_v4 }
 0x195   : > { %1449 = vmatpush1.bf16.msra.mxu0 %v7056_v5 }
 0x196   : > { %1450 = vmatprep.subr.bf16.mxu0 %v7060_v8 }
 0x199   : > { %1451 = vmatpush1.bf16.msra.mxu0 %v7062_v9 }
 0x19a   : > { %1452 = vmatprep.subr.bf16.mxu0 %v7066_v12 }
 0x19d   : > { %1453 = vmatpush1.bf16.msra.mxu0 %v7068_v13 }
 0x1a0   : > { %1471 = vmatmul.mubr.bf16.vlgmr.msra.gmra.mrb[4].mxu0 %v1343_v18 }
 0x1a1   : > { %1480 = vmatprep.mubr.bf16.mxu0 %v6550_v19 }
 0x1a8   : > { %1481 = vmatmul.mubr.bf16.gmra.mrb[8].mxu0 %v1344_v26 }
 0x253   : > { %v1049_v34 = vpop.f32.mrb[0].mxu0 }
 0x254   : > { %v1050_v35 = vadd.f32 %v1049_v34, %v848_v32  ;;  %v1051_v36 = vpop.f32.mrb[1].mxu0 }
 0x255   : > { %v1052_v37 = vadd.f32 %v1051_v36, %v852_v33  ;;  %v1053_v38 = vpop.f32.mrb[2].mxu0  ;;  %v1114_v36 = vrot.slane %v5400_v24, %v7096_v31 }
 0x256   : > { %v5398_v39 = vmul.f32 -1.442695, %v1050_v35  ;;  %v1054_v40 = vpop.f32.mrb[3].mxu0 }
 0x257   : > { %v5399_v41 = vmul.f32 -1.442695, %v1052_v37 }
 0x258   : > { %5926 = vpow2.f32 %v5398_v39 }
 0x259   : > { %5928 = vpow2.f32 %v5399_v41 }
 0x262   : > { %v5927_v42 = vpop.eup %5926 }
 0x263   : > { %v5929_v43 = vpop.eup %5928  ;;  %v1062_v44 = vadd.f32 1.0, %v5927_v42 }
 0x264   : > { %v1063_v45 = vadd.f32 1.0, %v5929_v43 }
 0x265   : > { %5930 = vrcp.f32 %v1062_v44 }
 0x266   : > { %5932 = vrcp.f32 %v1063_v45 }
 0x26f   : > { %v5931_v46 = vpop.eup %5930 }
 0x270   : > { %v5933_v47 = vpop.eup %5932  ;;  %v1068_v48 = vmul.f32 %v5931_v46, %v1050_v35  ;;  %v1110_v35 = vrot.slane %v5400_v24, %v7090_v29 }
 0x271   : > { %v1069_v49 = vmul.f32 %v5933_v47, %v1052_v37 }
 0x272   : > { %v1104_v51 = vpack.c.bf16 %v1068_v48, %v1068_v48 }
 0x273   : > { %v1105_v50 = vpack.c.bf16 %v1069_v49, %v1069_v49  ;;  %v1472_v58 = vpop.f32.mrb[4].mxu0 }
 0x274   : > { %v1474_v59 = vpop.f32.mrb[5].mxu0  ;;  %v1473_v25 = vadd.f32 %v1472_v58, %v7139_v14 }
 0x275   : > { %1309 = vmatprep.mubr.bf16.mxu1 %v1105_v50  ;;  %v1475_v30 = vadd.f32 %v1474_v59, %v7142_v15  ;;  %v5925_v59 = vld [vmem:[%s9525_s14 + $0x4] ss:$8 sps:$4 sm:$0xff]  }
 0x276   : > { %1310 = vmatmul.mubr.bf16.vlgmr.msra.gmra.mrb[0].mxu1 %v1104_v51 }
 0x277   : > { %5626 = vmatpush1.bf16.msra.mxu1 %v7026_v53  ;;  %1490 = vmatprep.mubr.bf16.mxu1 %v6550_v19  ;;  %v1323_v53 = vld [vmem:[%s9523_s6 + $0x28] sm:$0xff] }
 0x278   : > { %5619 = vmatprep.subr.bf16.mxu1 %v7029_v54  ;;  %v1345_v54 = vpack.c.bf16 %v1323_v53, %v1322_v52 }
 0x27b   : > { %5627 = vmatpush1.bf16.msra.mxu1 %v7032_v55  ;;  %v1324_v55 = vld [vmem:[%s9523_s6 + $0x30] sm:$0xff] }
 0x27c   : > { %5620 = vmatprep.subr.bf16.mxu1 %v7035_v56  ;;  %v1325_v56 = vld [vmem:[%s9523_s6 + $0x38] sm:$0xff] }
 0x27f   : > { %5628 = vmatpush1.bf16.msra.mxu1 %v7038_v57  ;;  %v1346_v57 = vpack.c.bf16 %v1325_v56, %v1324_v55 }
 0x280   : > { %5621 = vmatprep.subr.bf16.mxu1 %v7042_v60  ;;  %v1476_v60 = vpop.f32.mrb[6].mxu0 }
 0x281   : > { %v1477_v26 = vadd.f32 %v1476_v60, %v7139_v14 }
 0x283   : > { %5629 = vmatpush1.bf16.msra.mxu1 %v7044_v61  ;;  %v1478_v61 = vpop.f32.mrb[7].mxu0 }
 0x284   : > { %5622 = vmatprep.subr.bf16.mxu1 %v7048_v0  ;;  %v1482_v62 = vpop.f32.mrb[8].mxu0  ;;  %v1479_v32 = vadd.f32 %v1478_v61, %v7142_v15 }
 0x285   : > { %v1484_v63 = vpop.f32.mrb[9].mxu0  ;;  %v1483_v27 = vadd.f32 %v1482_v62, %v7139_v14 }
 0x286   : > { %v1486_v0 = vpop.f32.mrb[10].mxu0  ;;  %v1485_v33 = vadd.f32 %v1484_v63, %v7142_v15 }
 0x287   : > { %5630 = vmatpush1.bf16.msra.mxu1 %v7050_v1  ;;  %v1488_v1 = vpop.f32.mrb[11].mxu0 }
 0x288   : > { %5623 = vmatprep.subr.bf16.mxu1 %v7054_v4  ;;  %v1519_v4 = vunpack.c.0.s8 %v1518_v3  ;;  %v1489_v34 = vadd.f32 %v1488_v1, %v7142_v15 }
 0x28a   : > { %v7133_v6 = vsub.s32 %v1519_v4, %v7087_v28  ;;  %v1487_v28 = vadd.f32 %v1486_v0, %v7139_v14 }
 0x28b   : > { %5631 = vmatpush1.bf16.msra.mxu1 %v7056_v5  ;;  %v5923_v5 = vld [vmem:[%s9525_s14] ss:$8 sps:$4 sm:$0xff]  }
 0x28c   : > { %5624 = vmatprep.subr.bf16.mxu1 %v7060_v8  ;;  %v1523_v7 = vrot.slane %v5923_v5, %v7133_v6  ;;  %v1530_v60 = vrot.slane %v5925_v59, %v7133_v6 }
 0x28e   : > { %v1531_v8 = vcombine.high %v1523_v7, %v1523_v7  ;;  %v1532_v61 = vcombine.high %v1530_v60, %v1530_v60  ;;  %v1546_v62 = vrot.slane %v1530_v60, %v7133_v6 }
 0x28f   : > { %5632 = vmatpush1.bf16.msra.mxu1 %v7062_v9  ;;  %v1539_v9 = vrot.slane %v1523_v7, %v7133_v6 }
 0x290   : > { %5625 = vmatprep.subr.bf16.mxu1 %v7066_v12  ;;  %v1553_v10 = vrot.slane %v1531_v8, %v7133_v6  ;;  %v1560_v63 = vrot.slane %v1532_v61, %v7133_v6  ;;  %v1600_v0 = vrot.slane %v1546_v62, %v7090_v29  ;;  %v1604_v2 = vrot.slane %v1546_v62, %v7096_v31 }
 0x291   : > { %v1561_v12 = vcombine.high %v1539_v9, %v1539_v9  ;;  %v1568_v16 = vrot.slane %v1539_v9, %v7090_v29  ;;  %v1572_v17 = vrot.slane %v1539_v9, %v7096_v31  ;;  %v1562_v6 = vcombine.high %v1546_v62, %v1546_v62 }
 0x292   : > { %v1576_v18 = vrot.slane %v1553_v10, %v7090_v29  ;;  %v1608_v5 = vrot.slane %v1560_v63, %v7090_v29  ;;  %v1612_v9 = vrot.slane %v1560_v63, %v7096_v31 }
 0x293   : > { %5633 = vmatpush1.bf16.msra.mxu1 %v7068_v13  ;;  %v1563_v13 = vcombine.high %v1553_v10, %v1553_v10  ;;  %v1584_v20 = vrot.slane %v1561_v12, %v7090_v29  ;;  %v1588_v21 = vrot.slane %v1561_v12, %v7096_v31  ;;  %v1645_v37 = vadd.f32 %v1568_v16, %v1473_v25 }
 0x294   : > { %v1647_v38 = vadd.f32 %v1576_v18, %v1477_v26  ;;  %v1646_v41 = vadd.f32 %v1572_v17, %v1475_v30  ;;  %v1620_v26 = vrot.slane %v1562_v6, %v7096_v31 }
 0x295   : > { %v1592_v22 = vrot.slane %v1563_v13, %v7090_v29  ;;  %v1596_v23 = vrot.slane %v1563_v13, %v7096_v31  ;;  %v1649_v39 = vadd.f32 %v1584_v20, %v1483_v27  ;;  %v1650_v43 = vadd.f32 %v1588_v21, %v1485_v33 }
 0x296   : > { %1491 = vmatmul.mubr.bf16.vlgmr.msra.gmra.mrb[4].mxu1 %v1345_v54 }
 0x297   : > { %1500 = vmatprep.mubr.bf16.mxu1 %v6550_v19  ;;  %v1580_v19 = vrot.slane %v1553_v10, %v7096_v31  ;;  %v1651_v40 = vadd.f32 %v1592_v22, %v1487_v28  ;;  %v1652_v44 = vadd.f32 %v1596_v23, %v1489_v34  ;;  %v1616_v23 = vrot.slane %v1562_v6, %v7090_v29 }
 0x299   : > { %v1648_v42 = vadd.f32 %v1580_v19, %v1479_v32  ;;  %v1564_v19 = vcombine.high %v1560_v63, %v1560_v63 }
 0x29b   : > { %v1624_v30 = vrot.slane %v1564_v19, %v7090_v29  ;;  %v1628_v34 = vrot.slane %v1564_v19, %v7096_v31 }
 0x29e   : > { %1501 = vmatmul.mubr.bf16.gmra.mrb[8].mxu1 %v1346_v57 }
 0x349   : > { %v1311_v45 = vpop.f32.mrb[0].mxu1 }
 0x34a   : > { %v7165_v46 = vadd.f32 %v1311_v45, %v1110_v35  ;;  %v1313_v47 = vpop.f32.mrb[1].mxu1 }
 0x34b   : > { %v7167_v48 = vadd.f32 %v1313_v47, %v1114_v36  ;;  %v1315_v49 = vpop.f32.mrb[2].mxu1 }
 0x34c   : > { %v1661_v50 = vadd.f32 %v1645_v37, %v7165_v46  ;;  %v1663_v51 = vadd.f32 %v1647_v38, %v7165_v46  ;;  %v1665_v52 = vadd.f32 %v1649_v39, %v7165_v46  ;;  %v1667_v53 = vadd.f32 %v1651_v40, %v7165_v46  ;;  %v1316_v54 = vpop.f32.mrb[3].mxu1 }
 0x34d   : > { %v1662_v55 = vadd.f32 %v1646_v41, %v7167_v48  ;;  %v1664_v56 = vadd.f32 %v1648_v42, %v7167_v48  ;;  %v1666_v57 = vadd.f32 %v1650_v43, %v7167_v48  ;;  %v1668_v58 = vadd.f32 %v1652_v44, %v7167_v48 }
 0x34e   : > { %1677 = vst [vmem:[#allocation2] sm:$0xff] %v1661_v50  ;;  %1679 = vst [vmem:[#allocation2 + $0x10] sm:$0xff] %v1663_v51 }
 0x34f   : > { %1681 = vst [vmem:[#allocation2 + $0x20] sm:$0xff] %v1665_v52  ;;  %1683 = vst [vmem:[#allocation2 + $0x30] sm:$0xff] %v1667_v53 }
 0x350   : > { %1678 = vst [vmem:[#allocation2 + $0x8] sm:$0xff] %v1662_v55  ;;  %1680 = vst [vmem:[#allocation2 + $0x18] sm:$0xff] %v1664_v56 }
 0x351   : > { %1682 = vst [vmem:[#allocation2 + $0x28] sm:$0xff] %v1666_v57  ;;  %1684 = vst [vmem:[#allocation2 + $0x38] sm:$0xff] %v1668_v58 }
 0x369   : > { %v1492_v1 = vpop.f32.mrb[4].mxu1 }
 0x36a   : > { %v1493_v3 = vadd.f32 %v1492_v1, %v7139_v14  ;;  %v1494_v4 = vpop.f32.mrb[5].mxu1 }
 0x36b   : > { %v1495_v7 = vadd.f32 %v1494_v4, %v7142_v15  ;;  %v1496_v8 = vpop.f32.mrb[6].mxu1 }
 0x36c   : > { %v1653_v10 = vadd.f32 %v1600_v0, %v1493_v3  ;;  %v1497_v11 = vadd.f32 %v1496_v8, %v7139_v14  ;;  %v1498_v12 = vpop.f32.mrb[7].mxu1 }
 0x36d   : > { %v1654_v13 = vadd.f32 %v1604_v2, %v1495_v7  ;;  %v1499_v16 = vadd.f32 %v1498_v12, %v7142_v15 }
 0x36e   : > { %v1669_v17 = vadd.f32 %v1653_v10, %v7165_v46  ;;  %v1655_v18 = vadd.f32 %v1608_v5, %v1497_v11 }
 0x36f   : > { %v1670_v20 = vadd.f32 %v1654_v13, %v7167_v48  ;;  %v1656_v21 = vadd.f32 %v1612_v9, %v1499_v16 }
 0x370   : > { %1685 = vst [vmem:[#allocation2 + $0x40] sm:$0xff] %v1669_v17  ;;  %v1671_v22 = vadd.f32 %v1655_v18, %v7165_v46 }
 0x371   : > { %1686 = vst [vmem:[#allocation2 + $0x48] sm:$0xff] %v1670_v20  ;;  %v1672_v24 = vadd.f32 %v1656_v21, %v7167_v48  ;;  %v1502_v25 = vpop.f32.mrb[8].mxu1 }
 0x372   : > { %1687 = vst [vmem:[#allocation2 + $0x50] sm:$0xff] %v1671_v22  ;;  %v1503_v27 = vadd.f32 %v1502_v25, %v7139_v14  ;;  %v1504_v28 = vpop.f32.mrb[9].mxu1 }
 0x373   : > { %1688 = vst [vmem:[#allocation2 + $0x58] sm:$0xff] %v1672_v24  ;;  %v1505_v32 = vadd.f32 %v1504_v28, %v7142_v15  ;;  %v1506_v33 = vpop.f32.mrb[10].mxu1 }
 0x374   : > { %v1657_v35 = vadd.f32 %v1616_v23, %v1503_v27  ;;  %v1507_v36 = vadd.f32 %v1506_v33, %v7139_v14  ;;  %v1508_v37 = vpop.f32.mrb[11].mxu1 }
 0x375   : > { %v1658_v38 = vadd.f32 %v1620_v26, %v1505_v32  ;;  %v1509_v39 = vadd.f32 %v1508_v37, %v7142_v15 }
 0x376   : > { %v1673_v40 = vadd.f32 %v1657_v35, %v7165_v46  ;;  %v1659_v41 = vadd.f32 %v1624_v30, %v1507_v36 }
 0x377   : > { %v1674_v42 = vadd.f32 %v1658_v38, %v7167_v48  ;;  %v1660_v43 = vadd.f32 %v1628_v34, %v1509_v39 }
 0x378   : > { %1689 = vst [vmem:[#allocation2 + $0x60] sm:$0xff] %v1673_v40  ;;  %v1675_v29 = vadd.f32 %v1659_v41, %v7165_v46 }
 0x379   : > { %1690 = vst [vmem:[#allocation2 + $0x68] sm:$0xff] %v1674_v42  ;;  %v1676_v44 = vadd.f32 %v1660_v43, %v7167_v48 }
 0x37a   : > { %1691 = vst [vmem:[#allocation2 + $0x70] sm:$0xff] %v1675_v29 }
 0x37b   : > { %1692 = vst [vmem:[#allocation2 + $0x78] sm:$0xff] %v1676_v44 }
 0x37c PF: > { %v1730_v31 = vld [vmem:[%s7013_s19 + $0x8] sm:$0xff]  ;;  %v1732_v14 = vld [vmem:[%s7013_s19 + $0x18] sm:$0xff]  ;;  %v1729_v15 = vld [vmem:[%s7013_s19] sm:$0xff]  ;;  %s9527_s24 = sld [smem:[#allocation128_spill]]  ;;  %vm2349_vm0 = vcmask 523264  }
 0x37d   : > { %v1778_v45 = vunpack.c.l.s8.bf16 %v1730_v31  ;;  %v1784_v47 = vunpack.c.h.s8.bf16 %v1730_v31  ;;  %v1780_v49 = vunpack.c.l.s8.bf16 %v1732_v14  ;;  %v1786_v50 = vunpack.c.h.s8.bf16 %v1732_v14  ;;  %v1731_v46 = vld [vmem:[%s7013_s19 + $0x10] sm:$0xff]  ;;  %v1736_v52 = vld [vmem:[%s7013_s19 + $0x38] sm:$0xff]  ;;  %v1738_v53 = vld [vmem:[%s7013_s19 + $0x48] sm:$0xff] }
 0x37e   : > { %v1777_v48 = vunpack.c.l.s8.bf16 %v1729_v15  ;;  %v1779_v51 = vunpack.c.l.s8.bf16 %v1731_v46  ;;  %v1783_v54 = vunpack.c.h.s8.bf16 %v1729_v15  ;;  %v1785_v55 = vunpack.c.h.s8.bf16 %v1731_v46  ;;  %v1735_v58 = vld [vmem:[%s7013_s19 + $0x30] sm:$0xff]  ;;  %v1737_v59 = vld [vmem:[%s7013_s19 + $0x40] sm:$0xff]  ;;  %v1742_v0 = vld [vmem:[%s7013_s19 + $0x68] sm:$0xff] }
 0x37f   : > { %1873 = vmatprep.subr.bf16.mxu0 %v1778_v45  ;;  %1946 = vmatprep.subr.bf16.mxu1 %v1780_v49  ;;  %v1790_v56 = vunpack.c.l.s8.bf16 %v1736_v52  ;;  %v1792_v57 = vunpack.c.l.s8.bf16 %v1738_v53  ;;  %v1789_v60 = vunpack.c.l.s8.bf16 %v1735_v58  ;;  %v1791_v61 = vunpack.c.l.s8.bf16 %v1737_v59  ;;  %v1744_v1 = vld [vmem:[%s7013_s19 + $0x78] sm:$0xff]  ;;  %v1741_v7 = vld [vmem:[%s7013_s19 + $0x60] sm:$0xff]  ;;  %v1743_v8 = vld [vmem:[%s7013_s19 + $0x70] sm:$0xff] }
 0x380   : > { %1874 = vmatpush1.bf16.msra.mxu0 %v1777_v48  ;;  %1947 = vmatpush1.bf16.msra.mxu1 %v1779_v51  ;;  %v1796_v62 = vunpack.c.h.s8.bf16 %v1736_v52  ;;  %v1798_v63 = vunpack.c.h.s8.bf16 %v1738_v53  ;;  %v1795_v2 = vunpack.c.h.s8.bf16 %v1735_v58  ;;  %v1797_v3 = vunpack.c.h.s8.bf16 %v1737_v59  ;;  %v1706_v9 = vld [vmem:[#allocation2 + $0x8] sm:$0xff]  ;;  %v1708_v10 = vld [vmem:[#allocation2 + $0x18] sm:$0xff]  ;;  %v1747_v23 = vld [vmem:[%s7013_s19 + $0x90] sm:$0xff] }
 0x381   : > { %1875 = vmatprep.subr.bf16.mxu0 %v1784_v47  ;;  %1948 = vmatprep.subr.bf16.mxu1 %v1786_v50  ;;  %v1802_v4 = vunpack.c.l.s8.bf16 %v1742_v0  ;;  %v1804_v5 = vunpack.c.l.s8.bf16 %v1744_v1  ;;  %v1801_v11 = vunpack.c.l.s8.bf16 %v1741_v7  ;;  %v1803_v12 = vunpack.c.l.s8.bf16 %v1743_v8  ;;  %v1748_v17 = vld [vmem:[%s7013_s19 + $0x98] sm:$0xff]  ;;  %v1750_v18 = vld [vmem:[%s7013_s19 + $0xa8] sm:$0xff]  ;;  %v1749_v24 = vld [vmem:[%s7013_s19 + $0xa0] sm:$0xff] }
 0x382   : > { %v1808_v6 = vunpack.c.h.s8.bf16 %v1742_v0  ;;  %v1810_v13 = vunpack.c.h.s8.bf16 %v1744_v1  ;;  %v7219_v16 = vpack.c.bf16 %v1708_v10, %v1706_v9  ;;  %v1807_v19 = vunpack.c.h.s8.bf16 %v1741_v7  ;;  %v1754_v30 = vld [vmem:[%s7013_s19 + $0xc8] sm:$0xff]  ;;  %v1756_v32 = vld [vmem:[%s7013_s19 + $0xd8] sm:$0xff]  ;;  %v1753_v37 = vld [vmem:[%s7013_s19 + $0xc0] sm:$0xff]  ;;  %s9528_s3 = smov %s9527_s24 }
 0x383   : > { %v1809_v20 = vunpack.c.h.s8.bf16 %v1743_v8  ;;  %v1814_v21 = vunpack.c.l.s8.bf16 %v1748_v17  ;;  %v1816_v22 = vunpack.c.l.s8.bf16 %v1750_v18  ;;  %v1813_v25 = vunpack.c.l.s8.bf16 %v1747_v23  ;;  %v1755_v38 = vld [vmem:[%s7013_s19 + $0xd0] sm:$0xff]  ;;  %v1760_v43 = vld [vmem:[%s7013_s19 + $0xf8] sm:$0xff]  ;;  %v1762_v29 = vld [vmem:[%s7013_s19 + $0x108] sm:$0xff] }
 0x384   : > { %1876 = vmatpush1.bf16.msra.mxu0 %v1783_v54  ;;  %1949 = vmatpush1.bf16.msra.mxu1 %v1785_v55  ;;  %v1815_v26 = vunpack.c.l.s8.bf16 %v1749_v24  ;;  %v1820_v27 = vunpack.c.h.s8.bf16 %v1748_v17  ;;  %v1822_v28 = vunpack.c.h.s8.bf16 %v1750_v18  ;;  %v1819_v33 = vunpack.c.h.s8.bf16 %v1747_v23  ;;  %v1759_v45 = vld [vmem:[%s7013_s19 + $0xf0] sm:$0xff]  ;;  %v1761_v47 = vld [vmem:[%s7013_s19 + $0x100] sm:$0xff]  ;;  %v1766_v51 = vld [vmem:[%s7013_s19 + $0x128] sm:$0xff] }
 0x385   : > { %1877 = vmatprep.subr.bf16.mxu0 %v1790_v56  ;;  %1950 = vmatprep.subr.bf16.mxu1 %v1792_v57  ;;  %v1821_v34 = vunpack.c.h.s8.bf16 %v1749_v24  ;;  %v1826_v35 = vunpack.c.l.s8.bf16 %v1754_v30  ;;  %v1828_v36 = vunpack.c.l.s8.bf16 %v1756_v32  ;;  %v1825_v39 = vunpack.c.l.s8.bf16 %v1753_v37  ;;  %v1768_v52 = vld [vmem:[%s7013_s19 + $0x138] sm:$0xff]  ;;  %v1765_v57 = vld [vmem:[%s7013_s19 + $0x120] sm:$0xff]  ;;  %v1767_v58 = vld [vmem:[%s7013_s19 + $0x130] sm:$0xff] }
 0x386   : > { %1978 = vmatprep.mubr.bf16.mxu1 %v7219_v16  ;;  %1905 = vmatprep.mubr.bf16.mxu0 %v7219_v16  ;;  %v1827_v40 = vunpack.c.l.s8.bf16 %v1755_v38  ;;  %v1832_v41 = vunpack.c.h.s8.bf16 %v1754_v30  ;;  %v1834_v42 = vunpack.c.h.s8.bf16 %v1756_v32  ;;  %v1831_v44 = vunpack.c.h.s8.bf16 %v1753_v37  ;;  %v1774_v0 = vld [vmem:[%s7013_s19 + $0x168] sm:$0xff]  ;;  %v1773_v7 = vld [vmem:[%s7013_s19 + $0x160] sm:$0xff]  ;;  %v1707_v18 = vld [vmem:[#allocation2 + $0x10] sm:$0xff] }
 0x387   : > { %v1833_v31 = vunpack.c.h.s8.bf16 %v1755_v38  ;;  %v1838_v14 = vunpack.c.l.s8.bf16 %v1760_v43  ;;  %v1840_v15 = vunpack.c.l.s8.bf16 %v1762_v29  ;;  %v1837_v49 = vunpack.c.l.s8.bf16 %v1759_v45  ;;  %v1705_v17 = vld [vmem:[#allocation2] sm:$0xff]  ;;  %v1711_v32 = vld [vmem:[#allocation2 + $0x30] sm:$0xff] }
 0x388   : > { %1878 = vmatpush1.bf16.msra.mxu0 %v1789_v60  ;;  %1951 = vmatpush1.bf16.msra.mxu1 %v1791_v61  ;;  %v1839_v50 = vunpack.c.l.s8.bf16 %v1761_v47  ;;  %v1844_v46 = vunpack.c.h.s8.bf16 %v1760_v43  ;;  %v1846_v48 = vunpack.c.h.s8.bf16 %v1762_v29  ;;  %v1843_v53 = vunpack.c.h.s8.bf16 %v1759_v45  ;;  %v1709_v30 = vld [vmem:[#allocation2 + $0x20] sm:$0xff]  ;;  %v1715_v29 = vld [vmem:[#allocation2 + $0x50] sm:$0xff] }
 0x389   : > { %1879 = vmatprep.subr.bf16.mxu0 %v1796_v62  ;;  %1952 = vmatprep.subr.bf16.mxu1 %v1798_v63  ;;  %v1845_v54 = vunpack.c.h.s8.bf16 %v1761_v47  ;;  %v1850_v55 = vunpack.c.l.s8.bf16 %v1766_v51  ;;  %v1852_v56 = vunpack.c.l.s8.bf16 %v1768_v52  ;;  %v1849_v59 = vunpack.c.l.s8.bf16 %v1765_v57  ;;  %v1772_v63 = vld [vmem:[%s7013_s19 + $0x158] sm:$0xff]  ;;  %v1713_v43 = vld [vmem:[#allocation2 + $0x40] sm:$0xff] }
 0x38a   : > { %v1851_v60 = vunpack.c.l.s8.bf16 %v1767_v58  ;;  %v1856_v61 = vunpack.c.h.s8.bf16 %v1766_v51  ;;  %v1858_v62 = vunpack.c.h.s8.bf16 %v1768_v52  ;;  %v1855_v1 = vunpack.c.h.s8.bf16 %v1765_v57  ;;  %v1717_v51 = vld [vmem:[#allocation2 + $0x60] sm:$0xff]  ;;  %v1719_v52 = vld [vmem:[#allocation2 + $0x70] sm:$0xff] }
 0x38b   : > { %v1863_v9 = vunpack.c.l.s8.bf16 %v1773_v7  ;;  %v1868_v10 = vunpack.c.h.s8.bf16 %v1772_v63  ;;  %v7245_v23 = vpack.c.bf16 %v1707_v18, %v1705_v17  ;;  %v7255_v37 = vpack.c.bf16 %v1711_v32, %v1709_v30  ;;  %v1775_v17 = vld [vmem:[%s7013_s19 + $0x170] sm:$0xff] }
 0x38c   : > { %1880 = vmatpush1.bf16.msra.mxu0 %v1795_v2  ;;  %1953 = vmatpush1.bf16.msra.mxu1 %v1797_v3  ;;  %v1857_v2 = vunpack.c.h.s8.bf16 %v1767_v58  ;;  %v1862_v3 = vunpack.c.l.s8.bf16 %v1772_v63  ;;  %v7265_v45 = vpack.c.bf16 %v1715_v29, %v1713_v43  ;;  %v1758_v58 = vld [vmem:[%s7013_s19 + $0xe8] sm:$0xff]  ;;  %v1865_v18 = vunpack.c.l.s8.bf16 %v1775_v17 }
 0x38d   : > { %1881 = vmatprep.subr.bf16.mxu0 %v1802_v4  ;;  %1954 = vmatprep.subr.bf16.mxu1 %v1804_v5  ;;  %v1864_v4 = vunpack.c.l.s8.bf16 %v1774_v0  ;;  %v1771_v5 = vld [vmem:[%s7013_s19 + $0x150] sm:$0xff]  ;;  %v1836_v63 = vunpack.c.h.s8.bf16 %v1758_v58 }
 0x38e   : > { %v1861_v8 = vunpack.c.l.s8.bf16 %v1771_v5 }
 0x390   : > { %1882 = vmatpush1.bf16.msra.mxu0 %v1801_v11  ;;  %1955 = vmatpush1.bf16.msra.mxu1 %v1803_v12  ;;  %v1870_v11 = vunpack.c.h.s8.bf16 %v1774_v0  ;;  %v1734_v12 = vld [vmem:[%s7013_s19 + $0x28] sm:$0xff]  ;;  %v1764_v0 = vld [vmem:[%s7013_s19 + $0x118] sm:$0xff] }
 0x391   : > { %1883 = vmatprep.subr.bf16.mxu0 %v1808_v6  ;;  %1956 = vmatprep.subr.bf16.mxu1 %v1810_v13  ;;  %v1867_v6 = vunpack.c.h.s8.bf16 %v1771_v5  ;;  %v1869_v13 = vunpack.c.h.s8.bf16 %v1773_v7  ;;  %v1770_v5 = vld [vmem:[%s7013_s19 + $0x148] sm:$0xff] }
 0x394   : > { %1884 = vmatpush1.bf16.msra.mxu0 %v1807_v19  ;;  %1957 = vmatpush1.bf16.msra.mxu1 %v1809_v20  ;;  %v1782_v19 = vunpack.c.l.s8.bf16 %v1734_v12  ;;  %v1733_v20 = vld [vmem:[%s7013_s19 + $0x20] sm:$0xff] }
 0x395   : > { %1885 = vmatprep.subr.bf16.mxu0 %v1814_v21  ;;  %1958 = vmatprep.subr.bf16.mxu1 %v1816_v22  ;;  %v1710_v21 = vld [vmem:[#allocation2 + $0x28] sm:$0xff]  ;;  %v1712_v22 = vld [vmem:[#allocation2 + $0x38] sm:$0xff]  ;;  %v1781_v24 = vunpack.c.l.s8.bf16 %v1733_v20 }
 0x398   : > { %1886 = vmatpush1.bf16.msra.mxu0 %v1813_v25  ;;  %1959 = vmatpush1.bf16.msra.mxu1 %v1815_v26  ;;  %v7247_v25 = vpack.c.bf16 %v1712_v22, %v1710_v21  ;;  %v1788_v26 = vunpack.c.h.s8.bf16 %v1734_v12  ;;  %v1776_v12 = vld [vmem:[%s7013_s19 + $0x178] sm:$0xff]  ;;  %v2092_v21 = vlaneseq }
 0x399   : > { %1887 = vmatprep.subr.bf16.mxu0 %v1820_v27  ;;  %1960 = vmatprep.subr.bf16.mxu1 %v1822_v28  ;;  %v1740_v27 = vld [vmem:[%s7013_s19 + $0x58] sm:$0xff]  ;;  %v1787_v28 = vunpack.c.h.s8.bf16 %v1733_v20  ;;  %v1871_v20 = vunpack.c.h.s8.bf16 %v1775_v17 }
 0x39a   : > { %v7290_v22 = vshrl.u32 %v2092_v21, 7 }
 0x39c   : > { %1888 = vmatpush1.bf16.msra.mxu0 %v1819_v33  ;;  %1961 = vmatpush1.bf16.msra.mxu1 %v1821_v34  ;;  %v1794_v33 = vunpack.c.l.s8.bf16 %v1740_v27  ;;  %v1739_v34 = vld [vmem:[%s7013_s19 + $0x50] sm:$0xff]  ;;  %9526 = vst [vmem:[#allocation31_spill] sm:$0xff] %v7290_v22 }
 0x39d   : > { %1889 = vmatprep.subr.bf16.mxu0 %v1826_v35  ;;  %1962 = vmatprep.subr.bf16.mxu1 %v1828_v36  ;;  %v1714_v35 = vld [vmem:[#allocation2 + $0x48] sm:$0xff]  ;;  %v1716_v36 = vld [vmem:[#allocation2 + $0x58] sm:$0xff]  ;;  %v1793_v38 = vunpack.c.l.s8.bf16 %v1739_v34 }
 0x3a0   : > { %1890 = vmatpush1.bf16.msra.mxu0 %v1825_v39  ;;  %1963 = vmatpush1.bf16.msra.mxu1 %v1827_v40  ;;  %v7257_v39 = vpack.c.bf16 %v1716_v36, %v1714_v35  ;;  %v1800_v40 = vunpack.c.h.s8.bf16 %v1740_v27  ;;  %v1700_v27 = vld [vmem:[%s7015_s28 + $0x38] sm:$0xff] }
 0x3a1   : > { %1891 = vmatprep.subr.bf16.mxu0 %v1832_v41  ;;  %1964 = vmatprep.subr.bf16.mxu1 %v1834_v42  ;;  %v1746_v41 = vld [vmem:[%s7013_s19 + $0x88] sm:$0xff]  ;;  %v1799_v42 = vunpack.c.h.s8.bf16 %v1739_v34  ;;  %v1695_v34 = vld [vmem:[%s7015_s28 + $0x10] sm:$0xff] }
 0x3a4   : > { %1892 = vmatpush1.bf16.msra.mxu0 %v1831_v44  ;;  %1965 = vmatpush1.bf16.msra.mxu1 %v1833_v31  ;;  %v1806_v44 = vunpack.c.l.s8.bf16 %v1746_v41  ;;  %v1745_v31 = vld [vmem:[%s7013_s19 + $0x80] sm:$0xff] }
 0x3a5   : > { %1893 = vmatprep.subr.bf16.mxu0 %v1838_v14  ;;  %1966 = vmatprep.subr.bf16.mxu1 %v1840_v15  ;;  %v1718_v14 = vld [vmem:[#allocation2 + $0x68] sm:$0xff]  ;;  %v1720_v15 = vld [vmem:[#allocation2 + $0x78] sm:$0xff]  ;;  %v1805_v47 = vunpack.c.l.s8.bf16 %v1745_v31 }
 0x3a8   : > { %1894 = vmatpush1.bf16.msra.mxu0 %v1837_v49  ;;  %1967 = vmatpush1.bf16.msra.mxu1 %v1839_v50  ;;  %v7267_v49 = vpack.c.bf16 %v1720_v15, %v1718_v14  ;;  %v1812_v50 = vunpack.c.h.s8.bf16 %v1746_v41 }
 0x3a9   : > { %1895 = vmatprep.subr.bf16.mxu0 %v1844_v46  ;;  %1968 = vmatprep.subr.bf16.mxu1 %v1846_v48  ;;  %v1752_v46 = vld [vmem:[%s7013_s19 + $0xb8] sm:$0xff]  ;;  %v1811_v48 = vunpack.c.h.s8.bf16 %v1745_v31 }
 0x3aa   : > { %v1824_v57 = vunpack.c.h.s8.bf16 %v1752_v46 }
 0x3ac   : > { %1896 = vmatpush1.bf16.msra.mxu0 %v1843_v53  ;;  %1969 = vmatpush1.bf16.msra.mxu1 %v1845_v54  ;;  %v1818_v53 = vunpack.c.l.s8.bf16 %v1752_v46  ;;  %v1751_v54 = vld [vmem:[%s7013_s19 + $0xb0] sm:$0xff] }
 0x3ad   : > { %1897 = vmatprep.subr.bf16.mxu0 %v1850_v55  ;;  %1970 = vmatprep.subr.bf16.mxu1 %v1852_v56  ;;  %v1727_v55 = vpack.c.bf16 %v1719_v52, %v1717_v51  ;;  %v1817_v56 = vunpack.c.l.s8.bf16 %v1751_v54 }
 0x3b0   : > { %1898 = vmatpush1.bf16.msra.mxu0 %v1849_v59  ;;  %1971 = vmatpush1.bf16.msra.mxu1 %v1851_v60  ;;  %v1823_v59 = vunpack.c.h.s8.bf16 %v1751_v54  ;;  %v1830_v60 = vunpack.c.l.s8.bf16 %v1758_v58 }
 0x3b1   : > { %1899 = vmatprep.subr.bf16.mxu0 %v1856_v61  ;;  %1972 = vmatprep.subr.bf16.mxu1 %v1858_v62  ;;  %v1757_v61 = vld [vmem:[%s7013_s19 + $0xe0] sm:$0xff] }
 0x3b2   : > { %v1829_v62 = vunpack.c.l.s8.bf16 %v1757_v61 }
 0x3b4   : > { %1900 = vmatpush1.bf16.msra.mxu0 %v1855_v1  ;;  %1973 = vmatpush1.bf16.msra.mxu1 %v1857_v2  ;;  %v1835_v1 = vunpack.c.h.s8.bf16 %v1757_v61  ;;  %v1842_v2 = vunpack.c.l.s8.bf16 %v1764_v0 }
 0x3b5   : > { %1901 = vmatprep.subr.bf16.mxu0 %v1862_v3  ;;  %1974 = vmatprep.subr.bf16.mxu1 %v1864_v4  ;;  %v1763_v3 = vld [vmem:[%s7013_s19 + $0x110] sm:$0xff] }
 0x3b6   : > { %v1841_v4 = vunpack.c.l.s8.bf16 %v1763_v3  ;;  %v1847_v7 = vunpack.c.h.s8.bf16 %v1763_v3 }
 0x3b8   : > { %1902 = vmatpush1.bf16.msra.mxu0 %v1861_v8  ;;  %1975 = vmatpush1.bf16.msra.mxu1 %v1863_v9  ;;  %v1854_v8 = vunpack.c.l.s8.bf16 %v1770_v5  ;;  %v1769_v9 = vld [vmem:[%s7013_s19 + $0x140] sm:$0xff] }
 0x3b9   : > { %1903 = vmatprep.subr.bf16.mxu0 %v1868_v10  ;;  %1976 = vmatprep.subr.bf16.mxu1 %v1870_v11  ;;  %v1853_v10 = vunpack.c.l.s8.bf16 %v1769_v9  ;;  %v1860_v11 = vunpack.c.h.s8.bf16 %v1770_v5 }
 0x3bc   : > { %1904 = vmatpush1.bf16.msra.mxu0 %v1867_v6  ;;  %1977 = vmatpush1.bf16.msra.mxu1 %v1869_v13  ;;  %v1859_v6 = vunpack.c.h.s8.bf16 %v1769_v9  ;;  %v1866_v13 = vunpack.c.l.s8.bf16 %v1776_v12 }
 0x3bd   : > { %2019 = vmatprep.subr.bf16.mxu0 %v1782_v19  ;;  %v1872_v19 = vunpack.c.h.s8.bf16 %v1776_v12 }
 0x3bf   : > { %1979 = vmatmul.mubr.bf16.vlgmr.msra.gmra.mrb[0].mxu1 %v7245_v23  ;;  %1906 = vmatmul.mubr.bf16.vlgmr.msra.gmra.mrb[0].mxu0 %v7245_v23 }
 0x3c0   : > { %2020 = vmatpush1.bf16.msra.mxu0 %v1781_v24  ;;  %1988 = vmatprep.mubr.bf16.mxu1 %v7247_v25  ;;  %v7293_v24 = vsub.s32 0, %v7290_v22 }
 0x3c1   : > { %2021 = vmatprep.subr.bf16.mxu0 %v1788_v26  ;;  %1915 = vmatprep.mubr.bf16.mxu0 %v7247_v25  ;;  %v1702_v26 = vld [vmem:[%s7015_s28 + $0x48] sm:$0xff] }
 0x3c2   : > { %v7309_v35 = vrot.slane %v1702_v26, %v7293_v24  ;;  %v7312_v36 = vrot.slane %v1700_v27, %v7293_v24  ;;  %v7323_v43 = vrot.slane %v1695_v34, %v7293_v24 }
 0x3c4   : > { %2022 = vmatpush1.bf16.msra.mxu0 %v1787_v28  ;;  %v1693_v28 = vld [vmem:[%s7015_s28] sm:$0xff] }
 0x3c5   : > { %2023 = vmatprep.subr.bf16.mxu0 %v1794_v33  ;;  %v1694_v33 = vld [vmem:[%s7015_s28 + $0x8] sm:$0xff] }
 0x3c6   : > { %v7319_v41 = vrot.slane %v1694_v33, %v7293_v24 }
 0x3c7   : > { %1989 = vmatmul.mubr.bf16.gmra.mrb[4].mxu1 %v7255_v37  ;;  %1916 = vmatmul.mubr.bf16.gmra.mrb[4].mxu0 %v7255_v37 }
 0x3c8   : > { %2024 = vmatpush1.bf16.msra.mxu0 %v1793_v38  ;;  %1998 = vmatprep.mubr.bf16.mxu1 %v7257_v39  ;;  %v7316_v38 = vrot.slane %v1693_v28, %v7293_v24 }
 0x3c9   : > { %2025 = vmatprep.subr.bf16.mxu0 %v1800_v40  ;;  %1925 = vmatprep.mubr.bf16.mxu0 %v7257_v39 }
 0x3cc   : > { %2026 = vmatpush1.bf16.msra.mxu0 %v1799_v42 }
 0x3cd   : > { %2027 = vmatprep.subr.bf16.mxu0 %v1806_v44 }
 0x3cf   : > { %1999 = vmatmul.mubr.bf16.gmra.mrb[8].mxu1 %v7265_v45  ;;  %1926 = vmatmul.mubr.bf16.gmra.mrb[8].mxu0 %v7265_v45 }
 0x3d0   : > { %2028 = vmatpush1.bf16.msra.mxu0 %v1805_v47  ;;  %2008 = vmatprep.mubr.bf16.mxu1 %v7267_v49 }
 0x3d1   : > { %2029 = vmatprep.subr.bf16.mxu0 %v1812_v50  ;;  %1935 = vmatprep.mubr.bf16.mxu0 %v7267_v49 }
 0x3d4   : > { %2030 = vmatpush1.bf16.msra.mxu0 %v1811_v48 }
 0x3d5   : > { %2031 = vmatprep.subr.bf16.mxu0 %v1818_v53 }
 0x3d7   : > { %2009 = vmatmul.mubr.bf16.gmra.mrb[12].mxu1 %v1727_v55  ;;  %1936 = vmatmul.mubr.bf16.gmra.mrb[12].mxu0 %v1727_v55 }
 0x3d8   : > { %2032 = vmatpush1.bf16.msra.mxu0 %v1817_v56  ;;  %2051 = vmatprep.mubr.bf16.mxu0 %v7219_v16  ;;  %v1848_v16 = vunpack.c.h.s8.bf16 %v1764_v0 }
 0x3d9   : > { %2033 = vmatprep.subr.bf16.mxu0 %v1824_v57 }
 0x3dc   : > { %2034 = vmatpush1.bf16.msra.mxu0 %v1823_v59 }
 0x3dd   : > { %2035 = vmatprep.subr.bf16.mxu0 %v1830_v60 }
 0x3e0   : > { %2036 = vmatpush1.bf16.msra.mxu0 %v1829_v62 }
 0x3e1   : > { %2037 = vmatprep.subr.bf16.mxu0 %v1836_v63 }
 0x3e4   : > { %2038 = vmatpush1.bf16.msra.mxu0 %v1835_v1 }
 0x3e5   : > { %2039 = vmatprep.subr.bf16.mxu0 %v1842_v2 }
 0x3e8   : > { %2040 = vmatpush1.bf16.msra.mxu0 %v1841_v4 }
 0x3e9   : > { %2041 = vmatprep.subr.bf16.mxu0 %v1848_v16 }
 0x3ec   : > { %2042 = vmatpush1.bf16.msra.mxu0 %v1847_v7 }
 0x3ed   : > { %2043 = vmatprep.subr.bf16.mxu0 %v1854_v8 }
 0x3f0   : > { %2044 = vmatpush1.bf16.msra.mxu0 %v1853_v10 }
 0x3f1   : > { %2045 = vmatprep.subr.bf16.mxu0 %v1860_v11 }
 0x3f4   : > { %2046 = vmatpush1.bf16.msra.mxu0 %v1859_v6 }
 0x3f5   : > { %2047 = vmatprep.subr.bf16.mxu0 %v1866_v13 }
 0x3f8   : > { %2048 = vmatpush1.bf16.msra.mxu0 %v1865_v18 }
 0x3f9   : > { %2049 = vmatprep.subr.bf16.mxu0 %v1872_v19 }
 0x3fc   : > { %2050 = vmatpush1.bf16.msra.mxu0 %v1871_v20 }
 0x3ff   : > { %2052 = vmatmul.mubr.bf16.vlgmr.msra.gmra.mrb[16].mxu0 %v7245_v23  ;;  %v1701_v23 = vld [vmem:[%s7015_s28 + $0x40] sm:$0xff] }
 0x400   : > { %2061 = vmatprep.mubr.bf16.mxu0 %v7247_v25  ;;  %v1699_v25 = vld [vmem:[%s7015_s28 + $0x30] sm:$0xff]  ;;  %v7301_v30 = vrot.slane %v1701_v23, %v7293_v24 }
 0x401   : > { %v7304_v32 = vrot.slane %v1699_v25, %v7293_v24 }
 0x407   : > { %2062 = vmatmul.mubr.bf16.gmra.mrb[20].mxu0 %v7255_v37  ;;  %v1696_v37 = vld [vmem:[%s7015_s28 + $0x18] sm:$0xff] }
 0x408   : > { %2071 = vmatprep.mubr.bf16.mxu0 %v7257_v39  ;;  %v7328_v15 = vrot.slane %v1696_v37, %v7293_v24 }
 0x40f   : > { %2072 = vmatmul.mubr.bf16.gmra.mrb[24].mxu0 %v7265_v45 }
 0x410   : > { %2081 = vmatprep.mubr.bf16.mxu0 %v7267_v49 }
 0x417   : > { %2082 = vmatmul.mubr.bf16.gmra.mrb[28].mxu0 %v1727_v55 }
 0x492   : > { %v1980_v39 = vpop.f32.mrb[0].mxu1  ;;  %v1907_v40 = vpop.f32.mrb[0].mxu0 }
 0x493   : > { %v2118_v42 = vmul.f32 %v7301_v30, %v1980_v39  ;;  %v1982_v29 = vpop.f32.mrb[1].mxu1  ;;  %v2116_v44 = vmul.f32 %v7304_v32, %v1907_v40  ;;  %v1909_v31 = vpop.f32.mrb[1].mxu0 }
 0x494   : > { %v2119_v14 = vmul.f32 %v7309_v35, %v1982_v29  ;;  %v1984_v45 = vpop.f32.mrb[2].mxu1  ;;  %v2117_v47 = vmul.f32 %v7312_v36, %v1909_v31  ;;  %v1911_v49 = vpop.f32.mrb[2].mxu0 }
 0x495   : > { %v2124_v50 = vmul.f32 %v7301_v30, %v1984_v45  ;;  %v1986_v46 = vpop.f32.mrb[3].mxu1  ;;  %v2188_v48 = vadd.f32 %v7316_v38, %v2116_v44  ;;  %v2122_v51 = vmul.f32 %v7304_v32, %v1911_v49  ;;  %v1913_v52 = vpop.f32.mrb[3].mxu0  ;;  %v2190_v56 = vadd.f32 %v7323_v43, %v2118_v42 }
 0x496   : > { %v2125_v53 = vmul.f32 %v7309_v35, %v1986_v46  ;;  %v7336_v54 = vadd.f32 %v7319_v41, %v2117_v47  ;;  %v2123_v55 = vmul.f32 %v7312_v36, %v1913_v52  ;;  %v2191_v59 = vadd.f32 %v7328_v15, %v2119_v14 }
 0x497   : > { %v2196_v57 = vadd.f32 %v7323_v43, %v2124_v50  ;;  %v2194_v58 = vadd.f32 %v7316_v38, %v2122_v51 }
 0x498   : > { %v2197_v60 = vadd.f32 %v7328_v15, %v2125_v53  ;;  %v7345_v61 = vadd.f32 %v7319_v41, %v2123_v55 }
 0x499   : > { %v2238_v62 = vpack.c.bf16 %v2196_v57, %v2190_v56  ;;  %v2236_v63 = vpack.c.bf16 %v2194_v58, %v2188_v48 }
 0x49a   : > { %v1990_v0 = vpop.f32.mrb[4].mxu1  ;;  %v1917_v1 = vpop.f32.mrb[4].mxu0  ;;  %v7347_v2 = vpack.c.bf16 %v2197_v60, %v2191_v59  ;;  %v2237_v3 = vpack.c.bf16 %v7345_v61, %v7336_v54 }
 0x49b   : > { %v2130_v4 = vmul.f32 %v7301_v30, %v1990_v0  ;;  %v1992_v16 = vpop.f32.mrb[5].mxu1  ;;  %5554 = vmatprep.subr.bf16.mxu1 %v2238_v62  ;;  %v2128_v5 = vmul.f32 %v7304_v32, %v1917_v1  ;;  %v1919_v7 = vpop.f32.mrb[5].mxu0  ;;  %5562 = vmatprep.mubr.bf16.mxu1 %v2236_v63 }
 0x49c   : > { %v2131_v8 = vmul.f32 %v7309_v35, %v1992_v16  ;;  %v1994_v9 = vpop.f32.mrb[6].mxu1  ;;  %5555 = vmatpush3.bf16.xpose.msra.mxu1 %v2238_v62  ;;  %v2129_v10 = vmul.f32 %v7312_v36, %v1919_v7  ;;  %v1921_v11 = vpop.f32.mrb[6].mxu0 }
 0x49d   : > { %v2136_v12 = vmul.f32 %v7301_v30, %v1994_v9  ;;  %v1996_v6 = vpop.f32.mrb[7].mxu1  ;;  %v7357_v13 = vadd.f32 %v7316_v38, %v2128_v5  ;;  %v2134_v17 = vmul.f32 %v7304_v32, %v1921_v11  ;;  %v1923_v18 = vpop.f32.mrb[7].mxu0  ;;  %v2202_v25 = vadd.f32 %v7323_v43, %v2130_v4 }
 0x49e   : > { %v2203_v19 = vadd.f32 %v7328_v15, %v2131_v8  ;;  %v2137_v20 = vmul.f32 %v7309_v35, %v1996_v6  ;;  %v7363_v21 = vadd.f32 %v7319_v41, %v2129_v10  ;;  %v2135_v23 = vmul.f32 %v7312_v36, %v1923_v18 }
 0x49f   : > { %v2208_v26 = vadd.f32 %v7323_v43, %v2136_v12  ;;  %v7369_v27 = vadd.f32 %v7316_v38, %v2134_v17 }
 0x4a0   : > { %v2209_v28 = vadd.f32 %v7328_v15, %v2137_v20  ;;  %v7373_v33 = vadd.f32 %v7319_v41, %v2135_v23 }
 0x4a1   : > { %v2244_v34 = vpack.c.bf16 %v2208_v26, %v2202_v25  ;;  %v2242_v37 = vpack.c.bf16 %v7369_v27, %v7357_v13 }
 0x4a2   : > { %v2000_v39 = vpop.f32.mrb[8].mxu1  ;;  %v2243_v40 = vpack.c.bf16 %v7373_v33, %v7363_v21  ;;  %v1927_v42 = vpop.f32.mrb[8].mxu0  ;;  %v7379_v29 = vpack.c.bf16 %v2209_v28, %v2203_v19 }
 0x4a3   : > { %v2142_v44 = vmul.f32 %v7301_v30, %v2000_v39  ;;  %v2002_v31 = vpop.f32.mrb[9].mxu1  ;;  %5556 = vmatprep.subr.bf16.mxu1 %v2244_v34  ;;  %v2140_v14 = vmul.f32 %v7304_v32, %v1927_v42  ;;  %v1929_v45 = vpop.f32.mrb[9].mxu0 }
 0x4a4   : > { %v2143_v47 = vmul.f32 %v7309_v35, %v2002_v31  ;;  %v2004_v49 = vpop.f32.mrb[10].mxu1  ;;  %5557 = vmatpush3.bf16.xpose.msra.mxu1 %v2244_v34  ;;  %v2141_v50 = vmul.f32 %v7312_v36, %v1929_v45  ;;  %v1931_v46 = vpop.f32.mrb[10].mxu0 }
 0x4a5   : > { %v2148_v48 = vmul.f32 %v7301_v30, %v2004_v49  ;;  %v2006_v51 = vpop.f32.mrb[11].mxu1  ;;  %v2212_v52 = vadd.f32 %v7316_v38, %v2140_v14  ;;  %v2146_v53 = vmul.f32 %v7304_v32, %v1931_v46  ;;  %v1933_v55 = vpop.f32.mrb[11].mxu0  ;;  %v2214_v60 = vadd.f32 %v7323_v43, %v2142_v44 }
 0x4a6   : > { %v2215_v56 = vadd.f32 %v7328_v15, %v2143_v47  ;;  %v2149_v57 = vmul.f32 %v7309_v35, %v2006_v51  ;;  %v7391_v58 = vadd.f32 %v7319_v41, %v2141_v50  ;;  %v2147_v59 = vmul.f32 %v7312_v36, %v1933_v55 }
 0x4a7   : > { %v2220_v62 = vadd.f32 %v7323_v43, %v2148_v48  ;;  %v2218_v63 = vadd.f32 %v7316_v38, %v2146_v53 }
 0x4a8   : > { %v2221_v0 = vadd.f32 %v7328_v15, %v2149_v57  ;;  %v7399_v1 = vadd.f32 %v7319_v41, %v2147_v59 }
 0x4a9   : > { %v2250_v4 = vpack.c.bf16 %v2220_v62, %v2214_v60  ;;  %v2248_v16 = vpack.c.bf16 %v2218_v63, %v2212_v52 }
 0x4aa   : > { %v2010_v5 = vpop.f32.mrb[12].mxu1  ;;  %v1937_v7 = vpop.f32.mrb[12].mxu0  ;;  %v7401_v8 = vpack.c.bf16 %v2221_v0, %v2215_v56  ;;  %v2249_v9 = vpack.c.bf16 %v7399_v1, %v7391_v58 }
 0x4ab   : > { %v2154_v10 = vmul.f32 %v7301_v30, %v2010_v5  ;;  %v2012_v11 = vpop.f32.mrb[13].mxu1  ;;  %5558 = vmatprep.subr.bf16.mxu1 %v2250_v4  ;;  %v2152_v12 = vmul.f32 %v7304_v32, %v1937_v7  ;;  %v1939_v6 = vpop.f32.mrb[13].mxu0 }
 0x4ac   : > { %v2155_v17 = vmul.f32 %v7309_v35, %v2012_v11  ;;  %v2014_v18 = vpop.f32.mrb[14].mxu1  ;;  %5559 = vmatpush3.bf16.xpose.msra.mxu1 %v2250_v4  ;;  %v2153_v19 = vmul.f32 %v7312_v36, %v1939_v6  ;;  %v1941_v20 = vpop.f32.mrb[14].mxu0 }
 0x4ad   : > { %v2160_v23 = vmul.f32 %v7301_v30, %v2014_v18  ;;  %v2016_v25 = vpop.f32.mrb[15].mxu1  ;;  %v2224_v26 = vadd.f32 %v7316_v38, %v2152_v12  ;;  %v2158_v28 = vmul.f32 %v7304_v32, %v1941_v20  ;;  %v1943_v34 = vpop.f32.mrb[15].mxu0  ;;  %v2226_v14 = vadd.f32 %v7323_v43, %v2154_v10 }
 0x4ae   : > { %v2227_v39 = vadd.f32 %v7328_v15, %v2155_v17  ;;  %v2161_v42 = vmul.f32 %v7309_v35, %v2016_v25  ;;  %v7415_v44 = vadd.f32 %v7319_v41, %v2153_v19  ;;  %v2159_v31 = vmul.f32 %v7312_v36, %v1943_v34  ;;  %v1703_v36 = vld [vmem:[%s7015_s28 + $0x50] sm:$0xff] }
 0x4af   : > { %v2232_v30 = vadd.f32 %v7323_v43, %v2160_v23  ;;  %v2230_v45 = vadd.f32 %v7316_v38, %v2158_v28  ;;  %v1697_v38 = vld [vmem:[%s7015_s28 + $0x20] sm:$0xff] }
 0x4b0   : > { %v2233_v32 = vadd.f32 %v7328_v15, %v2161_v42  ;;  %v7423_v47 = vadd.f32 %v7319_v41, %v2159_v31  ;;  %v2111_v41 = vrot.slane %v1703_v36, %v7293_v24  ;;  %v2183_v43 = vrot.slane %v1697_v38, %v7293_v24  ;;  %v7464_v36 = vld [vmem:[%s9528_s3 + $0x18] sm:$0xff] }
 0x4b1   : > { %v2256_v49 = vpack.c.bf16 %v2232_v30, %v2226_v14  ;;  %v2254_v35 = vpack.c.bf16 %v2230_v45, %v2224_v26  ;;  %v7454_v14 = vld [vmem:[%s9527_s24 + $0x10] sm:$0xff] }
 0x4b2   : > { %v7425_v50 = vpack.c.bf16 %v2233_v32, %v2227_v39  ;;  %v2255_v46 = vpack.c.bf16 %v7423_v47, %v7415_v44  ;;  %v7459_v32 = vld [vmem:[%s9528_s3] sm:$0xff] }
 0x4b3   : > { %5560 = vmatprep.subr.bf16.mxu1 %v2256_v49 }
 0x4b4   : > { %5561 = vmatpush3.bf16.xpose.msra.mxu1 %v2256_v49 }
 0x4bb   : > { %5563 = vmatmul.mubr.bf16.vlgmr.msra.gmra.mrb[16].mxu1 %v2242_v37 }
 0x4bc   : > { %5566 = vmatprep.mubr.bf16.mxu1 %v2248_v16 }
 0x4c3   : > { %5567 = vmatmul.mubr.bf16.gmra.mrb[20].mxu1 %v2254_v35 }
 0x4d2   : > { %v2053_v15 = vpop.f32.mrb[16].mxu0 }
 0x4d3   : > { %v2120_v48 = vmul.f32 %v2111_v41, %v2053_v15  ;;  %v7436_v51 = vpop.f32.mrb[17].mxu0  ;;  %v7470_v15 = vld [vmem:[%s9528_s3 + $0x8] sm:$0xff] }
 0x4d4   : > { %v2057_v52 = vpop.f32.mrb[18].mxu0 }
 0x4d5   : > { %v2192_v53 = vadd.f32 %v2183_v43, %v2120_v48  ;;  %v2126_v55 = vmul.f32 %v2111_v41, %v2057_v52  ;;  %v7438_v56 = vpop.f32.mrb[19].mxu0 }
 0x4d7   : > { %v2198_v57 = vadd.f32 %v2183_v43, %v2126_v55 }
 0x4d9   : > { %v2240_v13 = vpack.c.bf16 %v2198_v57, %v2192_v53 }
 0x4da   : > { %v2063_v27 = vpop.f32.mrb[20].mxu0 }
 0x4db   : > { %v2132_v37 = vmul.f32 %v2111_v41, %v2063_v27  ;;  %v7440_v59 = vpop.f32.mrb[21].mxu0  ;;  %5570 = vmatprep.subr.bf16.mxu1 %v2240_v13 }
 0x4dc   : > { %v2067_v60 = vpop.f32.mrb[22].mxu0  ;;  %5571 = vmatpush3.bf16.msra.mxu1 %v2240_v13 }
 0x4dd   : > { %v2204_v62 = vadd.f32 %v2183_v43, %v2132_v37  ;;  %v2138_v63 = vmul.f32 %v2111_v41, %v2067_v60  ;;  %v7442_v0 = vpop.f32.mrb[23].mxu0 }
 0x4df   : > { %v2210_v4 = vadd.f32 %v2183_v43, %v2138_v63  ;;  %v7481_v63 = vld [vmem:[%s9528_s3 + $0x20] sm:$0xff] }
 0x4e1   : > { %v2246_v16 = vpack.c.bf16 %v2210_v4, %v2204_v62  ;;  %v7486_v4 = vld [vmem:[%s9528_s3 + $0x30] sm:$0xff] }
 0x4e2   : > { %v2073_v5 = vpop.f32.mrb[24].mxu0 }
 0x4e3   : > { %v2144_v7 = vmul.f32 %v2111_v41, %v2073_v5  ;;  %v7444_v10 = vpop.f32.mrb[25].mxu0  ;;  %5572 = vmatprep.subr.bf16.mxu1 %v2246_v16 }
 0x4e4   : > { %v2077_v11 = vpop.f32.mrb[26].mxu0  ;;  %5573 = vmatpush3.bf16.msra.mxu1 %v2246_v16 }
 0x4e5   : > { %v2216_v12 = vadd.f32 %v2183_v43, %v2144_v7  ;;  %v2150_v6 = vmul.f32 %v2111_v41, %v2077_v11  ;;  %v7446_v17 = vpop.f32.mrb[27].mxu0 }
 0x4e7   : > { %v2222_v18 = vadd.f32 %v2183_v43, %v2150_v6  ;;  %v7492_v6 = vld [vmem:[%s9528_s3 + $0x28] sm:$0xff] }
 0x4e9   : > { %v2252_v19 = vpack.c.bf16 %v2222_v18, %v2216_v12  ;;  %v7497_v18 = vld [vmem:[%s9528_s3 + $0x38] sm:$0xff] }
 0x4ea   : > { %v2083_v20 = vpop.f32.mrb[28].mxu0 }
 0x4eb   : > { %v2156_v23 = vmul.f32 %v2111_v41, %v2083_v20  ;;  %v7448_v25 = vpop.f32.mrb[29].mxu0  ;;  %5574 = vmatprep.subr.bf16.mxu1 %v2252_v19 }
 0x4ec   : > { %v2087_v26 = vpop.f32.mrb[30].mxu0  ;;  %5575 = vmatpush3.bf16.msra.mxu1 %v2252_v19 }
 0x4ed   : > { %v2228_v28 = vadd.f32 %v2183_v43, %v2156_v23  ;;  %v2162_v34 = vmul.f32 %v2111_v41, %v2087_v26 }
 0x4ef   : > { %v2234_v39 = vadd.f32 %v2183_v43, %v2162_v34 }
 0x4f1   : > { %v2258_v42 = vpack.c.bf16 %v2234_v39, %v2228_v28 }
 0x4f3   : > { %5576 = vmatprep.subr.bf16.mxu1 %v2258_v42 }
 0x4f4   : > { %5577 = vmatpush3.bf16.msra.mxu1 %v2258_v42 }
 0x4f5   : > { %5586 = vmatprep.subr.bf16.mxu1 %v7347_v2 }
 0x58e   : > { %v5564_v31 = vpop.f32.mrb[16].mxu1 }
 0x58f   : > { %v2327_v30 = vmul.f32 0.088388346, %v5564_v31  ;;  %v2294_v45 = vpop.f32.mrb[17].mxu1 }
 0x590   : > { %v2325_v49 = vmul.f32 0.088388346, %v2294_v45  ;;  %v5565_v35 = vpop.f32.mrb[18].mxu1 }
 0x591   : > { %v2328_v38 = vmul.f32 0.088388346, %v5565_v35  ;;  %v2297_v41 = vpop.f32.mrb[19].mxu1  ;;  %v2343_v43 = vadd.f32 %v7454_v14, %v2327_v30 }
 0x592   : > { %v2326_v48 = vmul.f32 0.088388346, %v2297_v41  ;;  %v2341_v52 = vadd.f32 %v7459_v32, %v2325_v49 }
 0x593   : > { %v2356_v53 = vsel %vm2349_vm0, %v2343_v43, -inf  ;;  %v2344_v55 = vadd.f32 %v7464_v36, %v2328_v38  ;;  %v1704_v38 = vld [vmem:[%s7015_s28 + $0x58] sm:$0xff] }
 0x594   : > { %2357 = vmax.xlane.f32.xlu1 %v2356_v53  ;;  %v2350_v57 = vsel %vm2349_vm0, %v2341_v52, -inf  ;;  %v2342_v13 = vadd.f32 %v7470_v15, %v2326_v48 }
 0x595   : > { %2351 = vmax.xlane.f32.xlu0 %v2350_v57  ;;  %v2359_v62 = vsel %vm2349_vm0, %v2344_v55, -inf }
 0x596   : > { %v5568_v27 = vpop.f32.mrb[20].mxu1  ;;  %v2353_v7 = vsel %vm2349_vm0, %v2342_v13, -inf }
 0x597   : > { %v2331_v37 = vmul.f32 0.088388346, %v5568_v27  ;;  %v2310_v60 = vpop.f32.mrb[21].mxu1 }
 0x598   : > { %v2329_v16 = vmul.f32 0.088388346, %v2310_v60  ;;  %2360 = vmax.xlane.f32.xlu1 %v2359_v62  ;;  %v5569_v5 = vpop.f32.mrb[22].mxu1  ;;  %v7509_v60 = vrot.slane %v1704_v38, %v7293_v24  ;;  %v1698_v62 = vld [vmem:[%s7015_s28 + $0x28] sm:$0xff] }
 0x599   : > { %v2332_v11 = vmul.f32 0.088388346, %v5569_v5  ;;  %2354 = vmax.xlane.f32.xlu0 %v2353_v7  ;;  %v2313_v12 = vpop.f32.mrb[23].mxu1  ;;  %v2347_v23 = vadd.f32 %v7486_v4, %v2331_v37 }
 0x59a   : > { %v2330_v19 = vmul.f32 0.088388346, %v2313_v12  ;;  %v2345_v20 = vadd.f32 %v7481_v63, %v2329_v16 }
 0x59b   : > { %v2348_v34 = vadd.f32 %v7497_v18, %v2332_v11  ;;  %v2368_v42 = vsel %vm2349_vm0, %v2347_v23, -inf  ;;  %v2187_v11 = vrot.slane %v1698_v62, %v7293_v24 }
 0x59c   : > { %v2362_v26 = vsel %vm2349_vm0, %v2345_v20, -inf  ;;  %v2346_v28 = vadd.f32 %v7492_v6, %v2330_v19 }
 0x59d   : > { %2363 = vmax.xlane.f32.xlu0 %v2362_v26  ;;  %v2371_v31 = vsel %vm2349_vm0, %v2348_v34, -inf }
 0x59e   : > { %v2365_v39 = vsel %vm2349_vm0, %v2346_v28, -inf }
 0x59f   : > { %2366 = vmax.xlane.f32.xlu1 %v2365_v39 }
 0x5a1   : > { %2369 = vmax.xlane.f32.xlu0 %v2368_v42 }
 0x5a3   : > { %2372 = vmax.xlane.f32.xlu1 %v2371_v31 }
 0x621   : > { %v2358_v30 = vpop.xlane.xlu1 %2357 }
 0x622   : > { %v2376_v45 = vsub.f32 %v2343_v43, %v2358_v30  ;;  %v2352_v49 = vpop.xlane.xlu0 %2351 }
 0x623   : > { %v2374_v35 = vsub.f32 %v2341_v52, %v2352_v49  ;;  %v2121_v52 = vmul.f32 %v7509_v60, %v7436_v51 }
 0x624   : > { %v2386_v41 = vmul.f32 1.442695, %v2376_v45 }
 0x625   : > { %v2382_v48 = vmul.f32 1.442695, %v2374_v35  ;;  %v2361_v53 = vpop.xlane.xlu1 %2360  ;;  %v2193_v31 = vadd.f32 %v2187_v11, %v2121_v52 }
 0x626   : > { %v2377_v57 = vsub.f32 %v2344_v55, %v2361_v53  ;;  %v2355_v27 = vpop.xlane.xlu0 %2354  ;;  %v2127_v55 = vmul.f32 %v7509_v60, %v7438_v56 }
 0x627   : > { %5934 = vpow2.f32 %v2382_v48  ;;  %v2375_v37 = vsub.f32 %v2342_v13, %v2355_v27 }
 0x628   : > { %5936 = vpow2.f32 %v2386_v41  ;;  %v2388_v16 = vmul.f32 1.442695, %v2377_v57  ;;  %v2199_v30 = vadd.f32 %v2187_v11, %v2127_v55 }
 0x629   : > { %v2384_v5 = vmul.f32 1.442695, %v2375_v37 }
 0x62a   : > { %v2364_v7 = vpop.xlane.xlu0 %2363  ;;  %v7527_v38 = vpack.c.bf16 %v2199_v30, %v2193_v31 }
 0x62b   : > { %5938 = vpow2.f32 %v2384_v5  ;;  %v2378_v43 = vsub.f32 %v2345_v20, %v2364_v7  ;;  %v2151_v5 = vmul.f32 %v7509_v60, %v7446_v17  ;;  %v2089_v17 = vpop.f32.mrb[31].mxu0 }
 0x62c   : > { %v2367_v12 = vpop.xlane.xlu1 %2366  ;;  %5940 = vpow2.f32 %v2388_v16  ;;  %v2145_v16 = vmul.f32 %v7509_v60, %v7444_v10  ;;  %v2157_v10 = vmul.f32 %v7509_v60, %v7448_v25 }
 0x62d   : > { %v2390_v13 = vmul.f32 1.442695, %v2378_v43  ;;  %v2379_v19 = vsub.f32 %v2346_v28, %v2367_v12  ;;  %v2133_v28 = vmul.f32 %v7509_v60, %v7440_v59 }
 0x62e   : > { %v2370_v26 = vpop.xlane.xlu0 %2369  ;;  %v2229_v31 = vadd.f32 %v2187_v11, %v2157_v10 }
 0x62f   : > { %5942 = vpow2.f32 %v2390_v13  ;;  %v2392_v39 = vmul.f32 1.442695, %v2379_v19  ;;  %v2380_v42 = vsub.f32 %v2347_v23, %v2370_v26  ;;  %v2139_v23 = vmul.f32 %v7509_v60, %v7442_v0 }
 0x630   : > { %v2373_v45 = vpop.xlane.xlu1 %2372  ;;  %v2205_v57 = vadd.f32 %v2187_v11, %v2133_v28  ;;  %v2217_v13 = vadd.f32 %v2187_v11, %v2145_v16  ;;  %v2223_v19 = vadd.f32 %v2187_v11, %v2151_v5 }
 0x631   : > { %v7517_v20 = vpop.eup %5934  ;;  %5944 = vpow2.f32 %v2392_v39  ;;  %v2394_v51 = vmul.f32 1.442695, %v2380_v42  ;;  %v2381_v49 = vsub.f32 %v2348_v34, %v2373_v45  ;;  %v2211_v27 = vadd.f32 %v2187_v11, %v2139_v23 }
 0x632   : > { %v2398_v24 = vsel %vm2349_vm0, %v7517_v20, 0.0  ;;  %v7521_v56 = vpop.eup %5936  ;;  %v2253_v39 = vpack.c.bf16 %v2223_v19, %v2217_v13  ;;  %v2163_v42 = vmul.f32 %v7509_v60, %v2089_v17 }
 0x633   : > { %5946 = vpow2.f32 %v2394_v51  ;;  %v2396_v35 = vmul.f32 1.442695, %v2381_v49  ;;  %2399 = vadd.xlane.f32.xlu0 %v2398_v24  ;;  %v2404_v34 = vsel %vm2349_vm0, %v7521_v56, 0.0  ;;  %v7538_v7 = vpack.c.bf16 %v2211_v27, %v2205_v57 }
 0x634   : > { %v2235_v30 = vadd.f32 %v2187_v11, %v2163_v42 }
 0x635   : > { %v5939_v41 = vpop.eup %5938  ;;  %5948 = vpow2.f32 %v2396_v35 }
 0x636   : > { %v2401_v48 = vsel %vm2349_vm0, %v5939_v41, 0.0  ;;  %v5941_v53 = vpop.eup %5940  ;;  %v2259_v45 = vpack.c.bf16 %v2235_v30, %v2229_v31 }
 0x637   : > { %2405 = vadd.xlane.f32.xlu0 %v2404_v34  ;;  %2402 = vadd.xlane.f32.xlu1 %v2401_v48  ;;  %v2407_v62 = vsel %vm2349_vm0, %v5941_v53, 0.0 }
 0x639   : > { %v5943_v37 = vpop.eup %5942 }
 0x63a   : > { %v2410_v59 = vsel %vm2349_vm0, %v5943_v37, 0.0 }
 0x63b   : > { %v5945_v0 = vpop.eup %5944  ;;  %2411 = vadd.xlane.f32.xlu0 %v2410_v59  ;;  %2408 = vadd.xlane.f32.xlu1 %v2407_v62 }
 0x63c   : > { %v2413_v55 = vsel %vm2349_vm0, %v5945_v0, 0.0 }
 0x63d   : > { %v5947_v43 = vpop.eup %5946 }
 0x63e   : > { %v2416_v52 = vsel %vm2349_vm0, %v5947_v43, 0.0 }
 0x63f   : > { %v5949_v12 = vpop.eup %5948  ;;  %2417 = vadd.xlane.f32.xlu0 %v2416_v52  ;;  %2414 = vadd.xlane.f32.xlu1 %v2413_v55 }
 0x640   : > { %v2419_v26 = vsel %vm2349_vm0, %v5949_v12, 0.0 }
 0x643   : > { %2420 = vadd.xlane.f32.xlu1 %v2419_v26 }
 0x6c0   : > { %v2400_v51 = vpop.xlane.xlu0 %2399 }
 0x6c1   : > { %5950 = vrcp.f32 %v2400_v51 }
 0x6c4   : > { %v2406_v49 = vpop.xlane.xlu0 %2405  ;;  %v2403_v24 = vpop.xlane.xlu1 %2402 }
 0x6c5   : > { %5952 = vrcp.f32 %v2403_v24 }
 0x6c6   : > { %5954 = vrcp.f32 %v2406_v49 }
 0x6c8   : > { %v2412_v35 = vpop.xlane.xlu0 %2411  ;;  %v2409_v28 = vpop.xlane.xlu1 %2408 }
 0x6c9   : > { %5956 = vrcp.f32 %v2409_v28 }
 0x6ca   : > { %5958 = vrcp.f32 %v2412_v35 }
 0x6cb   : > { %v5951_v25 = vpop.eup %5950 }
 0x6cc   : > { %v2418_v23 = vpop.xlane.xlu0 %2417  ;;  %v2415_v34 = vpop.xlane.xlu1 %2414  ;;  %v2423_v11 = vmul.f32 %v5951_v25, %v7517_v20 }
 0x6cd   : > { %5960 = vrcp.f32 %v2415_v34 }
 0x6ce   : > { %5962 = vrcp.f32 %v2418_v23 }
 0x6cf   : > { %v5953_v48 = vpop.eup %5952 }
 0x6d0   : > { %v2421_v60 = vpop.xlane.xlu1 %2420  ;;  %v2425_v57 = vmul.f32 %v5953_v48, %v5939_v41  ;;  %v5955_v27 = vpop.eup %5954 }
 0x6d1   : > { %5964 = vrcp.f32 %v2421_v60  ;;  %v2427_v16 = vmul.f32 %v5955_v27, %v7521_v56 }
 0x6d2   : > { %v2438_v59 = vpack.c.bf16 %v2425_v57, %v2423_v11 }
 0x6d3   : > { %v5957_v62 = vpop.eup %5956 }
 0x6d4   : > { %v2429_v5 = vmul.f32 %v5957_v62, %v5941_v53  ;;  %5578 = vmatprep.mubr.msk.bf16.mxu1 %vm2349_vm0, %v2438_v59  ;;  %v5959_v52 = vpop.eup %5958 }
 0x6d5   : > { %v2431_v26 = vmul.f32 %v5959_v52, %v5943_v37 }
 0x6d6   : > { %v2439_v55 = vpack.c.bf16 %v2429_v5, %v2427_v16 }
 0x6d7   : > { %v5961_v13 = vpop.eup %5960 }
 0x6d8   : > { %v5963_v19 = vpop.eup %5962  ;;  %5579 = vmatmul.mubr.msk.bf16.vlgmr.msra.gmra.mrb[24].mxu1 %vm2349_vm0, %v2439_v55  ;;  %v2433_v10 = vmul.f32 %v5961_v13, %v5945_v0 }
 0x6d9   : > { %5587 = vmatpush3.bf16.xpose.msra.mxu1 %v7347_v2  ;;  %v2435_v17 = vmul.f32 %v5963_v19, %v5947_v43 }
 0x6da   : > { %5588 = vmatprep.subr.bf16.mxu1 %v7379_v29  ;;  %v2440_v41 = vpack.c.bf16 %v2433_v10, %v2431_v26 }
 0x6db   : > { %v5965_v20 = vpop.eup %5964 }
 0x6dc   : > { %v2437_v42 = vmul.f32 %v5965_v20, %v5949_v12  ;;  %5582 = vmatprep.mubr.msk.bf16.mxu1 %vm2349_vm0, %v2440_v41 }
 0x6de   : > { %v2441_v56 = vpack.c.bf16 %v2437_v42, %v2435_v17 }
 0x6e0   : > { %5583 = vmatmul.mubr.msk.bf16.gmra.mrb[28].mxu1 %vm2349_vm0, %v2441_v56 }
 0x6e1   : > { %5589 = vmatpush3.bf16.xpose.msra.mxu1 %v7379_v29  ;;  %5594 = vmatprep.mubr.bf16.mxu1 %v2237_v3 }
 0x6e2   : > { %5590 = vmatprep.subr.bf16.mxu1 %v7401_v8 }
 0x6e9   : > { %5591 = vmatpush3.bf16.xpose.msra.mxu1 %v7401_v8 }
 0x6ea   : > { %5592 = vmatprep.subr.bf16.mxu1 %v7425_v50 }
 0x6f1   : > { %5593 = vmatpush3.bf16.xpose.msra.mxu1 %v7425_v50 }
 0x6f2   : > { %5602 = vmatprep.subr.bf16.mxu1 %v7527_v38 }
 0x6f8   : > { %5595 = vmatmul.mubr.bf16.vlgmr.msra.gmra.mrb[32].mxu1 %v2243_v40 }
 0x6f9   : > { %5598 = vmatprep.mubr.bf16.mxu1 %v2249_v9  ;;  %5603 = vmatpush3.bf16.msra.mxu1 %v7527_v38 }
 0x6fa   : > { %5604 = vmatprep.subr.bf16.mxu1 %v7538_v7 }
 0x6fd   : > { %5605 = vmatpush3.bf16.msra.mxu1 %v7538_v7 }
 0x6fe   : > { %5606 = vmatprep.subr.bf16.mxu1 %v2253_v39 }
 0x700   : > { %5599 = vmatmul.mubr.bf16.gmra.mrb[36].mxu1 %v2255_v46 }
 0x701   : > { %5607 = vmatpush3.bf16.msra.mxu1 %v2253_v39 }
 0x702   : > { %5608 = vmatprep.subr.bf16.mxu1 %v2259_v45 }
 0x705   : > { %5609 = vmatpush3.bf16.msra.mxu1 %v2259_v45 }
 0x7ab   : > { %v7575_v54 = vpop.f32.mrb[24].mxu1 }
 0x7ac   : > { %v7577_v61 = vpop.f32.mrb[25].mxu1 }
 0x7ad   : > { %v7579_v2 = vpop.f32.mrb[26].mxu1 }
 0x7ae   : > { %v2520_v3 = vpack.c.bf16 %v7579_v2, %v7575_v54  ;;  %v7583_v21 = vpop.f32.mrb[27].mxu1  ;;  %v7669_v2 = vld [vmem:[%s7015_s28] sm:$0xff] }
 0x7af   : > { %v2519_v33 = vpack.c.bf16 %v7583_v21, %v7577_v61  ;;  %v2924_v61 = vsub.s32 1, %v7290_v22  ;;  %v7657_v21 = vld [vmem:[%s7015_s28 + $0x30] sm:$0xff] }
 0x7b3   : > { %v7587_v40 = vpop.f32.mrb[28].mxu1 }
 0x7b4   : > { %v7589_v29 = vpop.f32.mrb[29].mxu1 }
 0x7b5   : > { %v7591_v58 = vpop.f32.mrb[30].mxu1 }
 0x7b6   : > { %v2522_v1 = vpack.c.bf16 %v7591_v58, %v7587_v40  ;;  %v7595_v8 = vpop.f32.mrb[31].mxu1  ;;  %v7675_v40 = vld [vmem:[%s7015_s28 + $0x8] sm:$0xff] }
 0x7b7   : > { %v2521_v9 = vpack.c.bf16 %v7595_v8, %v7589_v29  ;;  %v7678_v58 = vrot.slane %v7675_v40, %v2924_v61 }
 0x7cb   : > { %v5596_v44 = vpop.f32.mrb[32].mxu1 }
 0x7cc   : > { %v2561_v47 = vpop.f32.mrb[33].mxu1  ;;  %v2594_v50 = vmul.f32 0.088388346, %v5596_v44 }
 0x7cd   : > { %v2592_v46 = vmul.f32 0.088388346, %v2561_v47  ;;  %v5597_v38 = vpop.f32.mrb[34].mxu1 }
 0x7ce   : > { %v2564_v53 = vpop.f32.mrb[35].mxu1  ;;  %v2595_v37 = vmul.f32 0.088388346, %v5597_v38  ;;  %v2610_v39 = vadd.f32 %v2594_v50, %v7454_v14 }
 0x7cf   : > { %v2593_v0 = vmul.f32 0.088388346, %v2564_v53  ;;  %v2608_v7 = vadd.f32 %v2592_v46, %v7459_v32 }
 0x7d0   : > { %v2611_v45 = vadd.f32 %v2595_v37, %v7464_v36  ;;  %v2622_v28 = vsel %vm2349_vm0, %v2610_v39, -inf }
 0x7d1   : > { %v2616_v43 = vsel %vm2349_vm0, %v2608_v7, -inf  ;;  %v2609_v12 = vadd.f32 %v2593_v0, %v7470_v15 }
 0x7d2   : > { %2617 = vmax.xlane.f32.xlu0 %v2616_v43  ;;  %v2625_v15 = vsel %vm2349_vm0, %v2611_v45, -inf }
 0x7d3   : > { %v5600_v31 = vpop.f32.mrb[36].mxu1  ;;  %v2619_v30 = vsel %vm2349_vm0, %v2609_v12, -inf }
 0x7d4   : > { %2620 = vmax.xlane.f32.xlu1 %v2619_v30  ;;  %v2577_v51 = vpop.f32.mrb[37].mxu1  ;;  %v2598_v49 = vmul.f32 0.088388346, %v5600_v31 }
 0x7d5   : > { %v2596_v24 = vmul.f32 0.088388346, %v2577_v51  ;;  %v5601_v35 = vpop.f32.mrb[38].mxu1 }
 0x7d6   : > { %2623 = vmax.xlane.f32.xlu0 %v2622_v28  ;;  %v2580_v32 = vpop.f32.mrb[39].mxu1  ;;  %v2599_v23 = vmul.f32 0.088388346, %v5601_v35  ;;  %v2614_v48 = vadd.f32 %v2598_v49, %v7486_v4 }
 0x7d7   : > { %v2597_v34 = vmul.f32 0.088388346, %v2580_v32  ;;  %v2612_v14 = vadd.f32 %v2596_v24, %v7481_v63 }
 0x7d8   : > { %2626 = vmax.xlane.f32.xlu1 %v2625_v15  ;;  %v2615_v11 = vadd.f32 %v2599_v23, %v7497_v18  ;;  %v2634_v57 = vsel %vm2349_vm0, %v2614_v48, -inf  ;;  %v2802_v23 = vld [vmem:[%s6994_s27 + $0x8] sm:$0xff] }
 0x7d9   : > { %v2628_v25 = vsel %vm2349_vm0, %v2612_v14, -inf  ;;  %v2613_v36 = vadd.f32 %v2597_v34, %v7492_v6  ;;  %v2818_v34 = vunpack.c.l.s8.bf16 %v2802_v23 }
 0x7da   : > { %2629 = vmax.xlane.f32.xlu0 %v2628_v25  ;;  %v2637_v27 = vsel %vm2349_vm0, %v2615_v11, -inf }
 0x7db   : > { %v2631_v60 = vsel %vm2349_vm0, %v2613_v36, -inf  ;;  %2849 = vmatprep.subr.bf16.mxu1 %v2818_v34 }
 0x7dc   : > { %2632 = vmax.xlane.f32.xlu1 %v2631_v60 }
 0x7de   : > { %2635 = vmax.xlane.f32.xlu0 %v2634_v57 }
 0x7e0   : > { %2638 = vmax.xlane.f32.xlu1 %v2637_v27 }
 0x85f   : > { %v2618_v63 = vpop.xlane.xlu0 %2617 }
 0x860   : > { %v2640_v59 = vsub.f32 %v2608_v7, %v2618_v63 }
 0x861   : > { %v2621_v62 = vpop.xlane.xlu1 %2620 }
 0x862   : > { %v2648_v16 = vmul.f32 1.442695, %v2640_v59  ;;  %v2641_v5 = vsub.f32 %v2609_v12, %v2621_v62 }
 0x863   : > { %v2624_v6 = vpop.xlane.xlu0 %2623 }
 0x864   : > { %5966 = vpow2.f32 %v2648_v16  ;;  %v2650_v4 = vmul.f32 1.442695, %v2641_v5  ;;  %v2642_v52 = vsub.f32 %v2610_v39, %v2624_v6  ;;  %v2801_v6 = vld [vmem:[%s6994_s27] sm:$0xff] }
 0x865   : > { %v2627_v55 = vpop.xlane.xlu1 %2626 }
 0x866   : > { %5968 = vpow2.f32 %v2650_v4  ;;  %v2652_v13 = vmul.f32 1.442695, %v2642_v52  ;;  %v2643_v18 = vsub.f32 %v2611_v45, %v2627_v55 }
 0x867   : > { %v2630_v19 = vpop.xlane.xlu0 %2629 }
 0x868   : > { %5970 = vpow2.f32 %v2652_v13  ;;  %v2654_v26 = vmul.f32 1.442695, %v2643_v18  ;;  %v2644_v10 = vsub.f32 %v2612_v14, %v2630_v19  ;;  %v2817_v18 = vunpack.c.l.s8.bf16 %v2801_v6 }
 0x869   : > { %v2633_v20 = vpop.xlane.xlu1 %2632 }
 0x86a   : > { %5972 = vpow2.f32 %v2654_v26  ;;  %v2656_v41 = vmul.f32 1.442695, %v2644_v10  ;;  %v2645_v17 = vsub.f32 %v2613_v36, %v2633_v20  ;;  %v2820_v26 = vunpack.c.h.s8.bf16 %v2802_v23  ;;  %v2804_v20 = vld [vmem:[%s6994_s27 + $0x18] sm:$0xff]  ;;  %v2810_v23 = vld [vmem:[%s6994_s27 + $0x48] sm:$0xff] }
 0x86b   : > { %v2636_v42 = vpop.xlane.xlu0 %2635 }
 0x86c   : > { %5974 = vpow2.f32 %v2656_v41  ;;  %v2658_v56 = vmul.f32 1.442695, %v2645_v17  ;;  %v2646_v44 = vsub.f32 %v2614_v48, %v2636_v42 }
 0x86d   : > { %v2639_v47 = vpop.xlane.xlu1 %2638 }
 0x86e   : > { %v5967_v50 = vpop.eup %5966  ;;  %5976 = vpow2.f32 %v2658_v56  ;;  %v2660_v46 = vmul.f32 1.442695, %v2646_v44  ;;  %v2647_v38 = vsub.f32 %v2615_v11, %v2639_v47  ;;  %v2819_v56 = vunpack.c.h.s8.bf16 %v2801_v6 }
 0x86f   : > { %v2664_v53 = vsel %vm2349_vm0, %v5967_v50, 0.0  ;;  %v2822_v47 = vunpack.c.l.s8.bf16 %v2804_v20 }
 0x870   : > { %v5969_v37 = vpop.eup %5968  ;;  %5978 = vpow2.f32 %v2660_v46  ;;  %v2662_v0 = vmul.f32 1.442695, %v2647_v38  ;;  %2665 = vadd.xlane.f32.xlu0 %v2664_v53 }
 0x871   : > { %v2667_v7 = vsel %vm2349_vm0, %v5969_v37, 0.0 }
 0x872   : > { %v5971_v43 = vpop.eup %5970  ;;  %5980 = vpow2.f32 %v2662_v0  ;;  %2668 = vadd.xlane.f32.xlu1 %v2667_v7  ;;  %v2824_v7 = vunpack.c.h.s8.bf16 %v2804_v20 }
 0x873   : > { %v2670_v12 = vsel %vm2349_vm0, %v5971_v43, 0.0 }
 0x874   : > { %v5973_v39 = vpop.eup %5972  ;;  %2671 = vadd.xlane.f32.xlu0 %v2670_v12 }
 0x875   : > { %v2673_v31 = vsel %vm2349_vm0, %v5973_v39, 0.0 }
 0x876   : > { %v5975_v30 = vpop.eup %5974  ;;  %2674 = vadd.xlane.f32.xlu1 %v2673_v31  ;;  %v2805_v31 = vld [vmem:[%s6994_s27 + $0x20] sm:$0xff] }
 0x877   : > { %v2676_v45 = vsel %vm2349_vm0, %v5975_v30, 0.0 }
 0x878   : > { %v5977_v51 = vpop.eup %5976  ;;  %2677 = vadd.xlane.f32.xlu0 %v2676_v45 }
 0x879   : > { %v2679_v49 = vsel %vm2349_vm0, %v5977_v51, 0.0 }
 0x87a   : > { %v5979_v24 = vpop.eup %5978  ;;  %2680 = vadd.xlane.f32.xlu1 %v2679_v49  ;;  %v2827_v49 = vunpack.c.h.s8.bf16 %v2805_v31 }
 0x87b   : > { %v2682_v35 = vsel %vm2349_vm0, %v5979_v24, 0.0 }
 0x87c   : > { %v5981_v28 = vpop.eup %5980  ;;  %2683 = vadd.xlane.f32.xlu0 %v2682_v35  ;;  %v2807_v35 = vld [vmem:[%s6994_s27 + $0x30] sm:$0xff] }
 0x87d   : > { %v2685_v32 = vsel %vm2349_vm0, %v5981_v28, 0.0  ;;  %v2831_v34 = vunpack.c.h.s8.bf16 %v2807_v35 }
 0x87e   : > { %2686 = vadd.xlane.f32.xlu1 %v2685_v32 }
 0x8fd   : > { %v2666_v15 = vpop.xlane.xlu0 %2665 }
 0x8fe   : > { %5982 = vrcp.f32 %v2666_v15  ;;  %v2834_v15 = vunpack.c.l.s8.bf16 %v2810_v23 }
 0x8ff   : > { %v2669_v14 = vpop.xlane.xlu1 %2668 }
 0x900   : > { %5984 = vrcp.f32 %v2669_v14  ;;  %v2809_v14 = vld [vmem:[%s6994_s27 + $0x40] sm:$0xff] }
 0x901   : > { %v2672_v25 = vpop.xlane.xlu0 %2671 }
 0x902   : > { %5986 = vrcp.f32 %v2672_v25  ;;  %v2833_v25 = vunpack.c.l.s8.bf16 %v2809_v14 }
 0x903   : > { %v2675_v36 = vpop.xlane.xlu1 %2674 }
 0x904   : > { %5988 = vrcp.f32 %v2675_v36  ;;  %v2836_v36 = vunpack.c.h.s8.bf16 %v2810_v23 }
 0x905   : > { %v2678_v48 = vpop.xlane.xlu0 %2677 }
 0x906   : > { %5990 = vrcp.f32 %v2678_v48  ;;  %v2812_v48 = vld [vmem:[%s6994_s27 + $0x58] sm:$0xff] }
 0x907   : > { %v2681_v60 = vpop.xlane.xlu1 %2680 }
 0x908   : > { %v5983_v11 = vpop.eup %5982  ;;  %5992 = vrcp.f32 %v2681_v60  ;;  %v2835_v60 = vunpack.c.h.s8.bf16 %v2809_v14  ;;  %v6165_v14 = vld [vmem:[#allocation2 + $0x18] sm:$0xff] }
 0x909   : > { %v2684_v57 = vpop.xlane.xlu0 %2683  ;;  %v2689_v59 = vmul.f32 %v5983_v11, %v5967_v50  ;;  %v2803_v50 = vld [vmem:[%s6994_s27 + $0x10] sm:$0xff]  ;;  %v2838_v11 = vunpack.c.l.s8.bf16 %v2812_v48 }
 0x90a   : > { %v5985_v27 = vpop.eup %5984  ;;  %5994 = vrcp.f32 %v2684_v57  ;;  %v2823_v12 = vunpack.c.h.s8.bf16 %v2803_v50  ;;  %v2811_v57 = vld [vmem:[%s6994_s27 + $0x50] sm:$0xff] }
 0x90b   : > { %v2687_v63 = vpop.xlane.xlu1 %2686  ;;  %v2691_v62 = vmul.f32 %v5985_v27, %v5969_v37  ;;  %v2821_v37 = vunpack.c.l.s8.bf16 %v2803_v50  ;;  %v2837_v27 = vunpack.c.l.s8.bf16 %v2811_v57 }
 0x90c   : > { %v5987_v16 = vpop.eup %5986  ;;  %5996 = vrcp.f32 %v2687_v63  ;;  %v2840_v63 = vunpack.c.h.s8.bf16 %v2812_v48 }
 0x90d   : > { %v2704_v5 = vpack.c.bf16 %v2691_v62, %v2689_v59  ;;  %v2693_v52 = vmul.f32 %v5987_v16, %v5971_v43  ;;  %v2806_v43 = vld [vmem:[%s6994_s27 + $0x28] sm:$0xff]  ;;  %v2839_v62 = vunpack.c.h.s8.bf16 %v2811_v57 }
 0x90e   : > { %v5989_v4 = vpop.eup %5988  ;;  %v2828_v45 = vunpack.c.h.s8.bf16 %v2806_v43  ;;  %v2814_v59 = vld [vmem:[%s6994_s27 + $0x68] sm:$0xff] }
 0x90f   : > { %v2695_v55 = vmul.f32 %v5989_v4, %v5973_v39  ;;  %5610 = vmatprep.mubr.msk.bf16.mxu1 %vm2349_vm0, %v2704_v5  ;;  %v2826_v39 = vunpack.c.l.s8.bf16 %v2806_v43  ;;  %v2842_v16 = vunpack.c.l.s8.bf16 %v2814_v59  ;;  %v2813_v5 = vld [vmem:[%s6994_s27 + $0x60] sm:$0xff]  ;;  %v2844_v4 = vunpack.c.h.s8.bf16 %v2814_v59 }
 0x910   : > { %v5991_v13 = vpop.eup %5990  ;;  %v2841_v6 = vunpack.c.l.s8.bf16 %v2813_v5 }
 0x911   : > { %v2705_v19 = vpack.c.bf16 %v2695_v55, %v2693_v52  ;;  %v2697_v41 = vmul.f32 %v5991_v13, %v5975_v30  ;;  %v2825_v30 = vunpack.c.l.s8.bf16 %v2805_v31  ;;  %v2816_v52 = vld [vmem:[%s6994_s27 + $0x78] sm:$0xff]  ;;  %v2843_v55 = vunpack.c.h.s8.bf16 %v2813_v5 }
 0x912   : > { %v5993_v10 = vpop.eup %5992  ;;  %v2846_v13 = vunpack.c.l.s8.bf16 %v2816_v52 }
 0x913   : > { %5611 = vmatmul.mubr.msk.bf16.vlgmr.msra.gmra.mrb[40].mxu1 %vm2349_vm0, %v2705_v19  ;;  %v2699_v17 = vmul.f32 %v5993_v10, %v5977_v51  ;;  %v2808_v51 = vld [vmem:[%s6994_s27 + $0x38] sm:$0xff] }
 0x914   : > { %v5995_v42 = vpop.eup %5994  ;;  %2850 = vmatpush1.bf16.msra.mxu1 %v2817_v18  ;;  %v2832_v32 = vunpack.c.h.s8.bf16 %v2808_v51  ;;  %v2815_v18 = vld [vmem:[%s6994_s27 + $0x70] sm:$0xff]  ;;  %s9746_s27 = sld [smem:[#allocation25_spill]] }
 0x915   : > { %v2706_v44 = vpack.c.bf16 %v2699_v17, %v2697_v41  ;;  %2851 = vmatprep.subr.bf16.mxu1 %v2820_v26  ;;  %v2701_v38 = vmul.f32 %v5995_v42, %v5979_v24  ;;  %v2830_v24 = vunpack.c.l.s8.bf16 %v2808_v51  ;;  %v2845_v19 = vunpack.c.l.s8.bf16 %v2815_v18  ;;  %v6162_v51 = vld [vmem:[#allocation2] sm:$0xff] }
 0x916   : > { %v5997_v46 = vpop.eup %5996  ;;  %v2848_v26 = vunpack.c.h.s8.bf16 %v2816_v52  ;;  %v2847_v10 = vunpack.c.h.s8.bf16 %v2815_v18  ;;  %v6168_v18 = vld [vmem:[#allocation2 + $0x30] sm:$0xff] }
 0x917   : > { %5614 = vmatprep.mubr.msk.bf16.mxu1 %vm2349_vm0, %v2706_v44  ;;  %v2703_v53 = vmul.f32 %v5997_v46, %v5981_v28  ;;  %v2829_v28 = vunpack.c.l.s8.bf16 %v2807_v35  ;;  %v6163_v35 = vld [vmem:[#allocation2 + $0x8] sm:$0xff] }
 0x918   : > { %2852 = vmatpush1.bf16.msra.mxu1 %v2819_v56 }
 0x919   : > { %v2707_v0 = vpack.c.bf16 %v2703_v53, %v2701_v38  ;;  %2853 = vmatprep.subr.bf16.mxu1 %v2822_v47 }
 0x91a   : > { %p5457_p3 = scmp.ne.s32.totalorder %s9746_s27, 1 }
 0x91b   : > { %5615 = vmatmul.mubr.msk.bf16.gmra.mrb[44].mxu1 %vm2349_vm0, %v2707_v0  ;;  %v7663_v0 = vld [vmem:[%s7015_s28 + $0x38] sm:$0xff]  ;;  %s9748_s1 = sld [smem:[#allocation136_spill]] (!%p5457_p3) }
 0x91c   : > { %2854 = vmatpush1.bf16.msra.mxu1 %v2821_v37  ;;  %v7666_v54 = vrot.slane %v7663_v0, %v2924_v61 }
 0x91d   : > { %2855 = vmatprep.subr.bf16.mxu1 %v2824_v7 }
 0x920   : > { %2856 = vmatpush1.bf16.msra.mxu1 %v2823_v12 }
 0x921   : > { %2857 = vmatprep.subr.bf16.mxu1 %v2826_v39 }
 0x924   : > { %2858 = vmatpush1.bf16.msra.mxu1 %v2825_v30 }
 0x925   : > { %2859 = vmatprep.subr.bf16.mxu1 %v2828_v45 }
 0x928   : > { %2860 = vmatpush1.bf16.msra.mxu1 %v2827_v49 }
 0x929   : > { %2861 = vmatprep.subr.bf16.mxu1 %v2830_v24 }
 0x92c   : > { %2862 = vmatpush1.bf16.msra.mxu1 %v2829_v28 }
 0x92d   : > { %2863 = vmatprep.subr.bf16.mxu1 %v2832_v32  ;;  %v6164_v32 = vld [vmem:[#allocation2 + $0x10] sm:$0xff] }
 0x930   : > { %2864 = vmatpush1.bf16.msra.mxu1 %v2831_v34 }
 0x931   : > { %2865 = vmatprep.subr.bf16.mxu1 %v2834_v15 }
 0x934   : > { %2866 = vmatpush1.bf16.msra.mxu1 %v2833_v25 }
 0x935   : > { %2867 = vmatprep.subr.bf16.mxu1 %v2836_v36 }
 0x938   : > { %2868 = vmatpush1.bf16.msra.mxu1 %v2835_v60 }
 0x939   : > { %2869 = vmatprep.subr.bf16.mxu1 %v2838_v11 }
 0x93c   : > { %2870 = vmatpush1.bf16.msra.mxu1 %v2837_v27 }
 0x93d   : > { %2871 = vmatprep.subr.bf16.mxu1 %v2840_v63 }
 0x940   : > { %2872 = vmatpush1.bf16.msra.mxu1 %v2839_v62 }
 0x941   : > { %2873 = vmatprep.subr.bf16.mxu1 %v2842_v16 }
 0x944   : > { %2874 = vmatpush1.bf16.msra.mxu1 %v2841_v6  ;;  %v6166_v6 = vld [vmem:[#allocation2 + $0x20] sm:$0xff] }
 0x945   : > { %2875 = vmatprep.subr.bf16.mxu1 %v2844_v4 }
 0x948   : > { %2876 = vmatpush1.bf16.msra.mxu1 %v2843_v55  ;;  %v6167_v55 = vld [vmem:[#allocation2 + $0x28] sm:$0xff] }
 0x949   : > { %2877 = vmatprep.subr.bf16.mxu1 %v2846_v13 }
 0x94c   : > { %2878 = vmatpush1.bf16.msra.mxu1 %v2845_v19 }
 0x94d   : > { %2879 = vmatprep.subr.bf16.mxu1 %v2848_v26 }
 0x950   : > { %2880 = vmatpush1.bf16.msra.mxu1 %v2847_v10 }
 0x9e6   : > { %v5612_v20 = vpop.f32.mrb[40].mxu1 }
 0x9e7   : > { %v2754_v41 = vpop.f32.mrb[41].mxu1 }
 0x9e8   : > { %v5613_v17 = vpop.f32.mrb[42].mxu1 }
 0x9e9   : > { %v2786_v42 = vpack.c.bf16 %v5613_v17, %v5612_v20  ;;  %v2757_v56 = vpop.f32.mrb[43].mxu1  ;;  %v6169_v20 = vld [vmem:[#allocation2 + $0x38] sm:$0xff] }
 0x9ea   : > { %v2785_v44 = vpack.c.bf16 %v2757_v56, %v2754_v41 }
 0x9ec   : > { %2881 = vmatprep.mubr.bf16.mxu1 %v2785_v44 }
 0x9ed   : > { %2882 = vmatmul.mubr.bf16.vlgmr.msra.gmra.mrb[48].mxu1 %v2519_v33  ;;  %v7660_v33 = vrot.slane %v7657_v21, %v2924_v61 }
 0x9ee   : > { %v5616_v47 = vpop.f32.mrb[44].mxu1  ;;  %2891 = vmatprep.mubr.bf16.mxu1 %v2786_v42 }
 0x9ef   : > { %v2770_v50 = vpop.f32.mrb[45].mxu1 }
 0x9f0   : > { %v5617_v46 = vpop.f32.mrb[46].mxu1 }
 0x9f1   : > { %v2788_v38 = vpack.c.bf16 %v5617_v46, %v5616_v47  ;;  %v2773_v53 = vpop.f32.mrb[47].mxu1 }
 0x9f2   : > { %v2787_v37 = vpack.c.bf16 %v2773_v53, %v2770_v50 }
 0x9f5   : > { %2892 = vmatmul.mubr.bf16.gmra.mrb[52].mxu1 %v2520_v3  ;;  %v7672_v3 = vrot.slane %v7669_v2, %v2924_v61 }
 0x9f6   : > { %2901 = vmatprep.mubr.bf16.mxu1 %v2787_v37 }
 0x9fd   : > { %2902 = vmatmul.mubr.bf16.gmra.mrb[56].mxu1 %v2521_v9 }
 0x9fe   : > { %2911 = vmatprep.mubr.bf16.mxu1 %v2788_v38 }
 0xa05   : > { %2912 = vmatmul.mubr.bf16.gmra.mrb[60].mxu1 %v2522_v1 }
 0xac0   : > { %v2883_v29 = vpop.f32.mrb[48].mxu1 }
 0xac1   : > { %v2930_v1 = vmul.f32 %v7660_v33, %v2883_v29  ;;  %v2885_v8 = vpop.f32.mrb[49].mxu1  ;;  %v6170_v29 = vld [vmem:[#allocation2 + $0x40] sm:$0xff] }
 0xac2   : > { %v2931_v9 = vmul.f32 %v7666_v54, %v2885_v8  ;;  %v2887_v7 = vpop.f32.mrb[50].mxu1 }
 0xac3   : > { %v2954_v43 = vadd.f32 %v7672_v3, %v2930_v1  ;;  %v2932_v12 = vmul.f32 %v7660_v33, %v2887_v7  ;;  %v2889_v39 = vpop.f32.mrb[51].mxu1 }
 0xac4   : > { %v2955_v31 = vadd.f32 %v7678_v58, %v2931_v9  ;;  %v2933_v30 = vmul.f32 %v7666_v54, %v2889_v39  ;;  %v6171_v9 = vld [vmem:[#allocation2 + $0x48] sm:$0xff] }
 0xac5   : > { %v2956_v45 = vadd.f32 %v7672_v3, %v2932_v12  ;;  %v7687_v49 = vadd.f32 %v6162_v51, %v2954_v43  ;;  %v6172_v43 = vld [vmem:[#allocation2 + $0x50] sm:$0xff] }
 0xac6   : > { %v2957_v24 = vadd.f32 %v7678_v58, %v2933_v30  ;;  %v7690_v28 = vadd.f32 %v6163_v35, %v2955_v31  ;;  %v6173_v30 = vld [vmem:[#allocation2 + $0x58] sm:$0xff] }
 0xac7   : > { %v7692_v23 = vadd.f32 %v6164_v32, %v2956_v45 }
 0xac8   : > { %v2893_v34 = vpop.f32.mrb[52].mxu1  ;;  %v2986_v15 = vadd.f32 %v7690_v28, %v7687_v49  ;;  %v7696_v25 = vadd.f32 %v6165_v14, %v2957_v24 }
 0xac9   : > { %v2934_v36 = vmul.f32 %v7660_v33, %v2893_v34  ;;  %v2895_v48 = vpop.f32.mrb[53].mxu1 }
 0xaca   : > { %v2935_v60 = vmul.f32 %v7666_v54, %v2895_v48  ;;  %2987 = vadd.xlane.f32.xlu0 %v2986_v15  ;;  %v2897_v11 = vpop.f32.mrb[54].mxu1  ;;  %v2989_v57 = vadd.f32 %v7696_v25, %v7692_v23 }
 0xacb   : > { %v2958_v27 = vadd.f32 %v7672_v3, %v2934_v36  ;;  %v2936_v63 = vmul.f32 %v7660_v33, %v2897_v11  ;;  %v2899_v59 = vpop.f32.mrb[55].mxu1 }
 0xacc   : > { %v2959_v62 = vadd.f32 %v7678_v58, %v2935_v60  ;;  %v2937_v16 = vmul.f32 %v7666_v54, %v2899_v59  ;;  %2990 = vadd.xlane.f32.xlu1 %v2989_v57  ;;  %v6174_v57 = vld [vmem:[#allocation2 + $0x60] sm:$0xff]  ;;  %v6175_v59 = vld [vmem:[#allocation2 + $0x68] sm:$0xff] }
 0xacd   : > { %v2960_v5 = vadd.f32 %v7672_v3, %v2936_v63  ;;  %v7707_v4 = vadd.f32 %v6166_v6, %v2958_v27 }
 0xace   : > { %v2961_v52 = vadd.f32 %v7678_v58, %v2937_v16  ;;  %v7710_v13 = vadd.f32 %v6167_v55, %v2959_v62  ;;  %v3171_v55 = vld [vmem:[%s7000_s30] sm:$0xff] }
 0xacf   : > { %v7712_v19 = vadd.f32 %v6168_v18, %v2960_v5  ;;  %v6177_v5 = vld [vmem:[#allocation2 + $0x78] sm:$0xff] }
 0xad0   : > { %v2903_v26 = vpop.f32.mrb[56].mxu1  ;;  %v2992_v10 = vadd.f32 %v7710_v13, %v7707_v4  ;;  %v7716_v41 = vadd.f32 %v6169_v20, %v2961_v52  ;;  %v3174_v52 = vld [vmem:[%s7000_s30 + $0x18] sm:$0xff]  ;;  %v3173_v20 = vld [vmem:[%s7000_s30 + $0x10] sm:$0xff] }
 0xad1   : > { %v2938_v17 = vmul.f32 %v7660_v33, %v2903_v26  ;;  %v2905_v42 = vpop.f32.mrb[57].mxu1  ;;  %v3206_v26 = vunpack.c.l.s8.bf16 %v3174_v52 }
 0xad2   : > { %v2939_v56 = vmul.f32 %v7666_v54, %v2905_v42  ;;  %2993 = vadd.xlane.f32.xlu0 %v2992_v10  ;;  %v2907_v44 = vpop.f32.mrb[58].mxu1  ;;  %v2995_v47 = vadd.f32 %v7716_v41, %v7712_v19  ;;  %v3203_v10 = vunpack.c.l.s8.bf16 %v3171_v55  ;;  %v3205_v42 = vunpack.c.l.s8.bf16 %v3173_v20 }
 0xad3   : > { %v2962_v50 = vadd.f32 %v7672_v3, %v2938_v17  ;;  %v2940_v46 = vmul.f32 %v7660_v33, %v2907_v44  ;;  %v2909_v38 = vpop.f32.mrb[59].mxu1  ;;  %v3176_v44 = vld [vmem:[%s7000_s30 + $0x28] sm:$0xff]  ;;  %3340 = vmatprep.subr.bf16.mxu1 %v3206_v26  ;;  %v3190_v26 = vld [vmem:[%s7000_s30 + $0x98] sm:$0xff] }
 0xad4   : > { %v2963_v53 = vadd.f32 %v7678_v58, %v2939_v56  ;;  %v2941_v37 = vmul.f32 %v7666_v54, %v2909_v38  ;;  %2996 = vadd.xlane.f32.xlu1 %v2995_v47  ;;  %v3210_v56 = vunpack.c.h.s8.bf16 %v3174_v52  ;;  %v3178_v47 = vld [vmem:[%s7000_s30 + $0x38] sm:$0xff]  ;;  %3341 = vmatpush1.bf16.msra.mxu1 %v3205_v42  ;;  %v3212_v38 = vunpack.c.l.s8.bf16 %v3176_v44 }
 0xad5   : > { %v2964_v61 = vadd.f32 %v7672_v3, %v2940_v46  ;;  %v7727_v1 = vadd.f32 %v6170_v29, %v2962_v50  ;;  %v3207_v50 = vunpack.c.h.s8.bf16 %v3171_v55  ;;  %v3209_v46 = vunpack.c.h.s8.bf16 %v3173_v20 }
 0xad6   : > { %v2965_v8 = vadd.f32 %v7678_v58, %v2941_v37  ;;  %v7730_v7 = vadd.f32 %v6171_v9, %v2963_v53  ;;  %3342 = vmatprep.subr.bf16.mxu1 %v3210_v56  ;;  %v3214_v53 = vunpack.c.l.s8.bf16 %v3178_v47  ;;  %v3175_v37 = vld [vmem:[%s7000_s30 + $0x20] sm:$0xff]  ;;  %v3216_v9 = vunpack.c.h.s8.bf16 %v3176_v44  ;;  %v3189_v44 = vld [vmem:[%s7000_s30 + $0x90] sm:$0xff] }
 0xad7   : > { %v7732_v12 = vadd.f32 %v6172_v43, %v2964_v61  ;;  %v3177_v61 = vld [vmem:[%s7000_s30 + $0x30] sm:$0xff]  ;;  %v3211_v29 = vunpack.c.l.s8.bf16 %v3175_v37  ;;  %v3218_v43 = vunpack.c.h.s8.bf16 %v3178_v47  ;;  %v3238_v42 = vunpack.c.l.s8.bf16 %v3190_v26  ;;  %v3187_v56 = vld [vmem:[%s7000_s30 + $0x80] sm:$0xff] }
 0xad8   : > { %v2913_v39 = vpop.f32.mrb[60].mxu1  ;;  %v2998_v31 = vadd.f32 %v7730_v7, %v7727_v1  ;;  %v7736_v45 = vadd.f32 %v6173_v30, %v2965_v8  ;;  %3343 = vmatpush1.bf16.msra.mxu1 %v3209_v46  ;;  %v3213_v8 = vunpack.c.l.s8.bf16 %v3177_v61  ;;  %v3215_v30 = vunpack.c.h.s8.bf16 %v3175_v37 }
 0xad9   : > { %v2942_v51 = vmul.f32 %v7660_v33, %v2913_v39  ;;  %v2915_v24 = vpop.f32.mrb[61].mxu1  ;;  %3344 = vmatprep.subr.bf16.mxu1 %v3214_v53  ;;  %v3180_v39 = vld [vmem:[%s7000_s30 + $0x48] sm:$0xff]  ;;  %v3235_v47 = vunpack.c.l.s8.bf16 %v3187_v56  ;;  %v3239_v53 = vunpack.c.h.s8.bf16 %v3187_v56  ;;  %v3241_v37 = vunpack.c.h.s8.bf16 %v3189_v44 }
 0xada   : > { %v2943_v35 = vmul.f32 %v7666_v54, %v2915_v24  ;;  %2999 = vadd.xlane.f32.xlu0 %v2998_v31  ;;  %v2917_v32 = vpop.f32.mrb[62].mxu1  ;;  %v3001_v34 = vadd.f32 %v7736_v45, %v7732_v12  ;;  %v3182_v31 = vld [vmem:[%s7000_s30 + $0x58] sm:$0xff]  ;;  %v3220_v24 = vunpack.c.l.s8.bf16 %v3180_v39 }
 0xadb   : > { %v2966_v15 = vadd.f32 %v7672_v3, %v2942_v51  ;;  %v2944_v14 = vmul.f32 %v7660_v33, %v2917_v32  ;;  %v2919_v36 = vpop.f32.mrb[63].mxu1  ;;  %v6176_v33 = vld [vmem:[#allocation2 + $0x70] sm:$0xff]  ;;  %v3217_v51 = vunpack.c.h.s8.bf16 %v3177_v61  ;;  %v3179_v32 = vld [vmem:[%s7000_s30 + $0x40] sm:$0xff] }
 0xadc   : > { %v2967_v48 = vadd.f32 %v7678_v58, %v2943_v35  ;;  %v2945_v60 = vmul.f32 %v7666_v54, %v2919_v36  ;;  %3002 = vadd.xlane.f32.xlu1 %v3001_v34  ;;  %3345 = vmatpush1.bf16.msra.mxu1 %v3213_v8  ;;  %v3222_v35 = vunpack.c.l.s8.bf16 %v3182_v31  ;;  %v3181_v34 = vld [vmem:[%s7000_s30 + $0x50] sm:$0xff]  ;;  %v3224_v36 = vunpack.c.h.s8.bf16 %v3180_v39 }
 0xadd   : > { %v2968_v11 = vadd.f32 %v7672_v3, %v2944_v14  ;;  %v7747_v27 = vadd.f32 %v6174_v57, %v2966_v15  ;;  %3346 = vmatprep.subr.bf16.mxu1 %v3218_v43  ;;  %v3219_v15 = vunpack.c.l.s8.bf16 %v3179_v32  ;;  %v3221_v14 = vunpack.c.l.s8.bf16 %v3181_v34 }
 0xade   : > { %v2969_v63 = vadd.f32 %v7678_v58, %v2945_v60  ;;  %v7750_v62 = vadd.f32 %v6175_v59, %v2967_v48  ;;  %v3172_v58 = vld [vmem:[%s7000_s30 + $0x8] sm:$0xff]  ;;  %v3226_v48 = vunpack.c.h.s8.bf16 %v3182_v31  ;;  %v3223_v57 = vunpack.c.h.s8.bf16 %v3179_v32 }
 0xadf   : > { %v7752_v16 = vadd.f32 %v6176_v33, %v2968_v11  ;;  %v3204_v18 = vunpack.c.l.s8.bf16 %v3172_v58  ;;  %v3208_v17 = vunpack.c.h.s8.bf16 %v3172_v58  ;;  %v3184_v60 = vld [vmem:[%s7000_s30 + $0x68] sm:$0xff]  ;;  %v3186_v11 = vld [vmem:[%s7000_s30 + $0x78] sm:$0xff] }
 0xae0   : > { %v3004_v54 = vadd.f32 %v7750_v62, %v7747_v27  ;;  %v7756_v3 = vadd.f32 %v6177_v5, %v2969_v63  ;;  %3347 = vmatpush1.bf16.msra.mxu1 %v3217_v51  ;;  %v3225_v63 = vunpack.c.h.s8.bf16 %v3181_v34  ;;  %v3228_v59 = vunpack.c.l.s8.bf16 %v3184_v60  ;;  %v3185_v5 = vld [vmem:[%s7000_s30 + $0x70] sm:$0xff] }
 0xae1   : > { %3267 = vmatprep.subr.bf16.mxu0 %v3204_v18  ;;  %3348 = vmatprep.subr.bf16.mxu1 %v3222_v35  ;;  %v3230_v33 = vunpack.c.l.s8.bf16 %v3186_v11  ;;  %v3229_v58 = vunpack.c.l.s8.bf16 %v3185_v5  ;;  %v3232_v52 = vunpack.c.h.s8.bf16 %v3184_v60  ;;  %v3234_v55 = vunpack.c.h.s8.bf16 %v3186_v11  ;;  %v3188_v18 = vld [vmem:[%s7000_s30 + $0x88] sm:$0xff] }
 0xae2   : > { %3005 = vadd.xlane.f32.xlu0 %v3004_v54  ;;  %v3007_v6 = vadd.f32 %v7756_v3, %v7752_v16  ;;  %3268 = vmatpush1.bf16.msra.mxu0 %v3203_v10  ;;  %v3183_v54 = vld [vmem:[%s7000_s30 + $0x60] sm:$0xff]  ;;  %v3233_v20 = vunpack.c.h.s8.bf16 %v3185_v5  ;;  %v3240_v46 = vunpack.c.h.s8.bf16 %v3188_v18 }
 0xae3   : > { %3269 = vmatprep.subr.bf16.mxu0 %v3208_v17  ;;  %v3231_v10 = vunpack.c.h.s8.bf16 %v3183_v54  ;;  %v3236_v17 = vunpack.c.l.s8.bf16 %v3188_v18 }
 0xae4   : > { %3008 = vadd.xlane.f32.xlu1 %v3007_v6  ;;  %3349 = vmatpush1.bf16.msra.mxu1 %v3221_v14  ;;  %v3227_v6 = vunpack.c.l.s8.bf16 %v3183_v54 }
 0xae5   : > { %3350 = vmatprep.subr.bf16.mxu1 %v3226_v48 }
 0xae6   : > { %3270 = vmatpush1.bf16.msra.mxu0 %v3207_v50  ;;  %v3237_v50 = vunpack.c.l.s8.bf16 %v3189_v44 }
 0xae7   : > { %3271 = vmatprep.subr.bf16.mxu0 %v3212_v38  ;;  %v3242_v38 = vunpack.c.h.s8.bf16 %v3190_v26  ;;  %v3192_v26 = vld [vmem:[%s7000_s30 + $0xa8] sm:$0xff] }
 0xae8   : > { %3351 = vmatpush1.bf16.msra.mxu1 %v3225_v63 }
 0xae9   : > { %3352 = vmatprep.subr.bf16.mxu1 %v3230_v33 }
 0xaea   : > { %3272 = vmatpush1.bf16.msra.mxu0 %v3211_v29 }
 0xaeb   : > { %3273 = vmatprep.subr.bf16.mxu0 %v3216_v9 }
 0xaec   : > { %3353 = vmatpush1.bf16.msra.mxu1 %v3229_v58 }
 0xaed   : > { %3354 = vmatprep.subr.bf16.mxu1 %v3234_v55 }
 0xaee   : > { %3274 = vmatpush1.bf16.msra.mxu0 %v3215_v30 }
 0xaef   : > { %3275 = vmatprep.subr.bf16.mxu0 %v3220_v24 }
 0xaf0   : > { %3355 = vmatpush1.bf16.msra.mxu1 %v3233_v20 }
 0xaf1   : > { %3356 = vmatprep.subr.bf16.mxu1 %v3238_v42  ;;  %v3193_v42 = vld [vmem:[%s7000_s30 + $0xb0] sm:$0xff] }
 0xaf2   : > { %3276 = vmatpush1.bf16.msra.mxu0 %v3219_v15 }
 0xaf3   : > { %3277 = vmatprep.subr.bf16.mxu0 %v3224_v36 }
 0xaf4   : > { %3357 = vmatpush1.bf16.msra.mxu1 %v3237_v50 }
 0xaf5   : > { %3358 = vmatprep.subr.bf16.mxu1 %v3242_v38 }
 0xaf6   : > { %3278 = vmatpush1.bf16.msra.mxu0 %v3223_v57 }
 0xaf7   : > { %3279 = vmatprep.subr.bf16.mxu0 %v3228_v59 }
 0xaf8   : > { %3359 = vmatpush1.bf16.msra.mxu1 %v3241_v37 }
 0xafa   : > { %3280 = vmatpush1.bf16.msra.mxu0 %v3227_v6 }
 0xafb   : > { %3281 = vmatprep.subr.bf16.mxu0 %v3232_v52 }
 0xafe   : > { %3282 = vmatpush1.bf16.msra.mxu0 %v3231_v10 }
 0xaff   : > { %3283 = vmatprep.subr.bf16.mxu0 %v3236_v17  ;;  %v3191_v17 = vld [vmem:[%s7000_s30 + $0xa0] sm:$0xff] }
 0xb00   : > { %v3243_v44 = vunpack.c.l.s8.bf16 %v3191_v17 }
 0xb02   : > { %3284 = vmatpush1.bf16.msra.mxu0 %v3235_v47  ;;  %v3245_v47 = vunpack.c.l.s8.bf16 %v3193_v42 }
 0xb03   : > { %3285 = vmatprep.subr.bf16.mxu0 %v3240_v46 }
 0xb06   : > { %3286 = vmatpush1.bf16.msra.mxu0 %v3239_v53 }
 0xb57   : > { %v2988_v61 = vpop.xlane.xlu0 %2987 }
 0xb58   : > { %v3011_v29 = vmul.f32 0.00390625, %v2988_v61 }
 0xb59   : > { %v2991_v8 = vpop.xlane.xlu1 %2990 }
 0xb5a   : > { %v7781_v9 = vsub.f32 %v7687_v49, %v3011_v29  ;;  %v7784_v43 = vsub.f32 %v7690_v28, %v3011_v29  ;;  %v3012_v39 = vmul.f32 0.00390625, %v2991_v8  ;;  %v3248_v29 = vunpack.c.h.s8.bf16 %v3192_v26 }
 0xb5c   : > { %v7787_v31 = vsub.f32 %v7692_v23, %v3012_v39  ;;  %v7790_v30 = vsub.f32 %v7696_v25, %v3012_v39  ;;  %v3035_v51 = vmul.f32 %v7781_v9, %v7781_v9  ;;  %v3036_v24 = vmul.f32 %v7784_v43, %v7784_v43 }
 0xb5d   : > { %v3247_v39 = vunpack.c.h.s8.bf16 %v3191_v17 }
 0xb5e   : > { %v3051_v35 = vadd.f32 %v3036_v24, %v3035_v51  ;;  %v3037_v49 = vmul.f32 %v7787_v31, %v7787_v31  ;;  %v3038_v28 = vmul.f32 %v7790_v30, %v7790_v30  ;;  %v3249_v51 = vunpack.c.h.s8.bf16 %v3193_v42  ;;  %v7873_v42 = vld [vmem:[%s7002_s26 + $0x8] sm:$0xff] }
 0xb5f   : > { %v2994_v32 = vpop.xlane.xlu0 %2993 }
 0xb60   : > { %v3013_v34 = vmul.f32 0.00390625, %v2994_v32  ;;  %3052 = vadd.xlane.f32.xlu0 %v3051_v35  ;;  %v3054_v23 = vadd.f32 %v3038_v28, %v3037_v49  ;;  %v3196_v49 = vld [vmem:[%s7000_s30 + $0xc8] sm:$0xff]  ;;  %v3198_v28 = vld [vmem:[%s7000_s30 + $0xd8] sm:$0xff] }
 0xb61   : > { %v2997_v15 = vpop.xlane.xlu1 %2996 }
 0xb62   : > { %v7801_v25 = vsub.f32 %v7707_v4, %v3013_v34  ;;  %v7804_v14 = vsub.f32 %v7710_v13, %v3013_v34  ;;  %v3014_v36 = vmul.f32 0.00390625, %v2997_v15  ;;  %3055 = vadd.xlane.f32.xlu1 %v3054_v23  ;;  %v3195_v23 = vld [vmem:[%s7000_s30 + $0xc0] sm:$0xff]  ;;  %v3197_v15 = vld [vmem:[%s7000_s30 + $0xd0] sm:$0xff] }
 0xb64   : > { %v7807_v48 = vsub.f32 %v7712_v19, %v3014_v36  ;;  %v7810_v60 = vsub.f32 %v7716_v41, %v3014_v36  ;;  %v3039_v11 = vmul.f32 %v7801_v25, %v7801_v25  ;;  %v3040_v57 = vmul.f32 %v7804_v14, %v7804_v14 }
 0xb65   : > { %v3254_v36 = vunpack.c.l.s8.bf16 %v3198_v28 }
 0xb66   : > { %v3057_v63 = vadd.f32 %v3040_v57, %v3039_v11  ;;  %v3041_v4 = vmul.f32 %v7807_v48, %v7807_v48  ;;  %v3042_v13 = vmul.f32 %v7810_v60, %v7810_v60  ;;  %v3251_v11 = vunpack.c.l.s8.bf16 %v3195_v23 }
 0xb67   : > { %v3000_v19 = vpop.xlane.xlu0 %2999  ;;  %v3253_v57 = vunpack.c.l.s8.bf16 %v3197_v15 }
 0xb68   : > { %v3015_v59 = vmul.f32 0.00390625, %v3000_v19  ;;  %3058 = vadd.xlane.f32.xlu0 %v3057_v63  ;;  %v3060_v41 = vadd.f32 %v3042_v13, %v3041_v4  ;;  %v3256_v4 = vunpack.c.h.s8.bf16 %v3196_v49  ;;  %v3258_v13 = vunpack.c.h.s8.bf16 %v3198_v28 }
 0xb69   : > { %v3003_v33 = vpop.xlane.xlu1 %3002  ;;  %v3255_v19 = vunpack.c.h.s8.bf16 %v3195_v23 }
 0xb6a   : > { %v7821_v54 = vsub.f32 %v7727_v1, %v3015_v59  ;;  %v7824_v5 = vsub.f32 %v7730_v7, %v3015_v59  ;;  %v3016_v6 = vmul.f32 0.00390625, %v3003_v33  ;;  %3061 = vadd.xlane.f32.xlu1 %v3060_v41  ;;  %v3194_v1 = vld [vmem:[%s7000_s30 + $0xb8] sm:$0xff]  ;;  %v3257_v59 = vunpack.c.h.s8.bf16 %v3197_v15  ;;  %v3200_v41 = vld [vmem:[%s7000_s30 + $0xe8] sm:$0xff] }
 0xb6b   : > { %v3246_v56 = vunpack.c.l.s8.bf16 %v3194_v1  ;;  %v3250_v8 = vunpack.c.h.s8.bf16 %v3194_v1  ;;  %v3202_v33 = vld [vmem:[%s7000_s30 + $0xf8] sm:$0xff] }
 0xb6c   : > { %v7827_v58 = vsub.f32 %v7732_v12, %v3016_v6  ;;  %v7830_v52 = vsub.f32 %v7736_v45, %v3016_v6  ;;  %v3043_v55 = vmul.f32 %v7821_v54, %v7821_v54  ;;  %v3044_v18 = vmul.f32 %v7824_v5, %v7824_v5 }
 0xb6d   : > { %v3244_v12 = vunpack.c.l.s8.bf16 %v3192_v26  ;;  %3360 = vmatprep.subr.bf16.mxu1 %v3246_v56  ;;  %v3260_v6 = vunpack.c.l.s8.bf16 %v3200_v41  ;;  %v3201_v26 = vld [vmem:[%s7000_s30 + $0xf0] sm:$0xff] }
 0xb6e   : > { %v3063_v10 = vadd.f32 %v3044_v18, %v3043_v55  ;;  %v3045_v7 = vmul.f32 %v7827_v58, %v7827_v58  ;;  %v3046_v20 = vmul.f32 %v7830_v52, %v7830_v52  ;;  %3361 = vmatpush1.bf16.msra.mxu1 %v3245_v47  ;;  %v3262_v55 = vunpack.c.l.s8.bf16 %v3202_v33  ;;  %v3199_v18 = vld [vmem:[%s7000_s30 + $0xe0] sm:$0xff] }
 0xb6f   : > { %v3006_v45 = vpop.xlane.xlu0 %3005  ;;  %3287 = vmatprep.subr.bf16.mxu0 %v3244_v12  ;;  %3362 = vmatprep.subr.bf16.mxu1 %v3250_v8  ;;  %v3259_v1 = vunpack.c.l.s8.bf16 %v3199_v18  ;;  %v3263_v12 = vunpack.c.h.s8.bf16 %v3199_v18  ;;  %v3265_v17 = vunpack.c.h.s8.bf16 %v3201_v26  ;;  %v3117_v8 = vsub.s32 4, %v7290_v22 }
 0xb70   : > { %v3017_v50 = vmul.f32 0.00390625, %v3006_v45  ;;  %3064 = vadd.xlane.f32.xlu0 %v3063_v10  ;;  %v3066_v46 = vadd.f32 %v3046_v20, %v3045_v7  ;;  %3288 = vmatpush1.bf16.msra.mxu0 %v3243_v44  ;;  %v3261_v10 = vunpack.c.l.s8.bf16 %v3201_v26  ;;  %v3264_v7 = vunpack.c.h.s8.bf16 %v3200_v41 }
 0xb71   : > { %v3009_v38 = vpop.xlane.xlu1 %3008  ;;  %3289 = vmatprep.subr.bf16.mxu0 %v3248_v29  ;;  %v3266_v20 = vunpack.c.h.s8.bf16 %v3202_v33  ;;  %v4422_v45 = vunpack.c.l.s8.bf16 %v7873_v42  ;;  %v7879_v28 = vrot.slane %v7669_v2, %v3117_v8 }
 0xb72   : > { %v7845_v53 = vsub.f32 %v7747_v27, %v3017_v50  ;;  %v7848_v37 = vsub.f32 %v7750_v62, %v3017_v50  ;;  %v3018_v61 = vmul.f32 0.00390625, %v3009_v38  ;;  %3067 = vadd.xlane.f32.xlu1 %v3066_v46  ;;  %3363 = vmatpush1.bf16.msra.mxu1 %v3249_v51 }
 0xb73   : > { %3364 = vmatprep.subr.bf16.mxu1 %v3254_v36 }
 0xb74   : > { %v7851_v24 = vsub.f32 %v7752_v16, %v3018_v61  ;;  %v7854_v27 = vsub.f32 %v7756_v3, %v3018_v61  ;;  %v3047_v62 = vmul.f32 %v7845_v53, %v7845_v53  ;;  %v3048_v35 = vmul.f32 %v7848_v37, %v7848_v37  ;;  %3290 = vmatpush1.bf16.msra.mxu0 %v3247_v39 }
 0xb75   : > { %v3252_v3 = vunpack.c.l.s8.bf16 %v3196_v49  ;;  %v3141_v49 = vsub.s32 5, %v7290_v22 }
 0xb76   : > { %v3069_v32 = vadd.f32 %v3048_v35, %v3047_v62  ;;  %v3049_v34 = vmul.f32 %v7851_v24, %v7851_v24  ;;  %v3050_v16 = vmul.f32 %v7854_v27, %v7854_v27  ;;  %3365 = vmatpush1.bf16.msra.mxu1 %v3253_v57 }
 0xb77   : > { %3291 = vmatprep.subr.bf16.mxu0 %v3252_v3  ;;  %3366 = vmatprep.subr.bf16.mxu1 %v3258_v13  ;;  %v7890_v57 = vrot.slane %v7675_v40, %v3141_v49 }
 0xb78   : > { %3070 = vadd.xlane.f32.xlu0 %v3069_v32  ;;  %v3072_v63 = vadd.f32 %v3050_v16, %v3049_v34  ;;  %3292 = vmatpush1.bf16.msra.mxu0 %v3251_v11  ;;  %v7882_v32 = vrot.slane %v7675_v40, %v3117_v8  ;;  %v7887_v11 = vrot.slane %v7669_v2, %v3141_v49 }
 0xb79   : > { %3293 = vmatprep.subr.bf16.mxu0 %v3256_v4 }
 0xb7a   : > { %3073 = vadd.xlane.f32.xlu1 %v3072_v63  ;;  %3367 = vmatpush1.bf16.msra.mxu1 %v3257_v59 }
 0xb7b   : > { %3368 = vmatprep.subr.bf16.mxu1 %v3262_v55 }
 0xb7c   : > { %3294 = vmatpush1.bf16.msra.mxu0 %v3255_v19 }
 0xb7d   : > { %3295 = vmatprep.subr.bf16.mxu0 %v3260_v6  ;;  %v4389_v6 = vld [vmem:[%s7002_s26] sm:$0xff] }
 0xb7e   : > { %3369 = vmatpush1.bf16.msra.mxu1 %v3261_v10 }
 0xb7f   : > { %3370 = vmatprep.subr.bf16.mxu1 %v3266_v20 }
 0xb80   : > { %3296 = vmatpush1.bf16.msra.mxu0 %v3259_v1  ;;  %v4421_v1 = vunpack.c.l.s8.bf16 %v4389_v6 }
 0xb81   : > { %3297 = vmatprep.subr.bf16.mxu0 %v3264_v7 }
 0xb82   : > { %3371 = vmatpush1.bf16.msra.mxu1 %v3265_v17 }
 0xb84   : > { %3298 = vmatpush1.bf16.msra.mxu0 %v3263_v12 }
 0xb85   : > { %4485 = vmatprep.subr.bf16.mxu0 %v4422_v45 }
 0xbed   : > { %v3053_v56 = vpop.xlane.xlu0 %3052 }
 0xbee   : > { %v3075_v44 = vmul.f32 0.00390625, %v3053_v56 }
 0xbef   : > { %v3056_v47 = vpop.xlane.xlu1 %3055 }
 0xbf0   : > { %v3083_v50 = vadd.f32 1e-05, %v3075_v44  ;;  %v3076_v46 = vmul.f32 0.00390625, %v3056_v47  ;;  %v4424_v44 = vunpack.c.h.s8.bf16 %v7873_v42  ;;  %v4423_v42 = vunpack.c.h.s8.bf16 %v4389_v6 }
 0xbf2   : > { %5998 = vrsqrt.f32 %v3083_v50  ;;  %v3084_v38 = vadd.f32 1e-05, %v3076_v46 }
 0xbf4   : > { %6000 = vrsqrt.f32 %v3084_v38 }
 0xbf5   : > { %v3059_v61 = vpop.xlane.xlu0 %3058 }
 0xbf6   : > { %v3077_v29 = vmul.f32 0.00390625, %v3059_v61 }
 0xbf7   : > { %v3062_v39 = vpop.xlane.xlu1 %3061 }
 0xbf8   : > { %v3085_v51 = vadd.f32 1e-05, %v3077_v29  ;;  %v3078_v62 = vmul.f32 0.00390625, %v3062_v39 }
 0xbfa   : > { %6002 = vrsqrt.f32 %v3085_v51  ;;  %v3086_v35 = vadd.f32 1e-05, %v3078_v62 }
 0xbfc   : > { %v5999_v34 = vpop.eup %5998  ;;  %6004 = vrsqrt.f32 %v3086_v35 }
 0xbfd   : > { %v3099_v16 = vmul.f32 %v5999_v34, %v7781_v9  ;;  %v3065_v3 = vpop.xlane.xlu0 %3064  ;;  %v3100_v23 = vmul.f32 %v5999_v34, %v7784_v43 }
 0xbfe   : > { %v6001_v15 = vpop.eup %6000  ;;  %v3079_v36 = vmul.f32 0.00390625, %v3065_v3 }
 0xbff   : > { %v3123_v63 = vmul.f32 %v7879_v28, %v3099_v16  ;;  %v3101_v4 = vmul.f32 %v6001_v15, %v7787_v31  ;;  %v3068_v13 = vpop.xlane.xlu1 %3067  ;;  %v3102_v19 = vmul.f32 %v6001_v15, %v7790_v30  ;;  %v3124_v9 = vmul.f32 %v7882_v32, %v3100_v23 }
 0xc00   : > { %v3087_v59 = vadd.f32 1e-05, %v3079_v36  ;;  %v3080_v41 = vmul.f32 0.00390625, %v3068_v13 }
 0xc01   : > { %v3125_v43 = vmul.f32 %v7879_v28, %v3101_v4  ;;  %v3126_v33 = vmul.f32 %v7882_v32, %v3102_v19  ;;  %v7900_v40 = vadd.f32 %v7890_v57, %v3124_v9  ;;  %v7906_v31 = vadd.f32 %v7887_v11, %v3123_v63 }
 0xc02   : > { %6006 = vrsqrt.f32 %v3087_v59  ;;  %v3088_v55 = vadd.f32 1e-05, %v3080_v41 }
 0xc03   : > { %9529 = vst [vmem:[#allocation32_spill] sm:$0xff] %v7900_v40  ;;  %v7903_v18 = vadd.f32 %v7890_v57, %v3126_v33  ;;  %9531 = vst [vmem:[#allocation34_spill] sm:$0xff] %v7906_v31  ;;  %v7909_v30 = vadd.f32 %v7887_v11, %v3125_v43 }
 0xc04   : > { %v6003_v26 = vpop.eup %6002  ;;  %6008 = vrsqrt.f32 %v3088_v55 }
 0xc05   : > { %9530 = vst [vmem:[#allocation33_spill] sm:$0xff] %v7903_v18  ;;  %9532 = vst [vmem:[#allocation35_spill] sm:$0xff] %v7909_v30  ;;  %v3071_v10 = vpop.xlane.xlu0 %3070  ;;  %v3164_v7 = vpack.c.bf16 %v7903_v18, %v7900_v40  ;;  %v3163_v20 = vpack.c.bf16 %v7909_v30, %v7906_v31  ;;  %v3104_v12 = vmul.f32 %v6003_v26, %v7804_v14 }
 0xc06   : > { %v3103_v17 = vmul.f32 %v6003_v26, %v7801_v25  ;;  %v6005_v45 = vpop.eup %6004  ;;  %v3081_v56 = vmul.f32 0.00390625, %v3071_v10 }
 0xc07   : > { %3299 = vmatprep.mubr.bf16.mxu0 %v3164_v7  ;;  %3372 = vmatprep.mubr.bf16.mxu1 %v3164_v7  ;;  %v3074_v47 = vpop.xlane.xlu1 %3073  ;;  %v3106_v50 = vmul.f32 %v6005_v45, %v7810_v60  ;;  %v3128_v46 = vmul.f32 %v7882_v32, %v3104_v12  ;;  %v3105_v38 = vmul.f32 %v6005_v45, %v7807_v48 }
 0xc08   : > { %v3089_v61 = vadd.f32 1e-05, %v3081_v56  ;;  %v3082_v29 = vmul.f32 0.00390625, %v3074_v47  ;;  %3300 = vmatmul.mubr.bf16.vlgmr.msra.gmra.mrb[32].mxu0 %v3163_v20  ;;  %3373 = vmatmul.mubr.bf16.vlgmr.msra.gmra.mrb[64].mxu1 %v3163_v20  ;;  %v3127_v14 = vmul.f32 %v7879_v28, %v3103_v17  ;;  %v4391_v17 = vld [vmem:[%s7002_s26 + $0x10] sm:$0xff] }
 0xc09   : > { %v3130_v25 = vmul.f32 %v7882_v32, %v3106_v50  ;;  %v3129_v8 = vmul.f32 %v7879_v28, %v3105_v38  ;;  %4486 = vmatpush1.bf16.msra.mxu0 %v4421_v1  ;;  %v7925_v60 = vadd.f32 %v7890_v57, %v3128_v46  ;;  %v4425_v45 = vunpack.c.l.s8.bf16 %v4391_v17  ;;  %v4393_v50 = vld [vmem:[%s7002_s26 + $0x20] sm:$0xff] }
 0xc0a   : > { %6010 = vrsqrt.f32 %v3089_v61  ;;  %v3090_v39 = vadd.f32 1e-05, %v3082_v29  ;;  %4487 = vmatprep.subr.bf16.mxu0 %v4424_v44  ;;  %v7931_v51 = vadd.f32 %v7887_v11, %v3127_v14  ;;  %v4427_v56 = vunpack.c.h.s8.bf16 %v4391_v17  ;;  %v4394_v44 = vld [vmem:[%s7002_s26 + $0x28] sm:$0xff]  ;;  %v4396_v29 = vld [vmem:[%s7002_s26 + $0x38] sm:$0xff] }
 0xc0b   : > { %9533 = vst [vmem:[#allocation36_spill] sm:$0xff] %v7925_v60  ;;  %v7928_v48 = vadd.f32 %v7890_v57, %v3130_v25  ;;  %v7934_v62 = vadd.f32 %v7887_v11, %v3129_v8  ;;  %v4430_v47 = vunpack.c.l.s8.bf16 %v4394_v44  ;;  %v4429_v46 = vunpack.c.l.s8.bf16 %v4393_v50  ;;  %v4395_v25 = vld [vmem:[%s7002_s26 + $0x30] sm:$0xff] }
 0xc0c   : > { %9535 = vst [vmem:[#allocation38_spill] sm:$0xff] %v7931_v51  ;;  %v6007_v35 = vpop.eup %6006  ;;  %6012 = vrsqrt.f32 %v3090_v39  ;;  %v4432_v38 = vunpack.c.h.s8.bf16 %v4394_v44  ;;  %v4431_v61 = vunpack.c.h.s8.bf16 %v4393_v50  ;;  %v4434_v14 = vunpack.c.l.s8.bf16 %v4396_v29 }
 0xc0d   : > { %9534 = vst [vmem:[#allocation37_spill] sm:$0xff] %v7928_v48  ;;  %9536 = vst [vmem:[#allocation39_spill] sm:$0xff] %v7934_v62  ;;  %v3166_v49 = vpack.c.bf16 %v7928_v48, %v7925_v60  ;;  %v3165_v34 = vpack.c.bf16 %v7934_v62, %v7931_v51  ;;  %v3108_v16 = vmul.f32 %v6007_v35, %v7824_v5  ;;  %4488 = vmatpush1.bf16.msra.mxu0 %v4423_v42 }
 0xc0e   : > { %v3107_v3 = vmul.f32 %v6007_v35, %v7821_v54  ;;  %v6009_v23 = vpop.eup %6008  ;;  %v4433_v8 = vunpack.c.l.s8.bf16 %v4395_v25  ;;  %v4436_v42 = vunpack.c.h.s8.bf16 %v4396_v29  ;;  %v4435_v39 = vunpack.c.h.s8.bf16 %v4395_v25  ;;  %v4398_v35 = vld [vmem:[%s7002_s26 + $0x48] sm:$0xff] }
 0xc0f   : > { %3309 = vmatprep.mubr.bf16.mxu0 %v3166_v49  ;;  %3382 = vmatprep.mubr.bf16.mxu1 %v3166_v49  ;;  %v3110_v15 = vmul.f32 %v6009_v23, %v7830_v52  ;;  %v3132_v36 = vmul.f32 %v7882_v32, %v3108_v16  ;;  %v3109_v63 = vmul.f32 %v6009_v23, %v7827_v58  ;;  %v4438_v49 = vunpack.c.l.s8.bf16 %v4398_v35 }
 0xc10   : > { %3310 = vmatmul.mubr.bf16.gmra.mrb[36].mxu0 %v3165_v34  ;;  %3383 = vmatmul.mubr.bf16.gmra.mrb[68].mxu1 %v3165_v34  ;;  %v3131_v4 = vmul.f32 %v7879_v28, %v3107_v3  ;;  %v4397_v34 = vld [vmem:[%s7002_s26 + $0x40] sm:$0xff]  ;;  %v4440_v3 = vunpack.c.h.s8.bf16 %v4398_v35 }
 0xc11   : > { %v3134_v13 = vmul.f32 %v7882_v32, %v3110_v15  ;;  %v3133_v5 = vmul.f32 %v7879_v28, %v3109_v63  ;;  %v7949_v54 = vadd.f32 %v7890_v57, %v3132_v36  ;;  %v4437_v16 = vunpack.c.l.s8.bf16 %v4397_v34  ;;  %v4400_v15 = vld [vmem:[%s7002_s26 + $0x58] sm:$0xff]  ;;  %v4399_v63 = vld [vmem:[%s7002_s26 + $0x50] sm:$0xff] }
 0xc12   : > { %v7955_v52 = vadd.f32 %v7887_v11, %v3131_v4  ;;  %v4439_v23 = vunpack.c.h.s8.bf16 %v4397_v34  ;;  %v4442_v36 = vunpack.c.l.s8.bf16 %v4400_v15  ;;  %v4441_v4 = vunpack.c.l.s8.bf16 %v4399_v63 }
 0xc13   : > { %9537 = vst [vmem:[#allocation40_spill] sm:$0xff] %v7949_v54  ;;  %v7952_v19 = vadd.f32 %v7890_v57, %v3134_v13  ;;  %v7958_v9 = vadd.f32 %v7887_v11, %v3133_v5  ;;  %v4444_v13 = vunpack.c.h.s8.bf16 %v4400_v15  ;;  %v3415_v5 = vsub.s32 2, %v7290_v22 }
 0xc14   : > { %9539 = vst [vmem:[#allocation42_spill] sm:$0xff] %v7955_v52  ;;  %v6011_v58 = vpop.eup %6010 }
 0xc15   : > { %9538 = vst [vmem:[#allocation41_spill] sm:$0xff] %v7952_v19  ;;  %9540 = vst [vmem:[#allocation43_spill] sm:$0xff] %v7958_v9  ;;  %v3168_v59 = vpack.c.bf16 %v7952_v19, %v7949_v54  ;;  %v3167_v41 = vpack.c.bf16 %v7958_v9, %v7955_v52  ;;  %v3112_v43 = vmul.f32 %v6011_v58, %v7848_v37 }
 0xc16   : > { %v3111_v33 = vmul.f32 %v6011_v58, %v7845_v53  ;;  %v6013_v6 = vpop.eup %6012  ;;  %v4443_v58 = vunpack.c.h.s8.bf16 %v4399_v63 }
 0xc17   : > { %3319 = vmatprep.mubr.bf16.mxu0 %v3168_v59  ;;  %3392 = vmatprep.mubr.bf16.mxu1 %v3168_v59  ;;  %v3114_v55 = vmul.f32 %v6013_v6, %v7854_v27  ;;  %v3136_v26 = vmul.f32 %v7882_v32, %v3112_v43  ;;  %v3113_v1 = vmul.f32 %v6013_v6, %v7851_v24  ;;  %v4402_v59 = vld [vmem:[%s7002_s26 + $0x68] sm:$0xff]  ;;  %v4401_v43 = vld [vmem:[%s7002_s26 + $0x60] sm:$0xff] }
 0xc18   : > { %3320 = vmatmul.mubr.bf16.gmra.mrb[40].mxu0 %v3167_v41  ;;  %3393 = vmatmul.mubr.bf16.gmra.mrb[72].mxu1 %v3167_v41  ;;  %v3135_v10 = vmul.f32 %v7879_v28, %v3111_v33  ;;  %v4446_v41 = vunpack.c.l.s8.bf16 %v4402_v59  ;;  %v8002_v33 = vrot.slane %v7657_v21, %v3415_v5  ;;  %v6178_v6 = vld [vmem:[%s7015_s28 + $0x40] sm:$0xff] }
 0xc19   : > { %v3138_v7 = vmul.f32 %v7882_v32, %v3114_v55  ;;  %v3137_v37 = vmul.f32 %v7879_v28, %v3113_v1  ;;  %v7973_v53 = vadd.f32 %v7890_v57, %v3136_v26  ;;  %v4392_v28 = vld [vmem:[%s7002_s26 + $0x18] sm:$0xff]  ;;  %v8005_v55 = vrot.slane %v6178_v6, %v3415_v5 }
 0xc1a   : > { %v7979_v27 = vadd.f32 %v7887_v11, %v3135_v10  ;;  %v4445_v26 = vunpack.c.l.s8.bf16 %v4401_v43  ;;  %v4448_v1 = vunpack.c.h.s8.bf16 %v4402_v59  ;;  %v4404_v10 = vld [vmem:[%s7002_s26 + $0x78] sm:$0xff] }
 0xc1b   : > { %9541 = vst [vmem:[#allocation44_spill] sm:$0xff] %v7973_v53  ;;  %v7976_v20 = vadd.f32 %v7890_v57, %v3138_v7  ;;  %v7982_v24 = vadd.f32 %v7887_v11, %v3137_v37  ;;  %v4426_v57 = vunpack.c.l.s8.bf16 %v4392_v28  ;;  %v4428_v11 = vunpack.c.h.s8.bf16 %v4392_v28  ;;  %v6179_v37 = vld [vmem:[%s7015_s28 + $0x10] sm:$0xff] }
 0xc1c   : > { %9543 = vst [vmem:[#allocation46_spill] sm:$0xff] %v7979_v27  ;;  %v8009_v7 = vrot.slane %v7669_v2, %v3415_v5  ;;  %v4450_v17 = vunpack.c.l.s8.bf16 %v4404_v10 }
 0xc1d   : > { %9542 = vst [vmem:[#allocation45_spill] sm:$0xff] %v7976_v20  ;;  %9544 = vst [vmem:[#allocation47_spill] sm:$0xff] %v7982_v24  ;;  %v3170_v12 = vpack.c.bf16 %v7976_v20, %v7973_v53  ;;  %v3169_v32 = vpack.c.bf16 %v7982_v24, %v7979_v27  ;;  %4489 = vmatprep.subr.bf16.mxu0 %v4426_v57  ;;  %v8015_v57 = vrot.slane %v7663_v0, %v3415_v5 }
 0xc1e   : > { %4490 = vmatpush1.bf16.msra.mxu0 %v4425_v45  ;;  %v4403_v45 = vld [vmem:[%s7002_s26 + $0x70] sm:$0xff] }
 0xc1f   : > { %3329 = vmatprep.mubr.bf16.mxu0 %v3170_v12  ;;  %3402 = vmatprep.mubr.bf16.mxu1 %v3170_v12  ;;  %v8012_v12 = vrot.slane %v6179_v37, %v3415_v5 }
 0xc20   : > { %3330 = vmatmul.mubr.bf16.gmra.mrb[44].mxu0 %v3169_v32  ;;  %3403 = vmatmul.mubr.bf16.gmra.mrb[76].mxu1 %v3169_v32  ;;  %v4447_v32 = vunpack.c.h.s8.bf16 %v4401_v43 }
 0xc21   : > { %4491 = vmatprep.subr.bf16.mxu0 %v4428_v11 }
 0xc22   : > { %4492 = vmatpush1.bf16.msra.mxu0 %v4427_v56 }
 0xc23   : > { %4493 = vmatprep.subr.bf16.mxu0 %v4430_v47  ;;  %v6180_v47 = vld [vmem:[%s7015_s28 + $0x48] sm:$0xff] }
 0xc24   : > { %v8021_v50 = vrot.slane %v6180_v47, %v3415_v5 }
 0xc26   : > { %4494 = vmatpush1.bf16.msra.mxu0 %v4429_v46 }
 0xc27   : > { %4495 = vmatprep.subr.bf16.mxu0 %v4432_v38 }
 0xc2a   : > { %4496 = vmatpush1.bf16.msra.mxu0 %v4431_v61 }
 0xc2b   : > { %4497 = vmatprep.subr.bf16.mxu0 %v4434_v14 }
 0xc2e   : > { %4498 = vmatpush1.bf16.msra.mxu0 %v4433_v8  ;;  %v4449_v8 = vunpack.c.l.s8.bf16 %v4403_v45 }
 0xc2f   : > { %4499 = vmatprep.subr.bf16.mxu0 %v4436_v42 }
 0xc32   : > { %4500 = vmatpush1.bf16.msra.mxu0 %v4435_v39  ;;  %v6181_v39 = vld [vmem:[%s7015_s28 + $0x8] sm:$0xff] }
 0xc33   : > { %4501 = vmatprep.subr.bf16.mxu0 %v4438_v49  ;;  %v8034_v35 = vrot.slane %v6181_v39, %v3415_v5  ;;  %v4452_v49 = vunpack.c.h.s8.bf16 %v4404_v10 }
 0xc36   : > { %4502 = vmatpush1.bf16.msra.mxu0 %v4437_v16 }
 0xc37   : > { %4503 = vmatprep.subr.bf16.mxu0 %v4440_v3  ;;  %v6182_v3 = vld [vmem:[%s7015_s28 + $0x18] sm:$0xff] }
 0xc3a   : > { %4504 = vmatpush1.bf16.msra.mxu0 %v4439_v23  ;;  %v8043_v23 = vrot.slane %v6182_v3, %v3415_v5 }
 0xc3b   : > { %4505 = vmatprep.subr.bf16.mxu0 %v4442_v36 }
 0xc3e   : > { %4506 = vmatpush1.bf16.msra.mxu0 %v4441_v4  ;;  %v4451_v4 = vunpack.c.h.s8.bf16 %v4403_v45 }
 0xc3f   : > { %4507 = vmatprep.subr.bf16.mxu0 %v4444_v13 }
 0xc42   : > { %4508 = vmatpush1.bf16.msra.mxu0 %v4443_v58 }
 0xc43   : > { %4509 = vmatprep.subr.bf16.mxu0 %v4446_v41 }
 0xc46   : > { %4510 = vmatpush1.bf16.msra.mxu0 %v4445_v26 }
 0xc47   : > { %4511 = vmatprep.subr.bf16.mxu0 %v4448_v1 }
 0xc4a   : > { %4512 = vmatpush1.bf16.msra.mxu0 %v4447_v32 }
 0xc4b   : > { %4513 = vmatprep.subr.bf16.mxu0 %v4450_v17 }
 0xc4e   : > { %4514 = vmatpush1.bf16.msra.mxu0 %v4449_v8 }
 0xc4f   : > { %4515 = vmatprep.subr.bf16.mxu0 %v4452_v49 }
 0xc52   : > { %4516 = vmatpush1.bf16.msra.mxu0 %v4451_v4 }
 0xcdb   : > { %v3301_v28 = vpop.f32.mrb[32].mxu0  ;;  %v3374_v21 = vpop.f32.mrb[64].mxu1 }
 0xcdc   : > { %v3429_v11 = vmul.f32 %v8002_v33, %v3301_v28  ;;  %v3431_v56 = vmul.f32 %v8005_v55, %v3374_v21  ;;  %v3303_v2 = vpop.f32.mrb[33].mxu0  ;;  %v3376_v44 = vpop.f32.mrb[65].mxu1 }
 0xcdd   : > { %v3305_v46 = vpop.f32.mrb[34].mxu0  ;;  %v3378_v38 = vpop.f32.mrb[66].mxu1  ;;  %v3430_v42 = vmul.f32 %v8015_v57, %v3303_v2  ;;  %v3432_v63 = vmul.f32 %v8021_v50, %v3376_v44 }
 0xcde   : > { %v8024_v61 = vadd.f32 %v8009_v7, %v3429_v11  ;;  %v8027_v0 = vadd.f32 %v8012_v12, %v3431_v56  ;;  %v3435_v29 = vmul.f32 %v8005_v55, %v3378_v38  ;;  %v3307_v14 = vpop.f32.mrb[35].mxu0  ;;  %v8030_v25 = vpop.f32.mrb[67].mxu1  ;;  %v3433_v41 = vmul.f32 %v8002_v33, %v3305_v46 }
 0xcdf   : > { %v8049_v13 = vadd.f32 %v8034_v35, %v3430_v42  ;;  %v8061_v37 = vadd.f32 %v8043_v23, %v3432_v63  ;;  %v3436_v54 = vmul.f32 %v8021_v50, %v8030_v25 }
 0xce0   : > { %v8037_v34 = vmul.f32 0.70710677, %v8024_v61  ;;  %v8040_v16 = vmul.f32 0.70710677, %v8027_v0  ;;  %v8075_v11 = vadd.f32 %v8009_v7, %v3433_v41  ;;  %v8078_v56 = vadd.f32 %v8012_v12, %v3435_v29 }
 0xce1   : > { %v8068_v21 = vmul.f32 0.70710677, %v8049_v13  ;;  %v8081_v2 = vmul.f32 0.70710677, %v8061_v37  ;;  %v3434_v29 = vmul.f32 %v8015_v57, %v3307_v14  ;;  %v8135_v30 = vadd.f32 %v8043_v23, %v3436_v54 }
 0xce2   : > { %v3573_v15 = vand.u32 2147483647, %v8037_v34  ;;  %v3575_v36 = vand.u32 2147483647, %v8040_v16  ;;  %v8084_v44 = vmul.f32 0.70710677, %v8075_v11 }
 0xce3   : > { %v8052_v43 = vpop.f32.mrb[36].mxu0  ;;  %v8054_v5 = vpop.f32.mrb[68].mxu1  ;;  %9545 = vst [vmem:[#allocation48_spill] sm:$0xff] %v8068_v21  ;;  %9546 = vst [vmem:[#allocation49_spill] sm:$0xff] %v8081_v2  ;;  %v3574_v46 = vand.u32 2147483647, %v8068_v21  ;;  %v8111_v27 = vadd.f32 %v8034_v35, %v3434_v29 }
 0xce4   : > { %v3605_v58 = vmul.f32 0.3275911, %v3573_v15  ;;  %v3607_v59 = vmul.f32 0.3275911, %v3575_v36  ;;  %v8056_v6 = vpop.f32.mrb[37].mxu0  ;;  %v8058_v26 = vpop.f32.mrb[69].mxu1  ;;  %v4021_v47 = vmul.f32 %v3573_v15, %v3573_v15  ;;  %v4023_v63 = vmul.f32 %v3575_v36, %v3575_v36 }
 0xce5   : > { %v8063_v32 = vpop.f32.mrb[38].mxu0  ;;  %v8065_v28 = vpop.f32.mrb[70].mxu1  ;;  %v8088_v38 = vmul.f32 0.70710677, %v8078_v56  ;;  %v3577_v39 = vand.u32 2147483647, %v8084_v44  ;;  %v4022_v20 = vmul.f32 %v3574_v46, %v3574_v46  ;;  %v3439_v54 = vmul.f32 %v8005_v55, %v8054_v5 }
 0xce6   : > { %v3637_v1 = vadd.f32 1.0, %v3605_v58  ;;  %v3639_v10 = vadd.f32 1.0, %v3607_v59  ;;  %v8070_v17 = vpop.f32.mrb[39].mxu0  ;;  %v8072_v45 = vpop.f32.mrb[71].mxu1  ;;  %v3576_v58 = vand.u32 2147483647, %v8081_v2 }
 0xce7   : > { %v3579_v15 = vand.u32 2147483647, %v8088_v38  ;;  %v3609_v59 = vmul.f32 0.3275911, %v3577_v39  ;;  %v8114_v36 = vmul.f32 0.5, %v8024_v61  ;;  %v4055_v19 = vsub.f32 0.0, %v4023_v63 }
 0xce8   : > { %6014 = vrcp.f32 %v3637_v1  ;;  %v3606_v48 = vmul.f32 0.3275911, %v3574_v46  ;;  %v4024_v62 = vmul.f32 %v3576_v58, %v3576_v58  ;;  %v4054_v51 = vsub.f32 0.0, %v4022_v20 }
 0xce9   : > { %6016 = vrcp.f32 %v3639_v10  ;;  %v4053_v10 = vsub.f32 0.0, %v4021_v47  ;;  %v3611_v24 = vmul.f32 0.3275911, %v3579_v15  ;;  %v3641_v53 = vadd.f32 1.0, %v3609_v59 }
 0xcea   : > { %v3608_v47 = vmul.f32 0.3275911, %v3576_v58  ;;  %v4025_v63 = vmul.f32 %v3577_v39, %v3577_v39  ;;  %v8130_v46 = vmul.f32 0.70710677, %v8111_v27  ;;  %v4089_v18 = vmul.f32 1.442695, %v4055_v19 }
 0xceb   : > { %v8090_v8 = vpop.f32.mrb[40].mxu0  ;;  %v8092_v42 = vpop.f32.mrb[72].mxu1  ;;  %v3643_v9 = vadd.f32 1.0, %v3611_v24  ;;  %6018 = vrcp.f32 %v3641_v53  ;;  %v4085_v29 = vmul.f32 1.442695, %v4053_v10  ;;  %v8126_v24 = vmul.f32 0.5, %v8027_v0 }
 0xcec   : > { %v8096_v49 = vpop.f32.mrb[41].mxu0  ;;  %v8098_v3 = vpop.f32.mrb[73].mxu1  ;;  %9549 = vst [vmem:[#allocation52_spill] sm:$0xff] %v8130_v46  ;;  %v3638_v0 = vadd.f32 1.0, %v3606_v48  ;;  %v4056_v40 = vsub.f32 0.0, %v4024_v62  ;;  %v3437_v39 = vmul.f32 %v8002_v33, %v8052_v43  ;;  %v4057_v48 = vsub.f32 0.0, %v4025_v63 }
 0xced   : > { %v8101_v4 = vpop.f32.mrb[42].mxu0  ;;  %v8104_v41 = vpop.f32.mrb[74].mxu1  ;;  %6020 = vrcp.f32 %v3643_v9  ;;  %v4027_v62 = vmul.f32 %v3579_v15, %v3579_v15  ;;  %v3578_v21 = vand.u32 2147483647, %v8130_v46  ;;  %vm4213_vm1 = vcmp.ge.f32.partialorder %v8037_v34, 0.0 }
 0xcee   : > { %v8106_v1 = vpop.f32.mrb[43].mxu0  ;;  %v8108_v14 = vpop.f32.mrb[75].mxu1  ;;  %6022 = vpow2.f32 %v4085_v29  ;;  %v8160_v5 = vadd.f32 %v8009_v7, %v3437_v39  ;;  %v4091_v63 = vmul.f32 1.442695, %v4056_v40  ;;  %vm4215_vm2 = vcmp.ge.f32.partialorder %v8040_v16, 0.0 }
 0xcef   : > { %9547 = vst [vmem:[#allocation50_spill] sm:$0xff] %v8108_v14  ;;  %6024 = vpow2.f32 %v4089_v18  ;;  %vm4217_vm3 = vcmp.ge.f32.partialorder %v8084_v44, 0.0  ;;  %vm4219_vm4 = vcmp.ge.f32.partialorder %v8088_v38, 0.0  ;;  %v3444_v16 = vmul.f32 %v8021_v50, %v8072_v45 }
 0xcf0   : > { %6026 = vrcp.f32 %v3638_v0  ;;  %v3610_v0 = vmul.f32 0.3275911, %v3578_v21 }
 0xcf1   : > { %v8281_v38 = vadd.f32 %v8043_v23, %v3444_v16 }
 0xcf2   : > { %v8118_v52 = vpop.eup %6014 }
 0xcf3   : > { %v8120_v60 = vpop.eup %6016  ;;  %v3733_v59 = vmul.f32 1.0614054, %v8118_v52  ;;  %v8123_v61 = vpop.f32.mrb[44].mxu0 }
 0xcf4   : > { %9548 = vst [vmem:[#allocation51_spill] sm:$0xff] %v8123_v61  ;;  %v3735_v25 = vmul.f32 1.0614054, %v8120_v60  ;;  %v8132_v58 = vpop.f32.mrb[76].mxu1  ;;  %v8137_v20 = vpop.f32.mrb[45].mxu0 }
 0xcf5   : > { %9550 = vst [vmem:[#allocation53_spill] sm:$0xff] %v8132_v58  ;;  %v3765_v53 = vadd.f32 -1.4531521, %v3733_v59  ;;  %9551 = vst [vmem:[#allocation54_spill] sm:$0xff] %v8137_v20  ;;  %v8139_v9 = vpop.f32.mrb[77].mxu1  ;;  %v8143_v31 = vpop.f32.mrb[46].mxu0 }
 0xcf6   : > { %9552 = vst [vmem:[#allocation55_spill] sm:$0xff] %v8139_v9  ;;  %v3767_v10 = vadd.f32 -1.4531521, %v3735_v25  ;;  %9553 = vst [vmem:[#allocation56_spill] sm:$0xff] %v8143_v31  ;;  %v4087_v59 = vmul.f32 1.442695, %v4054_v51 }
 0xcf7   : > { %v3797_v22 = vmul.f32 %v8118_v52, %v3765_v53  ;;  %v8148_v19 = vpop.f32.mrb[78].mxu1  ;;  %v8150_v2 = vpop.f32.mrb[47].mxu0  ;;  %v3640_v53 = vadd.f32 1.0, %v3608_v47  ;;  %v8157_v51 = vmul.f32 0.70710677, %v8135_v30  ;;  %v3642_v9 = vadd.f32 1.0, %v3610_v0 }
 0xcf8   : > { %9554 = vst [vmem:[#allocation57_spill] sm:$0xff] %v8148_v19  ;;  %9555 = vst [vmem:[#allocation58_spill] sm:$0xff] %v8150_v2  ;;  %v3799_v25 = vmul.f32 %v8120_v60, %v3767_v10  ;;  %v8154_v43 = vpop.f32.mrb[79].mxu1  ;;  %v8163_v2 = vadd.f32 %v8012_v12, %v3439_v54  ;;  %6028 = vpow2.f32 %v4087_v59  ;;  %v8167_v10 = vmul.f32 0.5, %v8075_v11 }
 0xcf9   : > { %9556 = vst [vmem:[#allocation59_spill] sm:$0xff] %v8154_v43  ;;  %v3829_v31 = vadd.f32 1.4214138, %v3797_v22  ;;  %9557 = vst [vmem:[#allocation60_spill] sm:$0xff] %v8157_v51  ;;  %v8169_v22 = vpop.eup %6018  ;;  %v4093_v47 = vmul.f32 1.442695, %v4057_v48  ;;  %v4026_v43 = vmul.f32 %v3578_v21, %v3578_v21  ;;  %6030 = vrcp.f32 %v3640_v53 }
 0xcfa   : > { %v3831_v29 = vadd.f32 1.4214138, %v3799_v25  ;;  %v4059_v25 = vsub.f32 0.0, %v4027_v62  ;;  %v8172_v46 = vpop.eup %6020  ;;  %v3737_v54 = vmul.f32 1.0614054, %v8169_v22  ;;  %6032 = vpow2.f32 %v4091_v63 }
 0xcfb   : > { %v3861_v15 = vmul.f32 %v8118_v52, %v3829_v31  ;;  %v3580_v31 = vand.u32 2147483647, %v8157_v51  ;;  %v3739_v40 = vmul.f32 1.0614054, %v8172_v46  ;;  %v8178_v11 = vmul.f32 0.70710677, %v8160_v5  ;;  %v6023_v51 = vpop.eup %6022 }
 0xcfc   : > { %v3863_v18 = vmul.f32 %v8120_v60, %v3831_v29  ;;  %v3769_v48 = vadd.f32 -1.4531521, %v3737_v54  ;;  %v8182_v62 = vmul.f32 0.5, %v8078_v56  ;;  %v4097_v21 = vmul.f32 1.442695, %v4059_v25  ;;  %v6025_v54 = vpop.eup %6024 }
 0xcfd   : > { %v3893_v39 = vadd.f32 -0.28449672, %v3861_v15  ;;  %9558 = vst [vmem:[#allocation61_spill] sm:$0xff] %v8178_v11  ;;  %v3771_v19 = vadd.f32 -1.4531521, %v3739_v40  ;;  %v4058_v20 = vsub.f32 0.0, %v4026_v43  ;;  %v4028_v58 = vmul.f32 %v3580_v31, %v3580_v31  ;;  %v8192_v0 = vpop.eup %6026 }
 0xcfe   : > { %v3895_v59 = vadd.f32 -0.28449672, %v3863_v18  ;;  %v3801_v53 = vmul.f32 %v8169_v22, %v3769_v48  ;;  %6034 = vpow2.f32 %v4093_v47  ;;  %v3581_v63 = vand.u32 2147483647, %v8178_v11 }
 0xcff   : > { %v3925_v29 = vmul.f32 %v8118_v52, %v3893_v39  ;;  %v3803_v39 = vmul.f32 %v8172_v46, %v3771_v19  ;;  %v8190_v25 = vmul.f32 0.70710677, %v8163_v2  ;;  %6036 = vpow2.f32 %v4097_v21 }
 0xd00   : > { %v3927_v15 = vmul.f32 %v8120_v60, %v3895_v59  ;;  %v3833_v14 = vadd.f32 1.4214138, %v3801_v53  ;;  %v3612_v59 = vmul.f32 0.3275911, %v3580_v31  ;;  %v3438_v47 = vmul.f32 %v8015_v57, %v8056_v6 }
 0xd01   : > { %v3957_v18 = vadd.f32 0.2548296, %v3925_v29  ;;  %9559 = vst [vmem:[#allocation62_spill] sm:$0xff] %v8190_v25  ;;  %v3835_v43 = vadd.f32 1.4214138, %v3803_v39  ;;  %v4029_v53 = vmul.f32 %v3581_v63, %v3581_v63  ;;  %v3440_v11 = vmul.f32 %v8021_v50, %v8058_v26 }
 0xd02   : > { %v3959_v61 = vadd.f32 0.2548296, %v3927_v15  ;;  %v8197_v19 = vpop.eup %6028  ;;  %v3865_v48 = vmul.f32 %v8169_v22, %v3833_v14  ;;  %v4060_v15 = vsub.f32 0.0, %v4028_v58  ;;  %6038 = vrcp.f32 %v3642_v9 }
 0xd03   : > { %v3989_v56 = vmul.f32 %v8118_v52, %v3957_v18  ;;  %v4095_v52 = vmul.f32 1.442695, %v4058_v20  ;;  %v3867_v18 = vmul.f32 %v8172_v46, %v3835_v43  ;;  %v3583_v6 = vand.u32 2147483647, %v8190_v25  ;;  %v8205_v21 = vpop.eup %6030 }
 0xd04   : > { %v3991_v40 = vmul.f32 %v8120_v60, %v3959_v61  ;;  %v3897_v60 = vadd.f32 -0.28449672, %v3865_v48  ;;  %v3613_v61 = vmul.f32 0.3275911, %v3581_v63  ;;  %9560 = vst [vmem:[#allocation63_spill] sm:$0xff] %v8205_v21  ;;  %v3644_v20 = vadd.f32 1.0, %v3612_v59  ;;  %v8210_v39 = vpop.eup %6032 }
 0xd05   : > { %v4149_v29 = vmul.f32 %v6023_v51, %v3989_v56  ;;  %v3899_v14 = vadd.f32 -0.28449672, %v3867_v18  ;;  %v8208_v58 = vadd.f32 %v8034_v35, %v3438_v47  ;;  %9561 = vst [vmem:[#allocation64_spill] sm:$0xff] %v8210_v39  ;;  %6040 = vpow2.f32 %v4095_v52 }
 0xd06   : > { %v4151_v31 = vmul.f32 %v6025_v54, %v3991_v40  ;;  %v3929_v26 = vmul.f32 %v8169_v22, %v3897_v60  ;;  %v4099_v54 = vmul.f32 1.442695, %v4060_v15  ;;  %v3441_v9 = vmul.f32 %v8002_v33, %v8063_v32 }
 0xd07   : > { %v4181_v51 = vsub.f32 1.0, %v4149_v29  ;;  %v3931_v56 = vmul.f32 %v8172_v46, %v3899_v14  ;;  %v4061_v40 = vsub.f32 0.0, %v4029_v53  ;;  %v8218_v59 = vadd.f32 %v8043_v23, %v3440_v11 }
 0xd08   : > { %v4183_v63 = vsub.f32 1.0, %v4151_v31  ;;  %v3961_v43 = vadd.f32 0.2548296, %v3929_v26  ;;  %v3645_v47 = vadd.f32 1.0, %v3613_v61  ;;  %v3615_v29 = vmul.f32 0.3275911, %v3583_v6  ;;  %v6035_v18 = vpop.eup %6034 }
 0xd09   : > { %v4031_v48 = vmul.f32 %v3583_v6, %v3583_v6  ;;  %v4245_v25 = vsub.f32 0.0, %v4181_v51  ;;  %v3963_v39 = vadd.f32 0.2548296, %v3931_v56  ;;  %6042 = vrcp.f32 %v3644_v20  ;;  %v6037_v11 = vpop.eup %6036 }
 0xd0a   : > { %v8221_v52 = vmul.f32 0.70710677, %v8208_v58  ;;  %v3993_v32 = vmul.f32 %v8169_v22, %v3961_v43  ;;  %6044 = vpow2.f32 %v4099_v54  ;;  %v8226_v15 = vadd.f32 %v8009_v7, %v3441_v9 }
 0xd0b   : > { %v4247_v31 = vsub.f32 0.0, %v4183_v63  ;;  %v3995_v53 = vmul.f32 %v8172_v46, %v3963_v39  ;;  %v4101_v60 = vmul.f32 1.442695, %v4061_v40  ;;  %v8230_v61 = vmul.f32 0.70710677, %v8218_v59 }
 0xd0c   : > { %v4153_v6 = vmul.f32 %v6035_v18, %v3993_v32  ;;  %6046 = vrcp.f32 %v3645_v47  ;;  %v4063_v14 = vsub.f32 0.0, %v4031_v48  ;;  %v4277_v22 = vsel %vm4213_vm1, %v4181_v51, %v4245_v25  ;;  %v8236_v9 = vpop.eup %6038 }
 0xd0d   : > { %9562 = vst [vmem:[#allocation65_spill] sm:$0xff] %v8230_v61  ;;  %v4155_v20 = vmul.f32 %v6037_v11, %v3995_v53  ;;  %v3647_v26 = vadd.f32 1.0, %v3615_v29  ;;  %v3582_v54 = vand.u32 2147483647, %v8221_v52  ;;  %v8239_v46 = vmul.f32 0.70710677, %v8226_v15 }
 0xd0e   : > { %v4185_v56 = vsub.f32 1.0, %v4153_v6  ;;  %v3443_v39 = vmul.f32 %v8005_v55, %v8065_v28  ;;  %v3442_v40 = vmul.f32 %v8015_v57, %v8070_v17  ;;  %v4279_v34 = vsel %vm4215_vm2, %v4183_v63, %v4247_v31 }
 0xd0f   : > { %v4187_v25 = vsub.f32 1.0, %v4155_v20  ;;  %6048 = vpow2.f32 %v4101_v60  ;;  %v3584_v51 = vand.u32 2147483647, %v8230_v61  ;;  %v8248_v43 = vpop.eup %6040  ;;  %v4309_v47 = vadd.f32 1.0, %v4277_v22 }
 0xd10   : > { %v4249_v29 = vsub.f32 0.0, %v4185_v56  ;;  %v4105_v48 = vmul.f32 1.442695, %v4063_v14  ;;  %v8251_v18 = vadd.f32 %v8012_v12, %v3443_v39  ;;  %v4030_v28 = vmul.f32 %v3582_v54, %v3582_v54 }
 0xd11   : > { %v4251_v32 = vsub.f32 0.0, %v4187_v25  ;;  %v8254_v11 = vadd.f32 %v8034_v35, %v3442_v40  ;;  %v4311_v17 = vadd.f32 1.0, %v4279_v34  ;;  %v3585_v31 = vand.u32 2147483647, %v8239_v46 }
 0xd12   : > { %v4281_v63 = vsel %vm4217_vm3, %v4185_v56, %v4249_v29  ;;  %v8262_v53 = vmul.f32 0.70710677, %v8251_v18  ;;  %v3614_v22 = vmul.f32 0.3275911, %v3582_v54  ;;  %v4032_v20 = vmul.f32 %v3584_v51, %v3584_v51 }
 0xd13   : > { %v8264_v60 = vpop.eup %6042  ;;  %v4313_v6 = vadd.f32 1.0, %v4281_v63  ;;  %v4283_v14 = vsel %vm4219_vm4, %v4187_v25, %v4251_v32  ;;  %v8271_v45 = vmul.f32 %v4309_v47, %v8114_v36  ;;  %v3616_v56 = vmul.f32 0.3275911, %v3584_v51 }
 0xd14   : > { %9563 = vst [vmem:[#allocation66_spill] sm:$0xff] %v8262_v53  ;;  %9564 = vst [vmem:[#allocation67_spill] sm:$0xff] %v8264_v60  ;;  %v8268_v39 = vpop.eup %6044  ;;  %v4315_v44 = vadd.f32 1.0, %v4283_v14  ;;  %v3587_v40 = vand.u32 2147483647, %v8262_v53  ;;  %v3445_v54 = vmul.f32 %v8002_v33, %v8090_v8  ;;  %v8288_v36 = vmul.f32 %v4311_v17, %v8126_v24 }
 0xd15   : > { %9565 = vst [vmem:[#allocation68_spill] sm:$0xff] %v8268_v39  ;;  %v8275_v34 = vmul.f32 %v4313_v6, %v8167_v10  ;;  %v8278_v29 = vmul.f32 0.70710677, %v8254_v11  ;;  %v4062_v47 = vsub.f32 0.0, %v4030_v28  ;;  %v4033_v10 = vmul.f32 %v3585_v31, %v3585_v31  ;;  %v9581_v39 = vld [vmem:[#allocation50_spill] sm:$0xff] }
 0xd16   : > { %v8285_v25 = vpop.eup %6046  ;;  %9566 = vst [vmem:[#allocation69_spill] sm:$0xff] %v8288_v36  ;;  %v8291_v51 = vmul.f32 %v4315_v44, %v8182_v62  ;;  %v3646_v63 = vadd.f32 1.0, %v3614_v22  ;;  %v4064_v6 = vsub.f32 0.0, %v4032_v20  ;;  %v3617_v16 = vmul.f32 0.3275911, %v3585_v31 }
 0xd17   : > { %6050 = vrcp.f32 %v3647_v26  ;;  %v3648_v8 = vadd.f32 1.0, %v3616_v56  ;;  %v4035_v53 = vmul.f32 %v3587_v40, %v3587_v40  ;;  %v3586_v24 = vand.u32 2147483647, %v8278_v29 }
 0xd18   : > { %9567 = vst [vmem:[#allocation70_spill] sm:$0xff] %v8291_v51  ;;  %v8301_v62 = vmul.f32 0.70710677, %v8281_v38  ;;  %v8304_v28 = vadd.f32 %v8009_v7, %v3445_v54  ;;  %v3447_v17 = vmul.f32 %v8005_v55, %v8092_v42  ;;  %6052 = vpow2.f32 %v4105_v48 }
 0xd19   : > { %v8297_v61 = vpop.eup %6048  ;;  %v4103_v31 = vmul.f32 1.442695, %v4062_v47  ;;  %v4065_v22 = vsub.f32 0.0, %v4033_v10  ;;  %v3446_v26 = vmul.f32 %v8015_v57, %v8096_v49  ;;  %6054 = vrcp.f32 %v3646_v63 }
 0xd1a   : > { %9568 = vst [vmem:[#allocation71_spill] sm:$0xff] %v8301_v62  ;;  %v4107_v20 = vmul.f32 1.442695, %v4064_v6  ;;  %v3649_v44 = vadd.f32 1.0, %v3617_v16  ;;  %v3588_v56 = vand.u32 2147483647, %v8301_v62  ;;  %v8315_v54 = vadd.f32 %v8012_v12, %v3447_v17 }
 0xd1b   : > { %v3619_v14 = vmul.f32 0.3275911, %v3587_v40  ;;  %v4067_v32 = vsub.f32 0.0, %v4035_v53  ;;  %v8312_v36 = vmul.f32 0.70710677, %v8304_v28  ;;  %6056 = vrcp.f32 %v3648_v8 }
 0xd1c   : > { %v4034_v42 = vmul.f32 %v3586_v24, %v3586_v24  ;;  %v8318_v48 = vadd.f32 %v8034_v35, %v3446_v26  ;;  %6058 = vpow2.f32 %v4103_v31  ;;  %v4109_v49 = vmul.f32 1.442695, %v4065_v22 }
 0xd1d   : > { %9569 = vst [vmem:[#allocation72_spill] sm:$0xff] %v8312_v36  ;;  %v3589_v47 = vand.u32 2147483647, %v8312_v36  ;;  %v8322_v10 = vmul.f32 0.70710677, %v8315_v54  ;;  %v8325_v53 = vmul.f32 0.5, %v8049_v13  ;;  %6060 = vpow2.f32 %v4107_v20 }
 0xd1e   : > { %v3618_v40 = vmul.f32 0.3275911, %v3586_v24  ;;  %v4036_v63 = vmul.f32 %v3588_v56, %v3588_v56  ;;  %6062 = vrcp.f32 %v3649_v44  ;;  %v3651_v6 = vadd.f32 1.0, %v3619_v14 }
 0xd1f   : > { %9570 = vst [vmem:[#allocation73_spill] sm:$0xff] %v8322_v10  ;;  %v4113_v16 = vmul.f32 1.442695, %v4067_v32  ;;  %v3591_v8 = vand.u32 2147483647, %v8322_v10  ;;  %v4066_v17 = vsub.f32 0.0, %v4034_v42  ;;  %v4037_v26 = vmul.f32 %v3589_v47, %v3589_v47 }
 0xd20   : > { %v8329_v31 = vmul.f32 0.70710677, %v8318_v48  ;;  %v3448_v22 = vmul.f32 %v8021_v50, %v8098_v3  ;;  %v8336_v13 = vmul.f32 0.5, %v8061_v37  ;;  %v8339_v24 = vmul.f32 0.5, %v8111_v27 }
 0xd21   : > { %v8333_v51 = vpop.eup %6050  ;;  %6064 = vpow2.f32 %v4109_v49  ;;  %v3620_v32 = vmul.f32 0.3275911, %v3588_v56  ;;  %v3650_v14 = vadd.f32 1.0, %v3618_v40  ;;  %v4068_v20 = vsub.f32 0.0, %v4036_v63 }
 0xd22   : > { %9571 = vst [vmem:[#allocation74_spill] sm:$0xff] %v8333_v51  ;;  %9572 = vst [vmem:[#allocation75_spill] sm:$0xff] %v8336_v13  ;;  %v3590_v44 = vand.u32 2147483647, %v8329_v31  ;;  %v8343_v42 = vadd.f32 %v8043_v23, %v3448_v22  ;;  %v8345_v10 = vpop.eup %6052  ;;  %v8348_v3 = vmul.f32 0.5, %v8135_v30  ;;  %6066 = vrcp.f32 %v3651_v6 }
 0xd23   : > { %9573 = vst [vmem:[#allocation76_spill] sm:$0xff] %v8345_v10  ;;  %v3621_v37 = vmul.f32 0.3275911, %v3589_v47  ;;  %v4039_v62 = vmul.f32 %v3591_v8, %v3591_v8  ;;  %v8350_v51 = vpop.eup %6054  ;;  %6068 = vpow2.f32 %v4113_v16  ;;  %v4111_v27 = vmul.f32 1.442695, %v4066_v17 }
 0xd24   : > { %9574 = vst [vmem:[#allocation77_spill] sm:$0xff] %v8348_v3  ;;  %v4069_v56 = vsub.f32 0.0, %v4037_v26  ;;  %v8353_v49 = vmul.f32 0.70710677, %v8343_v42  ;;  %v3652_v40 = vadd.f32 1.0, %v3620_v32  ;;  %v4038_v63 = vmul.f32 %v3590_v44, %v3590_v44 }
 0xd25   : > { %v3449_v22 = vmul.f32 %v8002_v33, %v8101_v4  ;;  %v3451_v30 = vmul.f32 %v8005_v55, %v8104_v41  ;;  %v8359_v10 = vpop.eup %6056  ;;  %6070 = vrcp.f32 %v3650_v14  ;;  %v4115_v47 = vmul.f32 1.442695, %v4068_v20 }
 0xd26   : > { %9575 = vst [vmem:[#allocation78_spill] sm:$0xff] %v8353_v49  ;;  %9576 = vst [vmem:[#allocation79_spill] sm:$0xff] %v8359_v10  ;;  %v3623_v6 = vmul.f32 0.3275911, %v3591_v8  ;;  %v3592_v16 = vand.u32 2147483647, %v8353_v49  ;;  %v8362_v17 = vpop.eup %6058  ;;  %6072 = vpow2.f32 %v4111_v27 }
 0xd27   : > { %v3653_v26 = vadd.f32 1.0, %v3621_v37  ;;  %v4071_v3 = vsub.f32 0.0, %v4039_v62  ;;  %v8365_v32 = vadd.f32 %v8009_v7, %v3449_v22  ;;  %v8368_v13 = vadd.f32 %v8012_v12, %v3451_v30  ;;  %v8370_v4 = vpop.eup %6060 }
 0xd28   : > { %9577 = vst [vmem:[#allocation80_spill] sm:$0xff] %v8370_v4  ;;  %v8373_v41 = vmul.f32 0.5, %v8160_v5  ;;  %v4117_v14 = vmul.f32 1.442695, %v4069_v56  ;;  %v3622_v8 = vmul.f32 0.3275911, %v3590_v44  ;;  %v8375_v20 = vpop.eup %6062  ;;  %6074 = vrcp.f32 %v3652_v40 }
 0xd29   : > { %v4070_v49 = vsub.f32 0.0, %v4038_v63  ;;  %v8378_v62 = vmul.f32 0.70710677, %v8365_v32  ;;  %v8381_v37 = vmul.f32 0.70710677, %v8368_v13  ;;  %6076 = vpow2.f32 %v4115_v47 }
 0xd2a   : > { %9578 = vst [vmem:[#allocation81_spill] sm:$0xff] %v8373_v41  ;;  %v3655_v22 = vadd.f32 1.0, %v3623_v6  ;;  %v4040_v30 = vmul.f32 %v3592_v16, %v3592_v16  ;;  %v3450_v5 = vmul.f32 %v8015_v57, %v8106_v1  ;;  %6078 = vrcp.f32 %v3653_v26 }
 0xd2b   : > { %9579 = vst [vmem:[#allocation82_spill] sm:$0xff] %v8378_v62  ;;  %9580 = vst [vmem:[#allocation83_spill] sm:$0xff] %v8381_v37  ;;  %v8385_v4 = vpop.eup %6064  ;;  %v4121_v44 = vmul.f32 1.442695, %v4071_v3  ;;  %v3593_v27 = vand.u32 2147483647, %v8378_v62  ;;  %v3452_v47 = vmul.f32 %v8021_v50, %v9581_v39  ;;  %6080 = vpow2.f32 %v4117_v14 }
 0xd2c   : > { %v3595_v56 = vand.u32 2147483647, %v8381_v37  ;;  %v3654_v40 = vadd.f32 1.0, %v3622_v8  ;;  %v3624_v63 = vmul.f32 0.3275911, %v3592_v16  ;;  %v8390_v10 = vadd.f32 %v8034_v35, %v3450_v5  ;;  %v8394_v6 = vpop.eup %6066  ;;  %v9588_v37 = vld [vmem:[#allocation51_spill] sm:$0xff] }
 0xd2d   : > { %9582 = vst [vmem:[#allocation50_spill] sm:$0xff] %v8394_v6  ;;  %v8397_v1 = vmul.f32 0.5, %v8163_v2  ;;  %v8400_v26 = vmul.f32 0.5, %v8208_v58  ;;  %v4119_v3 = vmul.f32 1.442695, %v4070_v49  ;;  %v8402_v62 = vpop.eup %6068  ;;  %6082 = vrcp.f32 %v3655_v22 }
 0xd2e   : > { %9584 = vst [vmem:[#allocation85_spill] sm:$0xff] %v8402_v62  ;;  %v4072_v16 = vsub.f32 0.0, %v4040_v30  ;;  %v8405_v8 = vmul.f32 0.70710677, %v8390_v10  ;;  %v8408_v5 = vadd.f32 %v8043_v23, %v3452_v47  ;;  %v8411_v39 = vmul.f32 0.5, %v8218_v59 }
 0xd2f   : > { %9583 = vst [vmem:[#allocation84_spill] sm:$0xff] %v8397_v1  ;;  %6084 = vpow2.f32 %v4121_v44  ;;  %v4041_v2 = vmul.f32 %v3593_v27, %v3593_v27  ;;  %v4043_v1 = vmul.f32 %v3595_v56, %v3595_v56  ;;  %v8413_v58 = vpop.eup %6070  ;;  %v3656_v49 = vadd.f32 1.0, %v3624_v63 }
 0xd30   : > { %9585 = vst [vmem:[#allocation86_spill] sm:$0xff] %v8411_v39  ;;  %6086 = vrcp.f32 %v3654_v40  ;;  %v3594_v14 = vand.u32 2147483647, %v8405_v8  ;;  %v8417_v22 = vmul.f32 0.70710677, %v8408_v5  ;;  %v8420_v30 = vmul.f32 0.5, %v8226_v15  ;;  %v8424_v44 = vpop.eup %6072 }
 0xd31   : > { %6088 = vpow2.f32 %v4119_v3  ;;  %v3625_v47 = vmul.f32 0.3275911, %v3593_v27  ;;  %v3453_v59 = vmul.f32 %v8002_v33, %v9588_v37  ;;  %v4123_v39 = vmul.f32 1.442695, %v4072_v16  ;;  %v9590_v15 = vld [vmem:[#allocation53_spill] sm:$0xff] }
 0xd32   : > { %9586 = vst [vmem:[#allocation87_spill] sm:$0xff] %v8417_v22  ;;  %9587 = vst [vmem:[#allocation88_spill] sm:$0xff] %v8420_v30  ;;  %v3627_v62 = vmul.f32 0.3275911, %v3595_v56  ;;  %v4042_v6 = vmul.f32 %v3594_v14, %v3594_v14  ;;  %v3596_v40 = vand.u32 2147483647, %v8417_v22  ;;  %v8427_v63 = vpop.eup %6074  ;;  %v3455_v27 = vmul.f32 %v8005_v55, %v9590_v15 }
 0xd33   : > { %9589 = vst [vmem:[#allocation51_spill] sm:$0xff] %v8427_v63  ;;  %v4073_v36 = vsub.f32 0.0, %v4041_v2  ;;  %v4075_v60 = vsub.f32 0.0, %v4043_v1  ;;  %v8430_v21 = vadd.f32 %v8009_v7, %v3453_v59  ;;  %v8434_v3 = vpop.eup %6076  ;;  %v8437_v37 = vmul.f32 0.5, %v8251_v18  ;;  %v9596_v63 = vld [vmem:[#allocation54_spill] sm:$0xff] }
 0xd34   : > { %9591 = vst [vmem:[#allocation53_spill] sm:$0xff] %v8434_v3  ;;  %v8440_v56 = vmul.f32 0.5, %v8254_v11  ;;  %v8443_v16 = vmul.f32 0.5, %v8281_v38  ;;  %6090 = vrcp.f32 %v3656_v49  ;;  %v8445_v2 = vpop.eup %6078  ;;  %v3657_v1 = vadd.f32 1.0, %v3625_v47 }
 0xd35   : > { %9592 = vst [vmem:[#allocation89_spill] sm:$0xff] %v8437_v37  ;;  %v3626_v59 = vmul.f32 0.3275911, %v3594_v14  ;;  %v8448_v22 = vmul.f32 0.70710677, %v8430_v21  ;;  %v8451_v15 = vadd.f32 %v8012_v12, %v3455_v27  ;;  %v3659_v3 = vadd.f32 1.0, %v3627_v62  ;;  %v8455_v30 = vpop.eup %6080 }
 0xd36   : > { %9593 = vst [vmem:[#allocation90_spill] sm:$0xff] %v8443_v16  ;;  %v4074_v18 = vsub.f32 0.0, %v4042_v6  ;;  %v4044_v37 = vmul.f32 %v3596_v40, %v3596_v40  ;;  %v3454_v11 = vmul.f32 %v8015_v57, %v9596_v63  ;;  %6092 = vpow2.f32 %v4123_v39  ;;  %v9599_v6 = vld [vmem:[#allocation55_spill] sm:$0xff] }
 0xd37   : > { %9594 = vst [vmem:[#allocation91_spill] sm:$0xff] %v8448_v22  ;;  %9595 = vst [vmem:[#allocation92_spill] sm:$0xff] %v8451_v15  ;;  %v4125_v38 = vmul.f32 1.442695, %v4073_v36  ;;  %v4129_v49 = vmul.f32 1.442695, %v4075_v60  ;;  %v8458_v14 = vpop.eup %6082  ;;  %v3456_v27 = vmul.f32 %v8021_v50, %v9599_v6  ;;  %6094 = vrcp.f32 %v3657_v1 }
 0xd38   : > { %v3597_v47 = vand.u32 2147483647, %v8448_v22  ;;  %9597 = vst [vmem:[#allocation54_spill] sm:$0xff] %v8458_v14  ;;  %v3628_v16 = vmul.f32 0.3275911, %v3596_v40  ;;  %v8464_v62 = vadd.f32 %v8034_v35, %v3454_v11  ;;  %v8471_v39 = vmul.f32 0.5, %v8304_v28 }
 0xd39   : > { %v8461_v41 = vmul.f32 0.70710677, %v8451_v15  ;;  %v8468_v63 = vpop.eup %6084  ;;  %v3658_v60 = vadd.f32 1.0, %v3626_v59  ;;  %6096 = vrcp.f32 %v3659_v3  ;;  %v4127_v40 = vmul.f32 1.442695, %v4074_v18 }
 0xd3a   : > { %9600 = vst [vmem:[#allocation55_spill] sm:$0xff] %v8468_v63  ;;  %9601 = vst [vmem:[#allocation94_spill] sm:$0xff] %v8471_v39  ;;  %v4045_v36 = vmul.f32 %v3597_v47, %v3597_v47  ;;  %v8473_v22 = vpop.eup %6086  ;;  %v4076_v15 = vsub.f32 0.0, %v4044_v37  ;;  %v8476_v14 = vmul.f32 0.70710677, %v8464_v62  ;;  %6098 = vpow2.f32 %v4125_v38 }
 0xd3b   : > { %9598 = vst [vmem:[#allocation93_spill] sm:$0xff] %v8461_v41  ;;  %v8478_v11 = vpop.eup %6088  ;;  %v3629_v6 = vmul.f32 0.3275911, %v3597_v47  ;;  %v3599_v63 = vand.u32 2147483647, %v8461_v41  ;;  %v8482_v28 = vadd.f32 %v8043_v23, %v3456_v27  ;;  %v8485_v1 = vmul.f32 0.5, %v8315_v54 }
 0xd3c   : > { %6100 = vpow2.f32 %v4129_v49  ;;  %v3660_v59 = vadd.f32 1.0, %v3628_v16  ;;  %v3598_v3 = vand.u32 2147483647, %v8476_v14  ;;  %v8489_v37 = vmul.f32 0.5, %v8318_v48  ;;  %v9608_v48 = vld [vmem:[#allocation56_spill] sm:$0xff] }
 0xd3d   : > { %9602 = vst [vmem:[#allocation95_spill] sm:$0xff] %v8482_v28  ;;  %9603 = vst [vmem:[#allocation96_spill] sm:$0xff] %v8485_v1  ;;  %v8492_v18 = vmul.f32 0.5, %v8343_v42  ;;  %6102 = vrcp.f32 %v3658_v60  ;;  %v4077_v38 = vsub.f32 0.0, %v4045_v36  ;;  %v8497_v27 = vmul.f32 0.5, %v8365_v32 }
 0xd3e   : > { %v8494_v47 = vpop.eup %6090  ;;  %6104 = vpow2.f32 %v4127_v40  ;;  %v4131_v54 = vmul.f32 1.442695, %v4076_v15  ;;  %v8500_v49 = vmul.f32 0.70710677, %v8482_v28  ;;  %v3661_v16 = vadd.f32 1.0, %v3629_v6  ;;  %v9611_v6 = vld [vmem:[#allocation57_spill] sm:$0xff] }
 0xd3f   : > { %9604 = vst [vmem:[#allocation97_spill] sm:$0xff] %v8492_v18  ;;  %9605 = vst [vmem:[#allocation98_spill] sm:$0xff] %v8494_v47  ;;  %v3631_v41 = vmul.f32 0.3275911, %v3599_v63  ;;  %v4047_v1 = vmul.f32 %v3599_v63, %v3599_v63  ;;  %v3457_v39 = vmul.f32 %v8002_v33, %v9608_v48  ;;  %v8505_v42 = vmul.f32 0.5, %v8368_v13  ;;  %v9612_v48 = vld [vmem:[#allocation58_spill] sm:$0xff] }
 0xd40   : > { %9606 = vst [vmem:[#allocation99_spill] sm:$0xff] %v8497_v27  ;;  %9607 = vst [vmem:[#allocation100_spill] sm:$0xff] %v8500_v49  ;;  %v8508_v60 = vmul.f32 0.5, %v8390_v10  ;;  %6106 = vrcp.f32 %v3660_v59  ;;  %v4046_v32 = vmul.f32 %v3598_v3, %v3598_v3  ;;  %v8510_v36 = vpop.eup %6092  ;;  %v4133_v15 = vmul.f32 1.442695, %v4077_v38 }
 0xd41   : > { %9609 = vst [vmem:[#allocation56_spill] sm:$0xff] %v8505_v42  ;;  %9610 = vst [vmem:[#allocation101_spill] sm:$0xff] %v8510_v36  ;;  %v3630_v40 = vmul.f32 0.3275911, %v3598_v3  ;;  %v3505_v28 = vadd.f32 %v8009_v7, %v3457_v39  ;;  %v3459_v63 = vmul.f32 %v8005_v55, %v9611_v6  ;;  %6108 = vpow2.f32 %v4131_v54  ;;  %v9613_v42 = vld [vmem:[#allocation59_spill] sm:$0xff]  ;;  %v8520_v59 = vpop.eup %6094 }
 0xd42   : > { %v3600_v33 = vand.u32 2147483647, %v8500_v49  ;;  %v3458_v13 = vmul.f32 %v8015_v57, %v9612_v48  ;;  %v3460_v10 = vmul.f32 %v8021_v50, %v9613_v42  ;;  %v8523_v38 = vmul.f32 0.5, %v8408_v5 }
 0xd43   : > { %6110 = vrcp.f32 %v3661_v16  ;;  %v3663_v7 = vadd.f32 1.0, %v3631_v41  ;;  %v4079_v39 = vsub.f32 0.0, %v4047_v1  ;;  %v8525_v3 = vpop.eup %6096  ;;  %v4078_v55 = vsub.f32 0.0, %v4046_v32  ;;  %v8542_v1 = vld [vmem:[%s7002_s26 + $0x88] sm:$0xff] }
 0xd44   : > { %9614 = vst [vmem:[#allocation57_spill] sm:$0xff] %v8523_v38  ;;  %9615 = vst [vmem:[#allocation58_spill] sm:$0xff] %v8525_v3  ;;  %v8527_v54 = vmul.f32 0.70710677, %v3505_v28  ;;  %v8530_v6 = vadd.f32 %v8012_v12, %v3459_v63  ;;  %v3506_v57 = vadd.f32 %v8034_v35, %v3458_v13  ;;  %v8533_v50 = vpop.eup %6098  ;;  %v8536_v42 = vmul.f32 0.5, %v8430_v21 }
 0xd45   : > { %6112 = vpow2.f32 %v4133_v15  ;;  %v3662_v5 = vadd.f32 1.0, %v3630_v40  ;;  %v8539_v41 = vadd.f32 %v8043_v23, %v3460_v10  ;;  %v3632_v32 = vmul.f32 0.3275911, %v3600_v33 }
 0xd46   : > { %9616 = vst [vmem:[#allocation59_spill] sm:$0xff] %v8527_v54  ;;  %9617 = vst [vmem:[#allocation102_spill] sm:$0xff] %v8530_v6  ;;  %v8544_v16 = vpop.eup %6100  ;;  %v4048_v48 = vmul.f32 %v3600_v33, %v3600_v33  ;;  %v3601_v12 = vand.u32 2147483647, %v8527_v54  ;;  %v8548_v35 = vmul.f32 0.70710677, %v8530_v6  ;;  %6114 = vrcp.f32 %v3663_v7 }
 0xd47   : > { %9618 = vst [vmem:[#allocation103_spill] sm:$0xff] %v8536_v42  ;;  %9619 = vst [vmem:[#allocation104_spill] sm:$0xff] %v8539_v41  ;;  %v8550_v63 = vpop.eup %6102  ;;  %v8552_v21 = vmul.f32 1.442695, %v4079_v39  ;;  %v8555_v15 = vmul.f32 0.5, %v8464_v62  ;;  %6116 = vrcp.f32 %v3662_v5  ;;  %v4454_v7 = vunpack.c.l.s8.bf16 %v8542_v1 }
 0xd48   : > { %9620 = vst [vmem:[#allocation105_spill] sm:$0xff] %v8544_v16  ;;  %9621 = vst [vmem:[#allocation106_spill] sm:$0xff] %v8548_v35  ;;  %v8557_v23 = vmul.f32 0.70710677, %v3506_v57  ;;  %v8559_v40 = vpop.eup %6104  ;;  %v4135_v13 = vmul.f32 1.442695, %v4078_v55  ;;  %v4049_v33 = vmul.f32 %v3601_v12, %v3601_v12 }
 0xd49   : > { %9622 = vst [vmem:[#allocation107_spill] sm:$0xff] %v8552_v21  ;;  %9623 = vst [vmem:[#allocation108_spill] sm:$0xff] %v8555_v15  ;;  %v3633_v10 = vmul.f32 0.3275911, %v3601_v12  ;;  %v3603_v49 = vand.u32 2147483647, %v8548_v35  ;;  %4558 = vmatprep.subr.bf16.mxu0 %v4454_v7 }
 0xd4a   : > { %9624 = vst [vmem:[#allocation109_spill] sm:$0xff] %v8557_v23  ;;  %v3602_v6 = vand.u32 2147483647, %v8557_v23  ;;  %v8564_v38 = vmul.f32 0.70710677, %v8539_v41  ;;  %v8567_v39 = vpop.eup %6106  ;;  %v3664_v62 = vadd.f32 1.0, %v3632_v32  ;;  %6118 = vpow2.f32 %v4135_v13 }
 0xd4b   : > { %9626 = vst [vmem:[#allocation111_spill] sm:$0xff] %v8567_v39  ;;  %v4080_v21 = vsub.f32 0.0, %v4048_v48  ;;  %v4081_v18 = vsub.f32 0.0, %v4049_v33  ;;  %v3734_v16 = vmul.f32 1.0614054, %v8192_v0  ;;  %v3665_v55 = vadd.f32 1.0, %v3633_v10  ;;  %v8571_v35 = vpop.eup %6108 }
 0xd4c   : > { %9625 = vst [vmem:[#allocation110_spill] sm:$0xff] %v8564_v38  ;;  %v3634_v12 = vmul.f32 0.3275911, %v3602_v6  ;;  %v4050_v36 = vmul.f32 %v3602_v6, %v3602_v6  ;;  %v3604_v5 = vand.u32 2147483647, %v8564_v38  ;;  %9627 = vst [vmem:[#allocation112_spill] sm:$0xff] %v8571_v35  ;;  %6120 = vrcp.f32 %v3664_v62 }
 0xd4d   : > { %v8573_v41 = vmul.f32 0.5, %v3505_v28  ;;  %v4141_v3 = vmul.f32 1.442695, %v4081_v18  ;;  %v3635_v47 = vmul.f32 0.3275911, %v3603_v49  ;;  %v8575_v39 = vpop.eup %6110  ;;  %v8580_v10 = vld [vmem:[%s7002_s26 + $0x80] sm:$0xff]  ;;  %6122 = vrcp.f32 %v3665_v55 }
 0xd4e   : > { %v3666_v32 = vadd.f32 1.0, %v3634_v12  ;;  %v4082_v48 = vsub.f32 0.0, %v4050_v36  ;;  %v3636_v33 = vmul.f32 0.3275911, %v3604_v5  ;;  %v8577_v42 = vmul.f32 %v3604_v5, %v3604_v5  ;;  %v8601_v55 = vld [vmem:[%s7002_s26 + $0x98] sm:$0xff] }
 0xd4f   : > { %9628 = vst [vmem:[#allocation113_spill] sm:$0xff] %v8573_v41  ;;  %v8582_v6 = vmul.f32 1.442695, %v4080_v21  ;;  %v3738_v7 = vmul.f32 1.0614054, %v8236_v9  ;;  %v8585_v28 = vpop.eup %6112  ;;  %v8587_v18 = vmul.f32 %v3603_v49, %v3603_v49  ;;  %v8589_v38 = vmul.f32 0.5, %v3506_v57 }
 0xd50   : > { %9629 = vst [vmem:[#allocation114_spill] sm:$0xff] %v8577_v42  ;;  %v3766_v13 = vadd.f32 -1.4531521, %v3734_v16  ;;  %9631 = vst [vmem:[#allocation116_spill] sm:$0xff] %v8585_v28  ;;  %v4143_v36 = vmul.f32 1.442695, %v4082_v48  ;;  %6124 = vpow2.f32 %v4141_v3  ;;  %v8594_v62 = vpop.eup %6114 }
 0xd51   : > { %9630 = vst [vmem:[#allocation115_spill] sm:$0xff] %v8582_v6  ;;  %9632 = vst [vmem:[#allocation117_spill] sm:$0xff] %v8587_v18  ;;  %v8591_v12 = vadd.f32 1.0, %v3635_v47  ;;  %v3770_v5 = vadd.f32 -1.4531521, %v3738_v7  ;;  %6126 = vrcp.f32 %v3666_v32  ;;  %v8596_v6 = vadd.f32 1.0, %v3636_v33 }
 0xd52   : > { %9633 = vst [vmem:[#allocation118_spill] sm:$0xff] %v8589_v38  ;;  %v3798_v21 = vmul.f32 %v8192_v0, %v3766_v13  ;;  %9635 = vst [vmem:[#allocation120_spill] sm:$0xff] %v8594_v62  ;;  %v3742_v3 = vmul.f32 1.0614054, %v8350_v51  ;;  %v8607_v7 = vld [vmem:[%s7002_s26 + $0x90] sm:$0xff]  ;;  %v8609_v13 = vpop.eup %6116  ;;  %6128 = vpow2.f32 %v4143_v36  ;;  %vm4222_vm7 = vcmp.ge.f32.partialorder %v8221_v52, 0.0 }
 0xd53   : > { %9634 = vst [vmem:[#allocation119_spill] sm:$0xff] %v8591_v12  ;;  %9636 = vst [vmem:[#allocation121_spill] sm:$0xff] %v8596_v6  ;;  %v3802_v57 = vmul.f32 %v8236_v9, %v3770_v5  ;;  %v3746_v33 = vmul.f32 1.0614054, %v8413_v58  ;;  %v3741_v16 = vmul.f32 1.0614054, %v8285_v25 }
 0xd54   : > { %v3830_v48 = vadd.f32 1.4214138, %v3798_v21  ;;  %v3774_v5 = vadd.f32 -1.4531521, %v3742_v3  ;;  %v3745_v35 = vmul.f32 1.0614054, %v8375_v20  ;;  %v8618_v18 = vpop.eup %6118 }
 0xd55   : > { %v3834_v49 = vadd.f32 1.4214138, %v3802_v57  ;;  %v3778_v47 = vadd.f32 -1.4531521, %v3746_v33  ;;  %v3773_v6 = vadd.f32 -1.4531521, %v3741_v16 }
 0xd56   : > { %v3862_v62 = vmul.f32 %v8192_v0, %v3830_v48  ;;  %9637 = vst [vmem:[#allocation122_spill] sm:$0xff] %v8618_v18  ;;  %v3806_v12 = vmul.f32 %v8350_v51, %v3774_v5  ;;  %v3777_v3 = vadd.f32 -1.4531521, %v3745_v35  ;;  %v8626_v41 = vpop.eup %6120  ;;  %v3754_v35 = vmul.f32 1.0614054, %v8550_v63  ;;  %v8696_v52 = vld [vmem:[%s7002_s26 + $0xa0] sm:$0xff] }
 0xd57   : > { %v3866_v36 = vmul.f32 %v8236_v9, %v3834_v49  ;;  %v3810_v48 = vmul.f32 %v8413_v58, %v3778_v47  ;;  %v3805_v21 = vmul.f32 %v8285_v25, %v3773_v6  ;;  %9638 = vst [vmem:[#allocation123_spill] sm:$0xff] %v8626_v41  ;;  %v3750_v49 = vmul.f32 1.0614054, %v8473_v22 }
 0xd58   : > { %v3894_v32 = vadd.f32 -0.28449672, %v3862_v62  ;;  %v3838_v38 = vadd.f32 1.4214138, %v3806_v12  ;;  %v8630_v62 = vpop.eup %6122  ;;  %v3809_v57 = vmul.f32 %v8375_v20, %v3777_v3  ;;  %v9640_v12 = vld [vmem:[#allocation48_spill] sm:$0xff]  ;;  %vm4226_vm8 = vcmp.ge.f32.partialorder %v8278_v29, 0.0 }
 0xd59   : > { %v3898_v16 = vadd.f32 -0.28449672, %v3866_v36  ;;  %v3842_v5 = vadd.f32 1.4214138, %v3810_v48  ;;  %v3837_v15 = vadd.f32 1.4214138, %v3805_v21 }
 0xd5a   : > { %v3926_v42 = vmul.f32 %v8192_v0, %v3894_v32  ;;  %v8634_v47 = vpop.eup %6124  ;;  %v3870_v36 = vmul.f32 %v8350_v51, %v3838_v38  ;;  %v3782_v41 = vadd.f32 -1.4531521, %v3750_v49  ;;  %vm4214_vm5 = vcmp.ge.f32.partialorder %v9640_v12, 0.0  ;;  %v9642_v38 = vld [vmem:[#allocation52_spill] sm:$0xff] }
 0xd5b   : > { %9639 = vst [vmem:[#allocation124_spill] sm:$0xff] %v8634_v47  ;;  %v3930_v6 = vmul.f32 %v8236_v9, %v3898_v16  ;;  %v8638_v32 = vpop.eup %6126  ;;  %v3874_v27 = vmul.f32 %v8413_v58, %v3842_v5  ;;  %v3841_v48 = vadd.f32 1.4214138, %v3809_v57  ;;  %v3869_v3 = vmul.f32 %v8285_v25, %v3837_v15  ;;  %v8677_v12 = vld [vmem:[%s7002_s26 + $0xa8] sm:$0xff] }
 0xd5c   : > { %v3958_v33 = vadd.f32 0.2548296, %v3926_v42  ;;  %v3786_v21 = vadd.f32 -1.4531521, %v3754_v35  ;;  %v3902_v47 = vadd.f32 -0.28449672, %v3870_v36  ;;  %v3814_v16 = vmul.f32 %v8473_v22, %v3782_v41  ;;  %v8645_v42 = vpop.eup %6128 }
 0xd5d   : > { %v3962_v28 = vadd.f32 0.2548296, %v3930_v6  ;;  %9641 = vst [vmem:[#allocation48_spill] sm:$0xff] %v8645_v42  ;;  %vm4218_vm6 = vcmp.ge.f32.partialorder %v9642_v38, 0.0  ;;  %v3906_v49 = vadd.f32 -0.28449672, %v3874_v27  ;;  %v3873_v54 = vmul.f32 %v8375_v20, %v3841_v48 }
 0xd5e   : > { %v3990_v18 = vmul.f32 %v8192_v0, %v3958_v33  ;;  %v3901_v23 = vadd.f32 -0.28449672, %v3869_v3  ;;  %v3818_v5 = vmul.f32 %v8550_v63, %v3786_v21  ;;  %v3934_v35 = vmul.f32 %v8350_v51, %v3902_v47 }
 0xd5f   : > { %v3994_v57 = vmul.f32 %v8236_v9, %v3962_v28  ;;  %v3846_v0 = vadd.f32 1.4214138, %v3814_v16  ;;  %v3938_v33 = vmul.f32 %v8413_v58, %v3906_v49  ;;  %v3905_v41 = vadd.f32 -0.28449672, %v3873_v54 }
 0xd60   : > { %v4150_v15 = vmul.f32 %v8197_v19, %v3990_v18  ;;  %v3933_v6 = vmul.f32 %v8285_v25, %v3901_v23  ;;  %v3850_v36 = vadd.f32 1.4214138, %v3818_v5  ;;  %v3966_v48 = vadd.f32 0.2548296, %v3934_v35 }
 0xd61   : > { %v4154_v27 = vmul.f32 %v8248_v43, %v3994_v57  ;;  %v3878_v3 = vmul.f32 %v8473_v22, %v3846_v0  ;;  %v3970_v9 = vadd.f32 0.2548296, %v3938_v33  ;;  %v3937_v19 = vmul.f32 %v8375_v20, %v3905_v41  ;;  %v9643_v43 = vld [vmem:[#allocation61_spill] sm:$0xff] }
 0xd62   : > { %v4182_v42 = vsub.f32 1.0, %v4150_v15  ;;  %v3965_v28 = vadd.f32 0.2548296, %v3933_v6  ;;  %v3882_v18 = vmul.f32 %v8550_v63, %v3850_v36  ;;  %v3998_v23 = vmul.f32 %v8350_v51, %v3966_v48 }
 0xd63   : > { %v4186_v54 = vsub.f32 1.0, %v4154_v27  ;;  %v3910_v21 = vadd.f32 -0.28449672, %v3878_v3  ;;  %vm4221_vm9 = vcmp.ge.f32.partialorder %v9643_v43, 0.0  ;;  %v4002_v16 = vmul.f32 %v8413_v58, %v3970_v9 }
 0xd64   : > { %v4246_v47 = vsub.f32 0.0, %v4182_v42  ;;  %v3969_v49 = vadd.f32 0.2548296, %v3937_v19  ;;  %v3997_v5 = vmul.f32 %v8285_v25, %v3965_v28  ;;  %v3914_v57 = vadd.f32 -0.28449672, %v3882_v18 }
 0xd65   : > { %vm4225_vm10 = vcmp.ge.f32.partialorder %v8239_v46, 0.0  ;;  %v4250_v15 = vsub.f32 0.0, %v4186_v54  ;;  %v4158_v0 = vmul.f32 %v8362_v17, %v3998_v23  ;;  %v3942_v51 = vmul.f32 %v8473_v22, %v3910_v21 }
 0xd66   : > { %v4278_v35 = vsel %vm4214_vm5, %v4182_v42, %v4246_v47  ;;  %v4162_v41 = vmul.f32 %v8424_v44, %v4002_v16  ;;  %v4001_v58 = vmul.f32 %v8375_v20, %v3969_v49  ;;  %v4157_v6 = vmul.f32 %v8297_v61, %v3997_v5 }
 0xd67   : > { %v4310_v33 = vadd.f32 1.0, %v4278_v35  ;;  %v4282_v25 = vsel %vm4218_vm6, %v4186_v54, %v4250_v15  ;;  %v4190_v36 = vsub.f32 1.0, %v4158_v0  ;;  %v3946_v27 = vmul.f32 %v8550_v63, %v3914_v57 }
 0xd68   : > { %v3974_v48 = vadd.f32 0.2548296, %v3942_v51  ;;  %vm4230_vm11 = vcmp.ge.f32.partialorder %v8329_v31, 0.0  ;;  %v4314_v17 = vadd.f32 1.0, %v4282_v25  ;;  %v4194_v3 = vsub.f32 1.0, %v4162_v41 }
 0xd69   : > { %v4342_v42 = vmul.f32 %v4310_v33, %v8325_v53  ;;  %v4161_v44 = vmul.f32 %v8385_v4, %v4001_v58  ;;  %v4254_v20 = vsub.f32 0.0, %v4190_v36  ;;  %v4189_v9 = vsub.f32 1.0, %v4157_v6 }
 0xd6a   : > { %v3978_v61 = vadd.f32 0.2548296, %v3946_v27  ;;  %v4006_v38 = vmul.f32 %v8473_v22, %v3974_v48  ;;  %vm4234_vm12 = vcmp.ge.f32.partialorder %v8405_v8, 0.0  ;;  %v4346_v19 = vmul.f32 %v4314_v17, %v8339_v24 }
 0xd6b   : > { %v4258_v28 = vsub.f32 0.0, %v4194_v3  ;;  %v4193_v18 = vsub.f32 1.0, %v4161_v44  ;;  %v4462_v54 = vunpack.c.l.s8.bf16 %v8677_v12  ;;  %v4286_v53 = vsel %vm4222_vm7, %v4190_v36, %v4254_v20  ;;  %v8719_v20 = vld [vmem:[%s7002_s26 + $0xb8] sm:$0xff] }
 0xd6c   : > { %v4253_v47 = vsub.f32 0.0, %v4189_v9  ;;  %v4010_v4 = vmul.f32 %v8550_v63, %v3978_v61  ;;  %v4166_v23 = vmul.f32 %v8478_v11, %v4006_v38  ;;  %v4374_v21 = vpack.c.bf16 %v4346_v19, %v4342_v42 }
 0xd6d   : > { %v4290_v22 = vsel %vm4226_vm8, %v4194_v3, %v4258_v28  ;;  %v4318_v16 = vadd.f32 1.0, %v4286_v53  ;;  %v4257_v49 = vsub.f32 0.0, %v4193_v18  ;;  %v3749_v29 = vmul.f32 1.0614054, %v8445_v2 }
 0xd6e   : > { %v4322_v24 = vadd.f32 1.0, %v4290_v22  ;;  %v4285_v5 = vsel %vm4221_vm9, %v4189_v9, %v4253_v47  ;;  %v4170_v57 = vmul.f32 %v8559_v40, %v4010_v4  ;;  %v4198_v15 = vsub.f32 1.0, %v4166_v23  ;;  %4517 = vmatprep.mubr.bf16.mxu0 %v4374_v21  ;;  %v8730_v47 = vld [vmem:[%s7002_s26 + $0xb0] sm:$0xff] }
 0xd6f   : > { %v4350_v63 = vmul.f32 %v4318_v16, %v8400_v26  ;;  %v4289_v11 = vsel %vm4225_vm10, %v4193_v18, %v4257_v49  ;;  %v4317_v35 = vadd.f32 1.0, %v4285_v5  ;;  %v9644_v0 = vpack.c.bf16 %v8275_v34, %v8271_v45  ;;  %v9646_v26 = vld [vmem:[#allocation81_spill] sm:$0xff]  ;;  %v9648_v34 = vld [vmem:[#allocation88_spill] sm:$0xff] }
 0xd70   : > { %v4354_v43 = vmul.f32 %v4322_v24, %v8440_v56  ;;  %v4321_v51 = vadd.f32 1.0, %v4289_v11  ;;  %v4202_v40 = vsub.f32 1.0, %v4170_v57  ;;  %v4262_v33 = vsub.f32 0.0, %v4198_v15 }
 0xd71   : > { %4518 = vmatmul.mubr.bf16.vlgmr.msra.gmra.mrb[48].mxu0 %v9644_v0  ;;  %v9645_v41 = vunpack.c.l.s8.bf16 %v8580_v10  ;;  %v4349_v58 = vmul.f32 %v4317_v35, %v9646_v26  ;;  %v3753_v46 = vmul.f32 1.0614054, %v8520_v59  ;;  %v3781_v6 = vadd.f32 -1.4531521, %v3749_v29 }
 0xd72   : > { %v4461_v25 = vunpack.c.l.s8.bf16 %v8696_v52  ;;  %v9647_v36 = vunpack.c.h.s8.bf16 %v8542_v1  ;;  %v4378_v45 = vpack.c.bf16 %v4354_v43, %v4350_v63  ;;  %v4353_v56 = vmul.f32 %v4321_v51, %v9648_v34 }
 0xd73   : > { %4559 = vmatpush1.bf16.msra.mxu0 %v9645_v41  ;;  %v4266_v27 = vsub.f32 0.0, %v4202_v40  ;;  %v4294_v48 = vsel %vm4230_vm11, %v4198_v15, %v4262_v33  ;;  %v3785_v42 = vadd.f32 -1.4531521, %v3753_v46  ;;  %v3813_v3 = vmul.f32 %v8445_v2, %v3781_v6  ;;  %v9653_v33 = vld [vmem:[#allocation63_spill] sm:$0xff] }
 0xd74   : > { %4560 = vmatprep.subr.bf16.mxu0 %v9647_v36  ;;  %v4326_v17 = vadd.f32 1.0, %v4294_v48  ;;  %v4464_v44 = vunpack.c.h.s8.bf16 %v8677_v12  ;;  %4527 = vmatprep.mubr.bf16.mxu0 %v4378_v45  ;;  %v4377_v9 = vpack.c.bf16 %v4353_v56, %v4349_v58  ;;  %v4463_v61 = vunpack.c.h.s8.bf16 %v8696_v52  ;;  %v9654_v6 = vld [vmem:[#allocation67_spill] sm:$0xff] }
 0xd75   : > { %v4298_v1 = vsel %vm4234_vm12, %v4202_v40, %v4266_v27  ;;  %v3758_v38 = vmul.f32 1.0614054, %v8609_v13  ;;  %v9649_v31 = vunpack.c.h.s8.bf16 %v8580_v10  ;;  %v3817_v18 = vmul.f32 %v8520_v59, %v3785_v42 }
 0xd76   : > { %v4330_v19 = vadd.f32 1.0, %v4298_v1  ;;  %v4358_v28 = vmul.f32 %v4326_v17, %v8489_v37  ;;  %v3845_v53 = vadd.f32 1.4214138, %v3813_v3  ;;  %v9650_v4 = vunpack.c.l.s8.bf16 %v8601_v55 }
 0xd77   : > { %4561 = vmatpush1.bf16.msra.mxu0 %v9649_v31  ;;  %v3762_v8 = vmul.f32 1.0614054, %v8638_v32  ;;  %v3790_v23 = vadd.f32 -1.4531521, %v3758_v38  ;;  %v4466_v21 = vunpack.c.l.s8.bf16 %v8719_v20  ;;  %v3757_v22 = vmul.f32 1.0614054, %v8575_v39 }
 0xd78   : > { %4562 = vmatprep.subr.bf16.mxu0 %v9650_v4  ;;  %v4362_v10 = vmul.f32 %v4330_v19, %v8508_v60  ;;  %v3849_v16 = vadd.f32 1.4214138, %v3817_v18  ;;  %v3877_v37 = vmul.f32 %v8445_v2, %v3845_v53  ;;  %v3761_v49 = vmul.f32 1.0614054, %v8630_v62  ;;  %v9657_v4 = vld [vmem:[#allocation82_spill] sm:$0xff] }
 0xd79   : > { %4528 = vmatmul.mubr.bf16.gmra.mrb[52].mxu0 %v4377_v9  ;;  %v3794_v24 = vadd.f32 -1.4531521, %v3762_v8  ;;  %v3822_v5 = vmul.f32 %v8609_v13, %v3790_v23  ;;  %v3789_v57 = vadd.f32 -1.4531521, %v3757_v22  ;;  %v4465_v15 = vunpack.c.l.s8.bf16 %v8730_v47  ;;  %v9656_v9 = vld [vmem:[#allocation72_spill] sm:$0xff] }
 0xd7a   : > { %v9651_v63 = vunpack.c.l.s8.bf16 %v8607_v7  ;;  %v4382_v11 = vpack.c.bf16 %v4362_v10, %v4358_v28  ;;  %v3881_v35 = vmul.f32 %v8520_v59, %v3849_v16  ;;  %v3909_v29 = vadd.f32 -0.28449672, %v3877_v37 }
 0xd7b   : > { %v3793_v60 = vadd.f32 -1.4531521, %v3761_v49  ;;  %v9652_v0 = vunpack.c.h.s8.bf16 %v8601_v55  ;;  %v3826_v43 = vmul.f32 %v8638_v32, %v3794_v24  ;;  %v3854_v51 = vadd.f32 1.4214138, %v3822_v5 }
 0xd7c   : > { %4563 = vmatpush1.bf16.msra.mxu0 %v9651_v63  ;;  %v3821_v40 = vmul.f32 %v8575_v39, %v3789_v57  ;;  %v3736_v41 = vmul.f32 1.0614054, %v9653_v33  ;;  %4537 = vmatprep.mubr.bf16.mxu0 %v4382_v11  ;;  %v3913_v26 = vadd.f32 -0.28449672, %v3881_v35  ;;  %v3941_v58 = vmul.f32 %v8445_v2, %v3909_v29  ;;  %v9658_v29 = vld [vmem:[#allocation109_spill] sm:$0xff] }
 0xd7d   : > { %4564 = vmatprep.subr.bf16.mxu0 %v9652_v0  ;;  %v3825_v46 = vmul.f32 %v8630_v62, %v3793_v60  ;;  %v3740_v36 = vmul.f32 1.0614054, %v9654_v6  ;;  %v3858_v45 = vadd.f32 1.4214138, %v3826_v43  ;;  %v3886_v34 = vmul.f32 %v8609_v13, %v3854_v51 }
 0xd7e   : > { %v3853_v55 = vadd.f32 1.4214138, %v3821_v40  ;;  %v3768_v56 = vadd.f32 -1.4531521, %v3736_v41  ;;  %v9655_v27 = vunpack.c.h.s8.bf16 %v8607_v7  ;;  %v3945_v48 = vmul.f32 %v8520_v59, %v3913_v26  ;;  %v9660_v40 = vld [vmem:[#allocation59_spill] sm:$0xff]  ;;  %v9661_v26 = vld [vmem:[#allocation122_spill] sm:$0xff] }
 0xd7f   : > { %v3973_v17 = vadd.f32 0.2548296, %v3941_v58  ;;  %v3857_v42 = vadd.f32 1.4214138, %v3825_v46  ;;  %v3772_v3 = vadd.f32 -1.4531521, %v3740_v36  ;;  %v3890_v1 = vmul.f32 %v8638_v32, %v3858_v45 }
 0xd80   : > { %4565 = vmatpush1.bf16.msra.mxu0 %v9655_v27  ;;  %vm4229_vm13 = vcmp.ge.f32.partialorder %v9656_v9, 0.0  ;;  %v3918_v38 = vadd.f32 -0.28449672, %v3886_v34  ;;  %v3885_v31 = vmul.f32 %v8575_v39, %v3853_v55  ;;  %v3800_v19 = vmul.f32 %v9653_v33, %v3768_v56  ;;  %v9662_v55 = vld [vmem:[#allocation48_spill] sm:$0xff] }
 0xd81   : > { %4566 = vmatprep.subr.bf16.mxu0 %v4462_v54  ;;  %v3977_v28 = vadd.f32 0.2548296, %v3945_v48  ;;  %v4005_v7 = vmul.f32 %v8445_v2, %v3973_v17  ;;  %v3889_v18 = vmul.f32 %v8630_v62, %v3857_v42  ;;  %v3804_v53 = vmul.f32 %v9654_v6, %v3772_v3  ;;  %v9663_v27 = vld [vmem:[#allocation116_spill] sm:$0xff] }
 0xd82   : > { %vm4233_vm14 = vcmp.ge.f32.partialorder %v9657_v4, 0.0  ;;  %v3922_v8 = vadd.f32 -0.28449672, %v3890_v1  ;;  %v3950_v23 = vmul.f32 %v8609_v13, %v3918_v38  ;;  %v3917_v54 = vadd.f32 -0.28449672, %v3885_v31 }
 0xd83   : > { %v3832_v22 = vadd.f32 1.4214138, %v3800_v19  ;;  %v4009_v10 = vmul.f32 %v8520_v59, %v3977_v28  ;;  %v4165_v16 = vmul.f32 %v8455_v30, %v4005_v7  ;;  %v3921_v37 = vadd.f32 -0.28449672, %v3889_v18  ;;  %v9666_v19 = vld [vmem:[#allocation49_spill] sm:$0xff]  ;;  %v9667_v28 = vld [vmem:[#allocation60_spill] sm:$0xff] }
 0xd84   : > { %4567 = vmatpush1.bf16.msra.mxu0 %v4461_v25  ;;  %v3836_v2 = vadd.f32 1.4214138, %v3804_v53  ;;  %v3954_v49 = vmul.f32 %v8638_v32, %v3922_v8  ;;  %v3982_v24 = vadd.f32 0.2548296, %v3950_v23  ;;  %v3949_v5 = vmul.f32 %v8575_v39, %v3917_v54 }
 0xd85   : > { %4568 = vmatprep.subr.bf16.mxu0 %v4464_v44  ;;  %v3864_v57 = vmul.f32 %v9653_v33, %v3832_v22  ;;  %vm4238_vm15 = vcmp.ge.f32.partialorder %v8476_v14, 0.0  ;;  %v4169_v59 = vmul.f32 %v8533_v50, %v4009_v10  ;;  %v4197_v30 = vsub.f32 1.0, %v4165_v16  ;;  %v9659_v50 = vld [vmem:[#allocation91_spill] sm:$0xff] }
 0xd86   : > { %v3953_v63 = vmul.f32 %v8630_v62, %v3921_v37  ;;  %v3868_v25 = vmul.f32 %v9654_v6, %v3836_v2  ;;  %v3986_v11 = vadd.f32 0.2548296, %v3954_v49  ;;  %v4014_v12 = vmul.f32 %v8609_v13, %v3982_v24  ;;  %v9669_v2 = vld [vmem:[#allocation64_spill] sm:$0xff] }
 0xd87   : > { %v3981_v44 = vadd.f32 0.2548296, %v3949_v5  ;;  %v3896_v35 = vadd.f32 -0.28449672, %v3864_v57  ;;  %vm4242_vm0 = vcmp.ge.f32.partialorder %v9658_v29, 0.0  ;;  %v4201_v60 = vsub.f32 1.0, %v4169_v59 }
 0xd88   : > { %v4261_v0 = vsub.f32 0.0, %v4197_v30  ;;  %4569 = vmatpush1.bf16.msra.mxu0 %v4463_v61  ;;  %v3985_v43 = vadd.f32 0.2548296, %v3953_v63  ;;  %v3900_v51 = vadd.f32 -0.28449672, %v3868_v25  ;;  %vm4237_vm1 = vcmp.ge.f32.partialorder %v9659_v50, 0.0 }
 0xd89   : > { %vm4241_vm2 = vcmp.ge.f32.partialorder %v9660_v40, 0.0  ;;  %v4018_v41 = vmul.f32 %v8638_v32, %v3986_v11  ;;  %v4174_v58 = vmul.f32 %v9661_v26, %v4014_v12  ;;  %4570 = vmatprep.subr.bf16.mxu0 %v4466_v21  ;;  %v4013_v13 = vmul.f32 %v8575_v39, %v3981_v44  ;;  %v9664_v39 = vld [vmem:[#allocation124_spill] sm:$0xff]  ;;  %v9674_v26 = vld [vmem:[#allocation113_spill] sm:$0xff] }
 0xd8a   : > { %v3928_v46 = vmul.f32 %v9653_v33, %v3896_v35  ;;  %v4265_v36 = vsub.f32 0.0, %v4201_v60  ;;  %v4293_v52 = vsel %vm4229_vm13, %v4197_v30, %v4261_v0  ;;  %v4017_v61 = vmul.f32 %v8630_v62, %v3985_v43  ;;  %v9665_v62 = vld [vmem:[#allocation94_spill] sm:$0xff]  ;;  %v9670_v5 = vld [vmem:[#allocation68_spill] sm:$0xff]  ;;  %v4413_v30 = vld [vmem:[%s7002_s26 + $0xc0] sm:$0xff] }
 0xd8b   : > { %v3932_v45 = vmul.f32 %v9654_v6, %v3900_v51  ;;  %v4325_v34 = vadd.f32 1.0, %v4293_v52  ;;  %v4178_v32 = vmul.f32 %v9662_v55, %v4018_v41  ;;  %v4206_v56 = vsub.f32 1.0, %v4174_v58  ;;  %v4414_v59 = vld [vmem:[%s7002_s26 + $0xc8] sm:$0xff]  ;;  %v9673_v41 = vld [vmem:[#allocation103_spill] sm:$0xff]  ;;  %v9676_v52 = vld [vmem:[#allocation117_spill] sm:$0xff] }
 0xd8c   : > { %v4173_v48 = vmul.f32 %v9663_v27, %v4013_v13  ;;  %v4297_v21 = vsel %vm4233_vm14, %v4201_v60, %v4265_v36  ;;  %v4177_v17 = vmul.f32 %v9664_v39, %v4017_v61  ;;  %4571 = vmatpush1.bf16.msra.mxu0 %v4465_v15  ;;  %v3960_v42 = vadd.f32 0.2548296, %v3928_v46  ;;  %v9668_v15 = vld [vmem:[#allocation99_spill] sm:$0xff]  ;;  %v9671_v63 = vld [vmem:[#allocation108_spill] sm:$0xff]  ;;  %v9672_v60 = vld [vmem:[#allocation118_spill] sm:$0xff] }
 0xd8d   : > { %v3964_v3 = vadd.f32 0.2548296, %v3932_v45  ;;  %v4329_v9 = vadd.f32 1.0, %v4297_v21  ;;  %v4357_v1 = vmul.f32 %v4325_v34, %v9665_v62  ;;  %v4210_v38 = vsub.f32 1.0, %v4178_v32  ;;  %v4416_v46 = vld [vmem:[%s7002_s26 + $0xd8] sm:$0xff]  ;;  %v9675_v36 = vld [vmem:[#allocation119_spill] sm:$0xff] }
 0xd8e   : > { %v4270_v31 = vsub.f32 0.0, %v4206_v56  ;;  %vm4216_vm3 = vcmp.ge.f32.partialorder %v9666_v19, 0.0  ;;  %vm4220_vm4 = vcmp.ge.f32.partialorder %v9667_v28, 0.0  ;;  %v4205_v7 = vsub.f32 1.0, %v4173_v48  ;;  %v9677_v45 = vld [vmem:[#allocation114_spill] sm:$0xff]  ;;  %v8839_v27 = vld [vmem:[%s7002_s26 + $0xe8] sm:$0xff] }
 0xd8f   : > { %v4209_v18 = vsub.f32 1.0, %v4177_v17  ;;  %v3992_v53 = vmul.f32 %v9653_v33, %v3960_v42  ;;  %v3996_v4 = vmul.f32 %v9654_v6, %v3964_v3  ;;  %v4361_v8 = vmul.f32 %v4329_v9, %v9668_v15  ;;  %v9679_v48 = vld [vmem:[#allocation121_spill] sm:$0xff]  ;;  %v8847_v42 = vld [vmem:[%s7002_s26 + $0xe0] sm:$0xff] }
 0xd90   : > { %v4274_v23 = vsub.f32 0.0, %v4210_v38  ;;  %v4302_v54 = vsel %vm4238_vm15, %v4206_v56, %v4270_v31  ;;  %v4468_v22 = vunpack.c.h.s8.bf16 %v8719_v20  ;;  %v4269_v16 = vsub.f32 0.0, %v4205_v7  ;;  %v8836_v56 = vld [vmem:[%s7002_s26 + $0xd0] sm:$0xff]  ;;  %v9680_v28 = vld [vmem:[#allocation75_spill] sm:$0xff] }
 0xd91   : > { %v4334_v10 = vadd.f32 1.0, %v4302_v54  ;;  %v4273_v37 = vsub.f32 0.0, %v4209_v18  ;;  %v4152_v49 = vmul.f32 %v9669_v2, %v3992_v53  ;;  %v4381_v24 = vpack.c.bf16 %v4361_v8, %v4357_v1  ;;  %v9681_v53 = vld [vmem:[#allocation77_spill] sm:$0xff] }
 0xd92   : > { %v4306_v33 = vsel %vm4242_vm0, %v4210_v38, %v4274_v23  ;;  %v4156_v57 = vmul.f32 %v9670_v5, %v3996_v4  ;;  %4572 = vmatprep.subr.bf16.mxu0 %v4468_v22  ;;  %v4467_v6 = vunpack.c.h.s8.bf16 %v8730_v47  ;;  %v4301_v20 = vsel %vm4237_vm1, %v4205_v7, %v4269_v16  ;;  %v8857_v23 = vld [vmem:[%s7002_s26 + $0xf8] sm:$0xff]  ;;  %v8860_v54 = vld [vmem:[%s7002_s26 + $0xf0] sm:$0xff] }
 0xd93   : > { %v4338_v14 = vadd.f32 1.0, %v4306_v33  ;;  %v4366_v25 = vmul.f32 %v4334_v10, %v9671_v63  ;;  %v4305_v11 = vsel %vm4241_vm2, %v4209_v18, %v4273_v37  ;;  %4538 = vmatmul.mubr.bf16.gmra.mrb[56].mxu0 %v4381_v24  ;;  %v4333_v12 = vadd.f32 1.0, %v4301_v20  ;;  %v9682_v10 = vld [vmem:[#allocation79_spill] sm:$0xff]  ;;  %v9685_v5 = vld [vmem:[#allocation50_spill] sm:$0xff] }
 0xd94   : > { %v4337_v44 = vadd.f32 1.0, %v4305_v11  ;;  %v4184_v35 = vsub.f32 1.0, %v4152_v49  ;;  %v4188_v29 = vsub.f32 1.0, %v4156_v57  ;;  %4573 = vmatpush1.bf16.msra.mxu0 %v4467_v6  ;;  %v4470_v0 = vunpack.c.l.s8.bf16 %v4414_v59  ;;  %v9683_v37 = vld [vmem:[#allocation51_spill] sm:$0xff]  ;;  %v9684_v49 = vld [vmem:[#allocation74_spill] sm:$0xff] }
 0xd95   : > { %v4370_v47 = vmul.f32 %v4338_v14, %v9672_v60  ;;  %v4469_v43 = vunpack.c.l.s8.bf16 %v4413_v30  ;;  %v4472_v51 = vunpack.c.h.s8.bf16 %v4414_v59  ;;  %v4365_v50 = vmul.f32 %v4333_v12, %v9673_v41  ;;  %v9686_v6 = vld [vmem:[#allocation98_spill] sm:$0xff] }
 0xd96   : > { %v4369_v40 = vmul.f32 %v4337_v44, %v9674_v26  ;;  %v4248_v58 = vsub.f32 0.0, %v4184_v35  ;;  %v4252_v13 = vsub.f32 0.0, %v4188_v29  ;;  %6130 = vrcp.f32 %v9675_v36  ;;  %4574 = vmatprep.subr.bf16.mxu0 %v4470_v0 }
 0xd97   : > { %v4083_v61 = vsub.f32 0.0, %v9676_v52  ;;  %v9678_v34 = vsub.f32 0.0, %v9677_v45  ;;  %v4386_v32 = vpack.c.bf16 %v4370_v47, %v4366_v25  ;;  %6132 = vrcp.f32 %v9679_v48 }
 0xd98   : > { %v4385_v21 = vpack.c.bf16 %v4369_v40, %v4365_v50  ;;  %v4280_v39 = vsel %vm4216_vm3, %v4184_v35, %v4248_v58  ;;  %v4284_v17 = vsel %vm4220_vm4, %v4188_v29, %v4252_v13  ;;  %4575 = vmatpush1.bf16.msra.mxu0 %v4469_v43  ;;  %v4471_v62 = vunpack.c.h.s8.bf16 %v4413_v30  ;;  %v9687_v30 = vld [vmem:[#allocation111_spill] sm:$0xff]  ;;  %v9688_v43 = vld [vmem:[#allocation54_spill] sm:$0xff] }
 0xd99   : > { %v8833_v55 = vmul.f32 1.442695, %v9678_v34  ;;  %4547 = vmatprep.mubr.bf16.mxu0 %v4386_v32  ;;  %v4312_v3 = vadd.f32 1.0, %v4280_v39  ;;  %v4316_v9 = vadd.f32 1.0, %v4284_v17  ;;  %v4474_v1 = vunpack.c.l.s8.bf16 %v4416_v46  ;;  %4576 = vmatprep.subr.bf16.mxu0 %v4472_v51  ;;  %v9689_v58 = vld [vmem:[#allocation58_spill] sm:$0xff] }
 0xd9a   : > { %v4473_v38 = vunpack.c.l.s8.bf16 %v8836_v56  ;;  %v4476_v31 = vunpack.c.h.s8.bf16 %v4416_v46  ;;  %v4475_v19 = vunpack.c.h.s8.bf16 %v8836_v56  ;;  %v4478_v7 = vunpack.c.l.s8.bf16 %v8839_v27 }
 0xd9b   : > { %v4344_v18 = vmul.f32 %v4312_v3, %v9680_v28  ;;  %v4348_v4 = vmul.f32 %v4316_v9, %v9681_v53  ;;  %v4477_v15 = vunpack.c.l.s8.bf16 %v8847_v42  ;;  %v4480_v8 = vunpack.c.h.s8.bf16 %v8839_v27  ;;  %4548 = vmatmul.mubr.bf16.gmra.mrb[60].mxu0 %v4385_v21 }
 0xd9c   : > { %v4479_v22 = vunpack.c.h.s8.bf16 %v8847_v42  ;;  %v3744_v16 = vmul.f32 1.0614054, %v9682_v10  ;;  %v3748_v2 = vmul.f32 1.0614054, %v9683_v37  ;;  %v3743_v24 = vmul.f32 1.0614054, %v9684_v49  ;;  %4577 = vmatpush1.bf16.msra.mxu0 %v4471_v62 }
 0xd9d   : > { %v4376_v33 = vpack.c.bf16 %v4348_v4, %v4344_v18  ;;  %v3747_v57 = vmul.f32 1.0614054, %v9685_v5  ;;  %v3752_v59 = vmul.f32 1.0614054, %v9686_v6  ;;  %v3756_v14 = vmul.f32 1.0614054, %v9687_v30  ;;  %4578 = vmatprep.subr.bf16.mxu0 %v4474_v1 }
 0xd9e   : > { %v4482_v63 = vunpack.c.l.s8.bf16 %v8857_v23  ;;  %v3776_v25 = vadd.f32 -1.4531521, %v3744_v16  ;;  %v3780_v20 = vadd.f32 -1.4531521, %v3748_v2  ;;  %v3775_v11 = vadd.f32 -1.4531521, %v3743_v24 }
 0xd9f   : > { %4590 = vmatprep.mubr.bf16.mxu0 %v4376_v33  ;;  %v4481_v12 = vunpack.c.l.s8.bf16 %v8860_v54  ;;  %v3779_v44 = vadd.f32 -1.4531521, %v3747_v57  ;;  %v3784_v35 = vadd.f32 -1.4531521, %v3752_v59  ;;  %v3788_v29 = vadd.f32 -1.4531521, %v3756_v14 }
 0xda0   : > { %v3808_v60 = vmul.f32 %v9682_v10, %v3776_v25  ;;  %v3812_v47 = vmul.f32 %v9683_v37, %v3780_v20  ;;  %v3807_v0 = vmul.f32 %v9684_v49, %v3775_v11  ;;  %v3751_v51 = vmul.f32 1.0614054, %v9688_v43  ;;  %v8875_v41 = vpop.eup %6130  ;;  %4579 = vmatpush1.bf16.msra.mxu0 %v4473_v38  ;;  %v9699_v42 = vld [vmem:[#allocation85_spill] sm:$0xff] }
 0xda1   : > { %v3811_v50 = vmul.f32 %v9685_v5, %v3779_v44  ;;  %v3816_v26 = vmul.f32 %v9686_v6, %v3784_v35  ;;  %v3820_v40 = vmul.f32 %v9687_v30, %v3788_v29  ;;  %v3755_v13 = vmul.f32 1.0614054, %v9689_v58  ;;  %v8881_v46 = vpop.eup %6132  ;;  %4580 = vmatprep.subr.bf16.mxu0 %v4476_v31 }
 0xda2   : > { %v4484_v36 = vunpack.c.h.s8.bf16 %v8857_v23  ;;  %v3840_v45 = vadd.f32 1.4214138, %v3808_v60  ;;  %v3844_v34 = vadd.f32 1.4214138, %v3812_v47  ;;  %v3839_v32 = vadd.f32 1.4214138, %v3807_v0 }
 0xda3   : > { %v4483_v56 = vunpack.c.h.s8.bf16 %v8860_v54  ;;  %v3843_v48 = vadd.f32 1.4214138, %v3811_v50  ;;  %v3848_v21 = vadd.f32 1.4214138, %v3816_v26  ;;  %v3852_v39 = vadd.f32 1.4214138, %v3820_v40 }
 0xda4   : > { %v3872_v17 = vmul.f32 %v9682_v10, %v3840_v45  ;;  %v3876_v3 = vmul.f32 %v9683_v37, %v3844_v34  ;;  %v3871_v9 = vmul.f32 %v9684_v49, %v3839_v32  ;;  %v3783_v62 = vadd.f32 -1.4531521, %v3751_v51  ;;  %4581 = vmatpush1.bf16.msra.mxu0 %v4475_v19  ;;  %v9690_v0 = vld [vmem:[#allocation62_spill] sm:$0xff]  ;;  %v9691_v51 = vld [vmem:[#allocation65_spill] sm:$0xff] }
 0xda5   : > { %v3875_v1 = vmul.f32 %v9685_v5, %v3843_v48  ;;  %v3880_v38 = vmul.f32 %v9686_v6, %v3848_v21  ;;  %v3884_v31 = vmul.f32 %v9687_v30, %v3852_v39  ;;  %v3787_v28 = vadd.f32 -1.4531521, %v3755_v13  ;;  %4582 = vmatprep.subr.bf16.mxu0 %v4478_v7  ;;  %v9693_v45 = vld [vmem:[#allocation66_spill] sm:$0xff]  ;;  %v9695_v21 = vld [vmem:[#allocation87_spill] sm:$0xff] }
 0xda6   : > { %v3904_v18 = vadd.f32 -0.28449672, %v3872_v17  ;;  %v3908_v53 = vadd.f32 -0.28449672, %v3876_v3  ;;  %v3903_v4 = vadd.f32 -0.28449672, %v3871_v9  ;;  %v3815_v16 = vmul.f32 %v9688_v43, %v3783_v62 }
 0xda7   : > { %v3907_v2 = vadd.f32 -0.28449672, %v3875_v1  ;;  %v3912_v24 = vadd.f32 -0.28449672, %v3880_v38  ;;  %v3916_v33 = vadd.f32 -0.28449672, %v3884_v31  ;;  %v3819_v57 = vmul.f32 %v9689_v58, %v3787_v28 }
 0xda8   : > { %v3936_v19 = vmul.f32 %v9682_v10, %v3904_v18  ;;  %v3940_v59 = vmul.f32 %v9683_v37, %v3908_v53  ;;  %v3935_v14 = vmul.f32 %v9684_v49, %v3903_v4  ;;  %v3847_v25 = vadd.f32 1.4214138, %v3815_v16  ;;  %4583 = vmatpush1.bf16.msra.mxu0 %v4477_v15  ;;  %v9692_v15 = vld [vmem:[#allocation71_spill] sm:$0xff]  ;;  %v9694_v48 = vld [vmem:[#allocation78_spill] sm:$0xff]  ;;  %v9698_v1 = vld [vmem:[#allocation76_spill] sm:$0xff] }
 0xda9   : > { %v3939_v7 = vmul.f32 %v9685_v5, %v3907_v2  ;;  %v3944_v20 = vmul.f32 %v9686_v6, %v3912_v24  ;;  %v3948_v11 = vmul.f32 %v9687_v30, %v3916_v33  ;;  %v3851_v44 = vadd.f32 1.4214138, %v3819_v57  ;;  %4584 = vmatprep.subr.bf16.mxu0 %v4480_v8  ;;  %v9700_v28 = vld [vmem:[#allocation101_spill] sm:$0xff]  ;;  %v9701_v18 = vld [vmem:[#allocation112_spill] sm:$0xff] }
 0xdaa   : > { %v3968_v35 = vadd.f32 0.2548296, %v3936_v19  ;;  %v3972_v29 = vadd.f32 0.2548296, %v3940_v59  ;;  %v3967_v60 = vadd.f32 0.2548296, %v3935_v14  ;;  %v3879_v47 = vmul.f32 %v9688_v43, %v3847_v25 }
 0xdab   : > { %vm4223_vm5 = vcmp.ge.f32.partialorder %v9690_v0, 0.0  ;;  %vm4224_vm6 = vcmp.ge.f32.partialorder %v9691_v51, 0.0  ;;  %vm4228_vm7 = vcmp.ge.f32.partialorder %v9692_v15, 0.0  ;;  %v3971_v50 = vadd.f32 0.2548296, %v3939_v7  ;;  %v9702_v7 = vld [vmem:[#allocation73_spill] sm:$0xff] }
 0xdac   : > { %v3976_v26 = vadd.f32 0.2548296, %v3944_v20  ;;  %v3980_v40 = vadd.f32 0.2548296, %v3948_v11  ;;  %v3883_v13 = vmul.f32 %v9689_v58, %v3851_v44  ;;  %vm4227_vm8 = vcmp.ge.f32.partialorder %v9693_v45, 0.0  ;;  %4585 = vmatpush1.bf16.msra.mxu0 %v4479_v22  ;;  %v9703_v20 = vld [vmem:[#allocation83_spill] sm:$0xff] }
 0xdad   : > { %v4000_v27 = vmul.f32 %v9682_v10, %v3968_v35  ;;  %v4004_v8 = vmul.f32 %v9683_v37, %v3972_v29  ;;  %v3999_v34 = vmul.f32 %v9684_v49, %v3967_v60  ;;  %v3911_v32 = vadd.f32 -0.28449672, %v3879_v47  ;;  %4586 = vmatprep.subr.bf16.mxu0 %v4482_v63  ;;  %v9696_v10 = vld [vmem:[#allocation80_spill] sm:$0xff]  ;;  %v9697_v49 = vld [vmem:[#allocation53_spill] sm:$0xff]  ;;  %v9704_v60 = vld [vmem:[#allocation55_spill] sm:$0xff] }
 0xdae   : > { %vm4232_vm9 = vcmp.ge.f32.partialorder %v9694_v48, 0.0  ;;  %vm4236_vm10 = vcmp.ge.f32.partialorder %v9695_v21, 0.0  ;;  %v4003_v39 = vmul.f32 %v9685_v5, %v3971_v50  ;;  %v4008_v17 = vmul.f32 %v9686_v6, %v3976_v26  ;;  %v9705_v0 = vld [vmem:[#allocation105_spill] sm:$0xff] }
 0xdaf   : > { %v4012_v3 = vmul.f32 %v9687_v30, %v3980_v40  ;;  %v3915_v9 = vadd.f32 -0.28449672, %v3883_v13  ;;  %v4160_v37 = vmul.f32 %v9696_v10, %v4000_v27  ;;  %v4164_v62 = vmul.f32 %v9697_v49, %v4004_v8  ;;  %v9706_v27 = vld [vmem:[#allocation86_spill] sm:$0xff]  ;;  %v9710_v45 = vld [vmem:[#allocation69_spill] sm:$0xff] }
 0xdb0   : > { %v4159_v38 = vmul.f32 %v9698_v1, %v3999_v34  ;;  %v3943_v31 = vmul.f32 %v9688_v43, %v3911_v32  ;;  %v4163_v22 = vmul.f32 %v9699_v42, %v4003_v39  ;;  %v4168_v5 = vmul.f32 %v9700_v28, %v4008_v17  ;;  %4587 = vmatpush1.bf16.msra.mxu0 %v4481_v12  ;;  %v9707_v34 = vld [vmem:[#allocation90_spill] sm:$0xff]  ;;  %v9715_v28 = vld [vmem:[#allocation57_spill] sm:$0xff] }
 0xdb1   : > { %v4172_v6 = vmul.f32 %v9701_v18, %v4012_v3  ;;  %v3947_v30 = vmul.f32 %v9689_v58, %v3915_v9  ;;  %v4192_v53 = vsub.f32 1.0, %v4160_v37  ;;  %v4196_v4 = vsub.f32 1.0, %v4164_v62  ;;  %4588 = vmatprep.subr.bf16.mxu0 %v4484_v36  ;;  %v9709_v17 = vld [vmem:[#allocation70_spill] sm:$0xff]  ;;  %v9712_v9 = vld [vmem:[#allocation89_spill] sm:$0xff] }
 0xdb2   : > { %v4191_v16 = vsub.f32 1.0, %v4159_v38  ;;  %v3975_v63 = vadd.f32 0.2548296, %v3943_v31  ;;  %v4195_v2 = vsub.f32 1.0, %v4163_v22  ;;  %v4200_v24 = vsub.f32 1.0, %v4168_v5  ;;  %v9713_v62 = vld [vmem:[#allocation97_spill] sm:$0xff] }
 0xdb3   : > { %v4204_v33 = vsub.f32 1.0, %v4172_v6  ;;  %v3979_v57 = vadd.f32 0.2548296, %v3947_v30  ;;  %v4256_v19 = vsub.f32 0.0, %v4192_v53  ;;  %v4260_v59 = vsub.f32 0.0, %v4196_v4  ;;  %v9714_v38 = vld [vmem:[#allocation123_spill] sm:$0xff] }
 0xdb4   : > { %v4255_v14 = vsub.f32 0.0, %v4191_v16  ;;  %v4007_v25 = vmul.f32 %v9688_v43, %v3975_v63  ;;  %vm4231_vm11 = vcmp.ge.f32.partialorder %v9702_v7, 0.0  ;;  %vm4235_vm12 = vcmp.ge.f32.partialorder %v9703_v20, 0.0  ;;  %4589 = vmatpush1.bf16.msra.mxu0 %v4483_v56  ;;  %v9708_v56 = vld [vmem:[#allocation84_spill] sm:$0xff] }
 0xdb5   : > { %v4259_v11 = vsub.f32 0.0, %v4195_v2  ;;  %v4264_v44 = vsub.f32 0.0, %v4200_v24  ;;  %v4268_v35 = vsub.f32 0.0, %v4204_v33  ;;  %v4011_v12 = vmul.f32 %v9689_v58, %v3979_v57  ;;  %v9718_v7 = vld [vmem:[#allocation96_spill] sm:$0xff] }
 0xdb6   : > { %v4288_v29 = vsel %vm4224_vm6, %v4192_v53, %v4256_v19  ;;  %v4292_v23 = vsel %vm4228_vm7, %v4196_v4, %v4260_v59  ;;  %v4287_v36 = vsel %vm4223_vm5, %v4191_v16, %v4255_v14  ;;  %v4167_v43 = vmul.f32 %v9704_v60, %v4007_v25  ;;  %v9716_v4 = vld [vmem:[#allocation120_spill] sm:$0xff]  ;;  %v9717_v25 = vld [vmem:[#allocation115_spill] sm:$0xff] }
 0xdb7   : > { %v4320_v47 = vadd.f32 1.0, %v4288_v29  ;;  %v4324_v50 = vadd.f32 1.0, %v4292_v23  ;;  %v4291_v26 = vsel %vm4227_vm8, %v4195_v2, %v4259_v11  ;;  %v4319_v58 = vadd.f32 1.0, %v4287_v36  ;;  %v9719_v29 = vld [vmem:[#allocation56_spill] sm:$0xff] }
 0xdb8   : > { %v4323_v40 = vadd.f32 1.0, %v4291_v26  ;;  %v4296_v51 = vsel %vm4232_vm9, %v4200_v24, %v4264_v44  ;;  %v4300_v15 = vsel %vm4236_vm10, %v4204_v33, %v4268_v35  ;;  %v4171_v13 = vmul.f32 %v9705_v0, %v4011_v12 }
 0xdb9   : > { %v4352_v8 = vmul.f32 %v4320_v47, %v9706_v27  ;;  %v4356_v54 = vmul.f32 %v4324_v50, %v9707_v34  ;;  %v4351_v32 = vmul.f32 %v4319_v58, %v9708_v56  ;;  %v4328_v39 = vadd.f32 1.0, %v4296_v51  ;;  %v9720_v50 = vld [vmem:[#allocation107_spill] sm:$0xff] }
 0xdba   : > { %v9711_v3 = vpack.c.bf16 %v9709_v17, %v9710_v45  ;;  %v4355_v10 = vmul.f32 %v4323_v40, %v9712_v9  ;;  %v4332_v48 = vadd.f32 1.0, %v4300_v15  ;;  %v4199_v37 = vsub.f32 1.0, %v4167_v43 }
 0xdbb   : > { %v4203_v49 = vsub.f32 1.0, %v4171_v13  ;;  %v4380_v21 = vpack.c.bf16 %v4356_v54, %v4352_v8  ;;  %v4360_v1 = vmul.f32 %v4328_v39, %v9713_v62  ;;  %v3760_v31 = vmul.f32 1.0614054, %v9714_v38 }
 0xdbc   : > { %4591 = vmatmul.mubr.bf16.vlgmr.msra.gmra.mrb[48].mxu0 %v9711_v3  ;;  %v3764_v42 = vmul.f32 1.0614054, %v8881_v46  ;;  %v4379_v22 = vpack.c.bf16 %v4355_v10, %v4351_v32  ;;  %v4364_v5 = vmul.f32 %v4332_v48, %v9715_v28  ;;  %v4263_v18 = vsub.f32 0.0, %v4199_v37 }
 0xdbd   : > { %v4267_v6 = vsub.f32 0.0, %v4203_v49  ;;  %4600 = vmatprep.mubr.bf16.mxu0 %v4380_v21  ;;  %v3792_v30 = vadd.f32 -1.4531521, %v3760_v31  ;;  %v3759_v16 = vmul.f32 1.0614054, %v9716_v4  ;;  %6134 = vpow2.f32 %v9717_v25 }
 0xdbe   : > { %v3796_v53 = vadd.f32 -1.4531521, %v3764_v42  ;;  %v4384_v63 = vpack.c.bf16 %v4364_v5, %v4360_v1  ;;  %v4295_v2 = vsel %vm4231_vm11, %v4199_v37, %v4263_v18  ;;  %v3763_v33 = vmul.f32 1.0614054, %v8875_v41 }
 0xdbf   : > { %v4299_v24 = vsel %vm4235_vm12, %v4203_v49, %v4267_v6  ;;  %v4327_v57 = vadd.f32 1.0, %v4295_v2  ;;  %v3824_v59 = vmul.f32 %v9714_v38, %v3792_v30  ;;  %v4145_v11 = vmul.f32 1.442695, %v4083_v61 }
 0xdc0   : > { %v4331_v19 = vadd.f32 1.0, %v4299_v24  ;;  %v3828_v14 = vmul.f32 %v8881_v46, %v3796_v53  ;;  %v3791_v44 = vadd.f32 -1.4531521, %v3759_v16  ;;  %v3795_v35 = vadd.f32 -1.4531521, %v3763_v33  ;;  %v9723_v53 = vld [vmem:[#allocation95_spill] sm:$0xff] }
 0xdc1   : > { %v4359_v12 = vmul.f32 %v4327_v57, %v9718_v7  ;;  %v3856_v23 = vadd.f32 1.4214138, %v3824_v59  ;;  %6136 = vpow2.f32 %v8833_v55  ;;  %v3536_v16 = vmul.f32 0.5, %v9723_v53  ;;  %v9725_v59 = vld [vmem:[#allocation93_spill] sm:$0xff]  ;;  %v9727_v7 = vld [vmem:[#allocation92_spill] sm:$0xff] }
 0xdc2   : > { %v4363_v20 = vmul.f32 %v4331_v19, %v9719_v29  ;;  %v3860_v36 = vadd.f32 1.4214138, %v3828_v14  ;;  %v3823_v60 = vmul.f32 %v9716_v4, %v3791_v44  ;;  %v3827_v43 = vmul.f32 %v8875_v41, %v3795_v35  ;;  %v9726_v14 = vld [vmem:[#allocation106_spill] sm:$0xff] }
 0xdc3   : > { %v3888_v52 = vmul.f32 %v9714_v38, %v3856_v23  ;;  %6138 = vpow2.f32 %v9720_v50  ;;  %vm4239_vm15 = vcmp.ge.f32.partialorder %v9725_v59, 0.0  ;;  %vm4243_vm0 = vcmp.ge.f32.partialorder %v9726_v14, 0.0  ;;  %v9728_v29 = vld [vmem:[#allocation102_spill] sm:$0xff]  ;;  %v9736_v59 = vld [vmem:[#allocation39_spill] sm:$0xff] }
 0xdc4   : > { %4601 = vmatmul.mubr.bf16.gmra.mrb[52].mxu0 %v4379_v22  ;;  %v4383_v47 = vpack.c.bf16 %v4363_v20, %v4359_v12  ;;  %v3892_v61 = vmul.f32 %v8881_v46, %v3860_v36  ;;  %v3855_v26 = vadd.f32 1.4214138, %v3823_v60  ;;  %v3859_v58 = vadd.f32 1.4214138, %v3827_v43 }
 0xdc5   : > { %4610 = vmatprep.mubr.bf16.mxu0 %v4384_v63  ;;  %6140 = vpow2.f32 %v4145_v11  ;;  %v3920_v40 = vadd.f32 -0.28449672, %v3888_v52  ;;  %v9724_v63 = vld [vmem:[#allocation104_spill] sm:$0xff]  ;;  %v3535_v12 = vmul.f32 0.5, %v9727_v7  ;;  %v3539_v20 = vmul.f32 0.5, %v9728_v29 }
 0xdc6   : > { %v3924_v51 = vadd.f32 -0.28449672, %v3892_v61  ;;  %v3887_v55 = vmul.f32 %v9716_v4, %v3855_v26  ;;  %v3891_v15 = vmul.f32 %v8875_v41, %v3859_v58  ;;  %v3540_v2 = vmul.f32 0.5, %v9724_v63  ;;  %v9729_v61 = vld [vmem:[#allocation31_spill] sm:$0xff]  ;;  %v6183_v26 = vld [vmem:[%s7015_s28 + $0x30] sm:$0xff] }
 0xdc7   : > { %v3952_v0 = vmul.f32 %v9714_v38, %v3920_v40  ;;  %v6135_v56 = vpop.eup %6134  ;;  %v4633_v50 = vsub.s32 3, %v9729_v61  ;;  %v6184_v40 = vld [vmem:[%s7015_s28 + $0x38] sm:$0xff] }
 0xdc8   : > { %v3956_v13 = vmul.f32 %v8881_v46, %v3924_v51  ;;  %v3919_v27 = vadd.f32 -0.28449672, %v3887_v55  ;;  %v3923_v8 = vadd.f32 -0.28449672, %v3891_v15  ;;  %v9009_v55 = vld [vmem:[%s7015_s28] sm:$0xff] }
 0xdc9   : > { %v3984_v34 = vadd.f32 0.2548296, %v3952_v0  ;;  %v9003_v58 = vrot.slane %v6183_v26, %v4633_v50  ;;  %v9006_v51 = vrot.slane %v6184_v40, %v4633_v50  ;;  %v9012_v15 = vrot.slane %v9009_v55, %v4633_v50  ;;  %v9738_v26 = vld [vmem:[#allocation42_spill] sm:$0xff] }
 0xdca   : > { %v3988_v54 = vadd.f32 0.2548296, %v3956_v13  ;;  %v3951_v32 = vmul.f32 %v9716_v4, %v3919_v27  ;;  %v3955_v39 = vmul.f32 %v8875_v41, %v3923_v8  ;;  %v9015_v13 = vld [vmem:[%s7015_s28 + $0x8] sm:$0xff]  ;;  %s9747_s28 = sld [smem:[#allocation132_spill]] (!%p5457_p3) }
 0xdcb   : > { %v4016_v17 = vmul.f32 %v9714_v38, %v3984_v34  ;;  %v6137_v3 = vpop.eup %6136  ;;  %v9721_v38 = vld [vmem:[#allocation100_spill] sm:$0xff]  ;;  %v9018_v27 = vrot.slane %v9015_v13, %v4633_v50 }
 0xdcc   : > { %4611 = vmatmul.mubr.bf16.gmra.mrb[56].mxu0 %v4383_v47  ;;  %v4020_v45 = vmul.f32 %v8881_v46, %v3988_v54  ;;  %v3983_v9 = vadd.f32 0.2548296, %v3951_v32  ;;  %v3987_v10 = vadd.f32 0.2548296, %v3955_v39  ;;  %vm4240_vm13 = vcmp.ge.f32.partialorder %v9721_v38, 0.0  ;;  %v9722_v46 = vld [vmem:[#allocation110_spill] sm:$0xff] }
 0xdcd   : > { %v4176_v48 = vmul.f32 %v6135_v56, %v4016_v17  ;;  %v6139_v49 = vpop.eup %6138  ;;  %vm4244_vm14 = vcmp.ge.f32.partialorder %v9722_v46, 0.0 }
 0xdce   : > { %v4180_v37 = vmul.f32 %v6137_v3, %v4020_v45  ;;  %v4015_v21 = vmul.f32 %v9716_v4, %v3983_v9  ;;  %v4019_v62 = vmul.f32 %v8875_v41, %v3987_v10  ;;  %v9730_v10 = vld [vmem:[#allocation34_spill] sm:$0xff] }
 0xdcf   : > { %v6141_v1 = vpop.eup %6140  ;;  %v4208_v31 = vsub.f32 1.0, %v4176_v48 }
 0xdd0   : > { %v4212_v42 = vsub.f32 1.0, %v4180_v37  ;;  %v4175_v22 = vmul.f32 %v6139_v49, %v4015_v21  ;;  %v4179_v28 = vmul.f32 %v6141_v1, %v4019_v62  ;;  %v9731_v49 = vld [vmem:[#allocation32_spill] sm:$0xff]  ;;  %v9732_v62 = vld [vmem:[#allocation35_spill] sm:$0xff] }
 0xdd1   : > { %v4272_v5 = vsub.f32 0.0, %v4208_v31 }
 0xdd2   : > { %v4276_v18 = vsub.f32 0.0, %v4212_v42  ;;  %v4207_v6 = vsub.f32 1.0, %v4175_v22  ;;  %v4211_v30 = vsub.f32 1.0, %v4179_v28  ;;  %v9733_v22 = vld [vmem:[#allocation33_spill] sm:$0xff] }
 0xdd3   : > { %v4304_v4 = vsel %vm4240_vm13, %v4208_v31, %v4272_v5 }
 0xdd4   : > { %v4308_v24 = vsel %vm4244_vm14, %v4212_v42, %v4276_v18  ;;  %v4336_v41 = vadd.f32 1.0, %v4304_v4  ;;  %v4271_v57 = vsub.f32 0.0, %v4207_v6  ;;  %v4275_v19 = vsub.f32 0.0, %v4211_v30 }
 0xdd5   : > { %v4340_v33 = vadd.f32 1.0, %v4308_v24  ;;  %v9734_v24 = vld [vmem:[#allocation38_spill] sm:$0xff] }
 0xdd6   : > { %v4368_v25 = vmul.f32 %v4336_v41, %v3536_v16  ;;  %v4303_v44 = vsel %vm4239_vm15, %v4207_v6, %v4271_v57  ;;  %v4307_v35 = vsel %vm4243_vm0, %v4211_v30, %v4275_v19  ;;  %v9735_v57 = vld [vmem:[#allocation36_spill] sm:$0xff] }
 0xdd7   : > { %v4372_v11 = vmul.f32 %v4340_v33, %v3540_v2  ;;  %v4335_v23 = vadd.f32 1.0, %v4303_v44  ;;  %v4339_v36 = vadd.f32 1.0, %v4307_v35  ;;  %v9737_v44 = vld [vmem:[#allocation37_spill] sm:$0xff] }
 0xdd9   : > { %v4388_v60 = vpack.c.bf16 %v4372_v11, %v4368_v25  ;;  %v4367_v43 = vmul.f32 %v4335_v23, %v3535_v12  ;;  %v4371_v47 = vmul.f32 %v4339_v36, %v3539_v20 }
 0xddb   : > { %4620 = vmatprep.mubr.bf16.mxu0 %v4388_v60  ;;  %v4387_v52 = vpack.c.bf16 %v4371_v47, %v4367_v43 }
 0xddd   : > { %4621 = vmatmul.mubr.bf16.gmra.mrb[60].mxu0 %v4387_v52 }
 0xe8f   : > { %v4592_v0 = vpop.f32.mrb[48].mxu0 }
 0xe90   : > { %v4639_v8 = vmul.f32 %v9003_v58, %v4592_v0  ;;  %v4594_v34 = vpop.f32.mrb[49].mxu0 }
 0xe91   : > { %v4640_v54 = vmul.f32 %v9006_v51, %v4594_v34  ;;  %v4596_v56 = vpop.f32.mrb[50].mxu0 }
 0xe92   : > { %v4663_v32 = vadd.f32 %v9012_v15, %v4639_v8  ;;  %v4641_v39 = vmul.f32 %v9003_v58, %v4596_v56  ;;  %v4598_v17 = vpop.f32.mrb[51].mxu0  ;;  %v9739_v8 = vld [vmem:[#allocation40_spill] sm:$0xff] }
 0xe93   : > { %v4664_v45 = vadd.f32 %v9018_v27, %v4640_v54  ;;  %v4642_v3 = vmul.f32 %v9006_v51, %v4598_v17  ;;  %v9740_v54 = vld [vmem:[#allocation43_spill] sm:$0xff] }
 0xe94   : > { %v4665_v9 = vadd.f32 %v9012_v15, %v4641_v39  ;;  %v9028_v48 = vadd.f32 %v4663_v32, %v9730_v10  ;;  %v9741_v39 = vld [vmem:[#allocation41_spill] sm:$0xff] }
 0xe95   : > { %v4666_v37 = vadd.f32 %v9018_v27, %v4642_v3  ;;  %v9032_v21 = vadd.f32 %v4664_v45, %v9731_v49 }
 0xe96   : > { %v9035_v1 = vadd.f32 %v4665_v9, %v9732_v62 }
 0xe97   : > { %v4602_v31 = vpop.f32.mrb[52].mxu0  ;;  %v4695_v42 = vadd.f32 %v9032_v21, %v9028_v48  ;;  %v9040_v28 = vadd.f32 %v4666_v37, %v9733_v22 }
 0xe98   : > { %v4643_v5 = vmul.f32 %v9003_v58, %v4602_v31  ;;  %v4604_v18 = vpop.f32.mrb[53].mxu0 }
 0xe99   : > { %v4644_v38 = vmul.f32 %v9006_v51, %v4604_v18  ;;  %4696 = vadd.xlane.f32.xlu0 %v4695_v42  ;;  %v4606_v46 = vpop.f32.mrb[54].mxu0  ;;  %v4698_v6 = vadd.f32 %v9040_v28, %v9035_v1 }
 0xe9a   : > { %v4667_v30 = vadd.f32 %v9012_v15, %v4643_v5  ;;  %v4645_v53 = vmul.f32 %v9003_v58, %v4606_v46  ;;  %v4608_v16 = vpop.f32.mrb[55].mxu0 }
 0xe9b   : > { %v4668_v63 = vadd.f32 %v9018_v27, %v4644_v38  ;;  %v4646_v2 = vmul.f32 %v9006_v51, %v4608_v16  ;;  %4699 = vadd.xlane.f32.xlu1 %v4698_v6  ;;  %v9742_v38 = vld [vmem:[#allocation46_spill] sm:$0xff]  ;;  %v9744_v16 = vld [vmem:[#allocation47_spill] sm:$0xff] }
 0xe9c   : > { %v4669_v4 = vadd.f32 %v9012_v15, %v4645_v53  ;;  %v9052_v41 = vadd.f32 %v4667_v30, %v9734_v24  ;;  %v9743_v30 = vld [vmem:[#allocation44_spill] sm:$0xff] }
 0xe9d   : > { %v4670_v33 = vadd.f32 %v9018_v27, %v4646_v2  ;;  %v9056_v19 = vadd.f32 %v4668_v63, %v9735_v57 }
 0xe9e   : > { %v9059_v14 = vadd.f32 %v4669_v4, %v9736_v59  ;;  %v9745_v4 = vld [vmem:[#allocation45_spill] sm:$0xff] }
 0xe9f   : > { %v4612_v25 = vpop.f32.mrb[56].mxu0  ;;  %v4701_v11 = vadd.f32 %v9056_v19, %v9052_v41  ;;  %v9064_v35 = vadd.f32 %v4670_v33, %v9737_v44 }
 0xea0   : > { %v4647_v7 = vmul.f32 %v9003_v58, %v4612_v25  ;;  %v4614_v12 = vpop.f32.mrb[57].mxu0 }
 0xea1   : > { %v4648_v29 = vmul.f32 %v9006_v51, %v4614_v12  ;;  %4702 = vadd.xlane.f32.xlu0 %v4701_v11  ;;  %v4616_v20 = vpop.f32.mrb[58].mxu0  ;;  %v4704_v23 = vadd.f32 %v9064_v35, %v9059_v14 }
 0xea2   : > { %v4671_v36 = vadd.f32 %v9012_v15, %v4647_v7  ;;  %v4649_v60 = vmul.f32 %v9003_v58, %v4616_v20  ;;  %v4618_v43 = vpop.f32.mrb[59].mxu0 }
 0xea3   : > { %v4672_v47 = vadd.f32 %v9018_v27, %v4648_v29  ;;  %v4650_v52 = vmul.f32 %v9006_v51, %v4618_v43  ;;  %4705 = vadd.xlane.f32.xlu1 %v4704_v23 }
 0xea4   : > { %v4673_v50 = vadd.f32 %v9012_v15, %v4649_v60  ;;  %v9076_v40 = vadd.f32 %v4671_v36, %v9738_v26 }
 0xea5   : > { %v4674_v0 = vadd.f32 %v9018_v27, %v4650_v52  ;;  %v4688_v34 = vadd.f32 %v4672_v47, %v9739_v8 }
 0xea6   : > { %v9081_v56 = vadd.f32 %v4673_v50, %v9740_v54 }
 0xea7   : > { %v4707_v32 = vadd.f32 %v4688_v34, %v9076_v40  ;;  %v9085_v17 = vadd.f32 %v4674_v0, %v9741_v39 }
 0xea9   : > { %4708 = vadd.xlane.f32.xlu0 %v4707_v32  ;;  %v4710_v45 = vadd.f32 %v9085_v17, %v9081_v56 }
 0xeab   : > { %4711 = vadd.xlane.f32.xlu1 %v4710_v45 }
 0xeb0   : > { %v4622_v3 = vpop.f32.mrb[60].mxu0 }
 0xeb1   : > { %v4651_v9 = vmul.f32 %v9003_v58, %v4622_v3  ;;  %v4624_v10 = vpop.f32.mrb[61].mxu0 }
 0xeb2   : > { %v4652_v37 = vmul.f32 %v9006_v51, %v4624_v10  ;;  %v4626_v49 = vpop.f32.mrb[62].mxu0 }
 0xeb3   : > { %v4675_v62 = vadd.f32 %v9012_v15, %v4651_v9  ;;  %v4653_v31 = vmul.f32 %v9003_v58, %v4626_v49  ;;  %v4628_v42 = vpop.f32.mrb[63].mxu0 }
 0xeb4   : > { %v4676_v22 = vadd.f32 %v9018_v27, %v4652_v37  ;;  %v4654_v5 = vmul.f32 %v9006_v51, %v4628_v42 }
 0xeb5   : > { %v4677_v18 = vadd.f32 %v9012_v15, %v4653_v31  ;;  %v4691_v46 = vadd.f32 %v4675_v62, %v9742_v38 }
 0xeb6   : > { %v4678_v6 = vadd.f32 %v9018_v27, %v4654_v5  ;;  %v4692_v53 = vadd.f32 %v4676_v22, %v9743_v30 }
 0xeb7   : > { %v4693_v63 = vadd.f32 %v4677_v18, %v9744_v16 }
 0xeb8   : > { %v4713_v2 = vadd.f32 %v4692_v53, %v4691_v46  ;;  %v4694_v24 = vadd.f32 %v4678_v6, %v9745_v4 }
 0xeba   : > { %4714 = vadd.xlane.f32.xlu0 %v4713_v2  ;;  %v4716_v58 = vadd.f32 %v4694_v24, %v4693_v63 }
 0xebc   : > { %4717 = vadd.xlane.f32.xlu1 %v4716_v58 }
 0xf26   : > { %v4697_v33 = vpop.xlane.xlu0 %4696 }
 0xf27   : > { %v4719_v57 = vmul.f32 0.00390625, %v4697_v33 }
 0xf28   : > { %v4700_v59 = vpop.xlane.xlu1 %4699 }
 0xf29   : > { %v9102_v51 = vsub.f32 %v9028_v48, %v4719_v57  ;;  %v9105_v15 = vsub.f32 %v9032_v21, %v4719_v57  ;;  %v4720_v27 = vmul.f32 0.00390625, %v4700_v59 }
 0xf2b   : > { %v9108_v25 = vsub.f32 %v9035_v1, %v4720_v27  ;;  %v9111_v11 = vsub.f32 %v9040_v28, %v4720_v27  ;;  %v4743_v44 = vmul.f32 %v9102_v51, %v9102_v51  ;;  %v4744_v7 = vmul.f32 %v9105_v15, %v9105_v15 }
 0xf2c   : > { %v4825_v27 = vsub.s32 6, %v9729_v61 }
 0xf2d   : > { %v4759_v12 = vadd.f32 %v4744_v7, %v4743_v44  ;;  %v4745_v48 = vmul.f32 %v9108_v25, %v9108_v25  ;;  %v4746_v21 = vmul.f32 %v9111_v11, %v9111_v11 }
 0xf2e   : > { %v4703_v29 = vpop.xlane.xlu0 %4702 }
 0xf2f   : > { %v4721_v20 = vmul.f32 0.00390625, %v4703_v29  ;;  %4760 = vadd.xlane.f32.xlu0 %v4759_v12  ;;  %v4762_v1 = vadd.f32 %v4746_v21, %v4745_v48  ;;  %v4849_v48 = vsub.s32 7, %v9729_v61  ;;  %v9179_v29 = vrot.slane %v9009_v55, %v4825_v27 }
 0xf30   : > { %v4706_v23 = vpop.xlane.xlu1 %4705 }
 0xf31   : > { %v9122_v28 = vsub.f32 %v9052_v41, %v4721_v20  ;;  %v9125_v36 = vsub.f32 %v9056_v19, %v4721_v20  ;;  %v4722_v60 = vmul.f32 0.00390625, %v4706_v23  ;;  %4763 = vadd.xlane.f32.xlu1 %v4762_v1  ;;  %v9182_v20 = vrot.slane %v9015_v13, %v4825_v27 }
 0xf32   : > { %v9185_v23 = vrot.slane %v9009_v55, %v4849_v48 }
 0xf33   : > { %v9128_v43 = vsub.f32 %v9059_v14, %v4722_v60  ;;  %v9131_v47 = vsub.f32 %v9064_v35, %v4722_v60  ;;  %v4747_v52 = vmul.f32 %v9122_v28, %v9122_v28  ;;  %v4748_v50 = vmul.f32 %v9125_v36, %v9125_v36 }
 0xf34   : > { %v9188_v60 = vrot.slane %v9015_v13, %v4849_v48 }
 0xf35   : > { %v4765_v26 = vadd.f32 %v4748_v50, %v4747_v52  ;;  %v4749_v41 = vmul.f32 %v9128_v43, %v9128_v43  ;;  %v4750_v19 = vmul.f32 %v9131_v47, %v9131_v47 }
 0xf36   : > { %v4709_v0 = vpop.xlane.xlu0 %4708 }
 0xf37   : > { %v4723_v8 = vmul.f32 0.00390625, %v4709_v0  ;;  %4766 = vadd.xlane.f32.xlu0 %v4765_v26  ;;  %v4768_v14 = vadd.f32 %v4750_v19, %v4749_v41 }
 0xf38   : > { %v4712_v54 = vpop.xlane.xlu1 %4711 }
 0xf39   : > { %v9142_v35 = vsub.f32 %v9076_v40, %v4723_v8  ;;  %v9144_v32 = vsub.f32 %v4688_v34, %v4723_v8  ;;  %v4724_v39 = vmul.f32 0.00390625, %v4712_v54  ;;  %4769 = vadd.xlane.f32.xlu1 %v4768_v14 }
 0xf3b   : > { %v9147_v45 = vsub.f32 %v9081_v56, %v4724_v39  ;;  %v9150_v3 = vsub.f32 %v9085_v17, %v4724_v39  ;;  %v4751_v9 = vmul.f32 %v9142_v35, %v9142_v35  ;;  %v4752_v10 = vmul.f32 %v9144_v32, %v9144_v32 }
 0xf3d   : > { %v4771_v37 = vadd.f32 %v4752_v10, %v4751_v9  ;;  %v4753_v40 = vmul.f32 %v9147_v45, %v9147_v45  ;;  %v4754_v34 = vmul.f32 %v9150_v3, %v9150_v3 }
 0xf3f   : > { %4772 = vadd.xlane.f32.xlu0 %v4771_v37  ;;  %v4774_v49 = vadd.f32 %v4754_v34, %v4753_v40 }
 0xf41   : > { %4775 = vadd.xlane.f32.xlu1 %v4774_v49 }
 0xf47   : > { %v4715_v56 = vpop.xlane.xlu0 %4714 }
 0xf48   : > { %v4725_v62 = vmul.f32 0.00390625, %v4715_v56 }
 0xf49   : > { %v4718_v17 = vpop.xlane.xlu1 %4717 }
 0xf4a   : > { %v9160_v31 = vsub.f32 %v4691_v46, %v4725_v62  ;;  %v9162_v42 = vsub.f32 %v4692_v53, %v4725_v62  ;;  %v4726_v22 = vmul.f32 0.00390625, %v4718_v17 }
 0xf4c   : > { %v9164_v5 = vsub.f32 %v4693_v63, %v4726_v22  ;;  %v9166_v18 = vsub.f32 %v4694_v24, %v4726_v22  ;;  %v4755_v38 = vmul.f32 %v9160_v31, %v9160_v31  ;;  %v4756_v6 = vmul.f32 %v9162_v42, %v9162_v42 }
 0xf4e   : > { %v4777_v30 = vadd.f32 %v4756_v6, %v4755_v38  ;;  %v4757_v16 = vmul.f32 %v9164_v5, %v9164_v5  ;;  %v4758_v46 = vmul.f32 %v9166_v18, %v9166_v18 }
 0xf50   : > { %4778 = vadd.xlane.f32.xlu0 %v4777_v30  ;;  %v4780_v53 = vadd.f32 %v4758_v46, %v4757_v16 }
 0xf52   : > { %4781 = vadd.xlane.f32.xlu1 %v4780_v53 }
 0xfbc   : > { %v4761_v63 = vpop.xlane.xlu0 %4760 }
 0xfbd   : > { %v4783_v2 = vmul.f32 0.00390625, %v4761_v63 }
 0xfbe   : > { %v4764_v4 = vpop.xlane.xlu1 %4763 }
 0xfbf   : > { %v4791_v24 = vadd.f32 1e-05, %v4783_v2  ;;  %v4784_v58 = vmul.f32 0.00390625, %v4764_v4 }
 0xfc1   : > { %6142 = vrsqrt.f32 %v4791_v24  ;;  %v4792_v33 = vadd.f32 1e-05, %v4784_v58 }
 0xfc3   : > { %6144 = vrsqrt.f32 %v4792_v33 }
 0xfc4   : > { %v4767_v57 = vpop.xlane.xlu0 %4766 }
 0xfc5   : > { %v4785_v59 = vmul.f32 0.00390625, %v4767_v57 }
 0xfc6   : > { %v4770_v44 = vpop.xlane.xlu1 %4769 }
 0xfc7   : > { %v4793_v7 = vadd.f32 1e-05, %v4785_v59  ;;  %v4786_v12 = vmul.f32 0.00390625, %v4770_v44 }
 0xfc9   : > { %6146 = vrsqrt.f32 %v4793_v7  ;;  %v4794_v21 = vadd.f32 1e-05, %v4786_v12 }
 0xfcb   : > { %v6143_v1 = vpop.eup %6142  ;;  %6148 = vrsqrt.f32 %v4794_v21 }
 0xfcc   : > { %v4807_v52 = vmul.f32 %v6143_v1, %v9102_v51  ;;  %v4808_v61 = vmul.f32 %v6143_v1, %v9105_v15  ;;  %v4773_v50 = vpop.xlane.xlu0 %4772 }
 0xfcd   : > { %v6145_v26 = vpop.eup %6144  ;;  %v4787_v41 = vmul.f32 0.00390625, %v4773_v50 }
 0xfce   : > { %v4831_v19 = vmul.f32 %v9179_v29, %v4807_v52  ;;  %v4832_v0 = vmul.f32 %v9182_v20, %v4808_v61  ;;  %v4809_v8 = vmul.f32 %v6145_v26, %v9108_v25  ;;  %v4810_v14 = vmul.f32 %v6145_v26, %v9111_v11  ;;  %v4776_v55 = vpop.xlane.xlu1 %4775 }
 0xfcf   : > { %v4795_v54 = vadd.f32 1e-05, %v4787_v41  ;;  %v4788_v39 = vmul.f32 0.00390625, %v4776_v55  ;;  %v6191_v55 = vld [vmem:[#allocation11 + $0x50] sm:$0xff] (!%p5457_p3)  }
 0xfd0   : > { %v9197_v13 = vadd.f32 %v9185_v23, %v4831_v19  ;;  %v9200_v51 = vadd.f32 %v9188_v60, %v4832_v0  ;;  %v4833_v15 = vmul.f32 %v9179_v29, %v4809_v8  ;;  %v4834_v9 = vmul.f32 %v9182_v20, %v4810_v14 }
 0xfd1   : > { %6150 = vrsqrt.f32 %v4795_v54  ;;  %v4796_v10 = vadd.f32 1e-05, %v4788_v39  ;;  %v6192_v54 = vld [vmem:[#allocation11 + $0x10] sm:$0xff] (!%p5457_p3)   ;;  %v6193_v39 = vld [vmem:[#allocation11 + $0x58] sm:$0xff] (!%p5457_p3)  }
 0xfd2   : > { %4871 = vst [vmem:[#allocation2] sm:$0xff] %v9197_v13  ;;  %4872 = vst [vmem:[#allocation2 + $0x8] sm:$0xff] %v9200_v51  ;;  %v9207_v25 = vadd.f32 %v9185_v23, %v4833_v15  ;;  %v9210_v11 = vadd.f32 %v9188_v60, %v4834_v9  ;;  %v6195_v15 = vld [vmem:[#allocation11 + $0x60] sm:$0xff] (!%p5457_p3)  }
 0xfd3   : > { %v6147_v37 = vpop.eup %6146  ;;  %6152 = vrsqrt.f32 %v4796_v10  ;;  %v6196_v9 = vld [vmem:[#allocation11 + $0x20] sm:$0xff] (!%p5457_p3)   ;;  %v6197_v10 = vld [vmem:[#allocation11 + $0x68] sm:$0xff] (!%p5457_p3)  }
 0xfd4   : > { %4873 = vst [vmem:[#allocation2 + $0x10] sm:$0xff] %v9207_v25  ;;  %4874 = vst [vmem:[#allocation2 + $0x18] sm:$0xff] %v9210_v11  ;;  %v4811_v40 = vmul.f32 %v6147_v37, %v9122_v28  ;;  %v4812_v34 = vmul.f32 %v6147_v37, %v9125_v36  ;;  %v6199_v37 = vld [vmem:[#allocation11 + $0x70] sm:$0xff] (!%p5457_p3)  }
 0xfd5   : > { %v6149_v49 = vpop.eup %6148 }
 0xfd6   : > { %v4835_v56 = vmul.f32 %v9179_v29, %v4811_v40  ;;  %v4836_v62 = vmul.f32 %v9182_v20, %v4812_v34  ;;  %v4813_v17 = vmul.f32 %v6149_v49, %v9128_v43  ;;  %v4814_v22 = vmul.f32 %v6149_v49, %v9131_v47  ;;  %v6200_v40 = vld [vmem:[#allocation11 + $0x30] sm:$0xff] (!%p5457_p3)   ;;  %v6201_v34 = vld [vmem:[#allocation11 + $0x78] sm:$0xff] (!%p5457_p3)  }
 0xfd7   : > { %v6202_v49 = vld [vmem:[#allocation11 + $0x38] sm:$0xff] (!%p5457_p3)  }
 0xfd8   : > { %v9221_v38 = vadd.f32 %v9185_v23, %v4835_v56  ;;  %v9224_v6 = vadd.f32 %v9188_v60, %v4836_v62  ;;  %v4837_v30 = vmul.f32 %v9179_v29, %v4813_v17  ;;  %v4838_v28 = vmul.f32 %v9182_v20, %v4814_v22 }
 0xfd9   : > { %v4924_v56 = vpack.c.bf16 (!%p5457_p3), %v9207_v25, %v9197_v13 }
 0xfda   : > { %4875 = vst [vmem:[#allocation2 + $0x20] sm:$0xff] %v9221_v38  ;;  %4876 = vst [vmem:[#allocation2 + $0x28] sm:$0xff] %v9224_v6  ;;  %v9231_v36 = vadd.f32 %v9185_v23, %v4837_v30  ;;  %v9234_v43 = vadd.f32 %v9188_v60, %v4838_v28 }
 0xfdb   : > { %v6151_v47 = vpop.eup %6150 }
 0xfdc   : > { %4877 = vst [vmem:[#allocation2 + $0x30] sm:$0xff] %v9231_v36  ;;  %4878 = vst [vmem:[#allocation2 + $0x38] sm:$0xff] %v9234_v43  ;;  %v4815_v16 = vmul.f32 %v6151_v47, %v9142_v35  ;;  %v4816_v46 = vmul.f32 %v6151_v47, %v9144_v32  ;;  %v4927_v17 = vpack.c.bf16 (!%p5457_p3), %v9234_v43, %v9224_v6  ;;  %v5458_v6 = vld [vmem:[%s9747_s28] ss:$0 sm:$0xff] (!%p5457_p3) }
 0xfdd   : > { %v6153_v53 = vpop.eup %6152  ;;  %v4779_v58 = vpop.xlane.xlu0 %4778  ;;  %v4926_v30 = vpack.c.bf16 (!%p5457_p3), %v9231_v36, %v9221_v38 }
 0xfde   : > { %v4839_v63 = vmul.f32 %v9179_v29, %v4815_v16  ;;  %v4840_v2 = vmul.f32 %v9182_v20, %v4816_v46  ;;  %v4817_v4 = vmul.f32 %v6153_v53, %v9147_v45  ;;  %v4818_v24 = vmul.f32 %v6153_v53, %v9150_v3 }
 0xfdf   : > { %v4789_v32 = vmul.f32 0.00390625, %v4779_v58  ;;  %v4782_v27 = vpop.xlane.xlu1 %4781 }
 0xfe0   : > { %v9245_v33 = vadd.f32 %v9185_v23, %v4839_v63  ;;  %v4864_v57 = vadd.f32 %v9188_v60, %v4840_v2  ;;  %v4841_v59 = vmul.f32 %v9179_v29, %v4817_v4  ;;  %v4842_v35 = vmul.f32 %v9182_v20, %v4818_v24 }
 0xfe1   : > { %v4790_v3 = vmul.f32 0.00390625, %v4782_v27  ;;  %v4797_v7 = vadd.f32 1e-05, %v4789_v32 }
 0xfe2   : > { %4879 = vst [vmem:[#allocation2 + $0x40] sm:$0xff] %v9245_v33  ;;  %4880 = vst [vmem:[#allocation2 + $0x48] sm:$0xff] %v4864_v57  ;;  %v9252_v44 = vadd.f32 %v9185_v23, %v4841_v59  ;;  %v4866_v45 = vadd.f32 %v9188_v60, %v4842_v35 }
 0xfe3   : > { %v4798_v12 = vadd.f32 1e-05, %v4790_v3  ;;  %6154 = vrsqrt.f32 %v4797_v7 }
 0xfe4   : > { %4881 = vst [vmem:[#allocation2 + $0x50] sm:$0xff] %v9252_v44  ;;  %4882 = vst [vmem:[#allocation2 + $0x58] sm:$0xff] %v4866_v45  ;;  %v4928_v62 = vpack.c.bf16 (!%p5457_p3), %v9252_v44, %v9245_v33 }
 0xfe5   : > { %6156 = vrsqrt.f32 %v4798_v12 }
 0xfed   : > { %v6155_v48 = vpop.eup %6154 }
 0xfee   : > { %v4819_v1 = vmul.f32 %v6155_v48, %v9160_v31  ;;  %v4820_v52 = vmul.f32 %v6155_v48, %v9162_v42 }
 0xfef   : > { %v6157_v21 = vpop.eup %6156 }
 0xff0   : > { %v4821_v61 = vmul.f32 %v6157_v21, %v9164_v5  ;;  %v4822_v50 = vmul.f32 %v6157_v21, %v9166_v18  ;;  %v4843_v26 = vmul.f32 %v9179_v29, %v4819_v1  ;;  %v4844_v41 = vmul.f32 %v9182_v20, %v4820_v52  ;;  %4890 = sbr.rel (%p5457_p3) target bundleno = 4342 (0x10f6), region = 128  ;;  %v6187_v5 = vld [vmem:[#allocation11 + $0x40] sm:$0xff] (!%p5457_p3)  }
 0xff1   : > { %v6188_v18 = vld [vmem:[#allocation11] sm:$0xff] (!%p5457_p3)   ;;  %5514 = vmatprep.subr.bf16.mxu0 (!%p5457_p3), %v6187_v5  ;;  %5650 = vmatprep.subr.bf16.mxu1 (!%p5457_p3), %v6187_v5 }
 0xff2   : > { %v4845_v19 = vmul.f32 %v9179_v29, %v4821_v61  ;;  %v4846_v0 = vmul.f32 %v9182_v20, %v4822_v50  ;;  %v9265_v8 = vadd.f32 %v9185_v23, %v4843_v26  ;;  %v9268_v14 = vadd.f32 %v9188_v60, %v4844_v41  ;;  %5515 = vmatpush3.bf16.msra.mxu0 (!%p5457_p3), %v6188_v18 }
 0xff3   : > { %v4925_v29 = vpack.c.bf16 (!%p5457_p3), %v9210_v11, %v9200_v51  ;;  %v4929_v20 = vpack.c.bf16 (!%p5457_p3), %v4866_v45, %v4864_v57  ;;  %5658 = vmatpush3.bf16.msra.mxu1 (!%p5457_p3), %v6188_v18  ;;  %v6194_v51 = vld [vmem:[#allocation11 + $0x18] sm:$0xff] (!%p5457_p3)   ;;  %v6198_v11 = vld [vmem:[#allocation11 + $0x28] sm:$0xff] (!%p5457_p3)  }
 0xff4   : > { %v9271_v31 = vadd.f32 %v9185_v23, %v4845_v19  ;;  %v9274_v42 = vadd.f32 %v9188_v60, %v4846_v0  ;;  %4883 = vst [vmem:[#allocation2 + $0x60] sm:$0xff] %v9265_v8  ;;  %4884 = vst [vmem:[#allocation2 + $0x68] sm:$0xff] %v9268_v14  ;;  %v6189_v23 = vld [vmem:[#allocation11 + $0x48] sm:$0xff] (!%p5457_p3)  }
 0xff5   : > { %v6190_v60 = vld [vmem:[#allocation11 + $0x8] sm:$0xff] (!%p5457_p3)   ;;  %5516 = vmatprep.subr.bf16.mxu0 (!%p5457_p3), %v6189_v23  ;;  %5651 = vmatprep.subr.bf16.mxu1 (!%p5457_p3), %v6189_v23 }
 0xff6   : > { %4885 = vst [vmem:[#allocation2 + $0x70] sm:$0xff] %v9271_v31  ;;  %4886 = vst [vmem:[#allocation2 + $0x78] sm:$0xff] %v9274_v42  ;;  %5066 = vmatprep.mubr.bf16.mxu0 (!%p5457_p3), %v4925_v29  ;;  %5082 = vmatprep.mubr.bf16.mxu1 (!%p5457_p3), %v4929_v20  ;;  %v4931_v22 = vpack.c.bf16 (!%p5457_p3), %v9274_v42, %v9268_v14  ;;  %v4930_v13 = vpack.c.bf16 (!%p5457_p3), %v9271_v31, %v9265_v8 }
 0xff7   : > { %5517 = vmatpush3.bf16.msra.mxu0 %v6190_v60  ;;  %5659 = vmatpush3.bf16.msra.mxu1 %v6190_v60 }
 0xff8   : > { %5518 = vmatprep.subr.bf16.mxu0 %v6191_v55  ;;  %5652 = vmatprep.subr.bf16.mxu1 %v6191_v55 }
 0xffb   : > { %5519 = vmatpush3.bf16.msra.mxu0 %v6192_v54  ;;  %5660 = vmatpush3.bf16.msra.mxu1 %v6192_v54 }
 0xffc   : > { %5520 = vmatprep.subr.bf16.mxu0 %v6193_v39  ;;  %5653 = vmatprep.subr.bf16.mxu1 %v6193_v39 }
 0xfff   : > { %5521 = vmatpush3.bf16.msra.mxu0 %v6194_v51  ;;  %5661 = vmatpush3.bf16.msra.mxu1 %v6194_v51 }
0x1000   : > { %5522 = vmatprep.subr.bf16.mxu0 %v6195_v15  ;;  %5654 = vmatprep.subr.bf16.mxu1 %v6195_v15 }
0x1003   : > { %5523 = vmatpush3.bf16.msra.mxu0 %v6196_v9  ;;  %5662 = vmatpush3.bf16.msra.mxu1 %v6196_v9 }
0x1004   : > { %5524 = vmatprep.subr.bf16.mxu0 %v6197_v10  ;;  %5655 = vmatprep.subr.bf16.mxu1 %v6197_v10 }
0x1007   : > { %5525 = vmatpush3.bf16.msra.mxu0 %v6198_v11  ;;  %5663 = vmatpush3.bf16.msra.mxu1 %v6198_v11 }
0x1008   : > { %5526 = vmatprep.subr.bf16.mxu0 %v6199_v37  ;;  %5656 = vmatprep.subr.bf16.mxu1 %v6199_v37 }
0x100b   : > { %5527 = vmatpush3.bf16.msra.mxu0 %v6200_v40  ;;  %5664 = vmatpush3.bf16.msra.mxu1 %v6200_v40 }
0x100c   : > { %5528 = vmatprep.subr.bf16.mxu0 %v6201_v34  ;;  %5657 = vmatprep.subr.bf16.mxu1 %v6201_v34 }
0x100f   : > { %5529 = vmatpush3.bf16.msra.mxu0 %v6202_v49  ;;  %5665 = vmatpush3.bf16.msra.mxu1 %v6202_v49 }
0x1012   : > { %5067 = vmatmul.mubr.bf16.vlgmr.msra.gmra.mrb[0].mxu0 %v4924_v56  ;;  %5083 = vmatmul.mubr.bf16.vlgmr.msra.gmra.mrb[0].mxu1 %v4928_v62 }
0x1013   : > { %5074 = vmatprep.mubr.bf16.mxu0 %v4927_v17  ;;  %5090 = vmatprep.mubr.bf16.mxu1 %v4931_v22 }
0x101a   : > { %5075 = vmatmul.mubr.bf16.gmra.mrb[4].mxu0 %v4926_v30  ;;  %5091 = vmatmul.mubr.bf16.gmra.mrb[4].mxu1 %v4930_v13 }
0x10e5   : > { %v5530_v25 = vpop.f32.mrb[0].mxu0  ;;  %v5542_v28 = vpop.f32.mrb[0].mxu1 }
0x10e6   : > { %v5531_v43 = vpop.f32.mrb[1].mxu0  ;;  %v5543_v47 = vpop.f32.mrb[1].mxu1 }
0x10e7   : > { %v5532_v16 = vadd.f32 %v5531_v43, %v5530_v25  ;;  %v5544_v46 = vadd.f32 %v5543_v47, %v5542_v28  ;;  %v5533_v53 = vpop.f32.mrb[2].mxu0  ;;  %v5545_v63 = vpop.f32.mrb[2].mxu1 }
0x10e8   : > { %v5534_v2 = vpop.f32.mrb[3].mxu0  ;;  %v5546_v4 = vpop.f32.mrb[3].mxu1 }
0x10e9   : > { %v5069_v38 = vadd.f32 %v5532_v16, %v5458_v6  ;;  %v5085_v36 = vadd.f32 %v5544_v46, %v5458_v6  ;;  %v5535_v24 = vadd.f32 %v5534_v2, %v5533_v53  ;;  %v5547_v58 = vadd.f32 %v5546_v4, %v5545_v63 }
0x10eb   : > { %5099 = vst [vmem:[%s9748_s1] sm:$0xff] %v5069_v38  ;;  %5103 = vst [vmem:[%s9748_s1 + $0x20] sm:$0xff] %v5085_v36  ;;  %v5072_v33 = vadd.f32 %v5535_v24, %v5458_v6  ;;  %v5088_v57 = vadd.f32 %v5547_v58, %v5458_v6 }
0x10ed   : > { %5100 = vst [vmem:[%s9748_s1 + $0x8] sm:$0xff] %v5072_v33  ;;  %5104 = vst [vmem:[%s9748_s1 + $0x28] sm:$0xff] %v5088_v57  ;;  %v5536_v59 = vpop.f32.mrb[4].mxu0  ;;  %v5548_v35 = vpop.f32.mrb[4].mxu1 }
0x10ee   : > { %v5537_v32 = vpop.f32.mrb[5].mxu0  ;;  %v5549_v27 = vpop.f32.mrb[5].mxu1 }
0x10ef   : > { %v5538_v44 = vadd.f32 %v5537_v32, %v5536_v59  ;;  %v5550_v45 = vadd.f32 %v5549_v27, %v5548_v35  ;;  %v5539_v3 = vpop.f32.mrb[6].mxu0  ;;  %v5551_v7 = vpop.f32.mrb[6].mxu1 }
0x10f0   : > { %v5540_v12 = vpop.f32.mrb[7].mxu0  ;;  %v5552_v48 = vpop.f32.mrb[7].mxu1 }
0x10f1   : > { %v5077_v21 = vadd.f32 %v5538_v44, %v5458_v6  ;;  %v5093_v1 = vadd.f32 %v5550_v45, %v5458_v6  ;;  %v5541_v52 = vadd.f32 %v5540_v12, %v5539_v3  ;;  %v5553_v61 = vadd.f32 %v5552_v48, %v5551_v7 }
0x10f3   : > { %5101 = vst [vmem:[%s9748_s1 + $0x10] sm:$0xff] %v5077_v21  ;;  %5105 = vst [vmem:[%s9748_s1 + $0x30] sm:$0xff] %v5093_v1  ;;  %v5080_v50 = vadd.f32 %v5541_v52, %v5458_v6  ;;  %v5096_v26 = vadd.f32 %v5553_v61, %v5458_v6 }
0x10f5   : > { %5102 = vst [vmem:[%s9748_s1 + $0x18] sm:$0xff] %v5080_v50  ;;  %5106 = vst [vmem:[%s9748_s1 + $0x38] sm:$0xff] %v5096_v26 }
0x10f6 PF: > { %s9749_s30 = sld [smem:[#allocation26_spill]]  ;;  %s9750_s21 = sld [smem:[#allocation23_spill]] }
0x10f7   : > { %s9751_s22 = sld [smem:[#allocation24_spill]]  ;;  %s9752_s23 = sld [smem:[#allocation30_spill]] }
0x10f8   : > { %s9753_s28 = sld [smem:[#allocation28_spill]]  ;;  %s9754_s24 = smov %s6525_s25 }
0x10fc   : > { %s35_s26 = sadd.s32 1, %s9749_s30  }
0x10fd   : > { %p32_p9 = scmp.ge.s32.totalorder %s35_s26, 4  }
0x10fe   : > { %s9755_s25 = smov %s9753_s28 }
0x10ff   :  { %34 = sbr.rel (!%p32_p9) target bundleno = 22 (0x16), region = 198 }
0x1106   :  { %5129 = vsyncpa [#allocation5], 1 }
0x1107   :  { %5131 = vsyncpa [#allocation5 + $0x1], 1 }
0x1108   :  { %5132 = vsyncpa [#allocation7], 1 }
0x1109   :  { %5133 = vsyncpa [#allocation10], 1 }
0x110a   :  { %5134 = vsyncpa [#allocation13], 1 }
0x110b   :  { %5136 = vsyncpa [#allocation13 + $0x1], 1 }
0x110c   :  { %5137 = vsyncpa [#allocation16], 1 }
0x110d   :  { %5139 = vsyncpa [#allocation16 + $0x1], 1 }

</bundles_post_ra>
